<compile_context>
chip_gen: v6e
topology: v6e:2x2x1
jax: 0.10.0
libtpu: 0.0.40
codegen_flags: <defaults>
</compile_context>

<pallas_src>
import functools

import jax
import jax.numpy as jnp
from jax.experimental import pallas as pl
from jax.experimental.pallas import tpu as pltpu


# ---------------------------------------------------------------------------
# Fused Pallas kernel
# ---------------------------------------------------------------------------

def _fused_forward_kernel(shifts_ref, convw_ref, convb_ref, *refs,
                          OC, K2, H, num_layers):
    """Conv2d+ReLU fused into LSTM-layer-0 matmul -> LSTM stack -> fc1+ReLU -> fc2.

    refs = (wih_0, b_0, ..., wih_{L-1}, b_{L-1}, fc1_w, fc1_b, fc2_w, fc2_b, out)
    """
    lstm_refs = refs[:2 * num_layers]
    fc1w_ref, fc1b_ref, fc2w_ref, fc2b_ref, out_ref = refs[2 * num_layers:]
    Bt = shifts_ref.shape[1]
    P = shifts_ref.shape[2]

    # --- Conv2d(1 -> OC) + ReLU, fused into the layer-0 input projection ------
    # shifts_ref[t] is the lane-dense (Bt, P) slab x_pad[:, h*s+kh, w*s+kw] for
    # t = kh*K + kw.  K*K unrolled scalar-broadcast MACs on the VPU per channel;
    # each channel's ReLU'd slab is consumed immediately by a (Bt, P) @ (P, 3H)
    # bf16 MXU matmul accumulating into the gates, so the (Bt, OC*P) feature map
    # never round-trips through VMEM scratch.
    wih0_ref = lstm_refs[0]
    acc_gates = jnp.zeros((Bt, 3 * H), jnp.float32)
    for oc in range(OC):
        acc = convw_ref[oc * K2] * shifts_ref[0]
        for t in range(1, K2):
            acc = acc + convw_ref[oc * K2 + t] * shifts_ref[t]
        feat_oc = jnp.maximum(acc + convb_ref[oc], 0.0)            # (Bt, P) f32
        acc_gates = acc_gates + jnp.dot(
            feat_oc.astype(jnp.bfloat16),
            wih0_ref[oc * P:(oc + 1) * P, :],
            preferred_element_type=jnp.float32)
    gates = acc_gates + lstm_refs[1][...]                          # + (b_ih + b_hh)

    # --- Stacked LSTM, seq_len == 1, zero initial (h, c) ----------------------
    # h0 = c0 = 0  =>  W_hh term and the f-gate vanish exactly; weights arrive
    # pre-packed as (In, 3H) with gate (column) order [i | o | g].
    def lstm_cell(g):
        sig_io = jax.nn.sigmoid(g[:, :2 * H])          # one EUP pass over [i|o]
        g_gate = jnp.tanh(g[:, 2 * H:3 * H])           # one EUP pass over g
        c = sig_io[:, :H] * g_gate                     # c = i * g   (f * c0 == 0)
        return sig_io[:, H:2 * H] * jnp.tanh(c)        # h = o * tanh(c)

    h = lstm_cell(gates)
    for layer in range(1, num_layers):
        wih_ref = lstm_refs[2 * layer]
        b_ref = lstm_refs[2 * layer + 1]
        gates = jnp.dot(h.astype(jnp.bfloat16), wih_ref[...],
                        preferred_element_type=jnp.float32) + b_ref[...]
        h = lstm_cell(gates)
    # TODO(synk): nn.LSTM inter-layer dropout is training-mode only; eval => no-op.

    # x[:, -1, :] with seq_len == 1 is just the last layer's h.

    # --- fc1 + ReLU, fc2 -------------------------------------------------------
    y = jnp.dot(h.astype(jnp.bfloat16), fc1w_ref[...],
                preferred_element_type=jnp.float32) + fc1b_ref[...]
    y = jnp.maximum(y, 0.0)
    out = jnp.dot(y.astype(jnp.bfloat16), fc2w_ref[...],
                  preferred_element_type=jnp.float32) + fc2b_ref[...]
    out_ref[...] = out.astype(out_ref.dtype)


# ---------------------------------------------------------------------------
# Parameters (PyTorch-style init) + one-time repack into kernel layout
# ---------------------------------------------------------------------------

def init_params(key, cfg):
    """Deterministic PyTorch-style uniform(-1/sqrt(fan_in), 1/sqrt(fan_in)) init."""
    OC = cfg["out_channels"]
    K = cfg["kernel_size"]
    H = cfg["hidden_size"]
    keys = jax.random.split(key, 32)
    ki = iter(range(32))

    def u(shape, bound):
        return jax.random.uniform(keys[next(ki)], shape, jnp.float32, -bound, bound)

    params = {}
    conv_bound = 1.0 / (1 * K * K) ** 0.5
    params["conv_w"] = u((OC, 1, K, K), conv_bound)
    params["conv_b"] = u((OC,), conv_bound)

    Ho = (cfg["input_shape"][0] - K + 2 * cfg["padding"]) // cfg["stride"] + 1
    Wo = (cfg["input_shape"][1] - K + 2 * cfg["padding"]) // cfg["stride"] + 1
    cnn_out = OC * Ho * Wo

    lstm_bound = 1.0 / H ** 0.5
    in_size = cnn_out
    for l in range(cfg["num_layers"]):
        params[f"w_ih_{l}"] = u((4 * H, in_size), lstm_bound)
        params[f"w_hh_{l}"] = u((4 * H, H), lstm_bound)   # unused: h0 == 0, seq_len == 1
        params[f"b_ih_{l}"] = u((4 * H,), lstm_bound)
        params[f"b_hh_{l}"] = u((4 * H,), lstm_bound)
        in_size = H

    fc1_bound = 1.0 / H ** 0.5
    params["fc1_w"] = u((cfg["linear_input_size"], H), fc1_bound)
    params["fc1_b"] = u((cfg["linear_input_size"],), fc1_bound)
    fc2_bound = 1.0 / cfg["linear_input_size"] ** 0.5
    params["fc2_w"] = u((cfg["linear_output_size"], cfg["linear_input_size"]), fc2_bound)
    params["fc2_b"] = u((cfg["linear_output_size"],), fc2_bound)
    return params


def prepare_params(params, cfg):
    """One-time repack: drop f-gate & W_hh, pre-sum biases, transpose, bf16 weights."""
    OC, K, H = cfg["out_channels"], cfg["kernel_size"], cfg["hidden_size"]

    def pack_iog(w):
        # PyTorch gate (row) order is [i | f | g | o]; keep [i | o | g], drop f
        # (exact: f only multiplies c0 == 0).
        return jnp.concatenate([w[0:H], w[3 * H:4 * H], w[2 * H:3 * H]], axis=0)

    prep = {
        "conv_w": params["conv_w"].reshape(OC * K * K),           # in_channels == 1
        "conv_b": params["conv_b"],
        "fc1_w": params["fc1_w"].T.astype(jnp.bfloat16),          # (H, linear_input)
        "fc1_b": params["fc1_b"].reshape(1, -1),
        "fc2_w": params["fc2_w"].T.astype(jnp.bfloat16),          # (linear_input, linear_out)
        "fc2_b": params["fc2_b"].reshape(1, -1),
    }
    for l in range(cfg["num_layers"]):
        prep[f"wih_{l}"] = pack_iog(params[f"w_ih_{l}"]).T.astype(jnp.bfloat16)  # (In, 3H)
        prep[f"b_{l}"] = pack_iog(params[f"b_ih_{l}"] + params[f"b_hh_{l}"]).reshape(1, 3 * H)
        # w_hh_{l} intentionally dropped: contributes 0 with zero initial state.
    return prep


# ---------------------------------------------------------------------------
# Forward (thin jitted wrapper around the single pallas_call)
# ---------------------------------------------------------------------------

def cnn_lstm_forward(x, prep, cfg, block_b=128):
    """x: (B, H, W) float32  ->  (B, linear_output_size) float32."""
    B, Hin, Win = x.shape
    K, s, p = cfg["kernel_size"], cfg["stride"], cfg["padding"]
    OC = cfg["out_channels"]
    H = cfg["hidden_size"]
    L = cfg["num_layers"]
    Ho = (Hin - K + 2 * p) // s + 1
    Wo = (Win - K + 2 * p) // s + 1
    P = Ho * Wo
    K2 = K * K
    n_out = cfg["linear_output_size"]

    Bt = min(block_b, B)
    assert B % Bt == 0, (B, Bt)
    grid = (B // Bt,)

    # Lane-dense shifted slabs (K*K, B, Ho*Wo): slab[kh*K+kw][b, h*Wo+w] =
    # x_pad[b, h*s+kh, w*s+kw].  Built once per call by a tiny jitted XLA gather.
    # TODO(synk): could be folded into the kernel (pltpu.roll on a padded-flat x)
    # to drop this small HBM round trip; skipped as low-value / higher lowering risk.
    xp = jnp.pad(x, ((0, 0), (p, p), (p, p)))
    shifts = jnp.stack(
        [xp[:, kh:kh + (Ho - 1) * s + 1:s, kw:kw + (Wo - 1) * s + 1:s].reshape(B, P)
         for kh in range(K) for kw in range(K)], axis=0)

    operands = [shifts, prep["conv_w"], prep["conv_b"]]
    in_specs = [
        # Only the activations are blocked (over batch); everything below is a
        # whole-array resident operand, DMA'd once per call.
        pl.BlockSpec((K2, Bt, P), lambda i: (0, i, 0)),
        pl.BlockSpec(memory_space=pltpu.MemorySpace.SMEM),   # conv weights (scalars)
        pl.BlockSpec(memory_space=pltpu.MemorySpace.SMEM),   # conv bias (scalars)
    ]
    for l in range(L):
        operands += [prep[f"wih_{l}"], prep[f"b_{l}"]]
        in_specs += [pl.BlockSpec(memory_space=pltpu.MemorySpace.VMEM)] * 2
    operands += [prep["fc1_w"], prep["fc1_b"], prep["fc2_w"], prep["fc2_b"]]
    in_specs += [pl.BlockSpec(memory_space=pltpu.MemorySpace.VMEM)] * 4

    kern = functools.partial(_fused_forward_kernel,
                             OC=OC, K2=K2, H=H, num_layers=L)

    # Batch-blocked grid, "parallel": shards work across v7x's two TensorCores
    # (single-TC v5e/v6e just loop).  Per-step VMEM ~2.5 MiB << any generation's limit.
    return pl.pallas_call(
        kern,
        out_shape=jax.ShapeDtypeStruct((B, n_out), jnp.float32),
        grid=grid,
        in_specs=in_specs,
        out_specs=pl.BlockSpec((Bt, n_out), lambda i: (i, 0)),
        compiler_params=pltpu.CompilerParams(dimension_semantics=("parallel",)),
    )(*operands)


# ---------------------------------------------------------------------------
# Pure-JAX f32 reference (mirrors the PyTorch module exactly, incl. f-gate/W_hh)
# ---------------------------------------------------------------------------

def reference_forward(x, params, cfg):
    K, s, p = cfg["kernel_size"], cfg["stride"], cfg["padding"]
    H, L = cfg["hidden_size"], cfg["num_layers"]
    B = x.shape[0]
    feat = jax.lax.conv_general_dilated(
        x[:, None, :, :], params["conv_w"], window_strides=(s, s),
        padding=[(p, p), (p, p)], dimension_numbers=("NCHW", "OIHW", "NCHW"))
    feat = jax.nn.relu(feat + params["conv_b"][None, :, None, None])
    h = feat.reshape(B, -1)                      # NCHW flatten; seq_len == 1
    for l in range(L):
        h0 = jnp.zeros((B, H), jnp.float32)
        c0 = jnp.zeros((B, H), jnp.float32)
        gates = (h @ params[f"w_ih_{l}"].T + h0 @ params[f"w_hh_{l}"].T
                 + params[f"b_ih_{l}"] + params[f"b_hh_{l}"])
        i_g, f_g, g_g, o_g = jnp.split(gates, 4, axis=-1)
        c = jax.nn.sigmoid(f_g) * c0 + jax.nn.sigmoid(i_g) * jnp.tanh(g_g)
        h = jax.nn.sigmoid(o_g) * jnp.tanh(c)
    y = jax.nn.relu(h @ params["fc1_w"].T + params["fc1_b"])
    return y @ params["fc2_w"].T + params["fc2_b"]


if __name__ == "__main__":
    cfg = dict(
        in_channels=1,          # forward does x.unsqueeze(1) -> conv sees 1 channel
        out_channels=4,
        kernel_size=3,
        stride=1,
        padding=1,
        hidden_size=32,
        num_layers=2,
        dropout=0.0,
        linear_input_size=64,
        linear_output_size=8,
        input_shape=(16, 16),
    )
    key = jax.random.PRNGKey(0)
    pkey, xkey = jax.random.split(key)
    params = init_params(pkey, cfg)
    prep = prepare_params(params, cfg)

    # Perf review: amortize launch + weight DMA over a large batch; two 128-row
    # batch blocks let v7x split the grid across its TensorCores.
    B = 256
    x = jax.random.normal(xkey, (B, *cfg["input_shape"]), jnp.float32)

    fwd = jax.jit(functools.partial(cnn_lstm_forward, cfg=cfg))
    out = jax.block_until_ready(fwd(x, prep))
    assert out.shape == (B, cfg["linear_output_size"]), out.shape
    assert bool(jnp.all(jnp.isfinite(out)))

    # bf16 weights + f32 accumulation vs f32 reference => loose tolerance.
    ref = reference_forward(x, params, cfg)
    assert bool(jnp.allclose(out, ref, atol=5e-2, rtol=5e-2)), (
        float(jnp.max(jnp.abs(out - ref))))
    print("KERNEL_OK")
</pallas_src>

<mosaic_0001>
module attributes {stable_mosaic.version = 11 : i64} {
  func.func @_fused_forward_kernel(%arg0: i32, %arg1: memref<9x128x256xf32, #tpu.memory_space<vmem>>, %arg2: memref<36xf32, #tpu.memory_space<smem>>, %arg3: memref<4xf32, #tpu.memory_space<smem>>, %arg4: memref<1024x96xbf16, #tpu.memory_space<vmem>>, %arg5: memref<1x96xf32, #tpu.memory_space<vmem>>, %arg6: memref<32x96xbf16, #tpu.memory_space<vmem>>, %arg7: memref<1x96xf32, #tpu.memory_space<vmem>>, %arg8: memref<32x64xbf16, #tpu.memory_space<vmem>>, %arg9: memref<1x64xf32, #tpu.memory_space<vmem>>, %arg10: memref<64x8xbf16, #tpu.memory_space<vmem>>, %arg11: memref<1x8xf32, #tpu.memory_space<vmem>>, %arg12: memref<128x8xf32, #tpu.memory_space<vmem>>) attributes {dimension_semantics = [#tpu.dimension_semantics<parallel>], iteration_bounds = array<i64: 2>, scalar_prefetch = 0 : i64, scratch_operands = 0 : i64, tpu.core_type = #tpu.core_type<tc>, window_params = [{transform_indices = @transform_0, window_bounds = array<i64: 9, 128, 256>}, {transform_indices = @transform_1, window_bounds = array<i64: 36>}, {transform_indices = @transform_2, window_bounds = array<i64: 4>}, {pipeline_mode = #tpu.pipeline_mode<synchronous>, transform_indices = @transform_3, window_bounds = array<i64: 1024, 96>}, {pipeline_mode = #tpu.pipeline_mode<synchronous>, transform_indices = @transform_4, window_bounds = array<i64: 1, 96>}, {pipeline_mode = #tpu.pipeline_mode<synchronous>, transform_indices = @transform_5, window_bounds = array<i64: 32, 96>}, {pipeline_mode = #tpu.pipeline_mode<synchronous>, transform_indices = @transform_6, window_bounds = array<i64: 1, 96>}, {pipeline_mode = #tpu.pipeline_mode<synchronous>, transform_indices = @transform_7, window_bounds = array<i64: 32, 64>}, {pipeline_mode = #tpu.pipeline_mode<synchronous>, transform_indices = @transform_8, window_bounds = array<i64: 1, 64>}, {pipeline_mode = #tpu.pipeline_mode<synchronous>, transform_indices = @transform_9, window_bounds = array<i64: 64, 8>}, {pipeline_mode = #tpu.pipeline_mode<synchronous>, transform_indices = @transform_10, window_bounds = array<i64: 1, 8>}, {transform_indices = @transform_11, window_bounds = array<i64: 128, 8>}]} {
    %cst = arith.constant 0.000000e+00 : f32
    %0 = vector.broadcast %cst : f32 to vector<128x96xf32>
    %c0 = arith.constant 0 : index
    %1 = memref.load %arg2[%c0] : memref<36xf32, #tpu.memory_space<smem>>
    %c0_0 = arith.constant 0 : index
    %c0_1 = arith.constant 0 : index
    %c0_2 = arith.constant 0 : index
    %2 = vector.load %arg1[%c0_0, %c0_1, %c0_2] : memref<9x128x256xf32, #tpu.memory_space<vmem>>, vector<1x128x256xf32>
    %3 = vector.shape_cast %2 : vector<1x128x256xf32> to vector<128x256xf32>
    %4 = vector.broadcast %1 : f32 to vector<128x256xf32>
    %5 = arith.mulf %4, %3 : vector<128x256xf32>
    %c1 = arith.constant 1 : index
    %6 = memref.load %arg2[%c1] : memref<36xf32, #tpu.memory_space<smem>>
    %c1_3 = arith.constant 1 : index
    %c0_4 = arith.constant 0 : index
    %c0_5 = arith.constant 0 : index
    %7 = vector.load %arg1[%c1_3, %c0_4, %c0_5] : memref<9x128x256xf32, #tpu.memory_space<vmem>>, vector<1x128x256xf32>
    %8 = vector.shape_cast %7 : vector<1x128x256xf32> to vector<128x256xf32>
    %9 = vector.broadcast %6 : f32 to vector<128x256xf32>
    %10 = arith.mulf %9, %8 : vector<128x256xf32>
    %11 = arith.addf %5, %10 : vector<128x256xf32>
    %c2 = arith.constant 2 : index
    %12 = memref.load %arg2[%c2] : memref<36xf32, #tpu.memory_space<smem>>
    %c2_6 = arith.constant 2 : index
    %c0_7 = arith.constant 0 : index
    %c0_8 = arith.constant 0 : index
    %13 = vector.load %arg1[%c2_6, %c0_7, %c0_8] : memref<9x128x256xf32, #tpu.memory_space<vmem>>, vector<1x128x256xf32>
    %14 = vector.shape_cast %13 : vector<1x128x256xf32> to vector<128x256xf32>
    %15 = vector.broadcast %12 : f32 to vector<128x256xf32>
    %16 = arith.mulf %15, %14 : vector<128x256xf32>
    %17 = arith.addf %11, %16 : vector<128x256xf32>
    %c3 = arith.constant 3 : index
    %18 = memref.load %arg2[%c3] : memref<36xf32, #tpu.memory_space<smem>>
    %c3_9 = arith.constant 3 : index
    %c0_10 = arith.constant 0 : index
    %c0_11 = arith.constant 0 : index
    %19 = vector.load %arg1[%c3_9, %c0_10, %c0_11] : memref<9x128x256xf32, #tpu.memory_space<vmem>>, vector<1x128x256xf32>
    %20 = vector.shape_cast %19 : vector<1x128x256xf32> to vector<128x256xf32>
    %21 = vector.broadcast %18 : f32 to vector<128x256xf32>
    %22 = arith.mulf %21, %20 : vector<128x256xf32>
    %23 = arith.addf %17, %22 : vector<128x256xf32>
    %c4 = arith.constant 4 : index
    %24 = memref.load %arg2[%c4] : memref<36xf32, #tpu.memory_space<smem>>
    %c4_12 = arith.constant 4 : index
    %c0_13 = arith.constant 0 : index
    %c0_14 = arith.constant 0 : index
    %25 = vector.load %arg1[%c4_12, %c0_13, %c0_14] : memref<9x128x256xf32, #tpu.memory_space<vmem>>, vector<1x128x256xf32>
    %26 = vector.shape_cast %25 : vector<1x128x256xf32> to vector<128x256xf32>
    %27 = vector.broadcast %24 : f32 to vector<128x256xf32>
    %28 = arith.mulf %27, %26 : vector<128x256xf32>
    %29 = arith.addf %23, %28 : vector<128x256xf32>
    %c5 = arith.constant 5 : index
    %30 = memref.load %arg2[%c5] : memref<36xf32, #tpu.memory_space<smem>>
    %c5_15 = arith.constant 5 : index
    %c0_16 = arith.constant 0 : index
    %c0_17 = arith.constant 0 : index
    %31 = vector.load %arg1[%c5_15, %c0_16, %c0_17] : memref<9x128x256xf32, #tpu.memory_space<vmem>>, vector<1x128x256xf32>
    %32 = vector.shape_cast %31 : vector<1x128x256xf32> to vector<128x256xf32>
    %33 = vector.broadcast %30 : f32 to vector<128x256xf32>
    %34 = arith.mulf %33, %32 : vector<128x256xf32>
    %35 = arith.addf %29, %34 : vector<128x256xf32>
    %c6 = arith.constant 6 : index
    %36 = memref.load %arg2[%c6] : memref<36xf32, #tpu.memory_space<smem>>
    %c6_18 = arith.constant 6 : index
    %c0_19 = arith.constant 0 : index
    %c0_20 = arith.constant 0 : index
    %37 = vector.load %arg1[%c6_18, %c0_19, %c0_20] : memref<9x128x256xf32, #tpu.memory_space<vmem>>, vector<1x128x256xf32>
    %38 = vector.shape_cast %37 : vector<1x128x256xf32> to vector<128x256xf32>
    %39 = vector.broadcast %36 : f32 to vector<128x256xf32>
    %40 = arith.mulf %39, %38 : vector<128x256xf32>
    %41 = arith.addf %35, %40 : vector<128x256xf32>
    %c7 = arith.constant 7 : index
    %42 = memref.load %arg2[%c7] : memref<36xf32, #tpu.memory_space<smem>>
    %c7_21 = arith.constant 7 : index
    %c0_22 = arith.constant 0 : index
    %c0_23 = arith.constant 0 : index
    %43 = vector.load %arg1[%c7_21, %c0_22, %c0_23] : memref<9x128x256xf32, #tpu.memory_space<vmem>>, vector<1x128x256xf32>
    %44 = vector.shape_cast %43 : vector<1x128x256xf32> to vector<128x256xf32>
    %45 = vector.broadcast %42 : f32 to vector<128x256xf32>
    %46 = arith.mulf %45, %44 : vector<128x256xf32>
    %47 = arith.addf %41, %46 : vector<128x256xf32>
    %c8 = arith.constant 8 : index
    %48 = memref.load %arg2[%c8] : memref<36xf32, #tpu.memory_space<smem>>
    %c8_24 = arith.constant 8 : index
    %c0_25 = arith.constant 0 : index
    %c0_26 = arith.constant 0 : index
    %49 = vector.load %arg1[%c8_24, %c0_25, %c0_26] : memref<9x128x256xf32, #tpu.memory_space<vmem>>, vector<1x128x256xf32>
    %50 = vector.shape_cast %49 : vector<1x128x256xf32> to vector<128x256xf32>
    %51 = vector.broadcast %48 : f32 to vector<128x256xf32>
    %52 = arith.mulf %51, %50 : vector<128x256xf32>
    %53 = arith.addf %47, %52 : vector<128x256xf32>
    %c0_27 = arith.constant 0 : index
    %54 = memref.load %arg3[%c0_27] : memref<4xf32, #tpu.memory_space<smem>>
    %55 = vector.broadcast %54 : f32 to vector<128x256xf32>
    %56 = arith.addf %53, %55 : vector<128x256xf32>
    %cst_28 = arith.constant 0.000000e+00 : f32
    %57 = vector.broadcast %cst_28 : f32 to vector<128x256xf32>
    %58 = arith.maximumf %56, %57 : vector<128x256xf32>
    %59 = arith.truncf %58 : vector<128x256xf32> to vector<128x256xbf16>
    %c0_29 = arith.constant 0 : index
    %c0_30 = arith.constant 0 : index
    %60 = vector.load %arg4[%c0_29, %c0_30] : memref<1024x96xbf16, #tpu.memory_space<vmem>>, vector<256x96xbf16>
    %cst_31 = arith.constant dense<0.000000e+00> : vector<128x96xf32>
    %61 = tpu.matmul %59, %60, %cst_31 {dimension_numbers = #tpu.dot_dimension_numbers<[1], [0], [0], [1], [0, 0, 1, 1], [], []>} : vector<128x256xbf16>, vector<256x96xbf16>, vector<128x96xf32> -> vector<128x96xf32>
    %62 = arith.addf %0, %61 : vector<128x96xf32>
    %c9 = arith.constant 9 : index
    %63 = memref.load %arg2[%c9] : memref<36xf32, #tpu.memory_space<smem>>
    %c0_32 = arith.constant 0 : index
    %c0_33 = arith.constant 0 : index
    %c0_34 = arith.constant 0 : index
    %64 = vector.load %arg1[%c0_32, %c0_33, %c0_34] : memref<9x128x256xf32, #tpu.memory_space<vmem>>, vector<1x128x256xf32>
    %65 = vector.shape_cast %64 : vector<1x128x256xf32> to vector<128x256xf32>
    %66 = vector.broadcast %63 : f32 to vector<128x256xf32>
    %67 = arith.mulf %66, %65 : vector<128x256xf32>
    %c10 = arith.constant 10 : index
    %68 = memref.load %arg2[%c10] : memref<36xf32, #tpu.memory_space<smem>>
    %c1_35 = arith.constant 1 : index
    %c0_36 = arith.constant 0 : index
    %c0_37 = arith.constant 0 : index
    %69 = vector.load %arg1[%c1_35, %c0_36, %c0_37] : memref<9x128x256xf32, #tpu.memory_space<vmem>>, vector<1x128x256xf32>
    %70 = vector.shape_cast %69 : vector<1x128x256xf32> to vector<128x256xf32>
    %71 = vector.broadcast %68 : f32 to vector<128x256xf32>
    %72 = arith.mulf %71, %70 : vector<128x256xf32>
    %73 = arith.addf %67, %72 : vector<128x256xf32>
    %c11 = arith.constant 11 : index
    %74 = memref.load %arg2[%c11] : memref<36xf32, #tpu.memory_space<smem>>
    %c2_38 = arith.constant 2 : index
    %c0_39 = arith.constant 0 : index
    %c0_40 = arith.constant 0 : index
    %75 = vector.load %arg1[%c2_38, %c0_39, %c0_40] : memref<9x128x256xf32, #tpu.memory_space<vmem>>, vector<1x128x256xf32>
    %76 = vector.shape_cast %75 : vector<1x128x256xf32> to vector<128x256xf32>
    %77 = vector.broadcast %74 : f32 to vector<128x256xf32>
    %78 = arith.mulf %77, %76 : vector<128x256xf32>
    %79 = arith.addf %73, %78 : vector<128x256xf32>
    %c12 = arith.constant 12 : index
    %80 = memref.load %arg2[%c12] : memref<36xf32, #tpu.memory_space<smem>>
    %c3_41 = arith.constant 3 : index
    %c0_42 = arith.constant 0 : index
    %c0_43 = arith.constant 0 : index
    %81 = vector.load %arg1[%c3_41, %c0_42, %c0_43] : memref<9x128x256xf32, #tpu.memory_space<vmem>>, vector<1x128x256xf32>
    %82 = vector.shape_cast %81 : vector<1x128x256xf32> to vector<128x256xf32>
    %83 = vector.broadcast %80 : f32 to vector<128x256xf32>
    %84 = arith.mulf %83, %82 : vector<128x256xf32>
    %85 = arith.addf %79, %84 : vector<128x256xf32>
    %c13 = arith.constant 13 : index
    %86 = memref.load %arg2[%c13] : memref<36xf32, #tpu.memory_space<smem>>
    %c4_44 = arith.constant 4 : index
    %c0_45 = arith.constant 0 : index
    %c0_46 = arith.constant 0 : index
    %87 = vector.load %arg1[%c4_44, %c0_45, %c0_46] : memref<9x128x256xf32, #tpu.memory_space<vmem>>, vector<1x128x256xf32>
    %88 = vector.shape_cast %87 : vector<1x128x256xf32> to vector<128x256xf32>
    %89 = vector.broadcast %86 : f32 to vector<128x256xf32>
    %90 = arith.mulf %89, %88 : vector<128x256xf32>
    %91 = arith.addf %85, %90 : vector<128x256xf32>
    %c14 = arith.constant 14 : index
    %92 = memref.load %arg2[%c14] : memref<36xf32, #tpu.memory_space<smem>>
    %c5_47 = arith.constant 5 : index
    %c0_48 = arith.constant 0 : index
    %c0_49 = arith.constant 0 : index
    %93 = vector.load %arg1[%c5_47, %c0_48, %c0_49] : memref<9x128x256xf32, #tpu.memory_space<vmem>>, vector<1x128x256xf32>
    %94 = vector.shape_cast %93 : vector<1x128x256xf32> to vector<128x256xf32>
    %95 = vector.broadcast %92 : f32 to vector<128x256xf32>
    %96 = arith.mulf %95, %94 : vector<128x256xf32>
    %97 = arith.addf %91, %96 : vector<128x256xf32>
    %c15 = arith.constant 15 : index
    %98 = memref.load %arg2[%c15] : memref<36xf32, #tpu.memory_space<smem>>
    %c6_50 = arith.constant 6 : index
    %c0_51 = arith.constant 0 : index
    %c0_52 = arith.constant 0 : index
    %99 = vector.load %arg1[%c6_50, %c0_51, %c0_52] : memref<9x128x256xf32, #tpu.memory_space<vmem>>, vector<1x128x256xf32>
    %100 = vector.shape_cast %99 : vector<1x128x256xf32> to vector<128x256xf32>
    %101 = vector.broadcast %98 : f32 to vector<128x256xf32>
    %102 = arith.mulf %101, %100 : vector<128x256xf32>
    %103 = arith.addf %97, %102 : vector<128x256xf32>
    %c16 = arith.constant 16 : index
    %104 = memref.load %arg2[%c16] : memref<36xf32, #tpu.memory_space<smem>>
    %c7_53 = arith.constant 7 : index
    %c0_54 = arith.constant 0 : index
    %c0_55 = arith.constant 0 : index
    %105 = vector.load %arg1[%c7_53, %c0_54, %c0_55] : memref<9x128x256xf32, #tpu.memory_space<vmem>>, vector<1x128x256xf32>
    %106 = vector.shape_cast %105 : vector<1x128x256xf32> to vector<128x256xf32>
    %107 = vector.broadcast %104 : f32 to vector<128x256xf32>
    %108 = arith.mulf %107, %106 : vector<128x256xf32>
    %109 = arith.addf %103, %108 : vector<128x256xf32>
    %c17 = arith.constant 17 : index
    %110 = memref.load %arg2[%c17] : memref<36xf32, #tpu.memory_space<smem>>
    %c8_56 = arith.constant 8 : index
    %c0_57 = arith.constant 0 : index
    %c0_58 = arith.constant 0 : index
    %111 = vector.load %arg1[%c8_56, %c0_57, %c0_58] : memref<9x128x256xf32, #tpu.memory_space<vmem>>, vector<1x128x256xf32>
    %112 = vector.shape_cast %111 : vector<1x128x256xf32> to vector<128x256xf32>
    %113 = vector.broadcast %110 : f32 to vector<128x256xf32>
    %114 = arith.mulf %113, %112 : vector<128x256xf32>
    %115 = arith.addf %109, %114 : vector<128x256xf32>
    %c1_59 = arith.constant 1 : index
    %116 = memref.load %arg3[%c1_59] : memref<4xf32, #tpu.memory_space<smem>>
    %117 = vector.broadcast %116 : f32 to vector<128x256xf32>
    %118 = arith.addf %115, %117 : vector<128x256xf32>
    %cst_60 = arith.constant 0.000000e+00 : f32
    %119 = vector.broadcast %cst_60 : f32 to vector<128x256xf32>
    %120 = arith.maximumf %118, %119 : vector<128x256xf32>
    %121 = arith.truncf %120 : vector<128x256xf32> to vector<128x256xbf16>
    %c256 = arith.constant 256 : index
    %c0_61 = arith.constant 0 : index
    %122 = vector.load %arg4[%c256, %c0_61] : memref<1024x96xbf16, #tpu.memory_space<vmem>>, vector<256x96xbf16>
    %cst_62 = arith.constant dense<0.000000e+00> : vector<128x96xf32>
    %123 = tpu.matmul %121, %122, %cst_62 {dimension_numbers = #tpu.dot_dimension_numbers<[1], [0], [0], [1], [0, 0, 1, 1], [], []>} : vector<128x256xbf16>, vector<256x96xbf16>, vector<128x96xf32> -> vector<128x96xf32>
    %124 = arith.addf %62, %123 : vector<128x96xf32>
    %c18 = arith.constant 18 : index
    %125 = memref.load %arg2[%c18] : memref<36xf32, #tpu.memory_space<smem>>
    %c0_63 = arith.constant 0 : index
    %c0_64 = arith.constant 0 : index
    %c0_65 = arith.constant 0 : index
    %126 = vector.load %arg1[%c0_63, %c0_64, %c0_65] : memref<9x128x256xf32, #tpu.memory_space<vmem>>, vector<1x128x256xf32>
    %127 = vector.shape_cast %126 : vector<1x128x256xf32> to vector<128x256xf32>
    %128 = vector.broadcast %125 : f32 to vector<128x256xf32>
    %129 = arith.mulf %128, %127 : vector<128x256xf32>
    %c19 = arith.constant 19 : index
    %130 = memref.load %arg2[%c19] : memref<36xf32, #tpu.memory_space<smem>>
    %c1_66 = arith.constant 1 : index
    %c0_67 = arith.constant 0 : index
    %c0_68 = arith.constant 0 : index
    %131 = vector.load %arg1[%c1_66, %c0_67, %c0_68] : memref<9x128x256xf32, #tpu.memory_space<vmem>>, vector<1x128x256xf32>
    %132 = vector.shape_cast %131 : vector<1x128x256xf32> to vector<128x256xf32>
    %133 = vector.broadcast %130 : f32 to vector<128x256xf32>
    %134 = arith.mulf %133, %132 : vector<128x256xf32>
    %135 = arith.addf %129, %134 : vector<128x256xf32>
    %c20 = arith.constant 20 : index
    %136 = memref.load %arg2[%c20] : memref<36xf32, #tpu.memory_space<smem>>
    %c2_69 = arith.constant 2 : index
    %c0_70 = arith.constant 0 : index
    %c0_71 = arith.constant 0 : index
    %137 = vector.load %arg1[%c2_69, %c0_70, %c0_71] : memref<9x128x256xf32, #tpu.memory_space<vmem>>, vector<1x128x256xf32>
    %138 = vector.shape_cast %137 : vector<1x128x256xf32> to vector<128x256xf32>
    %139 = vector.broadcast %136 : f32 to vector<128x256xf32>
    %140 = arith.mulf %139, %138 : vector<128x256xf32>
    %141 = arith.addf %135, %140 : vector<128x256xf32>
    %c21 = arith.constant 21 : index
    %142 = memref.load %arg2[%c21] : memref<36xf32, #tpu.memory_space<smem>>
    %c3_72 = arith.constant 3 : index
    %c0_73 = arith.constant 0 : index
    %c0_74 = arith.constant 0 : index
    %143 = vector.load %arg1[%c3_72, %c0_73, %c0_74] : memref<9x128x256xf32, #tpu.memory_space<vmem>>, vector<1x128x256xf32>
    %144 = vector.shape_cast %143 : vector<1x128x256xf32> to vector<128x256xf32>
    %145 = vector.broadcast %142 : f32 to vector<128x256xf32>
    %146 = arith.mulf %145, %144 : vector<128x256xf32>
    %147 = arith.addf %141, %146 : vector<128x256xf32>
    %c22 = arith.constant 22 : index
    %148 = memref.load %arg2[%c22] : memref<36xf32, #tpu.memory_space<smem>>
    %c4_75 = arith.constant 4 : index
    %c0_76 = arith.constant 0 : index
    %c0_77 = arith.constant 0 : index
    %149 = vector.load %arg1[%c4_75, %c0_76, %c0_77] : memref<9x128x256xf32, #tpu.memory_space<vmem>>, vector<1x128x256xf32>
    %150 = vector.shape_cast %149 : vector<1x128x256xf32> to vector<128x256xf32>
    %151 = vector.broadcast %148 : f32 to vector<128x256xf32>
    %152 = arith.mulf %151, %150 : vector<128x256xf32>
    %153 = arith.addf %147, %152 : vector<128x256xf32>
    %c23 = arith.constant 23 : index
    %154 = memref.load %arg2[%c23] : memref<36xf32, #tpu.memory_space<smem>>
    %c5_78 = arith.constant 5 : index
    %c0_79 = arith.constant 0 : index
    %c0_80 = arith.constant 0 : index
    %155 = vector.load %arg1[%c5_78, %c0_79, %c0_80] : memref<9x128x256xf32, #tpu.memory_space<vmem>>, vector<1x128x256xf32>
    %156 = vector.shape_cast %155 : vector<1x128x256xf32> to vector<128x256xf32>
    %157 = vector.broadcast %154 : f32 to vector<128x256xf32>
    %158 = arith.mulf %157, %156 : vector<128x256xf32>
    %159 = arith.addf %153, %158 : vector<128x256xf32>
    %c24 = arith.constant 24 : index
    %160 = memref.load %arg2[%c24] : memref<36xf32, #tpu.memory_space<smem>>
    %c6_81 = arith.constant 6 : index
    %c0_82 = arith.constant 0 : index
    %c0_83 = arith.constant 0 : index
    %161 = vector.load %arg1[%c6_81, %c0_82, %c0_83] : memref<9x128x256xf32, #tpu.memory_space<vmem>>, vector<1x128x256xf32>
    %162 = vector.shape_cast %161 : vector<1x128x256xf32> to vector<128x256xf32>
    %163 = vector.broadcast %160 : f32 to vector<128x256xf32>
    %164 = arith.mulf %163, %162 : vector<128x256xf32>
    %165 = arith.addf %159, %164 : vector<128x256xf32>
    %c25 = arith.constant 25 : index
    %166 = memref.load %arg2[%c25] : memref<36xf32, #tpu.memory_space<smem>>
    %c7_84 = arith.constant 7 : index
    %c0_85 = arith.constant 0 : index
    %c0_86 = arith.constant 0 : index
    %167 = vector.load %arg1[%c7_84, %c0_85, %c0_86] : memref<9x128x256xf32, #tpu.memory_space<vmem>>, vector<1x128x256xf32>
    %168 = vector.shape_cast %167 : vector<1x128x256xf32> to vector<128x256xf32>
    %169 = vector.broadcast %166 : f32 to vector<128x256xf32>
    %170 = arith.mulf %169, %168 : vector<128x256xf32>
    %171 = arith.addf %165, %170 : vector<128x256xf32>
    %c26 = arith.constant 26 : index
    %172 = memref.load %arg2[%c26] : memref<36xf32, #tpu.memory_space<smem>>
    %c8_87 = arith.constant 8 : index
    %c0_88 = arith.constant 0 : index
    %c0_89 = arith.constant 0 : index
    %173 = vector.load %arg1[%c8_87, %c0_88, %c0_89] : memref<9x128x256xf32, #tpu.memory_space<vmem>>, vector<1x128x256xf32>
    %174 = vector.shape_cast %173 : vector<1x128x256xf32> to vector<128x256xf32>
    %175 = vector.broadcast %172 : f32 to vector<128x256xf32>
    %176 = arith.mulf %175, %174 : vector<128x256xf32>
    %177 = arith.addf %171, %176 : vector<128x256xf32>
    %c2_90 = arith.constant 2 : index
    %178 = memref.load %arg3[%c2_90] : memref<4xf32, #tpu.memory_space<smem>>
    %179 = vector.broadcast %178 : f32 to vector<128x256xf32>
    %180 = arith.addf %177, %179 : vector<128x256xf32>
    %cst_91 = arith.constant 0.000000e+00 : f32
    %181 = vector.broadcast %cst_91 : f32 to vector<128x256xf32>
    %182 = arith.maximumf %180, %181 : vector<128x256xf32>
    %183 = arith.truncf %182 : vector<128x256xf32> to vector<128x256xbf16>
    %c512 = arith.constant 512 : index
    %c0_92 = arith.constant 0 : index
    %184 = vector.load %arg4[%c512, %c0_92] : memref<1024x96xbf16, #tpu.memory_space<vmem>>, vector<256x96xbf16>
    %cst_93 = arith.constant dense<0.000000e+00> : vector<128x96xf32>
    %185 = tpu.matmul %183, %184, %cst_93 {dimension_numbers = #tpu.dot_dimension_numbers<[1], [0], [0], [1], [0, 0, 1, 1], [], []>} : vector<128x256xbf16>, vector<256x96xbf16>, vector<128x96xf32> -> vector<128x96xf32>
    %186 = arith.addf %124, %185 : vector<128x96xf32>
    %c27 = arith.constant 27 : index
    %187 = memref.load %arg2[%c27] : memref<36xf32, #tpu.memory_space<smem>>
    %c0_94 = arith.constant 0 : index
    %c0_95 = arith.constant 0 : index
    %c0_96 = arith.constant 0 : index
    %188 = vector.load %arg1[%c0_94, %c0_95, %c0_96] : memref<9x128x256xf32, #tpu.memory_space<vmem>>, vector<1x128x256xf32>
    %189 = vector.shape_cast %188 : vector<1x128x256xf32> to vector<128x256xf32>
    %190 = vector.broadcast %187 : f32 to vector<128x256xf32>
    %191 = arith.mulf %190, %189 : vector<128x256xf32>
    %c28 = arith.constant 28 : index
    %192 = memref.load %arg2[%c28] : memref<36xf32, #tpu.memory_space<smem>>
    %c1_97 = arith.constant 1 : index
    %c0_98 = arith.constant 0 : index
    %c0_99 = arith.constant 0 : index
    %193 = vector.load %arg1[%c1_97, %c0_98, %c0_99] : memref<9x128x256xf32, #tpu.memory_space<vmem>>, vector<1x128x256xf32>
    %194 = vector.shape_cast %193 : vector<1x128x256xf32> to vector<128x256xf32>
    %195 = vector.broadcast %192 : f32 to vector<128x256xf32>
    %196 = arith.mulf %195, %194 : vector<128x256xf32>
    %197 = arith.addf %191, %196 : vector<128x256xf32>
    %c29 = arith.constant 29 : index
    %198 = memref.load %arg2[%c29] : memref<36xf32, #tpu.memory_space<smem>>
    %c2_100 = arith.constant 2 : index
    %c0_101 = arith.constant 0 : index
    %c0_102 = arith.constant 0 : index
    %199 = vector.load %arg1[%c2_100, %c0_101, %c0_102] : memref<9x128x256xf32, #tpu.memory_space<vmem>>, vector<1x128x256xf32>
    %200 = vector.shape_cast %199 : vector<1x128x256xf32> to vector<128x256xf32>
    %201 = vector.broadcast %198 : f32 to vector<128x256xf32>
    %202 = arith.mulf %201, %200 : vector<128x256xf32>
    %203 = arith.addf %197, %202 : vector<128x256xf32>
    %c30 = arith.constant 30 : index
    %204 = memref.load %arg2[%c30] : memref<36xf32, #tpu.memory_space<smem>>
    %c3_103 = arith.constant 3 : index
    %c0_104 = arith.constant 0 : index
    %c0_105 = arith.constant 0 : index
    %205 = vector.load %arg1[%c3_103, %c0_104, %c0_105] : memref<9x128x256xf32, #tpu.memory_space<vmem>>, vector<1x128x256xf32>
    %206 = vector.shape_cast %205 : vector<1x128x256xf32> to vector<128x256xf32>
    %207 = vector.broadcast %204 : f32 to vector<128x256xf32>
    %208 = arith.mulf %207, %206 : vector<128x256xf32>
    %209 = arith.addf %203, %208 : vector<128x256xf32>
    %c31 = arith.constant 31 : index
    %210 = memref.load %arg2[%c31] : memref<36xf32, #tpu.memory_space<smem>>
    %c4_106 = arith.constant 4 : index
    %c0_107 = arith.constant 0 : index
    %c0_108 = arith.constant 0 : index
    %211 = vector.load %arg1[%c4_106, %c0_107, %c0_108] : memref<9x128x256xf32, #tpu.memory_space<vmem>>, vector<1x128x256xf32>
    %212 = vector.shape_cast %211 : vector<1x128x256xf32> to vector<128x256xf32>
    %213 = vector.broadcast %210 : f32 to vector<128x256xf32>
    %214 = arith.mulf %213, %212 : vector<128x256xf32>
    %215 = arith.addf %209, %214 : vector<128x256xf32>
    %c32 = arith.constant 32 : index
    %216 = memref.load %arg2[%c32] : memref<36xf32, #tpu.memory_space<smem>>
    %c5_109 = arith.constant 5 : index
    %c0_110 = arith.constant 0 : index
    %c0_111 = arith.constant 0 : index
    %217 = vector.load %arg1[%c5_109, %c0_110, %c0_111] : memref<9x128x256xf32, #tpu.memory_space<vmem>>, vector<1x128x256xf32>
    %218 = vector.shape_cast %217 : vector<1x128x256xf32> to vector<128x256xf32>
    %219 = vector.broadcast %216 : f32 to vector<128x256xf32>
    %220 = arith.mulf %219, %218 : vector<128x256xf32>
    %221 = arith.addf %215, %220 : vector<128x256xf32>
    %c33 = arith.constant 33 : index
    %222 = memref.load %arg2[%c33] : memref<36xf32, #tpu.memory_space<smem>>
    %c6_112 = arith.constant 6 : index
    %c0_113 = arith.constant 0 : index
    %c0_114 = arith.constant 0 : index
    %223 = vector.load %arg1[%c6_112, %c0_113, %c0_114] : memref<9x128x256xf32, #tpu.memory_space<vmem>>, vector<1x128x256xf32>
    %224 = vector.shape_cast %223 : vector<1x128x256xf32> to vector<128x256xf32>
    %225 = vector.broadcast %222 : f32 to vector<128x256xf32>
    %226 = arith.mulf %225, %224 : vector<128x256xf32>
    %227 = arith.addf %221, %226 : vector<128x256xf32>
    %c34 = arith.constant 34 : index
    %228 = memref.load %arg2[%c34] : memref<36xf32, #tpu.memory_space<smem>>
    %c7_115 = arith.constant 7 : index
    %c0_116 = arith.constant 0 : index
    %c0_117 = arith.constant 0 : index
    %229 = vector.load %arg1[%c7_115, %c0_116, %c0_117] : memref<9x128x256xf32, #tpu.memory_space<vmem>>, vector<1x128x256xf32>
    %230 = vector.shape_cast %229 : vector<1x128x256xf32> to vector<128x256xf32>
    %231 = vector.broadcast %228 : f32 to vector<128x256xf32>
    %232 = arith.mulf %231, %230 : vector<128x256xf32>
    %233 = arith.addf %227, %232 : vector<128x256xf32>
    %c35 = arith.constant 35 : index
    %234 = memref.load %arg2[%c35] : memref<36xf32, #tpu.memory_space<smem>>
    %c8_118 = arith.constant 8 : index
    %c0_119 = arith.constant 0 : index
    %c0_120 = arith.constant 0 : index
    %235 = vector.load %arg1[%c8_118, %c0_119, %c0_120] : memref<9x128x256xf32, #tpu.memory_space<vmem>>, vector<1x128x256xf32>
    %236 = vector.shape_cast %235 : vector<1x128x256xf32> to vector<128x256xf32>
    %237 = vector.broadcast %234 : f32 to vector<128x256xf32>
    %238 = arith.mulf %237, %236 : vector<128x256xf32>
    %239 = arith.addf %233, %238 : vector<128x256xf32>
    %c3_121 = arith.constant 3 : index
    %240 = memref.load %arg3[%c3_121] : memref<4xf32, #tpu.memory_space<smem>>
    %241 = vector.broadcast %240 : f32 to vector<128x256xf32>
    %242 = arith.addf %239, %241 : vector<128x256xf32>
    %cst_122 = arith.constant 0.000000e+00 : f32
    %243 = vector.broadcast %cst_122 : f32 to vector<128x256xf32>
    %244 = arith.maximumf %242, %243 : vector<128x256xf32>
    %245 = arith.truncf %244 : vector<128x256xf32> to vector<128x256xbf16>
    %c768 = arith.constant 768 : index
    %c0_123 = arith.constant 0 : index
    %246 = vector.load %arg4[%c768, %c0_123] : memref<1024x96xbf16, #tpu.memory_space<vmem>>, vector<256x96xbf16>
    %cst_124 = arith.constant dense<0.000000e+00> : vector<128x96xf32>
    %247 = tpu.matmul %245, %246, %cst_124 {dimension_numbers = #tpu.dot_dimension_numbers<[1], [0], [0], [1], [0, 0, 1, 1], [], []>} : vector<128x256xbf16>, vector<256x96xbf16>, vector<128x96xf32> -> vector<128x96xf32>
    %248 = arith.addf %186, %247 : vector<128x96xf32>
    %c0_125 = arith.constant 0 : index
    %c0_126 = arith.constant 0 : index
    %249 = vector.load %arg5[%c0_125, %c0_126] : memref<1x96xf32, #tpu.memory_space<vmem>>, vector<1x96xf32>
    %250 = vector.broadcast %249 : vector<1x96xf32> to vector<128x96xf32>
    %251 = arith.addf %248, %250 : vector<128x96xf32>
    %252 = vector.extract_strided_slice %251 {offsets = [0, 0], sizes = [128, 64], strides = [1, 1]} : vector<128x96xf32> to vector<128x64xf32>
    %253 = arith.negf %252 : vector<128x64xf32>
    %254 = math.exp %253 : vector<128x64xf32>
    %cst_127 = arith.constant 1.000000e+00 : f32
    %255 = vector.broadcast %cst_127 : f32 to vector<128x64xf32>
    %256 = arith.addf %255, %254 : vector<128x64xf32>
    %257 = arith.divf %255, %256 : vector<128x64xf32>
    %258 = vector.extract_strided_slice %251 {offsets = [0, 64], sizes = [128, 32], strides = [1, 1]} : vector<128x96xf32> to vector<128x32xf32>
    %259 = math.tanh %258 : vector<128x32xf32>
    %260 = vector.extract_strided_slice %257 {offsets = [0, 0], sizes = [128, 32], strides = [1, 1]} : vector<128x64xf32> to vector<128x32xf32>
    %261 = arith.mulf %260, %259 : vector<128x32xf32>
    %262 = vector.extract_strided_slice %257 {offsets = [0, 32], sizes = [128, 32], strides = [1, 1]} : vector<128x64xf32> to vector<128x32xf32>
    %263 = math.tanh %261 : vector<128x32xf32>
    %264 = arith.mulf %262, %263 : vector<128x32xf32>
    %265 = arith.truncf %264 : vector<128x32xf32> to vector<128x32xbf16>
    %c0_128 = arith.constant 0 : index
    %c0_129 = arith.constant 0 : index
    %266 = vector.load %arg6[%c0_128, %c0_129] : memref<32x96xbf16, #tpu.memory_space<vmem>>, vector<32x96xbf16>
    %cst_130 = arith.constant dense<0.000000e+00> : vector<128x96xf32>
    %267 = tpu.matmul %265, %266, %cst_130 {dimension_numbers = #tpu.dot_dimension_numbers<[1], [0], [0], [1], [0, 0, 1, 1], [], []>} : vector<128x32xbf16>, vector<32x96xbf16>, vector<128x96xf32> -> vector<128x96xf32>
    %c0_131 = arith.constant 0 : index
    %c0_132 = arith.constant 0 : index
    %268 = vector.load %arg7[%c0_131, %c0_132] : memref<1x96xf32, #tpu.memory_space<vmem>>, vector<1x96xf32>
    %269 = vector.broadcast %268 : vector<1x96xf32> to vector<128x96xf32>
    %270 = arith.addf %267, %269 : vector<128x96xf32>
    %271 = vector.extract_strided_slice %270 {offsets = [0, 0], sizes = [128, 64], strides = [1, 1]} : vector<128x96xf32> to vector<128x64xf32>
    %272 = arith.negf %271 : vector<128x64xf32>
    %273 = math.exp %272 : vector<128x64xf32>
    %cst_133 = arith.constant 1.000000e+00 : f32
    %274 = vector.broadcast %cst_133 : f32 to vector<128x64xf32>
    %275 = arith.addf %274, %273 : vector<128x64xf32>
    %276 = arith.divf %274, %275 : vector<128x64xf32>
    %277 = vector.extract_strided_slice %270 {offsets = [0, 64], sizes = [128, 32], strides = [1, 1]} : vector<128x96xf32> to vector<128x32xf32>
    %278 = math.tanh %277 : vector<128x32xf32>
    %279 = vector.extract_strided_slice %276 {offsets = [0, 0], sizes = [128, 32], strides = [1, 1]} : vector<128x64xf32> to vector<128x32xf32>
    %280 = arith.mulf %279, %278 : vector<128x32xf32>
    %281 = vector.extract_strided_slice %276 {offsets = [0, 32], sizes = [128, 32], strides = [1, 1]} : vector<128x64xf32> to vector<128x32xf32>
    %282 = math.tanh %280 : vector<128x32xf32>
    %283 = arith.mulf %281, %282 : vector<128x32xf32>
    %284 = arith.truncf %283 : vector<128x32xf32> to vector<128x32xbf16>
    %c0_134 = arith.constant 0 : index
    %c0_135 = arith.constant 0 : index
    %285 = vector.load %arg8[%c0_134, %c0_135] : memref<32x64xbf16, #tpu.memory_space<vmem>>, vector<32x64xbf16>
    %cst_136 = arith.constant dense<0.000000e+00> : vector<128x64xf32>
    %286 = tpu.matmul %284, %285, %cst_136 {dimension_numbers = #tpu.dot_dimension_numbers<[1], [0], [0], [1], [0, 0, 1, 1], [], []>} : vector<128x32xbf16>, vector<32x64xbf16>, vector<128x64xf32> -> vector<128x64xf32>
    %c0_137 = arith.constant 0 : index
    %c0_138 = arith.constant 0 : index
    %287 = vector.load %arg9[%c0_137, %c0_138] : memref<1x64xf32, #tpu.memory_space<vmem>>, vector<1x64xf32>
    %288 = vector.broadcast %287 : vector<1x64xf32> to vector<128x64xf32>
    %289 = arith.addf %286, %288 : vector<128x64xf32>
    %cst_139 = arith.constant 0.000000e+00 : f32
    %290 = vector.broadcast %cst_139 : f32 to vector<128x64xf32>
    %291 = arith.maximumf %289, %290 : vector<128x64xf32>
    %292 = arith.truncf %291 : vector<128x64xf32> to vector<128x64xbf16>
    %c0_140 = arith.constant 0 : index
    %c0_141 = arith.constant 0 : index
    %293 = vector.load %arg10[%c0_140, %c0_141] : memref<64x8xbf16, #tpu.memory_space<vmem>>, vector<64x8xbf16>
    %cst_142 = arith.constant dense<0.000000e+00> : vector<128x8xf32>
    %294 = tpu.matmul %292, %293, %cst_142 {dimension_numbers = #tpu.dot_dimension_numbers<[1], [0], [0], [1], [0, 0, 1, 1], [], []>} : vector<128x64xbf16>, vector<64x8xbf16>, vector<128x8xf32> -> vector<128x8xf32>
    %c0_143 = arith.constant 0 : index
    %c0_144 = arith.constant 0 : index
    %295 = vector.load %arg11[%c0_143, %c0_144] : memref<1x8xf32, #tpu.memory_space<vmem>>, vector<1x8xf32>
    %296 = vector.broadcast %295 : vector<1x8xf32> to vector<128x8xf32>
    %297 = arith.addf %294, %296 : vector<128x8xf32>
    %c0_145 = arith.constant 0 : index
    %c0_146 = arith.constant 0 : index
    %298 = vector.load %arg12[%c0_145, %c0_146] : memref<128x8xf32, #tpu.memory_space<vmem>>, vector<128x8xf32>
    tpu.vector_store %arg12[%c0_145, %c0_146], %297 {strides = array<i32>} : memref<128x8xf32, #tpu.memory_space<vmem>>, vector<128x8xf32>,
    return
  }
  func.func @transform_0(%arg0: i32) -> (i32, i32, i32) {
    %c0_i32 = arith.constant 0 : i32
    %c0_i32_0 = arith.constant 0 : i32
    %c0_i32_1 = arith.constant 0 : i32
    return %c0_i32, %arg0, %c0_i32_0 : i32, i32, i32
  }
  func.func @transform_1(%arg0: i32) -> i32 {
    %c0_i32 = arith.constant 0 : i32
    %c0_i32_0 = arith.constant 0 : i32
    return %c0_i32 : i32
  }
  func.func @transform_2(%arg0: i32) -> i32 {
    %c0_i32 = arith.constant 0 : i32
    %c0_i32_0 = arith.constant 0 : i32
    return %c0_i32 : i32
  }
  func.func @transform_3(%arg0: i32) -> (i32, i32) {
    %c0_i32 = arith.constant 0 : i32
    %c0_i32_0 = arith.constant 0 : i32
    %c0_i32_1 = arith.constant 0 : i32
    return %c0_i32, %c0_i32_0 : i32, i32
  }
  func.func @transform_4(%arg0: i32) -> (i32, i32) {
    %c0_i32 = arith.constant 0 : i32
    %c0_i32_0 = arith.constant 0 : i32
    %c0_i32_1 = arith.constant 0 : i32
    return %c0_i32, %c0_i32_0 : i32, i32
  }
  func.func @transform_5(%arg0: i32) -> (i32, i32) {
    %c0_i32 = arith.constant 0 : i32
    %c0_i32_0 = arith.constant 0 : i32
    %c0_i32_1 = arith.constant 0 : i32
    return %c0_i32, %c0_i32_0 : i32, i32
  }
  func.func @transform_6(%arg0: i32) -> (i32, i32) {
    %c0_i32 = arith.constant 0 : i32
    %c0_i32_0 = arith.constant 0 : i32
    %c0_i32_1 = arith.constant 0 : i32
    return %c0_i32, %c0_i32_0 : i32, i32
  }
  func.func @transform_7(%arg0: i32) -> (i32, i32) {
    %c0_i32 = arith.constant 0 : i32
    %c0_i32_0 = arith.constant 0 : i32
    %c0_i32_1 = arith.constant 0 : i32
    return %c0_i32, %c0_i32_0 : i32, i32
  }
  func.func @transform_8(%arg0: i32) -> (i32, i32) {
    %c0_i32 = arith.constant 0 : i32
    %c0_i32_0 = arith.constant 0 : i32
    %c0_i32_1 = arith.constant 0 : i32
    return %c0_i32, %c0_i32_0 : i32, i32
  }
  func.func @transform_9(%arg0: i32) -> (i32, i32) {
    %c0_i32 = arith.constant 0 : i32
    %c0_i32_0 = arith.constant 0 : i32
    %c0_i32_1 = arith.constant 0 : i32
    return %c0_i32, %c0_i32_0 : i32, i32
  }
  func.func @transform_10(%arg0: i32) -> (i32, i32) {
    %c0_i32 = arith.constant 0 : i32
    %c0_i32_0 = arith.constant 0 : i32
    %c0_i32_1 = arith.constant 0 : i32
    return %c0_i32, %c0_i32_0 : i32, i32
  }
  func.func @transform_11(%arg0: i32) -> (i32, i32) {
    %c0_i32 = arith.constant 0 : i32
    %c0_i32_0 = arith.constant 0 : i32
    return %arg0, %c0_i32 : i32, i32
  }
}

</mosaic_0001>

<bundles_post_ra>
// kernel: cnn_lstm_forward.1
= control target key start
LH: loop header
LB: loop body
LE: loop exit
PB: predicated region body
PF: predicated region fallthrough
CT: control target
= control target key end

     0   :  { %16 = vsyncpa [#allocation4], 0  ;;  %s12216_s0 = inlined_call_operand.vmem [shape: f32[9,256,256], index: 0, kind: input, shape index: {}]   ;;  %s12217_s1 = inlined_call_operand.vmem [shape: f32[36], index: 1, kind: input, shape index: {}]   ;;  %s12218_s2 = inlined_call_operand.vmem [shape: f32[4], index: 2, kind: input, shape index: {}]   ;;  %s12219_s3 = inlined_call_operand.vmem [shape: bf16[1024,96], index: 3, kind: input, shape index: {}]   ;;  %s12220_s4 = inlined_call_operand.vmem [shape: f32[1,96], index: 4, kind: input, shape index: {}]   ;;  %s12221_s5 = inlined_call_operand.vmem [shape: bf16[32,96], index: 5, kind: input, shape index: {}]   ;;  %s12222_s6 = inlined_call_operand.vmem [shape: f32[1,96], index: 6, kind: input, shape index: {}]   ;;  %s12223_s7 = inlined_call_operand.vmem [shape: bf16[32,64], index: 7, kind: input, shape index: {}]   ;;  %s12224_s8 = inlined_call_operand.vmem [shape: f32[1,64], index: 8, kind: input, shape index: {}]   ;;  %s12225_s9 = inlined_call_operand.vmem [shape: bf16[64,8], index: 9, kind: input, shape index: {}]   ;;  %s12226_s10 = inlined_call_operand.vmem [shape: f32[1,8], index: 10, kind: input, shape index: {}]   ;;  %s12227_s11 = inlined_call_operand.vmem [shape: f32[256,8], index: 11, kind: output, shape index: {}]  }
   0x1   :  { %17 = vsyncpa [#allocation6], 0  ;;  %s7647_s17 = smov 0   ;;  %s7649_s18 = smov 0  }
   0x2   :  { %s7651_s19 = smov 0  }
   0x3 LB: > { %s6054_s20 = sadd.s32 4294967295, %s7580_s19   ;;  %s7664_s21 = sadd.s32 1, %s7580_s19   ;;  %s7580_s19 = sphi %s7651_s19, %s12386_s19   ;;  %s7576_s18 = sphi %s7649_s18, %s12385_s18   ;;  %s7572_s17 = sphi %s7647_s17, %s12384_s17  }
   0x4   : > { %s27_s22 = ssub.s32 %s7580_s19, %s7664_s21  ;;  %s30_s23 = sadd.s32 1, %s7576_s18 }
   0x5   : > { %p28_p0 = scmp.eq.s32.totalorder %s27_s22, 0  ;;  %p37_p1 = scmp.ne.s32.totalorder %s7576_s18, %s7572_s17 }
   0x6   : > { %p38_p2 = scmp.eq.s32.totalorder %s7580_s19, 0  ;;  %p6056_p3 = scmp.ge.s32.totalorder %s7580_s19, 1 }
   0x7   : > { %s7674_s24 = scalar_select %p28_p0, %s7576_s18, %s30_s23  }
   0x8   : > { %p7676_p4 = por %p38_p2, %p37_p1  ;;  %p290_p5 = scmp.lt.s32.totalorder %s7580_s19, 3 }
   0x9   : > { %p7683_p6 = scmp.eq.s32.totalorder %s6054_s20, 0  ;;  %s303_s30 = sshll.u32 %s12217_s1, 4  ;;  %s304_s30 = int_to_ptr.vmem [resolvable:$true] %s303_s30 }
   0xa   : > { %s12242_s25 = scalar_select %p7676_p4, 1, 0 }
   0xb   : > { %s12243_s26 = scalar_select %p7683_p6, 1, 0 }
   0xc   : > { %p7687_p7 = pnand %p6056_p3, %p290_p5  ;;  %s314_s14 = sshll.u32 %s12218_s2, 4  ;;  %s315_s14 = int_to_ptr.vmem [resolvable:$true] %s314_s14 }
   0xd   : > { %s7520_s16 = scalar_lea.vmem %s304_s30, 16  ;;  %p7528_p0 = scmp.lt.s32.totalorder %s304_s30, %s304_s30 }
   0xe   : > { %s12244_s27 = scalar_select %p7687_p7, 1, 0 }
   0xf   : > { %p6864_p8 = pneg %p7687_p7  ;;  %p7521_p10 = scmp.ne.s32.totalorder %s304_s30, %s7520_s16 }
  0x10   : > { %p7529_p1 = scmp.lt.s32.totalorder %s7520_s16, %s7520_s16 }
  0x11   : > { %p7701_p9 = pnand %p7683_p6, %p6864_p8 }
  0x12   : > { %p7530_p2 = por %p7529_p1, %p7528_p0 }
  0x13   : > { %p7522_p11 = pneg %p7701_p9 }
  0x15   : > { %p7523_p12 = pnand %p7522_p11, %p7521_p10 }
  0x17   : > { %p7524_p13 = pneg %p7523_p12 }
  0x19   : > { %p7531_p3 = pnand %p7530_p2, %p7524_p13 }
  0x1b   : > { %7534 = shalt.err (!%p7531_p3)
}
  0x1c   : > { %s7582_s22 = smov [#allocation3]   ;;  %s7535_s23 = scalar_lea.vmem %s315_s14, 16 }
  0x1d   : > { %6867 = dma.vmem_to_smem (!%p7701_p9), %s304_s30, 16, %s7582_s22, [#allocation4]  }
  0x1e   : > { %p7536_p5 = scmp.ne.s32.totalorder %s315_s14, %s7535_s23  ;;  %p7543_p7 = scmp.lt.s32.totalorder %s315_s14, %s315_s14 }
  0x1f   : > { %p7544_p4 = scmp.lt.s32.totalorder %s7535_s23, %s7535_s23 }
  0x20   : > { %p7538_p8 = pnand %p7536_p5, %p7522_p11 }
  0x21   : > { %p7545_p10 = por %p7544_p4, %p7543_p7 }
  0x22   : > { %p7539_p6 = pneg %p7538_p8 }
  0x24   : > { %p7546_p12 = pnand %p7545_p10, %p7539_p6 }
  0x26   : > { %7549 = shalt.err (!%p7546_p12)
}
  0x27   : > { %s7583_s28 = smov [#allocation5]   ;;  %p6059_p13 = scmp.ge.s32.totalorder %s7580_s19, 2 }
  0x28   : > { %6870 = dma.vmem_to_smem (!%p7701_p9), %s315_s14, 16, %s7583_s28, [#allocation6]  }
  0x29   : > { %345 = sbr.rel (%p6059_p13) target bundleno = 195 (0xc3), region = 56  ;;  %p12246_p0 = scmp.ne.s32.totalorder (!%p6059_p13), %s12242_s25, 0 }
  0x2e   : > { %348 = sbr.rel (!%p12246_p0) target bundleno = 195 (0xc3), region = 60  ;;  %s350_s29 = sand.u32 (%p12246_p0), 1, %s7576_s18  }
  0x2f   : > { %s6497_s30 = sshll.u32 (%p12246_p0), %s7580_s19, 8  ;;  %s6854_s12 = smul.u32 (%p12246_p0), 2304, %s350_s29 }
  0x30   : > { %s7719_s22 = scalar_lea.vmem (%p12246_p0), %s12216_s0, %s6497_s30 }
  0x31   : > { %v369_v0 = vld [vmem:[%s7719_s22] sm:$0xff] (%p12246_p0)  ;;  %v371_v1 = vld [vmem:[%s7719_s22 + $0x8] sm:$0xff] (%p12246_p0)  ;;  %v373_v2 = vld [vmem:[%s7719_s22 + $0x10] sm:$0xff] (%p12246_p0)  ;;  %s7727_s25 = scalar_lea.vmem (%p12246_p0), [#allocation2], %s6854_s12 }
  0x32   : > { %v375_v3 = vld [vmem:[%s7719_s22 + $0x18] sm:$0xff] (%p12246_p0)  ;;  %v377_v4 = vld [vmem:[%s7719_s22 + $0x20] sm:$0xff] (%p12246_p0)  ;;  %v379_v5 = vld [vmem:[%s7719_s22 + $0x28] sm:$0xff] (%p12246_p0)  ;;  %370 = vst [vmem:[%s7727_s25] sm:$0xff] (%p12246_p0), %v369_v0 }
  0x33   : > { %372 = vst [vmem:[%s7727_s25 + $0x8] sm:$0xff] %v371_v1  ;;  %374 = vst [vmem:[%s7727_s25 + $0x10] sm:$0xff] %v373_v2  ;;  %v381_v6 = vld [vmem:[%s7719_s22 + $0x30] sm:$0xff]  ;;  %v383_v7 = vld [vmem:[%s7719_s22 + $0x38] sm:$0xff] }
  0x34   : > { %376 = vst [vmem:[%s7727_s25 + $0x18] sm:$0xff] %v375_v3  ;;  %378 = vst [vmem:[%s7727_s25 + $0x20] sm:$0xff] %v377_v4  ;;  %v385_v8 = vld [vmem:[%s7719_s22 + $0x40] sm:$0xff]  ;;  %v387_v9 = vld [vmem:[%s7719_s22 + $0x48] sm:$0xff] }
  0x35   : > { %380 = vst [vmem:[%s7727_s25 + $0x28] sm:$0xff] %v379_v5  ;;  %382 = vst [vmem:[%s7727_s25 + $0x30] sm:$0xff] %v381_v6  ;;  %v389_v10 = vld [vmem:[%s7719_s22 + $0x50] sm:$0xff]  ;;  %v391_v11 = vld [vmem:[%s7719_s22 + $0x58] sm:$0xff] }
  0x36   : > { %384 = vst [vmem:[%s7727_s25 + $0x38] sm:$0xff] %v383_v7  ;;  %386 = vst [vmem:[%s7727_s25 + $0x40] sm:$0xff] %v385_v8  ;;  %v393_v12 = vld [vmem:[%s7719_s22 + $0x60] sm:$0xff]  ;;  %v395_v13 = vld [vmem:[%s7719_s22 + $0x68] sm:$0xff] }
  0x37   : > { %388 = vst [vmem:[%s7727_s25 + $0x48] sm:$0xff] %v387_v9  ;;  %390 = vst [vmem:[%s7727_s25 + $0x50] sm:$0xff] %v389_v10  ;;  %v397_v14 = vld [vmem:[%s7719_s22 + $0x70] sm:$0xff]  ;;  %v399_v15 = vld [vmem:[%s7719_s22 + $0x78] sm:$0xff] }
  0x38   : > { %392 = vst [vmem:[%s7727_s25 + $0x58] sm:$0xff] %v391_v11  ;;  %394 = vst [vmem:[%s7727_s25 + $0x60] sm:$0xff] %v393_v12  ;;  %v401_v16 = vld [vmem:[%s7719_s22 + $0x80] sm:$0xff]  ;;  %v403_v17 = vld [vmem:[%s7719_s22 + $0x88] sm:$0xff] }
  0x39   : > { %396 = vst [vmem:[%s7727_s25 + $0x68] sm:$0xff] %v395_v13  ;;  %398 = vst [vmem:[%s7727_s25 + $0x70] sm:$0xff] %v397_v14  ;;  %v405_v18 = vld [vmem:[%s7719_s22 + $0x90] sm:$0xff]  ;;  %v407_v19 = vld [vmem:[%s7719_s22 + $0x98] sm:$0xff] }
  0x3a   : > { %400 = vst [vmem:[%s7727_s25 + $0x78] sm:$0xff] %v399_v15  ;;  %402 = vst [vmem:[%s7727_s25 + $0x80] sm:$0xff] %v401_v16  ;;  %v409_v20 = vld [vmem:[%s7719_s22 + $0xa0] sm:$0xff]  ;;  %v411_v21 = vld [vmem:[%s7719_s22 + $0xa8] sm:$0xff] }
  0x3b   : > { %404 = vst [vmem:[%s7727_s25 + $0x88] sm:$0xff] %v403_v17  ;;  %406 = vst [vmem:[%s7727_s25 + $0x90] sm:$0xff] %v405_v18  ;;  %v413_v22 = vld [vmem:[%s7719_s22 + $0xb0] sm:$0xff]  ;;  %v415_v23 = vld [vmem:[%s7719_s22 + $0xb8] sm:$0xff] }
  0x3c   : > { %408 = vst [vmem:[%s7727_s25 + $0x98] sm:$0xff] %v407_v19  ;;  %410 = vst [vmem:[%s7727_s25 + $0xa0] sm:$0xff] %v409_v20  ;;  %v417_v24 = vld [vmem:[%s7719_s22 + $0xc0] sm:$0xff]  ;;  %v419_v25 = vld [vmem:[%s7719_s22 + $0xc8] sm:$0xff] }
  0x3d   : > { %412 = vst [vmem:[%s7727_s25 + $0xa8] sm:$0xff] %v411_v21  ;;  %414 = vst [vmem:[%s7727_s25 + $0xb0] sm:$0xff] %v413_v22  ;;  %v421_v26 = vld [vmem:[%s7719_s22 + $0xd0] sm:$0xff]  ;;  %v423_v27 = vld [vmem:[%s7719_s22 + $0xd8] sm:$0xff] }
  0x3e   : > { %416 = vst [vmem:[%s7727_s25 + $0xb8] sm:$0xff] %v415_v23  ;;  %418 = vst [vmem:[%s7727_s25 + $0xc0] sm:$0xff] %v417_v24  ;;  %v425_v28 = vld [vmem:[%s7719_s22 + $0xe0] sm:$0xff]  ;;  %v427_v29 = vld [vmem:[%s7719_s22 + $0xe8] sm:$0xff] }
  0x3f   : > { %420 = vst [vmem:[%s7727_s25 + $0xc8] sm:$0xff] %v419_v25  ;;  %422 = vst [vmem:[%s7727_s25 + $0xd0] sm:$0xff] %v421_v26  ;;  %v429_v30 = vld [vmem:[%s7719_s22 + $0xf0] sm:$0xff]  ;;  %v431_v31 = vld [vmem:[%s7719_s22 + $0xf8] sm:$0xff] }
  0x40   : > { %424 = vst [vmem:[%s7727_s25 + $0xd8] sm:$0xff] %v423_v27  ;;  %426 = vst [vmem:[%s7727_s25 + $0xe0] sm:$0xff] %v425_v28  ;;  %v433_v32 = vld [vmem:[%s7719_s22 + $0x200] sm:$0xff]  ;;  %v435_v33 = vld [vmem:[%s7719_s22 + $0x208] sm:$0xff] }
  0x41   : > { %428 = vst [vmem:[%s7727_s25 + $0xe8] sm:$0xff] %v427_v29  ;;  %430 = vst [vmem:[%s7727_s25 + $0xf0] sm:$0xff] %v429_v30  ;;  %v437_v34 = vld [vmem:[%s7719_s22 + $0x210] sm:$0xff]  ;;  %v439_v35 = vld [vmem:[%s7719_s22 + $0x218] sm:$0xff] }
  0x42   : > { %432 = vst [vmem:[%s7727_s25 + $0xf8] sm:$0xff] %v431_v31  ;;  %434 = vst [vmem:[%s7727_s25 + $0x100] sm:$0xff] %v433_v32  ;;  %v441_v36 = vld [vmem:[%s7719_s22 + $0x220] sm:$0xff]  ;;  %v443_v37 = vld [vmem:[%s7719_s22 + $0x228] sm:$0xff] }
  0x43   : > { %436 = vst [vmem:[%s7727_s25 + $0x108] sm:$0xff] %v435_v33  ;;  %438 = vst [vmem:[%s7727_s25 + $0x110] sm:$0xff] %v437_v34  ;;  %v445_v38 = vld [vmem:[%s7719_s22 + $0x230] sm:$0xff]  ;;  %v447_v39 = vld [vmem:[%s7719_s22 + $0x238] sm:$0xff] }
  0x44   : > { %440 = vst [vmem:[%s7727_s25 + $0x118] sm:$0xff] %v439_v35  ;;  %442 = vst [vmem:[%s7727_s25 + $0x120] sm:$0xff] %v441_v36  ;;  %v449_v40 = vld [vmem:[%s7719_s22 + $0x240] sm:$0xff]  ;;  %v451_v41 = vld [vmem:[%s7719_s22 + $0x248] sm:$0xff] }
  0x45   : > { %444 = vst [vmem:[%s7727_s25 + $0x128] sm:$0xff] %v443_v37  ;;  %446 = vst [vmem:[%s7727_s25 + $0x130] sm:$0xff] %v445_v38  ;;  %v453_v42 = vld [vmem:[%s7719_s22 + $0x250] sm:$0xff]  ;;  %v455_v43 = vld [vmem:[%s7719_s22 + $0x258] sm:$0xff] }
  0x46   : > { %448 = vst [vmem:[%s7727_s25 + $0x138] sm:$0xff] %v447_v39  ;;  %450 = vst [vmem:[%s7727_s25 + $0x140] sm:$0xff] %v449_v40  ;;  %v457_v44 = vld [vmem:[%s7719_s22 + $0x260] sm:$0xff]  ;;  %v459_v45 = vld [vmem:[%s7719_s22 + $0x268] sm:$0xff] }
  0x47   : > { %452 = vst [vmem:[%s7727_s25 + $0x148] sm:$0xff] %v451_v41  ;;  %454 = vst [vmem:[%s7727_s25 + $0x150] sm:$0xff] %v453_v42  ;;  %v461_v46 = vld [vmem:[%s7719_s22 + $0x270] sm:$0xff]  ;;  %v463_v47 = vld [vmem:[%s7719_s22 + $0x278] sm:$0xff] }
  0x48   : > { %456 = vst [vmem:[%s7727_s25 + $0x158] sm:$0xff] %v455_v43  ;;  %458 = vst [vmem:[%s7727_s25 + $0x160] sm:$0xff] %v457_v44  ;;  %v465_v48 = vld [vmem:[%s7719_s22 + $0x280] sm:$0xff]  ;;  %v467_v49 = vld [vmem:[%s7719_s22 + $0x288] sm:$0xff] }
  0x49   : > { %460 = vst [vmem:[%s7727_s25 + $0x168] sm:$0xff] %v459_v45  ;;  %462 = vst [vmem:[%s7727_s25 + $0x170] sm:$0xff] %v461_v46  ;;  %v469_v50 = vld [vmem:[%s7719_s22 + $0x290] sm:$0xff]  ;;  %v471_v51 = vld [vmem:[%s7719_s22 + $0x298] sm:$0xff] }
  0x4a   : > { %464 = vst [vmem:[%s7727_s25 + $0x178] sm:$0xff] %v463_v47  ;;  %466 = vst [vmem:[%s7727_s25 + $0x180] sm:$0xff] %v465_v48  ;;  %v473_v52 = vld [vmem:[%s7719_s22 + $0x2a0] sm:$0xff]  ;;  %v475_v53 = vld [vmem:[%s7719_s22 + $0x2a8] sm:$0xff] }
  0x4b   : > { %468 = vst [vmem:[%s7727_s25 + $0x188] sm:$0xff] %v467_v49  ;;  %470 = vst [vmem:[%s7727_s25 + $0x190] sm:$0xff] %v469_v50  ;;  %v477_v54 = vld [vmem:[%s7719_s22 + $0x2b0] sm:$0xff]  ;;  %v479_v55 = vld [vmem:[%s7719_s22 + $0x2b8] sm:$0xff] }
  0x4c   : > { %472 = vst [vmem:[%s7727_s25 + $0x198] sm:$0xff] %v471_v51  ;;  %474 = vst [vmem:[%s7727_s25 + $0x1a0] sm:$0xff] %v473_v52  ;;  %v481_v56 = vld [vmem:[%s7719_s22 + $0x2c0] sm:$0xff]  ;;  %v483_v57 = vld [vmem:[%s7719_s22 + $0x2c8] sm:$0xff] }
  0x4d   : > { %476 = vst [vmem:[%s7727_s25 + $0x1a8] sm:$0xff] %v475_v53  ;;  %478 = vst [vmem:[%s7727_s25 + $0x1b0] sm:$0xff] %v477_v54  ;;  %v485_v58 = vld [vmem:[%s7719_s22 + $0x2d0] sm:$0xff]  ;;  %v487_v59 = vld [vmem:[%s7719_s22 + $0x2d8] sm:$0xff] }
  0x4e   : > { %480 = vst [vmem:[%s7727_s25 + $0x1b8] sm:$0xff] %v479_v55  ;;  %482 = vst [vmem:[%s7727_s25 + $0x1c0] sm:$0xff] %v481_v56  ;;  %v489_v60 = vld [vmem:[%s7719_s22 + $0x2e0] sm:$0xff]  ;;  %v491_v61 = vld [vmem:[%s7719_s22 + $0x2e8] sm:$0xff] }
  0x4f   : > { %484 = vst [vmem:[%s7727_s25 + $0x1c8] sm:$0xff] %v483_v57  ;;  %486 = vst [vmem:[%s7727_s25 + $0x1d0] sm:$0xff] %v485_v58  ;;  %v493_v62 = vld [vmem:[%s7719_s22 + $0x2f0] sm:$0xff]  ;;  %v495_v63 = vld [vmem:[%s7719_s22 + $0x2f8] sm:$0xff] }
  0x50   : > { %488 = vst [vmem:[%s7727_s25 + $0x1d8] sm:$0xff] %v487_v59  ;;  %490 = vst [vmem:[%s7727_s25 + $0x1e0] sm:$0xff] %v489_v60  ;;  %v497_v0 = vld [vmem:[%s7719_s22 + $0x400] sm:$0xff]  ;;  %v499_v1 = vld [vmem:[%s7719_s22 + $0x408] sm:$0xff] }
  0x51   : > { %492 = vst [vmem:[%s7727_s25 + $0x1e8] sm:$0xff] %v491_v61  ;;  %494 = vst [vmem:[%s7727_s25 + $0x1f0] sm:$0xff] %v493_v62  ;;  %v501_v2 = vld [vmem:[%s7719_s22 + $0x410] sm:$0xff]  ;;  %v503_v3 = vld [vmem:[%s7719_s22 + $0x418] sm:$0xff] }
  0x52   : > { %496 = vst [vmem:[%s7727_s25 + $0x1f8] sm:$0xff] %v495_v63  ;;  %498 = vst [vmem:[%s7727_s25 + $0x200] sm:$0xff] %v497_v0  ;;  %v505_v4 = vld [vmem:[%s7719_s22 + $0x420] sm:$0xff]  ;;  %v507_v5 = vld [vmem:[%s7719_s22 + $0x428] sm:$0xff] }
  0x53   : > { %500 = vst [vmem:[%s7727_s25 + $0x208] sm:$0xff] %v499_v1  ;;  %502 = vst [vmem:[%s7727_s25 + $0x210] sm:$0xff] %v501_v2  ;;  %v509_v6 = vld [vmem:[%s7719_s22 + $0x430] sm:$0xff]  ;;  %v511_v7 = vld [vmem:[%s7719_s22 + $0x438] sm:$0xff] }
  0x54   : > { %504 = vst [vmem:[%s7727_s25 + $0x218] sm:$0xff] %v503_v3  ;;  %506 = vst [vmem:[%s7727_s25 + $0x220] sm:$0xff] %v505_v4  ;;  %v513_v8 = vld [vmem:[%s7719_s22 + $0x440] sm:$0xff]  ;;  %v515_v9 = vld [vmem:[%s7719_s22 + $0x448] sm:$0xff] }
  0x55   : > { %508 = vst [vmem:[%s7727_s25 + $0x228] sm:$0xff] %v507_v5  ;;  %510 = vst [vmem:[%s7727_s25 + $0x230] sm:$0xff] %v509_v6  ;;  %v517_v10 = vld [vmem:[%s7719_s22 + $0x450] sm:$0xff]  ;;  %v519_v11 = vld [vmem:[%s7719_s22 + $0x458] sm:$0xff] }
  0x56   : > { %512 = vst [vmem:[%s7727_s25 + $0x238] sm:$0xff] %v511_v7  ;;  %514 = vst [vmem:[%s7727_s25 + $0x240] sm:$0xff] %v513_v8  ;;  %v521_v12 = vld [vmem:[%s7719_s22 + $0x460] sm:$0xff]  ;;  %v523_v13 = vld [vmem:[%s7719_s22 + $0x468] sm:$0xff] }
  0x57   : > { %516 = vst [vmem:[%s7727_s25 + $0x248] sm:$0xff] %v515_v9  ;;  %518 = vst [vmem:[%s7727_s25 + $0x250] sm:$0xff] %v517_v10  ;;  %v525_v14 = vld [vmem:[%s7719_s22 + $0x470] sm:$0xff]  ;;  %v527_v15 = vld [vmem:[%s7719_s22 + $0x478] sm:$0xff] }
  0x58   : > { %520 = vst [vmem:[%s7727_s25 + $0x258] sm:$0xff] %v519_v11  ;;  %522 = vst [vmem:[%s7727_s25 + $0x260] sm:$0xff] %v521_v12  ;;  %v529_v16 = vld [vmem:[%s7719_s22 + $0x480] sm:$0xff]  ;;  %v531_v17 = vld [vmem:[%s7719_s22 + $0x488] sm:$0xff] }
  0x59   : > { %524 = vst [vmem:[%s7727_s25 + $0x268] sm:$0xff] %v523_v13  ;;  %526 = vst [vmem:[%s7727_s25 + $0x270] sm:$0xff] %v525_v14  ;;  %v533_v18 = vld [vmem:[%s7719_s22 + $0x490] sm:$0xff]  ;;  %v535_v19 = vld [vmem:[%s7719_s22 + $0x498] sm:$0xff] }
  0x5a   : > { %528 = vst [vmem:[%s7727_s25 + $0x278] sm:$0xff] %v527_v15  ;;  %530 = vst [vmem:[%s7727_s25 + $0x280] sm:$0xff] %v529_v16  ;;  %v537_v20 = vld [vmem:[%s7719_s22 + $0x4a0] sm:$0xff]  ;;  %v539_v21 = vld [vmem:[%s7719_s22 + $0x4a8] sm:$0xff] }
  0x5b   : > { %532 = vst [vmem:[%s7727_s25 + $0x288] sm:$0xff] %v531_v17  ;;  %534 = vst [vmem:[%s7727_s25 + $0x290] sm:$0xff] %v533_v18  ;;  %v541_v22 = vld [vmem:[%s7719_s22 + $0x4b0] sm:$0xff]  ;;  %v543_v23 = vld [vmem:[%s7719_s22 + $0x4b8] sm:$0xff] }
  0x5c   : > { %536 = vst [vmem:[%s7727_s25 + $0x298] sm:$0xff] %v535_v19  ;;  %538 = vst [vmem:[%s7727_s25 + $0x2a0] sm:$0xff] %v537_v20  ;;  %v545_v24 = vld [vmem:[%s7719_s22 + $0x4c0] sm:$0xff]  ;;  %v547_v25 = vld [vmem:[%s7719_s22 + $0x4c8] sm:$0xff] }
  0x5d   : > { %540 = vst [vmem:[%s7727_s25 + $0x2a8] sm:$0xff] %v539_v21  ;;  %542 = vst [vmem:[%s7727_s25 + $0x2b0] sm:$0xff] %v541_v22  ;;  %v549_v26 = vld [vmem:[%s7719_s22 + $0x4d0] sm:$0xff]  ;;  %v551_v27 = vld [vmem:[%s7719_s22 + $0x4d8] sm:$0xff] }
  0x5e   : > { %544 = vst [vmem:[%s7727_s25 + $0x2b8] sm:$0xff] %v543_v23  ;;  %546 = vst [vmem:[%s7727_s25 + $0x2c0] sm:$0xff] %v545_v24  ;;  %v553_v28 = vld [vmem:[%s7719_s22 + $0x4e0] sm:$0xff]  ;;  %v555_v29 = vld [vmem:[%s7719_s22 + $0x4e8] sm:$0xff] }
  0x5f   : > { %548 = vst [vmem:[%s7727_s25 + $0x2c8] sm:$0xff] %v547_v25  ;;  %550 = vst [vmem:[%s7727_s25 + $0x2d0] sm:$0xff] %v549_v26  ;;  %v557_v30 = vld [vmem:[%s7719_s22 + $0x4f0] sm:$0xff]  ;;  %v559_v31 = vld [vmem:[%s7719_s22 + $0x4f8] sm:$0xff] }
  0x60   : > { %552 = vst [vmem:[%s7727_s25 + $0x2d8] sm:$0xff] %v551_v27  ;;  %554 = vst [vmem:[%s7727_s25 + $0x2e0] sm:$0xff] %v553_v28  ;;  %v561_v32 = vld [vmem:[%s7719_s22 + $0x600] sm:$0xff]  ;;  %v563_v33 = vld [vmem:[%s7719_s22 + $0x608] sm:$0xff] }
  0x61   : > { %556 = vst [vmem:[%s7727_s25 + $0x2e8] sm:$0xff] %v555_v29  ;;  %558 = vst [vmem:[%s7727_s25 + $0x2f0] sm:$0xff] %v557_v30  ;;  %v565_v34 = vld [vmem:[%s7719_s22 + $0x610] sm:$0xff]  ;;  %v567_v35 = vld [vmem:[%s7719_s22 + $0x618] sm:$0xff] }
  0x62   : > { %560 = vst [vmem:[%s7727_s25 + $0x2f8] sm:$0xff] %v559_v31  ;;  %562 = vst [vmem:[%s7727_s25 + $0x300] sm:$0xff] %v561_v32  ;;  %v569_v36 = vld [vmem:[%s7719_s22 + $0x620] sm:$0xff]  ;;  %v571_v37 = vld [vmem:[%s7719_s22 + $0x628] sm:$0xff] }
  0x63   : > { %564 = vst [vmem:[%s7727_s25 + $0x308] sm:$0xff] %v563_v33  ;;  %566 = vst [vmem:[%s7727_s25 + $0x310] sm:$0xff] %v565_v34  ;;  %v573_v38 = vld [vmem:[%s7719_s22 + $0x630] sm:$0xff]  ;;  %v575_v39 = vld [vmem:[%s7719_s22 + $0x638] sm:$0xff] }
  0x64   : > { %568 = vst [vmem:[%s7727_s25 + $0x318] sm:$0xff] %v567_v35  ;;  %570 = vst [vmem:[%s7727_s25 + $0x320] sm:$0xff] %v569_v36  ;;  %v577_v40 = vld [vmem:[%s7719_s22 + $0x640] sm:$0xff]  ;;  %v579_v41 = vld [vmem:[%s7719_s22 + $0x648] sm:$0xff] }
  0x65   : > { %572 = vst [vmem:[%s7727_s25 + $0x328] sm:$0xff] %v571_v37  ;;  %574 = vst [vmem:[%s7727_s25 + $0x330] sm:$0xff] %v573_v38  ;;  %v581_v42 = vld [vmem:[%s7719_s22 + $0x650] sm:$0xff]  ;;  %v583_v43 = vld [vmem:[%s7719_s22 + $0x658] sm:$0xff] }
  0x66   : > { %576 = vst [vmem:[%s7727_s25 + $0x338] sm:$0xff] %v575_v39  ;;  %578 = vst [vmem:[%s7727_s25 + $0x340] sm:$0xff] %v577_v40  ;;  %v585_v44 = vld [vmem:[%s7719_s22 + $0x660] sm:$0xff]  ;;  %v587_v45 = vld [vmem:[%s7719_s22 + $0x668] sm:$0xff] }
  0x67   : > { %580 = vst [vmem:[%s7727_s25 + $0x348] sm:$0xff] %v579_v41  ;;  %582 = vst [vmem:[%s7727_s25 + $0x350] sm:$0xff] %v581_v42  ;;  %v589_v46 = vld [vmem:[%s7719_s22 + $0x670] sm:$0xff]  ;;  %v591_v47 = vld [vmem:[%s7719_s22 + $0x678] sm:$0xff] }
  0x68   : > { %584 = vst [vmem:[%s7727_s25 + $0x358] sm:$0xff] %v583_v43  ;;  %586 = vst [vmem:[%s7727_s25 + $0x360] sm:$0xff] %v585_v44  ;;  %v593_v48 = vld [vmem:[%s7719_s22 + $0x680] sm:$0xff]  ;;  %v595_v49 = vld [vmem:[%s7719_s22 + $0x688] sm:$0xff] }
  0x69   : > { %588 = vst [vmem:[%s7727_s25 + $0x368] sm:$0xff] %v587_v45  ;;  %590 = vst [vmem:[%s7727_s25 + $0x370] sm:$0xff] %v589_v46  ;;  %v597_v50 = vld [vmem:[%s7719_s22 + $0x690] sm:$0xff]  ;;  %v599_v51 = vld [vmem:[%s7719_s22 + $0x698] sm:$0xff] }
  0x6a   : > { %592 = vst [vmem:[%s7727_s25 + $0x378] sm:$0xff] %v591_v47  ;;  %594 = vst [vmem:[%s7727_s25 + $0x380] sm:$0xff] %v593_v48  ;;  %v601_v52 = vld [vmem:[%s7719_s22 + $0x6a0] sm:$0xff]  ;;  %v603_v53 = vld [vmem:[%s7719_s22 + $0x6a8] sm:$0xff] }
  0x6b   : > { %596 = vst [vmem:[%s7727_s25 + $0x388] sm:$0xff] %v595_v49  ;;  %598 = vst [vmem:[%s7727_s25 + $0x390] sm:$0xff] %v597_v50  ;;  %v605_v54 = vld [vmem:[%s7719_s22 + $0x6b0] sm:$0xff]  ;;  %v607_v55 = vld [vmem:[%s7719_s22 + $0x6b8] sm:$0xff] }
  0x6c   : > { %600 = vst [vmem:[%s7727_s25 + $0x398] sm:$0xff] %v599_v51  ;;  %602 = vst [vmem:[%s7727_s25 + $0x3a0] sm:$0xff] %v601_v52  ;;  %v609_v56 = vld [vmem:[%s7719_s22 + $0x6c0] sm:$0xff]  ;;  %v611_v57 = vld [vmem:[%s7719_s22 + $0x6c8] sm:$0xff] }
  0x6d   : > { %604 = vst [vmem:[%s7727_s25 + $0x3a8] sm:$0xff] %v603_v53  ;;  %606 = vst [vmem:[%s7727_s25 + $0x3b0] sm:$0xff] %v605_v54  ;;  %v613_v58 = vld [vmem:[%s7719_s22 + $0x6d0] sm:$0xff]  ;;  %v615_v59 = vld [vmem:[%s7719_s22 + $0x6d8] sm:$0xff] }
  0x6e   : > { %608 = vst [vmem:[%s7727_s25 + $0x3b8] sm:$0xff] %v607_v55  ;;  %610 = vst [vmem:[%s7727_s25 + $0x3c0] sm:$0xff] %v609_v56  ;;  %v617_v60 = vld [vmem:[%s7719_s22 + $0x6e0] sm:$0xff]  ;;  %v619_v61 = vld [vmem:[%s7719_s22 + $0x6e8] sm:$0xff] }
  0x6f   : > { %612 = vst [vmem:[%s7727_s25 + $0x3c8] sm:$0xff] %v611_v57  ;;  %614 = vst [vmem:[%s7727_s25 + $0x3d0] sm:$0xff] %v613_v58  ;;  %v621_v62 = vld [vmem:[%s7719_s22 + $0x6f0] sm:$0xff]  ;;  %v623_v63 = vld [vmem:[%s7719_s22 + $0x6f8] sm:$0xff] }
  0x70   : > { %616 = vst [vmem:[%s7727_s25 + $0x3d8] sm:$0xff] %v615_v59  ;;  %618 = vst [vmem:[%s7727_s25 + $0x3e0] sm:$0xff] %v617_v60  ;;  %v625_v0 = vld [vmem:[%s7719_s22 + $0x800] sm:$0xff]  ;;  %v627_v1 = vld [vmem:[%s7719_s22 + $0x808] sm:$0xff] }
  0x71   : > { %620 = vst [vmem:[%s7727_s25 + $0x3e8] sm:$0xff] %v619_v61  ;;  %622 = vst [vmem:[%s7727_s25 + $0x3f0] sm:$0xff] %v621_v62  ;;  %v629_v2 = vld [vmem:[%s7719_s22 + $0x810] sm:$0xff]  ;;  %v631_v3 = vld [vmem:[%s7719_s22 + $0x818] sm:$0xff] }
  0x72   : > { %624 = vst [vmem:[%s7727_s25 + $0x3f8] sm:$0xff] %v623_v63  ;;  %626 = vst [vmem:[%s7727_s25 + $0x400] sm:$0xff] %v625_v0  ;;  %v633_v4 = vld [vmem:[%s7719_s22 + $0x820] sm:$0xff]  ;;  %v635_v5 = vld [vmem:[%s7719_s22 + $0x828] sm:$0xff] }
  0x73   : > { %628 = vst [vmem:[%s7727_s25 + $0x408] sm:$0xff] %v627_v1  ;;  %630 = vst [vmem:[%s7727_s25 + $0x410] sm:$0xff] %v629_v2  ;;  %v637_v6 = vld [vmem:[%s7719_s22 + $0x830] sm:$0xff]  ;;  %v639_v7 = vld [vmem:[%s7719_s22 + $0x838] sm:$0xff] }
  0x74   : > { %632 = vst [vmem:[%s7727_s25 + $0x418] sm:$0xff] %v631_v3  ;;  %634 = vst [vmem:[%s7727_s25 + $0x420] sm:$0xff] %v633_v4  ;;  %v641_v8 = vld [vmem:[%s7719_s22 + $0x840] sm:$0xff]  ;;  %v643_v9 = vld [vmem:[%s7719_s22 + $0x848] sm:$0xff] }
  0x75   : > { %636 = vst [vmem:[%s7727_s25 + $0x428] sm:$0xff] %v635_v5  ;;  %638 = vst [vmem:[%s7727_s25 + $0x430] sm:$0xff] %v637_v6  ;;  %v645_v10 = vld [vmem:[%s7719_s22 + $0x850] sm:$0xff]  ;;  %v647_v11 = vld [vmem:[%s7719_s22 + $0x858] sm:$0xff] }
  0x76   : > { %640 = vst [vmem:[%s7727_s25 + $0x438] sm:$0xff] %v639_v7  ;;  %642 = vst [vmem:[%s7727_s25 + $0x440] sm:$0xff] %v641_v8  ;;  %v649_v12 = vld [vmem:[%s7719_s22 + $0x860] sm:$0xff]  ;;  %v651_v13 = vld [vmem:[%s7719_s22 + $0x868] sm:$0xff] }
  0x77   : > { %644 = vst [vmem:[%s7727_s25 + $0x448] sm:$0xff] %v643_v9  ;;  %646 = vst [vmem:[%s7727_s25 + $0x450] sm:$0xff] %v645_v10  ;;  %v653_v14 = vld [vmem:[%s7719_s22 + $0x870] sm:$0xff]  ;;  %v655_v15 = vld [vmem:[%s7719_s22 + $0x878] sm:$0xff] }
  0x78   : > { %648 = vst [vmem:[%s7727_s25 + $0x458] sm:$0xff] %v647_v11  ;;  %650 = vst [vmem:[%s7727_s25 + $0x460] sm:$0xff] %v649_v12  ;;  %v657_v16 = vld [vmem:[%s7719_s22 + $0x880] sm:$0xff]  ;;  %v659_v17 = vld [vmem:[%s7719_s22 + $0x888] sm:$0xff] }
  0x79   : > { %652 = vst [vmem:[%s7727_s25 + $0x468] sm:$0xff] %v651_v13  ;;  %654 = vst [vmem:[%s7727_s25 + $0x470] sm:$0xff] %v653_v14  ;;  %v661_v18 = vld [vmem:[%s7719_s22 + $0x890] sm:$0xff]  ;;  %v663_v19 = vld [vmem:[%s7719_s22 + $0x898] sm:$0xff] }
  0x7a   : > { %656 = vst [vmem:[%s7727_s25 + $0x478] sm:$0xff] %v655_v15  ;;  %658 = vst [vmem:[%s7727_s25 + $0x480] sm:$0xff] %v657_v16  ;;  %v665_v20 = vld [vmem:[%s7719_s22 + $0x8a0] sm:$0xff]  ;;  %v667_v21 = vld [vmem:[%s7719_s22 + $0x8a8] sm:$0xff] }
  0x7b   : > { %660 = vst [vmem:[%s7727_s25 + $0x488] sm:$0xff] %v659_v17  ;;  %662 = vst [vmem:[%s7727_s25 + $0x490] sm:$0xff] %v661_v18  ;;  %v669_v22 = vld [vmem:[%s7719_s22 + $0x8b0] sm:$0xff]  ;;  %v671_v23 = vld [vmem:[%s7719_s22 + $0x8b8] sm:$0xff] }
  0x7c   : > { %664 = vst [vmem:[%s7727_s25 + $0x498] sm:$0xff] %v663_v19  ;;  %666 = vst [vmem:[%s7727_s25 + $0x4a0] sm:$0xff] %v665_v20  ;;  %v673_v24 = vld [vmem:[%s7719_s22 + $0x8c0] sm:$0xff]  ;;  %v675_v25 = vld [vmem:[%s7719_s22 + $0x8c8] sm:$0xff] }
  0x7d   : > { %668 = vst [vmem:[%s7727_s25 + $0x4a8] sm:$0xff] %v667_v21  ;;  %670 = vst [vmem:[%s7727_s25 + $0x4b0] sm:$0xff] %v669_v22  ;;  %v677_v26 = vld [vmem:[%s7719_s22 + $0x8d0] sm:$0xff]  ;;  %v679_v27 = vld [vmem:[%s7719_s22 + $0x8d8] sm:$0xff] }
  0x7e   : > { %672 = vst [vmem:[%s7727_s25 + $0x4b8] sm:$0xff] %v671_v23  ;;  %674 = vst [vmem:[%s7727_s25 + $0x4c0] sm:$0xff] %v673_v24  ;;  %v681_v28 = vld [vmem:[%s7719_s22 + $0x8e0] sm:$0xff]  ;;  %v683_v29 = vld [vmem:[%s7719_s22 + $0x8e8] sm:$0xff] }
  0x7f   : > { %676 = vst [vmem:[%s7727_s25 + $0x4c8] sm:$0xff] %v675_v25  ;;  %678 = vst [vmem:[%s7727_s25 + $0x4d0] sm:$0xff] %v677_v26  ;;  %v685_v30 = vld [vmem:[%s7719_s22 + $0x8f0] sm:$0xff]  ;;  %v687_v31 = vld [vmem:[%s7719_s22 + $0x8f8] sm:$0xff] }
  0x80   : > { %680 = vst [vmem:[%s7727_s25 + $0x4d8] sm:$0xff] %v679_v27  ;;  %682 = vst [vmem:[%s7727_s25 + $0x4e0] sm:$0xff] %v681_v28  ;;  %v689_v32 = vld [vmem:[%s7719_s22 + $0xa00] sm:$0xff]  ;;  %v691_v33 = vld [vmem:[%s7719_s22 + $0xa08] sm:$0xff] }
  0x81   : > { %684 = vst [vmem:[%s7727_s25 + $0x4e8] sm:$0xff] %v683_v29  ;;  %686 = vst [vmem:[%s7727_s25 + $0x4f0] sm:$0xff] %v685_v30  ;;  %v693_v34 = vld [vmem:[%s7719_s22 + $0xa10] sm:$0xff]  ;;  %v695_v35 = vld [vmem:[%s7719_s22 + $0xa18] sm:$0xff] }
  0x82   : > { %688 = vst [vmem:[%s7727_s25 + $0x4f8] sm:$0xff] %v687_v31  ;;  %690 = vst [vmem:[%s7727_s25 + $0x500] sm:$0xff] %v689_v32  ;;  %v697_v36 = vld [vmem:[%s7719_s22 + $0xa20] sm:$0xff]  ;;  %v699_v37 = vld [vmem:[%s7719_s22 + $0xa28] sm:$0xff] }
  0x83   : > { %692 = vst [vmem:[%s7727_s25 + $0x508] sm:$0xff] %v691_v33  ;;  %694 = vst [vmem:[%s7727_s25 + $0x510] sm:$0xff] %v693_v34  ;;  %v701_v38 = vld [vmem:[%s7719_s22 + $0xa30] sm:$0xff]  ;;  %v703_v39 = vld [vmem:[%s7719_s22 + $0xa38] sm:$0xff] }
  0x84   : > { %696 = vst [vmem:[%s7727_s25 + $0x518] sm:$0xff] %v695_v35  ;;  %698 = vst [vmem:[%s7727_s25 + $0x520] sm:$0xff] %v697_v36  ;;  %v705_v40 = vld [vmem:[%s7719_s22 + $0xa40] sm:$0xff]  ;;  %v707_v41 = vld [vmem:[%s7719_s22 + $0xa48] sm:$0xff] }
  0x85   : > { %700 = vst [vmem:[%s7727_s25 + $0x528] sm:$0xff] %v699_v37  ;;  %702 = vst [vmem:[%s7727_s25 + $0x530] sm:$0xff] %v701_v38  ;;  %v709_v42 = vld [vmem:[%s7719_s22 + $0xa50] sm:$0xff]  ;;  %v711_v43 = vld [vmem:[%s7719_s22 + $0xa58] sm:$0xff] }
  0x86   : > { %704 = vst [vmem:[%s7727_s25 + $0x538] sm:$0xff] %v703_v39  ;;  %706 = vst [vmem:[%s7727_s25 + $0x540] sm:$0xff] %v705_v40  ;;  %v713_v44 = vld [vmem:[%s7719_s22 + $0xa60] sm:$0xff]  ;;  %v715_v45 = vld [vmem:[%s7719_s22 + $0xa68] sm:$0xff] }
  0x87   : > { %708 = vst [vmem:[%s7727_s25 + $0x548] sm:$0xff] %v707_v41  ;;  %710 = vst [vmem:[%s7727_s25 + $0x550] sm:$0xff] %v709_v42  ;;  %v717_v46 = vld [vmem:[%s7719_s22 + $0xa70] sm:$0xff]  ;;  %v719_v47 = vld [vmem:[%s7719_s22 + $0xa78] sm:$0xff] }
  0x88   : > { %712 = vst [vmem:[%s7727_s25 + $0x558] sm:$0xff] %v711_v43  ;;  %714 = vst [vmem:[%s7727_s25 + $0x560] sm:$0xff] %v713_v44  ;;  %v721_v48 = vld [vmem:[%s7719_s22 + $0xa80] sm:$0xff]  ;;  %v723_v49 = vld [vmem:[%s7719_s22 + $0xa88] sm:$0xff] }
  0x89   : > { %716 = vst [vmem:[%s7727_s25 + $0x568] sm:$0xff] %v715_v45  ;;  %718 = vst [vmem:[%s7727_s25 + $0x570] sm:$0xff] %v717_v46  ;;  %v725_v50 = vld [vmem:[%s7719_s22 + $0xa90] sm:$0xff]  ;;  %v727_v51 = vld [vmem:[%s7719_s22 + $0xa98] sm:$0xff] }
  0x8a   : > { %720 = vst [vmem:[%s7727_s25 + $0x578] sm:$0xff] %v719_v47  ;;  %722 = vst [vmem:[%s7727_s25 + $0x580] sm:$0xff] %v721_v48  ;;  %v729_v52 = vld [vmem:[%s7719_s22 + $0xaa0] sm:$0xff]  ;;  %v731_v53 = vld [vmem:[%s7719_s22 + $0xaa8] sm:$0xff] }
  0x8b   : > { %724 = vst [vmem:[%s7727_s25 + $0x588] sm:$0xff] %v723_v49  ;;  %726 = vst [vmem:[%s7727_s25 + $0x590] sm:$0xff] %v725_v50  ;;  %v733_v54 = vld [vmem:[%s7719_s22 + $0xab0] sm:$0xff]  ;;  %v735_v55 = vld [vmem:[%s7719_s22 + $0xab8] sm:$0xff] }
  0x8c   : > { %728 = vst [vmem:[%s7727_s25 + $0x598] sm:$0xff] %v727_v51  ;;  %730 = vst [vmem:[%s7727_s25 + $0x5a0] sm:$0xff] %v729_v52  ;;  %v737_v56 = vld [vmem:[%s7719_s22 + $0xac0] sm:$0xff]  ;;  %v739_v57 = vld [vmem:[%s7719_s22 + $0xac8] sm:$0xff] }
  0x8d   : > { %732 = vst [vmem:[%s7727_s25 + $0x5a8] sm:$0xff] %v731_v53  ;;  %734 = vst [vmem:[%s7727_s25 + $0x5b0] sm:$0xff] %v733_v54  ;;  %v741_v58 = vld [vmem:[%s7719_s22 + $0xad0] sm:$0xff]  ;;  %v743_v59 = vld [vmem:[%s7719_s22 + $0xad8] sm:$0xff] }
  0x8e   : > { %736 = vst [vmem:[%s7727_s25 + $0x5b8] sm:$0xff] %v735_v55  ;;  %738 = vst [vmem:[%s7727_s25 + $0x5c0] sm:$0xff] %v737_v56  ;;  %v745_v60 = vld [vmem:[%s7719_s22 + $0xae0] sm:$0xff]  ;;  %v747_v61 = vld [vmem:[%s7719_s22 + $0xae8] sm:$0xff] }
  0x8f   : > { %740 = vst [vmem:[%s7727_s25 + $0x5c8] sm:$0xff] %v739_v57  ;;  %742 = vst [vmem:[%s7727_s25 + $0x5d0] sm:$0xff] %v741_v58  ;;  %v749_v62 = vld [vmem:[%s7719_s22 + $0xaf0] sm:$0xff]  ;;  %v751_v63 = vld [vmem:[%s7719_s22 + $0xaf8] sm:$0xff] }
  0x90   : > { %744 = vst [vmem:[%s7727_s25 + $0x5d8] sm:$0xff] %v743_v59  ;;  %746 = vst [vmem:[%s7727_s25 + $0x5e0] sm:$0xff] %v745_v60  ;;  %v753_v0 = vld [vmem:[%s7719_s22 + $0xc00] sm:$0xff]  ;;  %v755_v1 = vld [vmem:[%s7719_s22 + $0xc08] sm:$0xff] }
  0x91   : > { %748 = vst [vmem:[%s7727_s25 + $0x5e8] sm:$0xff] %v747_v61  ;;  %750 = vst [vmem:[%s7727_s25 + $0x5f0] sm:$0xff] %v749_v62  ;;  %v757_v2 = vld [vmem:[%s7719_s22 + $0xc10] sm:$0xff]  ;;  %v759_v3 = vld [vmem:[%s7719_s22 + $0xc18] sm:$0xff] }
  0x92   : > { %752 = vst [vmem:[%s7727_s25 + $0x5f8] sm:$0xff] %v751_v63  ;;  %754 = vst [vmem:[%s7727_s25 + $0x600] sm:$0xff] %v753_v0  ;;  %v761_v4 = vld [vmem:[%s7719_s22 + $0xc20] sm:$0xff]  ;;  %v763_v5 = vld [vmem:[%s7719_s22 + $0xc28] sm:$0xff] }
  0x93   : > { %756 = vst [vmem:[%s7727_s25 + $0x608] sm:$0xff] %v755_v1  ;;  %758 = vst [vmem:[%s7727_s25 + $0x610] sm:$0xff] %v757_v2  ;;  %v765_v6 = vld [vmem:[%s7719_s22 + $0xc30] sm:$0xff]  ;;  %v767_v7 = vld [vmem:[%s7719_s22 + $0xc38] sm:$0xff] }
  0x94   : > { %760 = vst [vmem:[%s7727_s25 + $0x618] sm:$0xff] %v759_v3  ;;  %762 = vst [vmem:[%s7727_s25 + $0x620] sm:$0xff] %v761_v4  ;;  %v769_v8 = vld [vmem:[%s7719_s22 + $0xc40] sm:$0xff]  ;;  %v771_v9 = vld [vmem:[%s7719_s22 + $0xc48] sm:$0xff] }
  0x95   : > { %764 = vst [vmem:[%s7727_s25 + $0x628] sm:$0xff] %v763_v5  ;;  %766 = vst [vmem:[%s7727_s25 + $0x630] sm:$0xff] %v765_v6  ;;  %v773_v10 = vld [vmem:[%s7719_s22 + $0xc50] sm:$0xff]  ;;  %v775_v11 = vld [vmem:[%s7719_s22 + $0xc58] sm:$0xff] }
  0x96   : > { %768 = vst [vmem:[%s7727_s25 + $0x638] sm:$0xff] %v767_v7  ;;  %770 = vst [vmem:[%s7727_s25 + $0x640] sm:$0xff] %v769_v8  ;;  %v777_v12 = vld [vmem:[%s7719_s22 + $0xc60] sm:$0xff]  ;;  %v779_v13 = vld [vmem:[%s7719_s22 + $0xc68] sm:$0xff] }
  0x97   : > { %772 = vst [vmem:[%s7727_s25 + $0x648] sm:$0xff] %v771_v9  ;;  %774 = vst [vmem:[%s7727_s25 + $0x650] sm:$0xff] %v773_v10  ;;  %v781_v14 = vld [vmem:[%s7719_s22 + $0xc70] sm:$0xff]  ;;  %v783_v15 = vld [vmem:[%s7719_s22 + $0xc78] sm:$0xff] }
  0x98   : > { %776 = vst [vmem:[%s7727_s25 + $0x658] sm:$0xff] %v775_v11  ;;  %778 = vst [vmem:[%s7727_s25 + $0x660] sm:$0xff] %v777_v12  ;;  %v785_v16 = vld [vmem:[%s7719_s22 + $0xc80] sm:$0xff]  ;;  %v787_v17 = vld [vmem:[%s7719_s22 + $0xc88] sm:$0xff] }
  0x99   : > { %780 = vst [vmem:[%s7727_s25 + $0x668] sm:$0xff] %v779_v13  ;;  %782 = vst [vmem:[%s7727_s25 + $0x670] sm:$0xff] %v781_v14  ;;  %v789_v18 = vld [vmem:[%s7719_s22 + $0xc90] sm:$0xff]  ;;  %v791_v19 = vld [vmem:[%s7719_s22 + $0xc98] sm:$0xff] }
  0x9a   : > { %784 = vst [vmem:[%s7727_s25 + $0x678] sm:$0xff] %v783_v15  ;;  %786 = vst [vmem:[%s7727_s25 + $0x680] sm:$0xff] %v785_v16  ;;  %v793_v20 = vld [vmem:[%s7719_s22 + $0xca0] sm:$0xff]  ;;  %v795_v21 = vld [vmem:[%s7719_s22 + $0xca8] sm:$0xff] }
  0x9b   : > { %788 = vst [vmem:[%s7727_s25 + $0x688] sm:$0xff] %v787_v17  ;;  %790 = vst [vmem:[%s7727_s25 + $0x690] sm:$0xff] %v789_v18  ;;  %v797_v22 = vld [vmem:[%s7719_s22 + $0xcb0] sm:$0xff]  ;;  %v799_v23 = vld [vmem:[%s7719_s22 + $0xcb8] sm:$0xff] }
  0x9c   : > { %792 = vst [vmem:[%s7727_s25 + $0x698] sm:$0xff] %v791_v19  ;;  %794 = vst [vmem:[%s7727_s25 + $0x6a0] sm:$0xff] %v793_v20  ;;  %v801_v24 = vld [vmem:[%s7719_s22 + $0xcc0] sm:$0xff]  ;;  %v803_v25 = vld [vmem:[%s7719_s22 + $0xcc8] sm:$0xff] }
  0x9d   : > { %796 = vst [vmem:[%s7727_s25 + $0x6a8] sm:$0xff] %v795_v21  ;;  %798 = vst [vmem:[%s7727_s25 + $0x6b0] sm:$0xff] %v797_v22  ;;  %v805_v26 = vld [vmem:[%s7719_s22 + $0xcd0] sm:$0xff]  ;;  %v807_v27 = vld [vmem:[%s7719_s22 + $0xcd8] sm:$0xff] }
  0x9e   : > { %800 = vst [vmem:[%s7727_s25 + $0x6b8] sm:$0xff] %v799_v23  ;;  %802 = vst [vmem:[%s7727_s25 + $0x6c0] sm:$0xff] %v801_v24  ;;  %v809_v28 = vld [vmem:[%s7719_s22 + $0xce0] sm:$0xff]  ;;  %v811_v29 = vld [vmem:[%s7719_s22 + $0xce8] sm:$0xff] }
  0x9f   : > { %804 = vst [vmem:[%s7727_s25 + $0x6c8] sm:$0xff] %v803_v25  ;;  %806 = vst [vmem:[%s7727_s25 + $0x6d0] sm:$0xff] %v805_v26  ;;  %v813_v30 = vld [vmem:[%s7719_s22 + $0xcf0] sm:$0xff]  ;;  %v815_v31 = vld [vmem:[%s7719_s22 + $0xcf8] sm:$0xff] }
  0xa0   : > { %808 = vst [vmem:[%s7727_s25 + $0x6d8] sm:$0xff] %v807_v27  ;;  %810 = vst [vmem:[%s7727_s25 + $0x6e0] sm:$0xff] %v809_v28  ;;  %v817_v32 = vld [vmem:[%s7719_s22 + $0xe00] sm:$0xff]  ;;  %v819_v33 = vld [vmem:[%s7719_s22 + $0xe08] sm:$0xff] }
  0xa1   : > { %812 = vst [vmem:[%s7727_s25 + $0x6e8] sm:$0xff] %v811_v29  ;;  %814 = vst [vmem:[%s7727_s25 + $0x6f0] sm:$0xff] %v813_v30  ;;  %v821_v34 = vld [vmem:[%s7719_s22 + $0xe10] sm:$0xff]  ;;  %v823_v35 = vld [vmem:[%s7719_s22 + $0xe18] sm:$0xff] }
  0xa2   : > { %816 = vst [vmem:[%s7727_s25 + $0x6f8] sm:$0xff] %v815_v31  ;;  %818 = vst [vmem:[%s7727_s25 + $0x700] sm:$0xff] %v817_v32  ;;  %v825_v36 = vld [vmem:[%s7719_s22 + $0xe20] sm:$0xff]  ;;  %v827_v37 = vld [vmem:[%s7719_s22 + $0xe28] sm:$0xff] }
  0xa3   : > { %820 = vst [vmem:[%s7727_s25 + $0x708] sm:$0xff] %v819_v33  ;;  %822 = vst [vmem:[%s7727_s25 + $0x710] sm:$0xff] %v821_v34  ;;  %v829_v38 = vld [vmem:[%s7719_s22 + $0xe30] sm:$0xff]  ;;  %v831_v39 = vld [vmem:[%s7719_s22 + $0xe38] sm:$0xff] }
  0xa4   : > { %824 = vst [vmem:[%s7727_s25 + $0x718] sm:$0xff] %v823_v35  ;;  %826 = vst [vmem:[%s7727_s25 + $0x720] sm:$0xff] %v825_v36  ;;  %v833_v40 = vld [vmem:[%s7719_s22 + $0xe40] sm:$0xff]  ;;  %v835_v41 = vld [vmem:[%s7719_s22 + $0xe48] sm:$0xff] }
  0xa5   : > { %828 = vst [vmem:[%s7727_s25 + $0x728] sm:$0xff] %v827_v37  ;;  %830 = vst [vmem:[%s7727_s25 + $0x730] sm:$0xff] %v829_v38  ;;  %v837_v42 = vld [vmem:[%s7719_s22 + $0xe50] sm:$0xff]  ;;  %v839_v43 = vld [vmem:[%s7719_s22 + $0xe58] sm:$0xff] }
  0xa6   : > { %832 = vst [vmem:[%s7727_s25 + $0x738] sm:$0xff] %v831_v39  ;;  %834 = vst [vmem:[%s7727_s25 + $0x740] sm:$0xff] %v833_v40  ;;  %v841_v44 = vld [vmem:[%s7719_s22 + $0xe60] sm:$0xff]  ;;  %v843_v45 = vld [vmem:[%s7719_s22 + $0xe68] sm:$0xff] }
  0xa7   : > { %836 = vst [vmem:[%s7727_s25 + $0x748] sm:$0xff] %v835_v41  ;;  %838 = vst [vmem:[%s7727_s25 + $0x750] sm:$0xff] %v837_v42  ;;  %v845_v46 = vld [vmem:[%s7719_s22 + $0xe70] sm:$0xff]  ;;  %v847_v47 = vld [vmem:[%s7719_s22 + $0xe78] sm:$0xff] }
  0xa8   : > { %840 = vst [vmem:[%s7727_s25 + $0x758] sm:$0xff] %v839_v43  ;;  %842 = vst [vmem:[%s7727_s25 + $0x760] sm:$0xff] %v841_v44  ;;  %v849_v48 = vld [vmem:[%s7719_s22 + $0xe80] sm:$0xff]  ;;  %v851_v49 = vld [vmem:[%s7719_s22 + $0xe88] sm:$0xff] }
  0xa9   : > { %844 = vst [vmem:[%s7727_s25 + $0x768] sm:$0xff] %v843_v45  ;;  %846 = vst [vmem:[%s7727_s25 + $0x770] sm:$0xff] %v845_v46  ;;  %v853_v50 = vld [vmem:[%s7719_s22 + $0xe90] sm:$0xff]  ;;  %v855_v51 = vld [vmem:[%s7719_s22 + $0xe98] sm:$0xff] }
  0xaa   : > { %848 = vst [vmem:[%s7727_s25 + $0x778] sm:$0xff] %v847_v47  ;;  %850 = vst [vmem:[%s7727_s25 + $0x780] sm:$0xff] %v849_v48  ;;  %v857_v52 = vld [vmem:[%s7719_s22 + $0xea0] sm:$0xff]  ;;  %v859_v53 = vld [vmem:[%s7719_s22 + $0xea8] sm:$0xff] }
  0xab   : > { %852 = vst [vmem:[%s7727_s25 + $0x788] sm:$0xff] %v851_v49  ;;  %854 = vst [vmem:[%s7727_s25 + $0x790] sm:$0xff] %v853_v50  ;;  %v861_v54 = vld [vmem:[%s7719_s22 + $0xeb0] sm:$0xff]  ;;  %v863_v55 = vld [vmem:[%s7719_s22 + $0xeb8] sm:$0xff] }
  0xac   : > { %856 = vst [vmem:[%s7727_s25 + $0x798] sm:$0xff] %v855_v51  ;;  %858 = vst [vmem:[%s7727_s25 + $0x7a0] sm:$0xff] %v857_v52  ;;  %v865_v56 = vld [vmem:[%s7719_s22 + $0xec0] sm:$0xff]  ;;  %v867_v57 = vld [vmem:[%s7719_s22 + $0xec8] sm:$0xff] }
  0xad   : > { %860 = vst [vmem:[%s7727_s25 + $0x7a8] sm:$0xff] %v859_v53  ;;  %862 = vst [vmem:[%s7727_s25 + $0x7b0] sm:$0xff] %v861_v54  ;;  %v869_v58 = vld [vmem:[%s7719_s22 + $0xed0] sm:$0xff]  ;;  %v871_v59 = vld [vmem:[%s7719_s22 + $0xed8] sm:$0xff] }
  0xae   : > { %864 = vst [vmem:[%s7727_s25 + $0x7b8] sm:$0xff] %v863_v55  ;;  %866 = vst [vmem:[%s7727_s25 + $0x7c0] sm:$0xff] %v865_v56  ;;  %v873_v60 = vld [vmem:[%s7719_s22 + $0xee0] sm:$0xff]  ;;  %v875_v61 = vld [vmem:[%s7719_s22 + $0xee8] sm:$0xff] }
  0xaf   : > { %868 = vst [vmem:[%s7727_s25 + $0x7c8] sm:$0xff] %v867_v57  ;;  %870 = vst [vmem:[%s7727_s25 + $0x7d0] sm:$0xff] %v869_v58  ;;  %v877_v62 = vld [vmem:[%s7719_s22 + $0xef0] sm:$0xff]  ;;  %v879_v63 = vld [vmem:[%s7719_s22 + $0xef8] sm:$0xff] }
  0xb0   : > { %872 = vst [vmem:[%s7727_s25 + $0x7d8] sm:$0xff] %v871_v59  ;;  %874 = vst [vmem:[%s7727_s25 + $0x7e0] sm:$0xff] %v873_v60  ;;  %v881_v0 = vld [vmem:[%s7719_s22 + $0x1000] sm:$0xff]  ;;  %v883_v1 = vld [vmem:[%s7719_s22 + $0x1008] sm:$0xff] }
  0xb1   : > { %876 = vst [vmem:[%s7727_s25 + $0x7e8] sm:$0xff] %v875_v61  ;;  %878 = vst [vmem:[%s7727_s25 + $0x7f0] sm:$0xff] %v877_v62  ;;  %v885_v2 = vld [vmem:[%s7719_s22 + $0x1010] sm:$0xff]  ;;  %v887_v3 = vld [vmem:[%s7719_s22 + $0x1018] sm:$0xff] }
  0xb2   : > { %880 = vst [vmem:[%s7727_s25 + $0x7f8] sm:$0xff] %v879_v63  ;;  %882 = vst [vmem:[%s7727_s25 + $0x800] sm:$0xff] %v881_v0  ;;  %v889_v4 = vld [vmem:[%s7719_s22 + $0x1020] sm:$0xff]  ;;  %v891_v5 = vld [vmem:[%s7719_s22 + $0x1028] sm:$0xff] }
  0xb3   : > { %884 = vst [vmem:[%s7727_s25 + $0x808] sm:$0xff] %v883_v1  ;;  %886 = vst [vmem:[%s7727_s25 + $0x810] sm:$0xff] %v885_v2  ;;  %v893_v6 = vld [vmem:[%s7719_s22 + $0x1030] sm:$0xff]  ;;  %v895_v7 = vld [vmem:[%s7719_s22 + $0x1038] sm:$0xff] }
  0xb4   : > { %888 = vst [vmem:[%s7727_s25 + $0x818] sm:$0xff] %v887_v3  ;;  %890 = vst [vmem:[%s7727_s25 + $0x820] sm:$0xff] %v889_v4  ;;  %v897_v8 = vld [vmem:[%s7719_s22 + $0x1040] sm:$0xff]  ;;  %v899_v9 = vld [vmem:[%s7719_s22 + $0x1048] sm:$0xff] }
  0xb5   : > { %892 = vst [vmem:[%s7727_s25 + $0x828] sm:$0xff] %v891_v5  ;;  %894 = vst [vmem:[%s7727_s25 + $0x830] sm:$0xff] %v893_v6  ;;  %v901_v10 = vld [vmem:[%s7719_s22 + $0x1050] sm:$0xff]  ;;  %v903_v11 = vld [vmem:[%s7719_s22 + $0x1058] sm:$0xff] }
  0xb6   : > { %896 = vst [vmem:[%s7727_s25 + $0x838] sm:$0xff] %v895_v7  ;;  %898 = vst [vmem:[%s7727_s25 + $0x840] sm:$0xff] %v897_v8  ;;  %v905_v12 = vld [vmem:[%s7719_s22 + $0x1060] sm:$0xff]  ;;  %v907_v13 = vld [vmem:[%s7719_s22 + $0x1068] sm:$0xff] }
  0xb7   : > { %900 = vst [vmem:[%s7727_s25 + $0x848] sm:$0xff] %v899_v9  ;;  %902 = vst [vmem:[%s7727_s25 + $0x850] sm:$0xff] %v901_v10  ;;  %v909_v14 = vld [vmem:[%s7719_s22 + $0x1070] sm:$0xff]  ;;  %v911_v15 = vld [vmem:[%s7719_s22 + $0x1078] sm:$0xff] }
  0xb8   : > { %904 = vst [vmem:[%s7727_s25 + $0x858] sm:$0xff] %v903_v11  ;;  %906 = vst [vmem:[%s7727_s25 + $0x860] sm:$0xff] %v905_v12  ;;  %v913_v16 = vld [vmem:[%s7719_s22 + $0x1080] sm:$0xff]  ;;  %v915_v17 = vld [vmem:[%s7719_s22 + $0x1088] sm:$0xff] }
  0xb9   : > { %908 = vst [vmem:[%s7727_s25 + $0x868] sm:$0xff] %v907_v13  ;;  %910 = vst [vmem:[%s7727_s25 + $0x870] sm:$0xff] %v909_v14  ;;  %v917_v18 = vld [vmem:[%s7719_s22 + $0x1090] sm:$0xff]  ;;  %v919_v19 = vld [vmem:[%s7719_s22 + $0x1098] sm:$0xff] }
  0xba   : > { %912 = vst [vmem:[%s7727_s25 + $0x878] sm:$0xff] %v911_v15  ;;  %914 = vst [vmem:[%s7727_s25 + $0x880] sm:$0xff] %v913_v16  ;;  %v921_v20 = vld [vmem:[%s7719_s22 + $0x10a0] sm:$0xff]  ;;  %v923_v21 = vld [vmem:[%s7719_s22 + $0x10a8] sm:$0xff] }
  0xbb   : > { %916 = vst [vmem:[%s7727_s25 + $0x888] sm:$0xff] %v915_v17  ;;  %918 = vst [vmem:[%s7727_s25 + $0x890] sm:$0xff] %v917_v18  ;;  %v925_v22 = vld [vmem:[%s7719_s22 + $0x10b0] sm:$0xff]  ;;  %v927_v23 = vld [vmem:[%s7719_s22 + $0x10b8] sm:$0xff] }
  0xbc   : > { %920 = vst [vmem:[%s7727_s25 + $0x898] sm:$0xff] %v919_v19  ;;  %922 = vst [vmem:[%s7727_s25 + $0x8a0] sm:$0xff] %v921_v20  ;;  %v929_v24 = vld [vmem:[%s7719_s22 + $0x10c0] sm:$0xff]  ;;  %v931_v25 = vld [vmem:[%s7719_s22 + $0x10c8] sm:$0xff] }
  0xbd   : > { %924 = vst [vmem:[%s7727_s25 + $0x8a8] sm:$0xff] %v923_v21  ;;  %926 = vst [vmem:[%s7727_s25 + $0x8b0] sm:$0xff] %v925_v22  ;;  %v933_v26 = vld [vmem:[%s7719_s22 + $0x10d0] sm:$0xff]  ;;  %v935_v27 = vld [vmem:[%s7719_s22 + $0x10d8] sm:$0xff] }
  0xbe   : > { %928 = vst [vmem:[%s7727_s25 + $0x8b8] sm:$0xff] %v927_v23  ;;  %930 = vst [vmem:[%s7727_s25 + $0x8c0] sm:$0xff] %v929_v24  ;;  %v937_v28 = vld [vmem:[%s7719_s22 + $0x10e0] sm:$0xff]  ;;  %v939_v29 = vld [vmem:[%s7719_s22 + $0x10e8] sm:$0xff] }
  0xbf   : > { %932 = vst [vmem:[%s7727_s25 + $0x8c8] sm:$0xff] %v931_v25  ;;  %934 = vst [vmem:[%s7727_s25 + $0x8d0] sm:$0xff] %v933_v26  ;;  %v941_v30 = vld [vmem:[%s7719_s22 + $0x10f0] sm:$0xff]  ;;  %v943_v31 = vld [vmem:[%s7719_s22 + $0x10f8] sm:$0xff] }
  0xc0   : > { %936 = vst [vmem:[%s7727_s25 + $0x8d8] sm:$0xff] %v935_v27  ;;  %938 = vst [vmem:[%s7727_s25 + $0x8e0] sm:$0xff] %v937_v28 }
  0xc1   : > { %940 = vst [vmem:[%s7727_s25 + $0x8e8] sm:$0xff] %v939_v29  ;;  %942 = vst [vmem:[%s7727_s25 + $0x8f0] sm:$0xff] %v941_v30 }
  0xc2   : > { %944 = vst [vmem:[%s7727_s25 + $0x8f8] sm:$0xff] %v943_v31 }
  0xc3 PF: > { %p12247_p4 = scmp.ne.s32.totalorder %s12244_s27, 0 }
  0xc5   : > { %953 = sbr.rel (%p12247_p4) target bundleno = 2451 (0x993), region = 83 }
  0xca   : > { %s956_s14 = sand.u32 1, %s7572_s17   ;;  %p12248_p6 = scmp.ne.s32.totalorder %s12243_s26, 0 }
  0xcb   : > { %s6855_s15 = smul.u32 2304, %s956_s14 }
  0xcd   : > { %s8302_s23 = scalar_lea.vmem [#allocation2], %s6855_s15 }
  0xce   : > { %7563 = dma.done.wait (%p12248_p6), [#allocation4], 16  }
  0xcf   : > { %7565 = vsyncadd (%p12248_p6), [#allocation4], 4294967280 }
  0xd0   : > { %7567 = dma.done.wait (%p12248_p6), [#allocation6], 16  }
  0xd1   : > { %7569 = vsyncadd (%p12248_p6), [#allocation6], 4294967280 }
  0xd2   : > { %970 = sfence }
  0xd3   : > { %v6904_v32 = vld [vmem:[%s12219_s3 + $0xf8] sm:$0xff]   ;;  %v6908_v36 = vld [vmem:[%s12219_s3 + $0xf0] sm:$0xff]   ;;  %v6912_v40 = vld [vmem:[%s12219_s3 + $0xe8] sm:$0xff]   ;;  %s6332_s15 = sld [smem:[#allocation3 + $0x9]]  ;;  %vm5182_vm0 = vcmask 261120   ;;  %vm5831_vm1 = vcmask 523264  }
  0xd4   : > { %v6905_v33 = vld [vmem:[%s12219_s3 + $0x78] sm:$0xff]   ;;  %6498 = vmatprep.subr.bf16.mxu0 %v6904_v32  ;;  %v6909_v37 = vld [vmem:[%s12219_s3 + $0x70] sm:$0xff]   ;;  %v6913_v41 = vld [vmem:[%s12219_s3 + $0x68] sm:$0xff]   ;;  %s6333_s27 = sld [smem:[#allocation3 + $0xa]]  ;;  %vm5953_vm2 = vcmask 64512  }
  0xd5   : > { %v6906_v34 = vld [vmem:[%s12219_s3 + $0xb8] sm:$0xff]   ;;  %6562 = vmatprep.subr.bf16.mxu1 %v6905_v33  ;;  %v6910_v38 = vld [vmem:[%s12219_s3 + $0xb0] sm:$0xff]   ;;  %v6914_v42 = vld [vmem:[%s12219_s3 + $0xa8] sm:$0xff]   ;;  %s6334_s28 = sld [smem:[#allocation3 + $0xb]] }
  0xd6   : > { %v6907_v35 = vld [vmem:[%s12219_s3 + $0x38] sm:$0xff]   ;;  %6499 = vmatpush3.bf16.msra.mxu0 %v6906_v34  ;;  %v6911_v39 = vld [vmem:[%s12219_s3 + $0x30] sm:$0xff]   ;;  %v6915_v43 = vld [vmem:[%s12219_s3 + $0x28] sm:$0xff]   ;;  %s8408_s17 = sld [smem:[#allocation3 + $0xc]] }
  0xd7   : > { %6563 = vmatpush3.bf16.msra.mxu1 %v6907_v35  ;;  %6500 = vmatprep.subr.bf16.mxu0 %v6908_v36  ;;  %v6916_v44 = vld [vmem:[%s12219_s3 + $0xe0] sm:$0xff]   ;;  %v6920_v48 = vld [vmem:[%s12219_s3 + $0xd8] sm:$0xff]   ;;  %v6924_v52 = vld [vmem:[%s12219_s3 + $0xd0] sm:$0xff]   ;;  %s8419_s29 = sld [smem:[#allocation3 + $0xd]] }
  0xd8   : > { %6564 = vmatprep.subr.bf16.mxu1 %v6909_v37  ;;  %v6917_v45 = vld [vmem:[%s12219_s3 + $0x60] sm:$0xff]   ;;  %v6921_v49 = vld [vmem:[%s12219_s3 + $0x58] sm:$0xff]   ;;  %v6925_v53 = vld [vmem:[%s12219_s3 + $0x50] sm:$0xff]   ;;  %s8430_s30 = sld [smem:[#allocation3 + $0xe]] }
  0xd9   : > { %v6918_v46 = vld [vmem:[%s12219_s3 + $0xa0] sm:$0xff]   ;;  %v6922_v50 = vld [vmem:[%s12219_s3 + $0x98] sm:$0xff]   ;;  %v6926_v54 = vld [vmem:[%s12219_s3 + $0x90] sm:$0xff]   ;;  %v8432_v6 = vstv %s6332_s15  ;;  %s8434_s12 = sld [smem:[#allocation3 + $0xf]] }
  0xda   : > { %6501 = vmatpush3.bf16.msra.mxu0 %v6910_v38  ;;  %v6919_v47 = vld [vmem:[%s12219_s3 + $0x20] sm:$0xff]   ;;  %v6923_v51 = vld [vmem:[%s12219_s3 + $0x18] sm:$0xff]   ;;  %v6927_v55 = vld [vmem:[%s12219_s3 + $0x10] sm:$0xff]   ;;  %v8455_v14 = vstv %s6333_s27  ;;  %s8457_s13 = sld [smem:[#allocation3 + $0x10]] }
  0xdb   : > { %6565 = vmatpush3.bf16.msra.mxu1 %v6911_v39  ;;  %6502 = vmatprep.subr.bf16.mxu0 %v6912_v40  ;;  %v6928_v56 = vld [vmem:[%s12219_s3 + $0xc8] sm:$0xff]   ;;  %v6932_v60 = vld [vmem:[%s12219_s3 + $0xc0] sm:$0xff]   ;;  %v8414_v1 = vld [vmem:[%s8302_s23 + $0x18] sm:$0xff]  ;;  %v8468_v19 = vstv %s6334_s28  ;;  %s8470_s16 = sld [smem:[#allocation3 + $0x11]] }
  0xdc   : > { %6566 = vmatprep.subr.bf16.mxu1 %v6913_v41  ;;  %v6929_v57 = vld [vmem:[%s12219_s3 + $0x48] sm:$0xff]   ;;  %v6933_v61 = vld [vmem:[%s12219_s3 + $0x40] sm:$0xff]   ;;  %v8422_v3 = vld [vmem:[%s8302_s23 + $0x118] sm:$0xff]  ;;  %v1989_v13 = vmul.f32 %v8432_v6, %v8414_v1  ;;  %v8491_v27 = vstv %s8408_s17  ;;  %s8493_s26 = sld [smem:[#allocation5 + $0x1]] }
  0xdd   : > { %v6930_v58 = vld [vmem:[%s12219_s3 + $0x88] sm:$0xff]   ;;  %v6934_v62 = vld [vmem:[%s12219_s3 + $0x80] sm:$0xff]   ;;  %v8428_v5 = vld [vmem:[%s8302_s23 + $0x218] sm:$0xff]  ;;  %v2023_v18 = vmul.f32 %v8422_v3, %v8455_v14  ;;  %s8510_s22 = sld [smem:[#allocation3]]  ;;  %v8519_v38 = vstv %s8419_s29 }
  0xde   : > { %6503 = vmatpush3.bf16.msra.mxu0 %v6914_v42  ;;  %v6931_v59 = vld [vmem:[%s12219_s3 + $0x8] sm:$0xff]   ;;  %v6935_v63 = vld [vmem:[%s12219_s3] sm:$0xff]   ;;  %v8440_v8 = vld [vmem:[%s8302_s23 + $0x10] sm:$0xff]  ;;  %v2089_v26 = vmul.f32 %v8428_v5, %v8468_v19  ;;  %v8522_v39 = vstv %s8430_s30  ;;  %s8524_s25 = sld [smem:[#allocation3 + $0x1]] }
  0xdf   : > { %6567 = vmatpush3.bf16.msra.mxu1 %v6915_v43  ;;  %6504 = vmatprep.subr.bf16.mxu0 %v6916_v44  ;;  %v8411_v0 = vld [vmem:[%s8302_s23 + $0x8] sm:$0xff]  ;;  %v8437_v7 = vld [vmem:[%s8302_s23] sm:$0xff]  ;;  %v8449_v11 = vld [vmem:[%s8302_s23 + $0x318] sm:$0xff]  ;;  %v1988_v21 = vmul.f32 %v8432_v6, %v8440_v8  ;;  %v2055_v33 = vadd.f32 %v2023_v18, %v1989_v13  ;;  %s8537_s14 = sld [smem:[#allocation3 + $0x2]] }
  0xe0   : > { %6568 = vmatprep.subr.bf16.mxu1 %v6917_v45  ;;  %v8417_v2 = vld [vmem:[%s8302_s23 + $0x108] sm:$0xff]  ;;  %v8443_v9 = vld [vmem:[%s8302_s23 + $0x100] sm:$0xff]  ;;  %v1987_v12 = vmul.f32 %v8432_v6, %v8411_v0  ;;  %v1986_v15 = vmul.f32 %v8432_v6, %v8437_v7  ;;  %v8473_v20 = vld [vmem:[%s8302_s23 + $0x110] sm:$0xff]  ;;  %v2155_v35 = vmul.f32 %v8449_v11, %v8491_v27  ;;  %s8552_s28 = sld [smem:[#allocation3 + $0x3]] }
  0xe1   : > { %v8425_v4 = vld [vmem:[%s8302_s23 + $0x208] sm:$0xff]  ;;  %v2021_v17 = vmul.f32 %v8417_v2, %v8455_v14  ;;  %v8478_v22 = vld [vmem:[%s8302_s23 + $0x418] sm:$0xff]  ;;  %v2020_v28 = vmul.f32 %v8443_v9, %v8455_v14  ;;  %v2022_v40 = vmul.f32 %v8473_v20, %v8455_v14  ;;  %v2121_v44 = vadd.f32 %v2089_v26, %v2055_v33  ;;  %s8558_s17 = sld [smem:[#allocation3 + $0x4]] }
  0xe2   : > { %6505 = vmatpush3.bf16.msra.mxu0 %v6918_v46  ;;  %v8446_v10 = vld [vmem:[%s8302_s23 + $0x308] sm:$0xff]  ;;  %v8484_v24 = vld [vmem:[%s8302_s23 + $0x518] sm:$0xff]  ;;  %v2087_v25 = vmul.f32 %v8425_v4, %v8468_v19  ;;  %v2221_v46 = vmul.f32 %v8478_v22, %v8519_v38  ;;  %s10429_s15 = sld [smem:[#allocation3 + $0x18]] }
  0xe3   : > { %6569 = vmatpush3.bf16.msra.mxu1 %v6919_v47  ;;  %6506 = vmatprep.subr.bf16.mxu0 %v6920_v48  ;;  %v8462_v16 = vld [vmem:[%s8302_s23 + $0x408] sm:$0xff]  ;;  %v8501_v30 = vld [vmem:[%s8302_s23 + $0x618] sm:$0xff]  ;;  %v2053_v32 = vadd.f32 %v2021_v17, %v1987_v12  ;;  %v2153_v34 = vmul.f32 %v8446_v10, %v8491_v27  ;;  %v8528_v41 = vadd.f32 %v2020_v28, %v1986_v15  ;;  %v8585_v15 = vstv %s8510_s22  ;;  %s8618_s22 = sld [smem:[#allocation5]] }
  0xe4   : > { %6570 = vmatprep.subr.bf16.mxu1 %v6921_v49  ;;  %v8481_v23 = vld [vmem:[%s8302_s23 + $0x508] sm:$0xff]  ;;  %v8513_v36 = vld [vmem:[%s8302_s23 + $0x718] sm:$0xff]  ;;  %v2219_v45 = vmul.f32 %v8462_v16, %v8519_v38  ;;  %v2287_v49 = vmul.f32 %v8484_v24, %v8522_v39  ;;  %v8588_v17 = vstv %s8524_s25  ;;  %v8592_v18 = vadd.f32 %v2022_v40, %v1988_v21  ;;  %s10405_s25 = sld [smem:[#allocation3 + $0x17]] }
  0xe5   : > { %v8498_v29 = vld [vmem:[%s8302_s23 + $0x608] sm:$0xff]  ;;  %v8531_v42 = vld [vmem:[%s8302_s23 + $0x818] sm:$0xff]  ;;  %v2119_v43 = vadd.f32 %v2087_v25, %v2053_v32  ;;  %v2285_v48 = vmul.f32 %v8481_v23, %v8522_v39  ;;  %v1047_v32 = vmul.f32 %v8585_v15, %v8411_v0  ;;  %v1049_v33 = vmul.f32 %v8585_v15, %v8414_v1  ;;  %s10437_s27 = sld [smem:[#allocation3 + $0x19]] }
  0xe6   : > { %6507 = vmatpush3.bf16.msra.mxu0 %v6922_v50  ;;  %v8504_v31 = vld [vmem:[%s8302_s23 + $0x708] sm:$0xff]  ;;  %v6936_v47 = vld [vmem:[%s12219_s3 + $0x178] sm:$0xff]   ;;  %v8547_v50 = vstv %s8434_s12  ;;  %s8576_s12 = sld [smem:[#allocation3 + $0x5]]  ;;  %v1116_v21 = vmul.f32 %v8422_v3, %v8588_v17  ;;  %v8610_v40 = vstv %s8552_s28 }
  0xe7   : > { %6571 = vmatpush3.bf16.msra.mxu1 %v6923_v51  ;;  %6508 = vmatprep.subr.bf16.mxu0 %v6924_v52  ;;  %v8516_v37 = vld [vmem:[%s8302_s23 + $0x808] sm:$0xff]  ;;  %v8550_v51 = vstv %s8457_s13  ;;  %v2185_v52 = vadd.f32 %v2153_v34, %v2119_v43  ;;  %s8582_s13 = sld [smem:[#allocation3 + $0x6]]  ;;  %v1114_v34 = vmul.f32 %v8417_v2, %v8588_v17  ;;  %v1312_v3 = vmul.f32 %v8446_v10, %v8610_v40 }
  0xe8   : > { %6572 = vmatprep.subr.bf16.mxu1 %v6925_v53  ;;  %v2187_v53 = vadd.f32 %v2155_v35, %v2121_v44  ;;  %v8607_v35 = vstv %s8537_s14  ;;  %s10417_s14 = sld [smem:[#allocation3 + $0x1b]] }
  0xe9   : > { %v1213_v0 = vmul.f32 %v8425_v4, %v8607_v35  ;;  %v1215_v1 = vmul.f32 %v8428_v5, %v8607_v35  ;;  %v1146_v2 = vadd.f32 %v1114_v34, %v1047_v32  ;;  %v6104_v32 = vld [vmem:[%s8302_s23 + $0x210] sm:$0xff]  ;;  %s10454_s28 = sld [smem:[#allocation3 + $0x1a]] }
  0xea   : > { %6509 = vmatpush3.bf16.msra.mxu0 %v6926_v54  ;;  %v2351_v54 = vmul.f32 %v8498_v29, %v8547_v50  ;;  %s10471_s29 = sld [smem:[#allocation3 + $0x1c]] }
  0xeb   : > { %6573 = vmatpush3.bf16.msra.mxu1 %v6927_v55  ;;  %6510 = vmatprep.subr.bf16.mxu0 %v6928_v56  ;;  %v2353_v55 = vmul.f32 %v8501_v30, %v8547_v50  ;;  %v8561_v56 = vld [vmem:[%s8302_s23 + $0x200] sm:$0xff]  ;;  %s10484_s30 = sld [smem:[#allocation3 + $0x1d]] }
  0xec   : > { %6574 = vmatprep.subr.bf16.mxu1 %v6929_v57  ;;  %v6938_v57 = vld [vmem:[%s12219_s3 + $0x1f8] sm:$0xff]   ;;  %v8596_v25 = vmul.f32 %v8561_v56, %v8468_v19  ;;  %v8628_v4 = vstv %s8576_s12  ;;  %s10375_s12 = sld [smem:[#allocation3 + $0x12]] }
  0xee   : > { %6511 = vmatpush3.bf16.msra.mxu0 %v6930_v58  ;;  %v2417_v58 = vmul.f32 %v8504_v31, %v8550_v51 }
  0xef   : > { %6575 = vmatpush3.bf16.msra.mxu1 %v6931_v59  ;;  %6512 = vmatprep.subr.bf16.mxu0 %v6932_v60  ;;  %v2419_v59 = vmul.f32 %v8513_v36, %v8550_v51  ;;  %v8571_v60 = vstv %s8470_s16  ;;  %s8590_s16 = sld [smem:[#allocation3 + $0x7]] }
  0xf0   : > { %6576 = vmatprep.subr.bf16.mxu1 %v6933_v61  ;;  %v8574_v61 = vstv %s8493_s26  ;;  %v2483_v12 = vmul.f32 %v8516_v37, %v8571_v60  ;;  %v2485_v13 = vmul.f32 %v8531_v42, %v8571_v60  ;;  %s8612_s26 = sld [smem:[#allocation3 + $0x8]] }
  0xf2   : > { %6513 = vmatpush3.bf16.msra.mxu0 %v6934_v62  ;;  %v2251_v62 = vadd.f32 %v2219_v45, %v2185_v52  ;;  %v1148_v45 = vadd.f32 %v1116_v21, %v1049_v33  ;;  %v1245_v52 = vadd.f32 %v1213_v0, %v1146_v2  ;;  %v8656_v33 = vld [vmem:[%s8302_s23 + $0x300] sm:$0xff]  ;;  %v8662_v21 = vstv %s8618_s22  ;;  %v6170_v2 = vld [vmem:[%s8302_s23 + $0x410] sm:$0xff]  ;;  %s10400_s22 = sld [smem:[#allocation3 + $0x16]] }
  0xf3   : > { %6577 = vmatpush3.bf16.msra.mxu1 %v6935_v63  ;;  %6626 = vmatprep.subr.bf16.mxu0 %v6936_v47  ;;  %v2253_v63 = vadd.f32 %v2221_v46, %v2187_v53  ;;  %v1314_v46 = vmul.f32 %v8449_v11, %v8610_v40  ;;  %v1510_v11 = vmul.f32 %v8481_v23, %v8628_v4 }
  0xf4   : > { %6690 = vmatprep.subr.bf16.mxu1 %v6938_v57  ;;  %v2317_v26 = vadd.f32 %v2285_v48, %v2251_v62  ;;  %v1247_v5 = vadd.f32 %v1215_v1, %v1148_v45  ;;  %v1512_v57 = vmul.f32 %v8484_v24, %v8628_v4  ;;  %v8639_v62 = vstv %s8582_s13  ;;  %v8672_v45 = vld [vmem:[%s8302_s23 + $0x500] sm:$0xff]  ;;  %s10381_s13 = sld [smem:[#allocation3 + $0x13]] }
  0xf5   : > { %v2319_v28 = vadd.f32 %v2287_v49, %v2253_v63  ;;  %v8625_v49 = vstv %s8558_s17  ;;  %v1609_v23 = vmul.f32 %v8498_v29, %v8639_v62  ;;  %v1611_v24 = vmul.f32 %v8501_v30, %v8639_v62  ;;  %s10464_s17 = sld [smem:[#allocation5 + $0x2]] }
  0xf6   : > { %v2383_v43 = vadd.f32 %v2351_v54, %v2317_v26  ;;  %v1411_v53 = vmul.f32 %v8462_v16, %v8625_v49  ;;  %v1413_v54 = vmul.f32 %v8478_v22, %v8625_v49  ;;  %v8642_v16 = vstv %s8590_s16  ;;  %s10385_s16 = sld [smem:[#allocation3 + $0x14]] }
  0xf7   : > { %v2385_v44 = vadd.f32 %v2353_v55, %v2319_v28  ;;  %v1708_v26 = vmul.f32 %v8504_v31, %v8642_v16  ;;  %v1710_v28 = vmul.f32 %v8513_v36, %v8642_v16  ;;  %v8659_v30 = vstv %s8612_s26  ;;  %s10394_s26 = sld [smem:[#allocation3 + $0x15]] }
  0xf8   : > { %v2449_v47 = vadd.f32 %v2417_v58, %v2383_v43  ;;  %v1344_v58 = vadd.f32 %v1312_v3, %v1245_v52  ;;  %v6137_v43 = vld [vmem:[%s8302_s23 + $0x310] sm:$0xff]  ;;  %v1807_v36 = vmul.f32 %v8516_v37, %v8659_v30  ;;  %v1809_v1 = vmul.f32 %v8531_v42, %v8659_v30  ;;  %v8682_v52 = vld [vmem:[%s8302_s23 + $0x700] sm:$0xff] }
  0xf9   : > { %v2451_v48 = vadd.f32 %v2419_v59, %v2385_v44  ;;  %v1346_v59 = vadd.f32 %v1314_v46, %v1247_v5  ;;  %v6168_v44 = vld [vmem:[%s8302_s23 + $0x400] sm:$0xff]  ;;  %v8675_v3 = vld [vmem:[%s8302_s23 + $0x510] sm:$0xff]  ;;  %v2088_v5 = vmul.f32 %v6104_v32, %v8468_v19  ;;  %v2118_v37 = vadd.f32 %v8596_v25, %v8528_v41 }
  0xfa   : > { %v2515_v10 = vadd.f32 %v2483_v12, %v2449_v47  ;;  %v1443_v12 = vadd.f32 %v1411_v53, %v1344_v58  ;;  %v6234_v47 = vld [vmem:[%s8302_s23 + $0x600] sm:$0xff]  ;;  %v2152_v42 = vmul.f32 %v8656_v33, %v8491_v27  ;;  %v2284_v41 = vmul.f32 %v8672_v45, %v8522_v39 }
  0xfb   : > { %v2517_v55 = vadd.f32 %v2485_v13, %v2451_v48  ;;  %v1445_v13 = vadd.f32 %v1413_v54, %v1346_v59  ;;  %v8679_v48 = vld [vmem:[%s8302_s23 + $0x610] sm:$0xff]  ;;  %v2120_v58 = vadd.f32 %v2088_v5, %v8592_v18  ;;  %v2416_v18 = vmul.f32 %v8682_v52, %v8550_v51 }
  0xfc   : > { %v2549_v22 = vadd.f32 %v8574_v61, %v2515_v10  ;;  %v1542_v0 = vadd.f32 %v1510_v11, %v1443_v12  ;;  %v8690_v10 = vld [vmem:[%s8302_s23 + $0x710] sm:$0xff]  ;;  %v2218_v11 = vmul.f32 %v6168_v44, %v8519_v38  ;;  %v2184_v59 = vadd.f32 %v2152_v42, %v2118_v37 }
  0xfd   : > { %v2551_v63 = vadd.f32 %v8574_v61, %v2517_v55  ;;  %v1544_v31 = vadd.f32 %v1512_v57, %v1445_v13  ;;  %v2154_v55 = vmul.f32 %v6137_v43, %v8491_v27  ;;  %v6300_v57 = vld [vmem:[%s8302_s23 + $0x800] sm:$0xff]  ;;  %v2350_v12 = vmul.f32 %v6234_v47, %v8547_v50 }
  0xfe   : > { %v2581_v29 = vmax.f32 %v2549_v22, 0.0  ;;  %v1641_v53 = vadd.f32 %v1609_v23, %v1542_v0  ;;  %v2220_v22 = vmul.f32 %v6170_v2, %v8519_v38  ;;  %v6302_v23 = vld [vmem:[%s8302_s23 + $0x810] sm:$0xff]  ;;  %v1046_v42 = vmul.f32 %v8585_v15, %v8437_v7 }
  0xff   : > { %v2583_v34 = vmax.f32 %v2551_v63, 0.0  ;;  %v1643_v54 = vadd.f32 %v1611_v24, %v1544_v31  ;;  %v2286_v24 = vmul.f32 %v8675_v3, %v8522_v39  ;;  %v2186_v13 = vadd.f32 %v2154_v55, %v2120_v58 }
 0x100   : > { %v1740_v25 = vadd.f32 %v1708_v26, %v1641_v53  ;;  %v2418_v26 = vmul.f32 %v8690_v10, %v8550_v51  ;;  %v2484_v37 = vmul.f32 %v6302_v23, %v8571_v60  ;;  %v1115_v58 = vmul.f32 %v8473_v20, %v8588_v17 }
 0x101   : > { %v2613_v46 = vpack.c.bf16 %v2583_v34, %v2581_v29  ;;  %v1742_v63 = vadd.f32 %v1710_v28, %v1643_v54  ;;  %v2250_v29 = vadd.f32 %v2218_v11, %v2184_v59  ;;  %v2352_v34 = vmul.f32 %v8679_v48, %v8547_v50 }
 0x102   : > { %v1839_v0 = vadd.f32 %v1807_v36, %v1740_v25  ;;  %v2482_v28 = vmul.f32 %v6300_v57, %v8571_v60  ;;  %v1048_v36 = vmul.f32 %v8585_v15, %v8440_v8  ;;  %v1212_v59 = vmul.f32 %v8561_v56, %v8607_v35 }
 0x103   : > { %2788 = vmatprep.mubr.bf16.mxu0 %v2613_v46  ;;  %v1841_v31 = vadd.f32 %v1809_v1, %v1742_v63  ;;  %v2252_v46 = vadd.f32 %v2220_v22, %v2186_v13  ;;  %v2316_v5 = vadd.f32 %v2284_v41, %v2250_v29  ;;  %v1113_v1 = vmul.f32 %v8443_v9, %v8588_v17 }
 0x104   : > { %v1873_v53 = vadd.f32 %v8662_v21, %v1839_v0  ;;  %v1214_v25 = vmul.f32 %v6104_v32, %v8607_v35  ;;  %v1147_v8 = vadd.f32 %v1115_v58, %v1048_v36  ;;  %v1311_v9 = vmul.f32 %v8656_v33, %v8610_v40  ;;  %v8761_v36 = vld [vmem:[%s8302_s23 + $0x328] sm:$0xff] }
 0x105   : > { %v1875_v54 = vadd.f32 %v8662_v21, %v1841_v31  ;;  %v2318_v55 = vadd.f32 %v2286_v24, %v2252_v46  ;;  %v2382_v11 = vadd.f32 %v2350_v12, %v2316_v5  ;;  %v1145_v41 = vadd.f32 %v1113_v1, %v1046_v42  ;;  %v8741_v5 = vld [vmem:[%s8302_s23 + $0x38] sm:$0xff] }
 0x106   : > { %v1905_v22 = vmax.f32 %v1873_v53, 0.0  ;;  %v1313_v29 = vmul.f32 %v6137_v43, %v8610_v40  ;;  %v1410_v20 = vmul.f32 %v6168_v44, %v8625_v49  ;;  %v1246_v31 = vadd.f32 %v1214_v25, %v1147_v8 }
 0x107   : > { %v1907_v7 = vmax.f32 %v1875_v54, 0.0  ;;  %v2384_v63 = vadd.f32 %v2352_v34, %v2318_v55  ;;  %v2448_v13 = vadd.f32 %v2416_v18, %v2382_v11  ;;  %v1244_v12 = vadd.f32 %v1212_v59, %v1145_v41  ;;  %v8735_v18 = vld [vmem:[%s8302_s23 + $0x28] sm:$0xff]  ;;  %v8758_v54 = vld [vmem:[%s8302_s23 + $0x238] sm:$0xff] }
 0x108   : > { %v1412_v32 = vmul.f32 %v6170_v2, %v8625_v49  ;;  %v1509_v33 = vmul.f32 %v8672_v45, %v8628_v4  ;;  %v1511_v43 = vmul.f32 %v8675_v3, %v8628_v4  ;;  %v1608_v44 = vmul.f32 %v6234_v47, %v8639_v62  ;;  %v8744_v45 = vld [vmem:[%s8302_s23 + $0x128] sm:$0xff]  ;;  %v8747_v3 = vld [vmem:[%s8302_s23 + $0x138] sm:$0xff] }
 0x109   : > { %v1937_v24 = vpack.c.bf16 %v1907_v7, %v1905_v22  ;;  %v2450_v56 = vadd.f32 %v2418_v26, %v2384_v63  ;;  %v2514_v0 = vadd.f32 %v2482_v28, %v2448_v13  ;;  %v1343_v34 = vadd.f32 %v1311_v9, %v1244_v12  ;;  %v8769_v59 = vld [vmem:[%s8302_s23 + $0x428] sm:$0xff]  ;;  %v6937_v22 = vld [vmem:[%s12219_s3 + $0x138] sm:$0xff]  }
 0x10a   : > { %v1345_v46 = vadd.f32 %v1313_v29, %v1246_v31  ;;  %v1610_v2 = vmul.f32 %v8679_v48, %v8639_v62  ;;  %v1707_v47 = vmul.f32 %v8682_v52, %v8642_v16  ;;  %v1806_v53 = vmul.f32 %v6300_v57, %v8659_v30  ;;  %v8755_v48 = vld [vmem:[%s8302_s23 + $0x228] sm:$0xff]  ;;  %v8766_v52 = vld [vmem:[%s8302_s23 + $0x338] sm:$0xff] }
 0x10b   : > { %2981 = vmatprep.mubr.bf16.mxu1 %v1937_v24  ;;  %v2516_v26 = vadd.f32 %v2484_v37, %v2450_v56  ;;  %v2548_v28 = vadd.f32 %v8574_v61, %v2514_v0  ;;  %v1442_v42 = vadd.f32 %v1410_v20, %v1343_v34  ;;  %v1709_v37 = vmul.f32 %v8690_v10, %v8642_v16  ;;  %v8772_v10 = vld [vmem:[%s8302_s23 + $0x438] sm:$0xff]  ;;  %v8778_v7 = vld [vmem:[%s8302_s23 + $0x528] sm:$0xff] }
 0x10c   : > { %v1444_v11 = vadd.f32 %v1412_v32, %v1345_v46  ;;  %v1808_v58 = vmul.f32 %v6302_v23, %v8659_v30  ;;  %v8781_v41 = vld [vmem:[%s8302_s23 + $0x538] sm:$0xff]  ;;  %v1991_v25 = vmul.f32 %v8432_v6, %v8735_v18  ;;  %v1993_v23 = vmul.f32 %v8432_v6, %v8741_v5  ;;  %v8790_v9 = vld [vmem:[%s8302_s23 + $0x628] sm:$0xff] }
 0x10d   : > { %v2550_v1 = vadd.f32 %v8574_v61, %v2516_v26  ;;  %v2580_v55 = vmax.f32 %v2548_v28, 0.0  ;;  %v1541_v57 = vadd.f32 %v1509_v33, %v1442_v42  ;;  %v2025_v63 = vmul.f32 %v8744_v45, %v8455_v14  ;;  %v8797_v20 = vld [vmem:[%s8302_s23 + $0x638] sm:$0xff]  ;;  %v8809_v28 = vld [vmem:[%s8302_s23 + $0x728] sm:$0xff] }
 0x10e   : > { %v1543_v8 = vadd.f32 %v1511_v43, %v1444_v11  ;;  %v2027_v24 = vmul.f32 %v8747_v3, %v8455_v14  ;;  %v2091_v12 = vmul.f32 %v8755_v48, %v8468_v19  ;;  %v2093_v0 = vmul.f32 %v8758_v54, %v8468_v19  ;;  %v8812_v46 = vld [vmem:[%s8302_s23 + $0x738] sm:$0xff]  ;;  %v8819_v11 = vld [vmem:[%s8302_s23 + $0x828] sm:$0xff] }
 0x10f   : > { %v2582_v13 = vmax.f32 %v2550_v1, 0.0  ;;  %v1640_v29 = vadd.f32 %v1608_v44, %v1541_v57  ;;  %v2057_v56 = vadd.f32 %v2025_v63, %v1991_v25  ;;  %v2157_v31 = vmul.f32 %v8761_v36, %v8491_v27  ;;  %v6940_v44 = vld [vmem:[%s12219_s3 + $0x170] sm:$0xff]   ;;  %v8822_v57 = vld [vmem:[%s8302_s23 + $0x838] sm:$0xff] }
 0x110   : > { %v1642_v34 = vadd.f32 %v1610_v2, %v1543_v8  ;;  %v2059_v33 = vadd.f32 %v2027_v24, %v1993_v23  ;;  %v2159_v43 = vmul.f32 %v8766_v52, %v8491_v27  ;;  %v2223_v1 = vmul.f32 %v8769_v59, %v8519_v38  ;;  %v6941_v24 = vld [vmem:[%s12219_s3 + $0x130] sm:$0xff]  }
 0x111   : > { %v2612_v32 = vpack.c.bf16 %v2582_v13, %v2580_v55  ;;  %v1739_v26 = vadd.f32 %v1707_v47, %v1640_v29  ;;  %v2123_v42 = vadd.f32 %v2091_v12, %v2057_v56  ;;  %v2225_v2 = vmul.f32 %v8772_v10, %v8519_v38 }
 0x112   : > { %v1741_v55 = vadd.f32 %v1709_v37, %v1642_v34  ;;  %v2125_v25 = vadd.f32 %v2093_v0, %v2059_v33  ;;  %v2289_v47 = vmul.f32 %v8778_v7, %v8522_v39  ;;  %v2291_v23 = vmul.f32 %v8781_v41, %v8522_v39 }
 0x113   : > { %2789 = vmatmul.mubr.bf16.vlgmr.msra.gmra.mxu0 %v2612_v32  ;;  %v1838_v63 = vadd.f32 %v1806_v53, %v1739_v26  ;;  %v2189_v13 = vadd.f32 %v2157_v31, %v2123_v42  ;;  %v2355_v8 = vmul.f32 %v8790_v9, %v8547_v50  ;;  %v2357_v37 = vmul.f32 %v8797_v20, %v8547_v50 }
 0x114   : > { %6627 = vmatpush3.bf16.msra.mxu0 %v6937_v22  ;;  %v1840_v12 = vadd.f32 %v1808_v58, %v1741_v55  ;;  %v2191_v29 = vadd.f32 %v2159_v43, %v2125_v25  ;;  %v2421_v56 = vmul.f32 %v8809_v28, %v8550_v51  ;;  %v2423_v53 = vmul.f32 %v8812_v46, %v8550_v51  ;;  %v6944_v22 = vld [vmem:[%s12219_s3 + $0x168] sm:$0xff]  }
 0x115   : > { %6628 = vmatprep.subr.bf16.mxu0 %v6940_v44  ;;  %v1872_v0 = vadd.f32 %v8662_v21, %v1838_v63  ;;  %v2255_v31 = vadd.f32 %v2223_v1, %v2189_v13  ;;  %v2487_v32 = vmul.f32 %v8819_v11, %v8571_v60  ;;  %v2489_v58 = vmul.f32 %v8822_v57, %v8571_v60  ;;  %v6945_v25 = vld [vmem:[%s12219_s3 + $0x128] sm:$0xff]  }
 0x116   : > { %v1874_v34 = vadd.f32 %v8662_v21, %v1840_v12  ;;  %v2257_v33 = vadd.f32 %v2225_v2, %v2191_v29  ;;  %v1051_v43 = vmul.f32 %v8585_v15, %v8735_v18  ;;  %v1053_v44 = vmul.f32 %v8585_v15, %v8741_v5  ;;  %v6942_v29 = vld [vmem:[%s12219_s3 + $0x1f0] sm:$0xff]  }
 0x117   : > { %v1904_v26 = vmax.f32 %v1872_v0, 0.0  ;;  %v2321_v42 = vadd.f32 %v2289_v47, %v2255_v31  ;;  %v1118_v1 = vmul.f32 %v8744_v45, %v8588_v17  ;;  %v1120_v55 = vmul.f32 %v8747_v3, %v8588_v17  ;;  %v6939_v45 = vld [vmem:[%s12219_s3 + $0x1b8] sm:$0xff]  }
 0x118   : > { %6629 = vmatpush3.bf16.msra.mxu0 %v6941_v24  ;;  %v1906_v2 = vmax.f32 %v1874_v34, 0.0  ;;  %v2323_v63 = vadd.f32 %v2291_v23, %v2257_v33  ;;  %v1217_v18 = vmul.f32 %v8755_v48, %v8607_v35  ;;  %v1219_v5 = vmul.f32 %v8758_v54, %v8607_v35 }
 0x119   : > { %6630 = vmatprep.subr.bf16.mxu0 %v6944_v22  ;;  %v2387_v3 = vadd.f32 %v2355_v8, %v2321_v42  ;;  %v1150_v47 = vadd.f32 %v1118_v1, %v1051_v43  ;;  %v1152_v13 = vadd.f32 %v1120_v55, %v1053_v44  ;;  %v1316_v23 = vmul.f32 %v8761_v36, %v8610_v40  ;;  %v8878_v36 = vld [vmem:[%s8302_s23 + $0x20] sm:$0xff]  ;;  %v6943_v43 = vld [vmem:[%s12219_s3 + $0x1b0] sm:$0xff]   ;;  %v6946_v44 = vld [vmem:[%s12219_s3 + $0x1e8] sm:$0xff]  }
 0x11a   : > { %v1936_v24 = vpack.c.bf16 %v1906_v2, %v1904_v26  ;;  %v2389_v12 = vadd.f32 %v2357_v37, %v2323_v63  ;;  %v1318_v48 = vmul.f32 %v8766_v52, %v8610_v40  ;;  %v1415_v54 = vmul.f32 %v8769_v59, %v8625_v49  ;;  %v8881_v37 = vld [vmem:[%s8302_s23 + $0x30] sm:$0xff]  ;;  %v8884_v52 = vld [vmem:[%s8302_s23 + $0x120] sm:$0xff] }
 0x11b   : > { %v2453_v22 = vadd.f32 %v2421_v56, %v2387_v3  ;;  %v1249_v8 = vadd.f32 %v1217_v18, %v1150_v47  ;;  %v1251_v0 = vadd.f32 %v1219_v5, %v1152_v13  ;;  %v1417_v31 = vmul.f32 %v8772_v10, %v8625_v49  ;;  %v8893_v10 = vld [vmem:[%s8302_s23 + $0x130] sm:$0xff]  ;;  %v6948_v42 = vld [vmem:[%s12219_s3 + $0x160] sm:$0xff]  }
 0x11c   : > { %6631 = vmatpush3.bf16.msra.mxu0 %v6945_v25  ;;  %2982 = vmatmul.mubr.bf16.vlgmr.msra.gmra.mxu1 %v1936_v24  ;;  %v2455_v59 = vadd.f32 %v2423_v53, %v2389_v12  ;;  %v1514_v34 = vmul.f32 %v8778_v7, %v8628_v4  ;;  %v1516_v56 = vmul.f32 %v8781_v41, %v8628_v4  ;;  %v8922_v18 = vld [vmem:[%s8302_s23 + $0x230] sm:$0xff]  ;;  %v8938_v24 = vld [vmem:[%s8302_s23 + $0x420] sm:$0xff] }
 0x11d   : > { %v1613_v33 = vmul.f32 %v8790_v9, %v8639_v62  ;;  %6691 = vmatpush3.bf16.msra.mxu1 %v6939_v45  ;;  %v2519_v53 = vadd.f32 %v2487_v32, %v2453_v22  ;;  %v1348_v7 = vadd.f32 %v1316_v23, %v1249_v8  ;;  %v1350_v26 = vadd.f32 %v1318_v48, %v1251_v0  ;;  %v8904_v9 = vld [vmem:[%s8302_s23 + $0x220] sm:$0xff]  ;;  %v8935_v23 = vld [vmem:[%s8302_s23 + $0x330] sm:$0xff]  ;;  %v6947_v48 = vld [vmem:[%s12219_s3 + $0x1a8] sm:$0xff]  }
 0x11e   : > { %v1615_v41 = vmul.f32 %v8797_v20, %v8639_v62  ;;  %v2521_v1 = vadd.f32 %v2489_v58, %v2455_v59  ;;  %v1712_v55 = vmul.f32 %v8809_v28, %v8642_v16  ;;  %v1714_v32 = vmul.f32 %v8812_v46, %v8642_v16  ;;  %6692 = vmatprep.subr.bf16.mxu1 %v6942_v29  ;;  %v6949_v20 = vld [vmem:[%s12219_s3 + $0x120] sm:$0xff]   ;;  %v8946_v29 = vld [vmem:[%s8302_s23 + $0x430] sm:$0xff] }
 0x11f   : > { %v1811_v25 = vmul.f32 %v8819_v11, %v8659_v30  ;;  %v2553_v2 = vadd.f32 %v8574_v61, %v2519_v53  ;;  %v1447_v63 = vadd.f32 %v1415_v54, %v1348_v7  ;;  %v1449_v58 = vadd.f32 %v1417_v31, %v1350_v26  ;;  %6632 = vmatprep.subr.bf16.mxu0 %v6948_v42  ;;  %v8926_v11 = vld [vmem:[%s8302_s23 + $0x320] sm:$0xff] }
 0x120   : > { %v1813_v28 = vmul.f32 %v8822_v57, %v8659_v30  ;;  %v2555_v46 = vadd.f32 %v8574_v61, %v2521_v1  ;;  %v1990_v5 = vmul.f32 %v8432_v6, %v8878_v36  ;;  %v1992_v45 = vmul.f32 %v8432_v6, %v8881_v37  ;;  %6633 = vmatpush3.bf16.msra.mxu0 %v6949_v20  ;;  %v8949_v22 = vld [vmem:[%s8302_s23 + $0x520] sm:$0xff]  ;;  %v8967_v1 = vld [vmem:[%s8302_s23 + $0x630] sm:$0xff] }
 0x121   : > { %v2024_v3 = vmul.f32 %v8884_v52, %v8455_v14  ;;  %v2585_v57 = vmax.f32 %v2553_v2, 0.0  ;;  %v1546_v47 = vadd.f32 %v1514_v34, %v1447_v63  ;;  %v1548_v13 = vadd.f32 %v1516_v56, %v1449_v58  ;;  %6693 = vmatpush3.bf16.msra.mxu1 %v6943_v43  ;;  %v8956_v56 = vld [vmem:[%s8302_s23 + $0x530] sm:$0xff]  ;;  %v8959_v43 = vld [vmem:[%s8302_s23 + $0x620] sm:$0xff] }
 0x122   : > { %v2026_v12 = vmul.f32 %v8893_v10, %v8455_v14  ;;  %v2587_v54 = vmax.f32 %v2555_v46, 0.0  ;;  %v2090_v0 = vmul.f32 %v8904_v9, %v8468_v19  ;;  %v2092_v31 = vmul.f32 %v8922_v18, %v8468_v19  ;;  %6694 = vmatprep.subr.bf16.mxu1 %v6946_v44  ;;  %v6950_v26 = vld [vmem:[%s12219_s3 + $0x1e0] sm:$0xff]   ;;  %v8977_v58 = vld [vmem:[%s8302_s23 + $0x730] sm:$0xff] }
 0x123   : > { %v2056_v8 = vadd.f32 %v2024_v3, %v1990_v5  ;;  %v1645_v59 = vadd.f32 %v1613_v33, %v1546_v47  ;;  %v1647_v34 = vadd.f32 %v1615_v41, %v1548_v13  ;;  %v2156_v7 = vmul.f32 %v8926_v11, %v8491_v27  ;;  %v8970_v44 = vld [vmem:[%s8302_s23 + $0x720] sm:$0xff] }
 0x124   : > { %v2058_v53 = vadd.f32 %v2026_v12, %v1992_v45  ;;  %v2615_v42 = vpack.c.bf16 %v2587_v54, %v2585_v57  ;;  %v2158_v41 = vmul.f32 %v8935_v23, %v8491_v27  ;;  %v2222_v20 = vmul.f32 %v8938_v24, %v8519_v38  ;;  %v8980_v46 = vld [vmem:[%s8302_s23 + $0x820] sm:$0xff]  ;;  %v8988_v57 = vld [vmem:[%s8302_s23 + $0x830] sm:$0xff] }
 0x125   : > { %v2122_v33 = vadd.f32 %v2090_v0, %v2056_v8  ;;  %v1744_v2 = vadd.f32 %v1712_v55, %v1645_v59  ;;  %v1746_v63 = vadd.f32 %v1714_v32, %v1647_v34  ;;  %v2224_v45 = vmul.f32 %v8946_v29, %v8519_v38  ;;  %6695 = vmatpush3.bf16.msra.mxu1 %v6947_v48  ;;  %v6951_v3 = vld [vmem:[%s12219_s3 + $0x1a0] sm:$0xff]  }
 0x126   : > { %v2124_v5 = vadd.f32 %v2092_v31, %v2058_v53  ;;  %2796 = vmatprep.mubr.bf16.mxu0 %v2615_v42  ;;  %v2288_v55 = vmul.f32 %v8949_v22, %v8522_v39  ;;  %v2290_v32 = vmul.f32 %v8956_v56, %v8522_v39  ;;  %v2354_v13 = vmul.f32 %v8959_v43, %v8547_v50 }
 0x127   : > { %v2188_v47 = vadd.f32 %v2156_v7, %v2122_v33  ;;  %v1843_v12 = vadd.f32 %v1811_v25, %v1744_v2  ;;  %v1845_v54 = vadd.f32 %v1813_v28, %v1746_v63  ;;  %v2356_v8 = vmul.f32 %v8967_v1, %v8547_v50  ;;  %6696 = vmatprep.subr.bf16.mxu1 %v6950_v26 }
 0x128   : > { %v2190_v48 = vadd.f32 %v2158_v41, %v2124_v5  ;;  %v2420_v31 = vmul.f32 %v8970_v44, %v8550_v51  ;;  %v2422_v59 = vmul.f32 %v8977_v58, %v8550_v51  ;;  %v2486_v34 = vmul.f32 %v8980_v46, %v8571_v60 }
 0x129   : > { %v2254_v0 = vadd.f32 %v2222_v20, %v2188_v47  ;;  %v1877_v53 = vadd.f32 %v8662_v21, %v1843_v12  ;;  %v1879_v25 = vadd.f32 %v8662_v21, %v1845_v54  ;;  %v2488_v7 = vmul.f32 %v8988_v57, %v8571_v60  ;;  %6697 = vmatpush3.bf16.msra.mxu1 %v6951_v3 }
 0x12a   : > { %v2256_v28 = vadd.f32 %v2224_v45, %v2190_v48  ;;  %v1050_v42 = vmul.f32 %v8585_v15, %v8878_v36  ;;  %v1052_v33 = vmul.f32 %v8585_v15, %v8881_v37  ;;  %v1117_v41 = vmul.f32 %v8884_v52, %v8588_v17 }
 0x12b   : > { %v2320_v26 = vadd.f32 %v2288_v55, %v2254_v0  ;;  %v1909_v20 = vmax.f32 %v1877_v53, 0.0  ;;  %v1911_v2 = vmax.f32 %v1879_v25, 0.0  ;;  %v1119_v5 = vmul.f32 %v8893_v10, %v8588_v17  ;;  %v9045_v25 = vld [vmem:[%s8302_s23 + $0x148] sm:$0xff] }
 0x12c   : > { %v2322_v63 = vadd.f32 %v2290_v32, %v2256_v28  ;;  %v1149_v47 = vadd.f32 %v1117_v41, %v1050_v42  ;;  %v1216_v3 = vmul.f32 %v8904_v9, %v8607_v35  ;;  %v1218_v36 = vmul.f32 %v8922_v18, %v8607_v35  ;;  %v9062_v41 = vld [vmem:[%s8302_s23 + $0x258] sm:$0xff] }
 0x12d   : > { %v2386_v45 = vadd.f32 %v2354_v13, %v2320_v26  ;;  %v1939_v55 = vpack.c.bf16 %v1911_v2, %v1909_v20  ;;  %v1151_v37 = vadd.f32 %v1119_v5, %v1052_v33  ;;  %v1315_v52 = vmul.f32 %v8926_v11, %v8610_v40  ;;  %v9053_v26 = vld [vmem:[%s8302_s23 + $0x158] sm:$0xff] }
 0x12e   : > { %v2388_v12 = vadd.f32 %v2356_v8, %v2322_v63  ;;  %v1248_v32 = vadd.f32 %v1216_v3, %v1149_v47  ;;  %v1317_v10 = vmul.f32 %v8935_v23, %v8610_v40  ;;  %v1414_v13 = vmul.f32 %v8938_v24, %v8625_v49  ;;  %v9070_v63 = vld [vmem:[%s8302_s23 + $0x358] sm:$0xff]  ;;  %v9077_v3 = vld [vmem:[%s8302_s23 + $0x448] sm:$0xff] }
 0x12f   : > { %v2452_v54 = vadd.f32 %v2420_v31, %v2386_v45  ;;  %2989 = vmatprep.mubr.bf16.mxu1 %v1939_v55  ;;  %v1250_v18 = vadd.f32 %v1218_v36, %v1151_v37  ;;  %v1416_v48 = vmul.f32 %v8946_v29, %v8625_v49  ;;  %v1513_v8 = vmul.f32 %v8949_v22, %v8628_v4  ;;  %v9035_v31 = vld [vmem:[%s8302_s23 + $0x48] sm:$0xff]  ;;  %v9080_v36 = vld [vmem:[%s8302_s23 + $0x458] sm:$0xff] }
 0x130   : > { %v2454_v9 = vadd.f32 %v2422_v59, %v2388_v12  ;;  %v1347_v0 = vadd.f32 %v1315_v52, %v1248_v32  ;;  %v1515_v23 = vmul.f32 %v8956_v56, %v8628_v4  ;;  %v1612_v24 = vmul.f32 %v8959_v43, %v8639_v62  ;;  %v9087_v52 = vld [vmem:[%s8302_s23 + $0x548] sm:$0xff] }
 0x131   : > { %v2518_v11 = vadd.f32 %v2486_v34, %v2452_v54  ;;  %v1349_v53 = vadd.f32 %v1317_v10, %v1250_v18  ;;  %v1614_v29 = vmul.f32 %v8967_v1, %v8639_v62  ;;  %v1711_v22 = vmul.f32 %v8970_v44, %v8642_v16  ;;  %v9042_v34 = vld [vmem:[%s8302_s23 + $0x58] sm:$0xff]  ;;  %v9056_v1 = vld [vmem:[%s8302_s23 + $0x248] sm:$0xff] }
 0x132   : > { %v2520_v59 = vadd.f32 %v2488_v7, %v2454_v9  ;;  %v1446_v43 = vadd.f32 %v1414_v13, %v1347_v0  ;;  %v1713_v28 = vmul.f32 %v8977_v58, %v8642_v16  ;;  %v1810_v7 = vmul.f32 %v8980_v46, %v8659_v30  ;;  %v9065_v58 = vld [vmem:[%s8302_s23 + $0x348] sm:$0xff]  ;;  %v9090_v54 = vld [vmem:[%s8302_s23 + $0x558] sm:$0xff] }
 0x133   : > { %v2552_v56 = vadd.f32 %v8574_v61, %v2518_v11  ;;  %v1448_v42 = vadd.f32 %v1416_v48, %v1349_v53  ;;  %v1812_v33 = vmul.f32 %v8988_v57, %v8659_v30  ;;  %v1995_v46 = vmul.f32 %v8432_v6, %v9035_v31  ;;  %v9093_v32 = vld [vmem:[%s8302_s23 + $0x648] sm:$0xff]  ;;  %v9106_v0 = vld [vmem:[%s8302_s23 + $0x758] sm:$0xff] }
 0x134   : > { %v2554_v44 = vadd.f32 %v8574_v61, %v2520_v59  ;;  %v1545_v2 = vadd.f32 %v1513_v8, %v1446_v43  ;;  %v1997_v5 = vmul.f32 %v8432_v6, %v9042_v34  ;;  %v2029_v57 = vmul.f32 %v9045_v25, %v8455_v14  ;;  %v9100_v8 = vld [vmem:[%s8302_s23 + $0x658] sm:$0xff]  ;;  %v9103_v11 = vld [vmem:[%s8302_s23 + $0x748] sm:$0xff] }
 0x135   : > { %v2584_v20 = vmax.f32 %v2552_v56, 0.0  ;;  %v1547_v47 = vadd.f32 %v1515_v23, %v1448_v42  ;;  %v2031_v55 = vmul.f32 %v9053_v26, %v8455_v14  ;;  %v2095_v12 = vmul.f32 %v9056_v1, %v8468_v19  ;;  %v6954_v42 = vld [vmem:[%s12219_s3 + $0x1d8] sm:$0xff]  }
 0x136   : > { %v2586_v45 = vmax.f32 %v2554_v44, 0.0  ;;  %v1644_v37 = vadd.f32 %v1612_v24, %v1545_v2  ;;  %v2061_v10 = vadd.f32 %v2029_v57, %v1995_v46  ;;  %v2097_v13 = vmul.f32 %v9062_v41, %v8468_v19  ;;  %v6953_v44 = vld [vmem:[%s12219_s3 + $0x118] sm:$0xff]   ;;  %v9124_v46 = vld [vmem:[%s8302_s23 + $0x848] sm:$0xff]  ;;  %6698 = vmatprep.subr.bf16.mxu1 %v6954_v42 }
 0x137   : > { %v2161_v9 = vmul.f32 %v9065_v58, %v8491_v27  ;;  %v1646_v48 = vadd.f32 %v1614_v29, %v1547_v47  ;;  %v2063_v23 = vadd.f32 %v2031_v55, %v1997_v5  ;;  %v2163_v24 = vmul.f32 %v9070_v63, %v8491_v27  ;;  %v6952_v29 = vld [vmem:[%s12219_s3 + $0x158] sm:$0xff]  }
 0x138   : > { %v2614_v18 = vpack.c.bf16 %v2586_v45, %v2584_v20  ;;  %v1743_v59 = vadd.f32 %v1711_v22, %v1644_v37  ;;  %v2127_v53 = vadd.f32 %v2095_v12, %v2061_v10  ;;  %v2227_v56 = vmul.f32 %v9077_v3, %v8519_v38  ;;  %v9127_v20 = vld [vmem:[%s8302_s23 + $0x858] sm:$0xff]  ;;  %6634 = vmatprep.subr.bf16.mxu0 %v6952_v29 }
 0x139   : > { %v2229_v43 = vmul.f32 %v9080_v36, %v8519_v38  ;;  %v1745_v22 = vadd.f32 %v1713_v28, %v1646_v48  ;;  %v2129_v2 = vadd.f32 %v2097_v13, %v2063_v23  ;;  %v2293_v5 = vmul.f32 %v9087_v52, %v8522_v39  ;;  %v6955_v45 = vld [vmem:[%s12219_s3 + $0x198] sm:$0xff]   ;;  %6635 = vmatpush3.bf16.msra.mxu0 %v6953_v44 }
 0x13a   : > { %2797 = vmatmul.mubr.bf16.gmra.mxu0 %v2614_v18  ;;  %v2295_v57 = vmul.f32 %v9090_v54, %v8522_v39  ;;  %v1842_v47 = vadd.f32 %v1810_v7, %v1743_v59  ;;  %v2193_v55 = vadd.f32 %v2161_v9, %v2127_v53  ;;  %v2359_v28 = vmul.f32 %v9093_v32, %v8547_v50 }
 0x13b   : > { %v2361_v12 = vmul.f32 %v9100_v8, %v8547_v50  ;;  %v1844_v37 = vadd.f32 %v1812_v33, %v1745_v22  ;;  %v2195_v10 = vadd.f32 %v2163_v24, %v2129_v2  ;;  %v2425_v13 = vmul.f32 %v9103_v11, %v8550_v51  ;;  %6699 = vmatpush3.bf16.msra.mxu1 %v6955_v45 }
 0x13c   : > { %v2427_v18 = vmul.f32 %v9106_v0, %v8550_v51  ;;  %v1876_v48 = vadd.f32 %v8662_v21, %v1842_v47  ;;  %v2259_v7 = vadd.f32 %v2227_v56, %v2193_v55  ;;  %v2491_v9 = vmul.f32 %v9124_v46, %v8571_v60 }
 0x13d   : > { %v2493_v23 = vmul.f32 %v9127_v20, %v8571_v60  ;;  %v1878_v33 = vadd.f32 %v8662_v21, %v1844_v37  ;;  %v2261_v24 = vadd.f32 %v2229_v43, %v2195_v10  ;;  %v1055_v59 = vmul.f32 %v8585_v15, %v9035_v31 }
 0x13e   : > { %v1057_v53 = vmul.f32 %v8585_v15, %v9042_v34  ;;  %v1908_v29 = vmax.f32 %v1876_v48, 0.0  ;;  %v2325_v44 = vadd.f32 %v2293_v5, %v2259_v7  ;;  %v1122_v56 = vmul.f32 %v9045_v25, %v8588_v17  ;;  %v9177_v48 = vld [vmem:[%s8302_s23 + $0x140] sm:$0xff]  ;;  %v9186_v7 = vld [vmem:[%s8302_s23 + $0x150] sm:$0xff] }
 0x13f   : > { %v1124_v22 = vmul.f32 %v9053_v26, %v8588_v17  ;;  %v1910_v2 = vmax.f32 %v1878_v33, 0.0  ;;  %v2327_v42 = vadd.f32 %v2295_v57, %v2261_v24  ;;  %v1221_v43 = vmul.f32 %v9056_v1, %v8607_v35 }
 0x140   : > { %v1223_v31 = vmul.f32 %v9062_v41, %v8607_v35  ;;  %v2391_v34 = vadd.f32 %v2359_v28, %v2325_v44  ;;  %v1154_v45 = vadd.f32 %v1122_v56, %v1055_v59  ;;  %v1320_v25 = vmul.f32 %v9065_v58, %v8610_v40  ;;  %v9171_v28 = vld [vmem:[%s8302_s23 + $0x40] sm:$0xff]  ;;  %v9174_v58 = vld [vmem:[%s8302_s23 + $0x50] sm:$0xff] }
 0x141   : > { %v1156_v5 = vadd.f32 %v1124_v22, %v1057_v53  ;;  %v1938_v47 = vpack.c.bf16 %v1910_v2, %v1908_v29  ;;  %v2393_v26 = vadd.f32 %v2361_v12, %v2327_v42  ;;  %v1322_v57 = vmul.f32 %v9070_v63, %v8610_v40  ;;  %v9191_v59 = vld [vmem:[%s8302_s23 + $0x240] sm:$0xff]  ;;  %v9209_v22 = vld [vmem:[%s8302_s23 + $0x350] sm:$0xff] }
 0x142   : > { %v1419_v55 = vmul.f32 %v9077_v3, %v8625_v49  ;;  %v2457_v1 = vadd.f32 %v2425_v13, %v2391_v34  ;;  %v1253_v37 = vadd.f32 %v1221_v43, %v1154_v45  ;;  %v1421_v41 = vmul.f32 %v9080_v36, %v8625_v49  ;;  %v9203_v29 = vld [vmem:[%s8302_s23 + $0x340] sm:$0xff]  ;;  %v9216_v2 = vld [vmem:[%s8302_s23 + $0x450] sm:$0xff] }
 0x143   : > { %v1255_v10 = vadd.f32 %v1223_v31, %v1156_v5  ;;  %2990 = vmatmul.mubr.bf16.gmra.mxu1 %v1938_v47  ;;  %v2459_v63 = vadd.f32 %v2427_v18, %v2393_v26  ;;  %v1518_v3 = vmul.f32 %v9087_v52, %v8628_v4  ;;  %v1520_v12 = vmul.f32 %v9090_v54, %v8628_v4  ;;  %v9194_v52 = vld [vmem:[%s8302_s23 + $0x250] sm:$0xff]  ;;  %v9225_v45 = vld [vmem:[%s8302_s23 + $0x540] sm:$0xff] }
 0x144   : > { %v1617_v13 = vmul.f32 %v9093_v32, %v8639_v62  ;;  %v2523_v36 = vadd.f32 %v2491_v9, %v2457_v1  ;;  %v1352_v33 = vadd.f32 %v1320_v25, %v1253_v37  ;;  %v1619_v18 = vmul.f32 %v9100_v8, %v8639_v62  ;;  %v9228_v5 = vld [vmem:[%s8302_s23 + $0x550] sm:$0xff]  ;;  %v9233_v26 = vld [vmem:[%s8302_s23 + $0x640] sm:$0xff] }
 0x145   : > { %v1354_v24 = vadd.f32 %v1322_v57, %v1255_v10  ;;  %v2525_v53 = vadd.f32 %v2493_v23, %v2459_v63  ;;  %v1716_v54 = vmul.f32 %v9103_v11, %v8642_v16  ;;  %v1718_v32 = vmul.f32 %v9106_v0, %v8642_v16  ;;  %v9212_v11 = vld [vmem:[%s8302_s23 + $0x440] sm:$0xff] }
 0x146   : > { %v1815_v9 = vmul.f32 %v9124_v46, %v8659_v30  ;;  %v2557_v8 = vadd.f32 %v8574_v61, %v2523_v36  ;;  %v1451_v44 = vadd.f32 %v1419_v55, %v1352_v33  ;;  %v1817_v23 = vmul.f32 %v9127_v20, %v8659_v30 }
 0x147   : > { %v1453_v56 = vadd.f32 %v1421_v41, %v1354_v24  ;;  %v2559_v0 = vadd.f32 %v8574_v61, %v2525_v53  ;;  %v1994_v46 = vmul.f32 %v8432_v6, %v9171_v28  ;;  %v1996_v42 = vmul.f32 %v8432_v6, %v9174_v58 }
 0x148   : > { %v2028_v43 = vmul.f32 %v9177_v48, %v8455_v14  ;;  %v2589_v31 = vmax.f32 %v2557_v8, 0.0  ;;  %v1550_v20 = vadd.f32 %v1518_v3, %v1451_v44  ;;  %v2030_v25 = vmul.f32 %v9186_v7, %v8455_v14  ;;  %v6275_v44 = vld [vmem:[%s8302_s23 + $0x740] sm:$0xff] }
 0x149   : > { %v1552_v34 = vadd.f32 %v1520_v12, %v1453_v56  ;;  %v2591_v47 = vmax.f32 %v2559_v0, 0.0  ;;  %v2094_v55 = vmul.f32 %v9191_v59, %v8468_v19  ;;  %v2096_v1 = vmul.f32 %v9194_v52, %v8468_v19  ;;  %v6244_v12 = vld [vmem:[%s8302_s23 + $0x650] sm:$0xff] }
 0x14a   : > { %v2060_v57 = vadd.f32 %v2028_v43, %v1994_v46  ;;  %v1649_v37 = vadd.f32 %v1617_v13, %v1550_v20  ;;  %v2062_v41 = vadd.f32 %v2030_v25, %v1996_v42  ;;  %v2160_v63 = vmul.f32 %v9203_v29, %v8491_v27  ;;  %v6277_v56 = vld [vmem:[%s8302_s23 + $0x750] sm:$0xff]  ;;  %v6308_v13 = vld [vmem:[%s8302_s23 + $0x840] sm:$0xff] }
 0x14b   : > { %v1651_v10 = vadd.f32 %v1619_v18, %v1552_v34  ;;  %v2617_v3 = vpack.c.bf16 %v2591_v47, %v2589_v31  ;;  %v2162_v33 = vmul.f32 %v9209_v22, %v8491_v27  ;;  %v2226_v24 = vmul.f32 %v9212_v11, %v8519_v38  ;;  %v6310_v46 = vld [vmem:[%s8302_s23 + $0x850] sm:$0xff] }
 0x14c   : > { %v2126_v36 = vadd.f32 %v2094_v55, %v2060_v57  ;;  %v1748_v53 = vadd.f32 %v1716_v54, %v1649_v37  ;;  %v2128_v18 = vadd.f32 %v2096_v1, %v2062_v41  ;;  %v2228_v0 = vmul.f32 %v9216_v2, %v8519_v38 }
 0x14d   : > { %v1750_v8 = vadd.f32 %v1718_v32, %v1651_v10  ;;  %2804 = vmatprep.mubr.bf16.mxu0 %v2617_v3  ;;  %v2292_v43 = vmul.f32 %v9225_v45, %v8522_v39  ;;  %v2294_v31 = vmul.f32 %v9228_v5, %v8522_v39  ;;  %v2358_v54 = vmul.f32 %v9233_v26, %v8547_v50 }
 0x14e   : > { %v2192_v42 = vadd.f32 %v2160_v63, %v2126_v36  ;;  %v1847_v32 = vadd.f32 %v1815_v9, %v1748_v53  ;;  %v2194_v34 = vadd.f32 %v2162_v33, %v2128_v18  ;;  %v2360_v25 = vmul.f32 %v6244_v12, %v8547_v50 }
 0x14f   : > { %v1849_v20 = vadd.f32 %v1817_v23, %v1750_v8  ;;  %v2424_v57 = vmul.f32 %v6275_v44, %v8550_v51  ;;  %v2426_v55 = vmul.f32 %v6277_v56, %v8550_v51  ;;  %v2490_v1 = vmul.f32 %v6308_v13, %v8571_v60 }
 0x150   : > { %v2258_v47 = vadd.f32 %v2226_v24, %v2192_v42  ;;  %v1881_v37 = vadd.f32 %v8662_v21, %v1847_v32  ;;  %v2260_v41 = vadd.f32 %v2228_v0, %v2194_v34  ;;  %v2492_v63 = vmul.f32 %v6310_v46, %v8571_v60 }
 0x151   : > { %v1883_v10 = vadd.f32 %v8662_v21, %v1849_v20  ;;  %v1054_v9 = vmul.f32 %v8585_v15, %v9171_v28  ;;  %v1056_v23 = vmul.f32 %v8585_v15, %v9174_v58  ;;  %v1121_v36 = vmul.f32 %v9177_v48, %v8588_v17 }
 0x152   : > { %v2324_v3 = vadd.f32 %v2292_v43, %v2258_v47  ;;  %v1913_v33 = vmax.f32 %v1881_v37, 0.0  ;;  %v2326_v53 = vadd.f32 %v2294_v31, %v2260_v41  ;;  %v1123_v8 = vmul.f32 %v9186_v7, %v8588_v17 }
 0x153   : > { %v1915_v24 = vmax.f32 %v1883_v10, 0.0  ;;  %v1153_v0 = vadd.f32 %v1121_v36, %v1054_v9  ;;  %v1220_v42 = vmul.f32 %v9191_v59, %v8607_v35  ;;  %v1222_v28 = vmul.f32 %v9194_v52, %v8607_v35  ;;  %v9297_v10 = vld [vmem:[%s8302_s23 + $0x78] sm:$0xff]  ;;  %v9309_v9 = vld [vmem:[%s8302_s23 + $0x268] sm:$0xff] }
 0x154   : > { %v2390_v18 = vadd.f32 %v2358_v54, %v2324_v3  ;;  %v2392_v32 = vadd.f32 %v2360_v25, %v2326_v53  ;;  %v1155_v58 = vadd.f32 %v1123_v8, %v1056_v23  ;;  %v1319_v48 = vmul.f32 %v9203_v29, %v8610_v40  ;;  %v9314_v36 = vld [vmem:[%s8302_s23 + $0x278] sm:$0xff] }
 0x155   : > { %v1941_v43 = vpack.c.bf16 %v1915_v24, %v1913_v33  ;;  %v1252_v31 = vadd.f32 %v1220_v42, %v1153_v0  ;;  %v1321_v7 = vmul.f32 %v9209_v22, %v8610_v40  ;;  %v1418_v54 = vmul.f32 %v9212_v11, %v8625_v49  ;;  %v9317_v33 = vld [vmem:[%s8302_s23 + $0x368] sm:$0xff]  ;;  %v9322_v53 = vld [vmem:[%s8302_s23 + $0x378] sm:$0xff] }
 0x156   : > { %v2456_v20 = vadd.f32 %v2424_v57, %v2390_v18  ;;  %v2458_v59 = vadd.f32 %v2426_v55, %v2392_v32  ;;  %v1254_v52 = vadd.f32 %v1222_v28, %v1155_v58  ;;  %v1420_v34 = vmul.f32 %v9216_v2, %v8625_v49  ;;  %v9292_v57 = vld [vmem:[%s8302_s23 + $0x68] sm:$0xff]  ;;  %v9332_v28 = vld [vmem:[%s8302_s23 + $0x478] sm:$0xff] }
 0x157   : > { %2997 = vmatprep.mubr.bf16.mxu1 %v1941_v43  ;;  %v1517_v25 = vmul.f32 %v9225_v45, %v8628_v4  ;;  %v1351_v47 = vadd.f32 %v1319_v48, %v1252_v31  ;;  %v1519_v22 = vmul.f32 %v9228_v5, %v8628_v4  ;;  %v1616_v11 = vmul.f32 %v9233_v26, %v8639_v62  ;;  %v9329_v42 = vld [vmem:[%s8302_s23 + $0x468] sm:$0xff] }
 0x158   : > { %v2522_v29 = vadd.f32 %v2490_v1, %v2456_v20  ;;  %v2524_v55 = vadd.f32 %v2492_v63, %v2458_v59  ;;  %v1353_v37 = vadd.f32 %v1321_v7, %v1254_v52  ;;  %v1618_v2 = vmul.f32 %v6244_v12, %v8639_v62  ;;  %v9300_v1 = vld [vmem:[%s8302_s23 + $0x168] sm:$0xff]  ;;  %v9306_v63 = vld [vmem:[%s8302_s23 + $0x178] sm:$0xff] }
 0x159   : > { %v1715_v45 = vmul.f32 %v6275_v44, %v8642_v16  ;;  %v1450_v41 = vadd.f32 %v1418_v54, %v1351_v47  ;;  %v1717_v26 = vmul.f32 %v6277_v56, %v8642_v16  ;;  %v1814_v3 = vmul.f32 %v6308_v13, %v8659_v30  ;;  %v9339_v48 = vld [vmem:[%s8302_s23 + $0x568] sm:$0xff]  ;;  %v9342_v20 = vld [vmem:[%s8302_s23 + $0x578] sm:$0xff] }
 0x15a   : > { %v2556_v5 = vadd.f32 %v8574_v61, %v2522_v29  ;;  %v2558_v12 = vadd.f32 %v8574_v61, %v2524_v55  ;;  %v1452_v44 = vadd.f32 %v1420_v34, %v1353_v37  ;;  %v1816_v23 = vmul.f32 %v6310_v46, %v8659_v30  ;;  %v9345_v31 = vld [vmem:[%s8302_s23 + $0x668] sm:$0xff]  ;;  %v9358_v47 = vld [vmem:[%s8302_s23 + $0x778] sm:$0xff] }
 0x15b   : > { %v1999_v56 = vmul.f32 %v8432_v6, %v9292_v57  ;;  %v1549_v24 = vadd.f32 %v1517_v25, %v1450_v41  ;;  %v2001_v8 = vmul.f32 %v8432_v6, %v9297_v10  ;;  %v2033_v46 = vmul.f32 %v9300_v1, %v8455_v14  ;;  %v9352_v25 = vld [vmem:[%s8302_s23 + $0x678] sm:$0xff]  ;;  %v9355_v29 = vld [vmem:[%s8302_s23 + $0x768] sm:$0xff] }
 0x15c   : > { %v2588_v13 = vmax.f32 %v2556_v5, 0.0  ;;  %v2590_v18 = vmax.f32 %v2558_v12, 0.0  ;;  %v1551_v0 = vadd.f32 %v1519_v22, %v1452_v44  ;;  %v2035_v43 = vmul.f32 %v9306_v63, %v8455_v14  ;;  %v6957_v12 = vld [vmem:[%s12219_s3 + $0x110] sm:$0xff]  }
 0x15d   : > { %v2099_v32 = vmul.f32 %v9309_v9, %v8468_v19  ;;  %v1648_v58 = vadd.f32 %v1616_v11, %v1549_v24  ;;  %v2065_v7 = vadd.f32 %v2033_v46, %v1999_v56  ;;  %v2101_v54 = vmul.f32 %v9314_v36, %v8468_v19  ;;  %v6958_v44 = vld [vmem:[%s12219_s3 + $0x1d0] sm:$0xff]   ;;  %v6313_v56 = vld [vmem:[%s8302_s23 + $0x868] sm:$0xff] }
 0x15e   : > { %v2165_v59 = vmul.f32 %v9317_v33, %v8491_v27  ;;  %v2616_v52 = vpack.c.bf16 %v2590_v18, %v2588_v13  ;;  %v1650_v34 = vadd.f32 %v1618_v2, %v1551_v0  ;;  %v2067_v22 = vadd.f32 %v2035_v43, %v2001_v8  ;;  %v6956_v2 = vld [vmem:[%s12219_s3 + $0x150] sm:$0xff]   ;;  %v9377_v13 = vld [vmem:[%s8302_s23 + $0x878] sm:$0xff]  ;;  %6700 = vmatprep.subr.bf16.mxu1 %v6958_v44 }
 0x15f   : > { %v2167_v11 = vmul.f32 %v9322_v53, %v8491_v27  ;;  %v1747_v55 = vadd.f32 %v1715_v45, %v1648_v58  ;;  %v2131_v37 = vadd.f32 %v2099_v32, %v2065_v7  ;;  %v2231_v5 = vmul.f32 %v9329_v42, %v8519_v38  ;;  %v6959_v18 = vld [vmem:[%s12219_s3 + $0x190] sm:$0xff]   ;;  %6636 = vmatprep.subr.bf16.mxu0 %v6956_v2 }
 0x160   : > { %v2233_v41 = vmul.f32 %v9332_v28, %v8519_v38  ;;  %2805 = vmatmul.mubr.bf16.gmra.mxu0 %v2616_v52  ;;  %v1749_v45 = vadd.f32 %v1717_v26, %v1650_v34  ;;  %v2133_v24 = vadd.f32 %v2101_v54, %v2067_v22  ;;  %v2297_v8 = vmul.f32 %v9339_v48, %v8522_v39 }
 0x161   : > { %v2299_v46 = vmul.f32 %v9342_v20, %v8522_v39  ;;  %v1846_v0 = vadd.f32 %v1814_v3, %v1747_v55  ;;  %v2197_v43 = vadd.f32 %v2165_v59, %v2131_v37  ;;  %v2363_v32 = vmul.f32 %v9345_v31, %v8547_v50  ;;  %6637 = vmatpush3.bf16.msra.mxu0 %v6957_v12 }
 0x162   : > { %v2365_v26 = vmul.f32 %v9352_v25, %v8547_v50  ;;  %v1848_v58 = vadd.f32 %v1816_v23, %v1749_v45  ;;  %v2199_v7 = vadd.f32 %v2167_v11, %v2133_v24  ;;  %v2429_v54 = vmul.f32 %v9355_v29, %v8550_v51  ;;  %6701 = vmatpush3.bf16.msra.mxu1 %v6959_v18 }
 0x163   : > { %v2431_v52 = vmul.f32 %v9358_v47, %v8550_v51  ;;  %v1880_v34 = vadd.f32 %v8662_v21, %v1846_v0  ;;  %v2263_v3 = vadd.f32 %v2231_v5, %v2197_v43  ;;  %v2495_v59 = vmul.f32 %v6313_v56, %v8571_v60 }
 0x164   : > { %v2497_v22 = vmul.f32 %v9377_v13, %v8571_v60  ;;  %v1882_v55 = vadd.f32 %v8662_v21, %v1848_v58  ;;  %v2265_v23 = vadd.f32 %v2233_v41, %v2199_v7  ;;  %v1059_v11 = vmul.f32 %v8585_v15, %v9292_v57 }
 0x165   : > { %v1061_v37 = vmul.f32 %v8585_v15, %v9297_v10  ;;  %v1912_v2 = vmax.f32 %v1880_v34, 0.0  ;;  %v2329_v12 = vadd.f32 %v2297_v8, %v2263_v3  ;;  %v1126_v5 = vmul.f32 %v9300_v1, %v8588_v17  ;;  %v9428_v3 = vld [vmem:[%s8302_s23 + $0x60] sm:$0xff] }
 0x166   : > { %v1128_v45 = vmul.f32 %v9306_v63, %v8588_v17  ;;  %v1914_v24 = vmax.f32 %v1882_v55, 0.0  ;;  %v2331_v44 = vadd.f32 %v2299_v46, %v2265_v23  ;;  %v1225_v41 = vmul.f32 %v9309_v9, %v8607_v35  ;;  %v9442_v23 = vld [vmem:[%s8302_s23 + $0x170] sm:$0xff] }
 0x167   : > { %v1227_v57 = vmul.f32 %v9314_v36, %v8607_v35  ;;  %v2395_v0 = vadd.f32 %v2363_v32, %v2329_v12  ;;  %v1158_v43 = vadd.f32 %v1126_v5, %v1059_v11  ;;  %v1324_v8 = vmul.f32 %v9317_v33, %v8610_v40  ;;  %v9455_v12 = vld [vmem:[%s8302_s23 + $0x360] sm:$0xff] }
 0x168   : > { %v1160_v10 = vadd.f32 %v1128_v45, %v1061_v37  ;;  %v1940_v18 = vpack.c.bf16 %v1914_v24, %v1912_v2  ;;  %v2397_v58 = vadd.f32 %v2365_v26, %v2331_v44  ;;  %v1326_v1 = vmul.f32 %v9322_v53, %v8610_v40  ;;  %v9448_v2 = vld [vmem:[%s8302_s23 + $0x260] sm:$0xff] }
 0x169   : > { %v1423_v63 = vmul.f32 %v9329_v42, %v8625_v49  ;;  %v2461_v9 = vadd.f32 %v2429_v54, %v2395_v0  ;;  %v1257_v46 = vadd.f32 %v1225_v41, %v1158_v43  ;;  %v1425_v32 = vmul.f32 %v9332_v28, %v8625_v49  ;;  %v9464_v41 = vld [vmem:[%s8302_s23 + $0x370] sm:$0xff] }
 0x16a   : > { %v1259_v36 = vadd.f32 %v1227_v57, %v1160_v10  ;;  %2998 = vmatmul.mubr.bf16.gmra.mxu1 %v1940_v18  ;;  %v2463_v33 = vadd.f32 %v2431_v52, %v2397_v58  ;;  %v1522_v26 = vmul.f32 %v9339_v48, %v8628_v4  ;;  %v1524_v53 = vmul.f32 %v9342_v20, %v8628_v4  ;;  %v9431_v52 = vld [vmem:[%s8302_s23 + $0x70] sm:$0xff]  ;;  %v9434_v48 = vld [vmem:[%s8302_s23 + $0x160] sm:$0xff] }
 0x16b   : > { %v1621_v7 = vmul.f32 %v9345_v31, %v8639_v62  ;;  %v2527_v42 = vadd.f32 %v2495_v59, %v2461_v9  ;;  %v1356_v54 = vadd.f32 %v1324_v8, %v1257_v46  ;;  %v1623_v28 = vmul.f32 %v9352_v25, %v8639_v62  ;;  %v9467_v57 = vld [vmem:[%s8302_s23 + $0x460] sm:$0xff]  ;;  %v9472_v10 = vld [vmem:[%s8302_s23 + $0x470] sm:$0xff] }
 0x16c   : > { %v1358_v34 = vadd.f32 %v1326_v1, %v1259_v36  ;;  %v2529_v55 = vadd.f32 %v2497_v22, %v2463_v33  ;;  %v1720_v20 = vmul.f32 %v9355_v29, %v8642_v16  ;;  %v1722_v31 = vmul.f32 %v9358_v47, %v8642_v16  ;;  %v9451_v29 = vld [vmem:[%s8302_s23 + $0x270] sm:$0xff]  ;;  %v6213_v9 = vld [vmem:[%s8302_s23 + $0x560] sm:$0xff] }
 0x16d   : > { %v1819_v59 = vmul.f32 %v6313_v56, %v8659_v30  ;;  %v2561_v25 = vadd.f32 %v8574_v61, %v2527_v42  ;;  %v1455_v11 = vadd.f32 %v1423_v63, %v1356_v54  ;;  %v1821_v22 = vmul.f32 %v9377_v13, %v8659_v30  ;;  %v6215_v46 = vld [vmem:[%s8302_s23 + $0x570] sm:$0xff]  ;;  %v6246_v36 = vld [vmem:[%s8302_s23 + $0x660] sm:$0xff] }
 0x16e   : > { %v1457_v37 = vadd.f32 %v1425_v32, %v1358_v34  ;;  %v2563_v47 = vadd.f32 %v8574_v61, %v2529_v55  ;;  %v1998_v56 = vmul.f32 %v8432_v6, %v9428_v3  ;;  %v2000_v5 = vmul.f32 %v8432_v6, %v9431_v52 }
 0x16f   : > { %v2032_v45 = vmul.f32 %v9434_v48, %v8455_v14  ;;  %v2593_v13 = vmax.f32 %v2561_v25, 0.0  ;;  %v1554_v24 = vadd.f32 %v1522_v26, %v1455_v11  ;;  %v2034_v0 = vmul.f32 %v9442_v23, %v8455_v14  ;;  %v6281_v25 = vld [vmem:[%s8302_s23 + $0x770] sm:$0xff]  ;;  %v6312_v11 = vld [vmem:[%s8302_s23 + $0x860] sm:$0xff] }
 0x170   : > { %v1556_v44 = vadd.f32 %v1524_v53, %v1457_v37  ;;  %v2595_v43 = vmax.f32 %v2563_v47, 0.0  ;;  %v2098_v18 = vmul.f32 %v9448_v2, %v8468_v19  ;;  %v2100_v58 = vmul.f32 %v9451_v29, %v8468_v19  ;;  %v6248_v53 = vld [vmem:[%s8302_s23 + $0x670] sm:$0xff] }
 0x171   : > { %v2064_v8 = vadd.f32 %v2032_v45, %v1998_v56  ;;  %v1653_v1 = vadd.f32 %v1621_v7, %v1554_v24  ;;  %v2066_v32 = vadd.f32 %v2034_v0, %v2000_v5  ;;  %v2164_v33 = vmul.f32 %v9455_v12, %v8491_v27  ;;  %v6314_v56 = vld [vmem:[%s8302_s23 + $0x870] sm:$0xff] }
 0x172   : > { %v1655_v63 = vadd.f32 %v1623_v28, %v1556_v44  ;;  %v2619_v26 = vpack.c.bf16 %v2595_v43, %v2593_v13  ;;  %v2166_v54 = vmul.f32 %v9464_v41, %v8491_v27  ;;  %v2230_v34 = vmul.f32 %v9467_v57, %v8519_v38  ;;  %v6279_v28 = vld [vmem:[%s8302_s23 + $0x760] sm:$0xff] }
 0x173   : > { %v2130_v42 = vadd.f32 %v2098_v18, %v2064_v8  ;;  %v1752_v7 = vadd.f32 %v1720_v20, %v1653_v1  ;;  %v2132_v37 = vadd.f32 %v2100_v58, %v2066_v32  ;;  %v2232_v47 = vmul.f32 %v9472_v10, %v8519_v38 }
 0x174   : > { %v1754_v55 = vadd.f32 %v1722_v31, %v1655_v63  ;;  %2812 = vmatprep.mubr.bf16.mxu0 %v2619_v26  ;;  %v2296_v45 = vmul.f32 %v6213_v9, %v8522_v39  ;;  %v2298_v13 = vmul.f32 %v6215_v46, %v8522_v39  ;;  %v2362_v24 = vmul.f32 %v6246_v36, %v8547_v50 }
 0x175   : > { %v2196_v5 = vadd.f32 %v2164_v33, %v2130_v42  ;;  %v1851_v44 = vadd.f32 %v1819_v59, %v1752_v7  ;;  %v2198_v20 = vadd.f32 %v2166_v54, %v2132_v37  ;;  %v2364_v31 = vmul.f32 %v6248_v53, %v8547_v50 }
 0x176   : > { %v1853_v0 = vadd.f32 %v1821_v22, %v1754_v55  ;;  %v2428_v8 = vmul.f32 %v6279_v28, %v8550_v51  ;;  %v2430_v18 = vmul.f32 %v6281_v25, %v8550_v51  ;;  %v2494_v58 = vmul.f32 %v6312_v11, %v8571_v60 }
 0x177   : > { %v2262_v43 = vadd.f32 %v2230_v34, %v2196_v5  ;;  %v1885_v1 = vadd.f32 %v8662_v21, %v1851_v44  ;;  %v2264_v32 = vadd.f32 %v2232_v47, %v2198_v20  ;;  %v2496_v33 = vmul.f32 %v6314_v56, %v8571_v60 }
 0x178   : > { %v1887_v63 = vadd.f32 %v8662_v21, %v1853_v0  ;;  %v1058_v59 = vmul.f32 %v8585_v15, %v9428_v3  ;;  %v1060_v22 = vmul.f32 %v8585_v15, %v9431_v52  ;;  %v1125_v42 = vmul.f32 %v9434_v48, %v8588_v17 }
 0x179   : > { %v2328_v26 = vadd.f32 %v2296_v45, %v2262_v43  ;;  %v1917_v54 = vmax.f32 %v1885_v1, 0.0  ;;  %v2330_v7 = vadd.f32 %v2298_v13, %v2264_v32  ;;  %v1127_v55 = vmul.f32 %v9442_v23, %v8588_v17  ;;  %v9528_v1 = vld [vmem:[%s8302_s23 + $0x88] sm:$0xff]  ;;  %v9533_v32 = vld [vmem:[%s8302_s23 + $0x98] sm:$0xff] }
 0x17a   : > { %v1919_v34 = vmax.f32 %v1887_v63, 0.0  ;;  %v1157_v47 = vadd.f32 %v1125_v42, %v1058_v59  ;;  %v1224_v5 = vmul.f32 %v9448_v2, %v8607_v35  ;;  %v1226_v3 = vmul.f32 %v9451_v29, %v8607_v35  ;;  %v9545_v59 = vld [vmem:[%s8302_s23 + $0x288] sm:$0xff]  ;;  %v9550_v42 = vld [vmem:[%s8302_s23 + $0x298] sm:$0xff] }
 0x17b   : > { %v2394_v37 = vadd.f32 %v2362_v24, %v2328_v26  ;;  %v2396_v44 = vadd.f32 %v2364_v31, %v2330_v7  ;;  %v1159_v52 = vadd.f32 %v1127_v55, %v1060_v22  ;;  %v1323_v48 = vmul.f32 %v9455_v12, %v8610_v40  ;;  %v9558_v7 = vld [vmem:[%s8302_s23 + $0x398] sm:$0xff] }
 0x17c   : > { %v1943_v45 = vpack.c.bf16 %v1919_v34, %v1917_v54  ;;  %v1256_v13 = vadd.f32 %v1224_v5, %v1157_v47  ;;  %v1325_v23 = vmul.f32 %v9464_v41, %v8610_v40  ;;  %v1422_v24 = vmul.f32 %v9467_v57, %v8625_v49  ;;  %v9553_v54 = vld [vmem:[%s8302_s23 + $0x388] sm:$0xff] }
 0x17d   : > { %v2460_v0 = vadd.f32 %v2428_v8, %v2394_v37  ;;  %v2462_v2 = vadd.f32 %v2430_v18, %v2396_v44  ;;  %v1258_v29 = vadd.f32 %v1226_v3, %v1159_v52  ;;  %v1424_v20 = vmul.f32 %v9472_v10, %v8625_v49  ;;  %v9565_v5 = vld [vmem:[%s8302_s23 + $0x488] sm:$0xff]  ;;  %v9568_v3 = vld [vmem:[%s8302_s23 + $0x498] sm:$0xff] }
 0x17e   : > { %3005 = vmatprep.mubr.bf16.mxu1 %v1943_v45  ;;  %v1521_v31 = vmul.f32 %v6213_v9, %v8628_v4  ;;  %v1355_v43 = vadd.f32 %v1323_v48, %v1256_v13  ;;  %v1523_v8 = vmul.f32 %v6215_v46, %v8628_v4  ;;  %v1620_v41 = vmul.f32 %v6246_v36, %v8639_v62  ;;  %v9536_v9 = vld [vmem:[%s8302_s23 + $0x188] sm:$0xff] }
 0x17f   : > { %v2526_v12 = vadd.f32 %v2494_v58, %v2460_v0  ;;  %v2528_v57 = vadd.f32 %v2496_v33, %v2462_v2  ;;  %v1357_v18 = vadd.f32 %v1325_v23, %v1258_v29  ;;  %v1622_v63 = vmul.f32 %v6248_v53, %v8639_v62  ;;  %v9542_v33 = vld [vmem:[%s8302_s23 + $0x198] sm:$0xff]  ;;  %v9575_v48 = vld [vmem:[%s8302_s23 + $0x588] sm:$0xff] }
 0x180   : > { %v1719_v10 = vmul.f32 %v6279_v28, %v8642_v16  ;;  %v1454_v46 = vadd.f32 %v1422_v24, %v1355_v43  ;;  %v1721_v36 = vmul.f32 %v6281_v25, %v8642_v16  ;;  %v1818_v26 = vmul.f32 %v6312_v11, %v8659_v30  ;;  %v9578_v0 = vld [vmem:[%s8302_s23 + $0x598] sm:$0xff]  ;;  %v9581_v13 = vld [vmem:[%s8302_s23 + $0x688] sm:$0xff] }
 0x181   : > { %v2560_v58 = vadd.f32 %v8574_v61, %v2526_v12  ;;  %v2562_v53 = vadd.f32 %v8574_v61, %v2528_v57  ;;  %v1456_v28 = vadd.f32 %v1424_v20, %v1357_v18  ;;  %v1820_v22 = vmul.f32 %v6314_v56, %v8659_v30  ;;  %v9591_v12 = vld [vmem:[%s8302_s23 + $0x788] sm:$0xff]  ;;  %v9594_v43 = vld [vmem:[%s8302_s23 + $0x798] sm:$0xff] }
 0x182   : > { %v2003_v25 = vmul.f32 %v8432_v6, %v9528_v1  ;;  %v1553_v34 = vadd.f32 %v1521_v31, %v1454_v46  ;;  %v2005_v55 = vmul.f32 %v8432_v6, %v9533_v32  ;;  %v2037_v56 = vmul.f32 %v9536_v9, %v8455_v14  ;;  %v9588_v31 = vld [vmem:[%s8302_s23 + $0x698] sm:$0xff] }
 0x183   : > { %v2592_v11 = vmax.f32 %v2560_v58, 0.0  ;;  %v2594_v37 = vmax.f32 %v2562_v53, 0.0  ;;  %v1555_v47 = vadd.f32 %v1523_v8, %v1456_v28  ;;  %v2039_v45 = vmul.f32 %v9542_v33, %v8455_v14  ;;  %v6961_v53 = vld [vmem:[%s12219_s3 + $0x108] sm:$0xff]  }
 0x184   : > { %v2103_v44 = vmul.f32 %v9545_v59, %v8468_v19  ;;  %v1652_v52 = vadd.f32 %v1620_v41, %v1553_v34  ;;  %v2069_v23 = vadd.f32 %v2037_v56, %v2003_v25  ;;  %v2105_v24 = vmul.f32 %v9550_v42, %v8468_v19  ;;  %v6962_v28 = vld [vmem:[%s12219_s3 + $0x1c8] sm:$0xff]  }
 0x185   : > { %v2169_v2 = vmul.f32 %v9553_v54, %v8491_v27  ;;  %v2618_v29 = vpack.c.bf16 %v2594_v37, %v2592_v11  ;;  %v1654_v20 = vadd.f32 %v1622_v63, %v1555_v47  ;;  %v2071_v8 = vadd.f32 %v2039_v45, %v2005_v55  ;;  %v6960_v63 = vld [vmem:[%s12219_s3 + $0x148] sm:$0xff]   ;;  %v9613_v11 = vld [vmem:[%s8302_s23 + $0x898] sm:$0xff]  ;;  %6702 = vmatprep.subr.bf16.mxu1 %v6962_v28 }
 0x186   : > { %v2171_v41 = vmul.f32 %v9558_v7, %v8491_v27  ;;  %v1751_v57 = vadd.f32 %v1719_v10, %v1652_v52  ;;  %v2135_v18 = vadd.f32 %v2103_v44, %v2069_v23  ;;  %v2235_v58 = vmul.f32 %v9565_v5, %v8519_v38  ;;  %v6317_v25 = vld [vmem:[%s8302_s23 + $0x888] sm:$0xff]  ;;  %6638 = vmatprep.subr.bf16.mxu0 %v6960_v63 }
 0x187   : > { %v2237_v46 = vmul.f32 %v9568_v3, %v8519_v38  ;;  %2813 = vmatmul.mubr.bf16.gmra.mxu0 %v2618_v29  ;;  %v1753_v10 = vadd.f32 %v1721_v36, %v1654_v20  ;;  %v2137_v34 = vadd.f32 %v2105_v24, %v2071_v8  ;;  %v2301_v55 = vmul.f32 %v9575_v48, %v8522_v39  ;;  %v6963_v37 = vld [vmem:[%s12219_s3 + $0x188] sm:$0xff]  }
 0x188   : > { %v2303_v56 = vmul.f32 %v9578_v0, %v8522_v39  ;;  %v1850_v47 = vadd.f32 %v1818_v26, %v1751_v57  ;;  %v2201_v45 = vadd.f32 %v2169_v2, %v2135_v18  ;;  %v2367_v44 = vmul.f32 %v9581_v13, %v8547_v50  ;;  %6639 = vmatpush3.bf16.msra.mxu0 %v6961_v53 }
 0x189   : > { %v2369_v36 = vmul.f32 %v9588_v31, %v8547_v50  ;;  %v1852_v52 = vadd.f32 %v1820_v22, %v1753_v10  ;;  %v2203_v23 = vadd.f32 %v2171_v41, %v2137_v34  ;;  %v2433_v24 = vmul.f32 %v9591_v12, %v8550_v51  ;;  %6703 = vmatpush3.bf16.msra.mxu1 %v6963_v37 }
 0x18a   : > { %v2435_v29 = vmul.f32 %v9594_v43, %v8550_v51  ;;  %v1884_v20 = vadd.f32 %v8662_v21, %v1850_v47  ;;  %v2267_v26 = vadd.f32 %v2235_v58, %v2201_v45  ;;  %v2499_v2 = vmul.f32 %v6317_v25, %v8571_v60 }
 0x18b   : > { %v2501_v8 = vmul.f32 %v9613_v11, %v8571_v60  ;;  %v1886_v57 = vadd.f32 %v8662_v21, %v1852_v52  ;;  %v2269_v22 = vadd.f32 %v2237_v46, %v2203_v23  ;;  %v1063_v41 = vmul.f32 %v8585_v15, %v9528_v1 }
 0x18c   : > { %v1065_v18 = vmul.f32 %v8585_v15, %v9533_v32  ;;  %v1916_v63 = vmax.f32 %v1884_v20, 0.0  ;;  %v2333_v53 = vadd.f32 %v2301_v55, %v2267_v26  ;;  %v1130_v58 = vmul.f32 %v9536_v9, %v8588_v17  ;;  %v9664_v26 = vld [vmem:[%s8302_s23 + $0x80] sm:$0xff] }
 0x18d   : > { %v1132_v10 = vmul.f32 %v9542_v33, %v8588_v17  ;;  %v1918_v34 = vmax.f32 %v1886_v57, 0.0  ;;  %v2335_v28 = vadd.f32 %v2303_v56, %v2269_v22  ;;  %v1229_v46 = vmul.f32 %v9545_v59, %v8607_v35  ;;  %v9678_v22 = vld [vmem:[%s8302_s23 + $0x190] sm:$0xff] }
 0x18e   : > { %v1231_v1 = vmul.f32 %v9550_v42, %v8607_v35  ;;  %v2399_v47 = vadd.f32 %v2367_v44, %v2333_v53  ;;  %v1162_v45 = vadd.f32 %v1130_v58, %v1063_v41  ;;  %v1328_v55 = vmul.f32 %v9553_v54, %v8610_v40  ;;  %v9691_v53 = vld [vmem:[%s8302_s23 + $0x380] sm:$0xff] }
 0x18f   : > { %v1164_v32 = vadd.f32 %v1132_v10, %v1065_v18  ;;  %v1942_v37 = vpack.c.bf16 %v1918_v34, %v1916_v63  ;;  %v2401_v52 = vadd.f32 %v2369_v36, %v2335_v28  ;;  %v1330_v9 = vmul.f32 %v9558_v7, %v8610_v40  ;;  %v9684_v63 = vld [vmem:[%s8302_s23 + $0x280] sm:$0xff] }
 0x190   : > { %v1427_v33 = vmul.f32 %v9565_v5, %v8625_v49  ;;  %v2465_v59 = vadd.f32 %v2433_v24, %v2399_v47  ;;  %v1261_v56 = vadd.f32 %v1229_v46, %v1162_v45  ;;  %v1429_v44 = vmul.f32 %v9568_v3, %v8625_v49  ;;  %v9700_v46 = vld [vmem:[%s8302_s23 + $0x390] sm:$0xff] }
 0x191   : > { %v1263_v42 = vadd.f32 %v1231_v1, %v1164_v32  ;;  %3006 = vmatmul.mubr.bf16.gmra.mxu1 %v1942_v37  ;;  %v2467_v54 = vadd.f32 %v2435_v29, %v2401_v52  ;;  %v1526_v36 = vmul.f32 %v9575_v48, %v8628_v4  ;;  %v1528_v7 = vmul.f32 %v9578_v0, %v8628_v4  ;;  %v9667_v29 = vld [vmem:[%s8302_s23 + $0x90] sm:$0xff]  ;;  %v9670_v48 = vld [vmem:[%s8302_s23 + $0x180] sm:$0xff] }
 0x192   : > { %v1625_v23 = vmul.f32 %v9581_v13, %v8639_v62  ;;  %v2531_v5 = vadd.f32 %v2499_v2, %v2465_v59  ;;  %v1360_v24 = vadd.f32 %v1328_v55, %v1261_v56  ;;  %v1627_v3 = vmul.f32 %v9588_v31, %v8639_v62  ;;  %v9703_v1 = vld [vmem:[%s8302_s23 + $0x480] sm:$0xff]  ;;  %v9708_v32 = vld [vmem:[%s8302_s23 + $0x490] sm:$0xff] }
 0x193   : > { %v1362_v20 = vadd.f32 %v1330_v9, %v1263_v42  ;;  %v2533_v57 = vadd.f32 %v2501_v8, %v2467_v54  ;;  %v1724_v0 = vmul.f32 %v9591_v12, %v8642_v16  ;;  %v1726_v13 = vmul.f32 %v9594_v43, %v8642_v16  ;;  %v9687_v12 = vld [vmem:[%s8302_s23 + $0x290] sm:$0xff]  ;;  %v6217_v59 = vld [vmem:[%s8302_s23 + $0x580] sm:$0xff] }
 0x194   : > { %v1823_v2 = vmul.f32 %v6317_v25, %v8659_v30  ;;  %v2565_v31 = vadd.f32 %v8574_v61, %v2531_v5  ;;  %v1459_v41 = vadd.f32 %v1427_v33, %v1360_v24  ;;  %v1825_v8 = vmul.f32 %v9613_v11, %v8659_v30  ;;  %v6219_v56 = vld [vmem:[%s8302_s23 + $0x590] sm:$0xff]  ;;  %v6250_v42 = vld [vmem:[%s8302_s23 + $0x680] sm:$0xff] }
 0x195   : > { %v1461_v18 = vadd.f32 %v1429_v44, %v1362_v20  ;;  %v2567_v43 = vadd.f32 %v8574_v61, %v2533_v57  ;;  %v2002_v25 = vmul.f32 %v8432_v6, %v9664_v26  ;;  %v2004_v58 = vmul.f32 %v8432_v6, %v9667_v29 }
 0x196   : > { %v2036_v10 = vmul.f32 %v9670_v48, %v8455_v14  ;;  %v2597_v11 = vmax.f32 %v2565_v31, 0.0  ;;  %v1558_v34 = vadd.f32 %v1526_v36, %v1459_v41  ;;  %v2038_v47 = vmul.f32 %v9678_v22, %v8455_v14  ;;  %v6285_v31 = vld [vmem:[%s8302_s23 + $0x790] sm:$0xff]  ;;  %v6316_v41 = vld [vmem:[%s8302_s23 + $0x880] sm:$0xff] }
 0x197   : > { %v1560_v28 = vadd.f32 %v1528_v7, %v1461_v18  ;;  %v2599_v45 = vmax.f32 %v2567_v43, 0.0  ;;  %v2102_v37 = vmul.f32 %v9684_v63, %v8468_v19  ;;  %v2104_v52 = vmul.f32 %v9687_v12, %v8468_v19  ;;  %v6252_v7 = vld [vmem:[%s8302_s23 + $0x690] sm:$0xff] }
 0x198   : > { %v2068_v55 = vadd.f32 %v2036_v10, %v2002_v25  ;;  %v1657_v9 = vadd.f32 %v1625_v23, %v1558_v34  ;;  %v2070_v44 = vadd.f32 %v2038_v47, %v2004_v58  ;;  %v2168_v54 = vmul.f32 %v9691_v53, %v8491_v27  ;;  %v6318_v25 = vld [vmem:[%s8302_s23 + $0x890] sm:$0xff] }
 0x199   : > { %v1659_v33 = vadd.f32 %v1627_v3, %v1560_v28  ;;  %v2621_v36 = vpack.c.bf16 %v2599_v45, %v2597_v11  ;;  %v2170_v24 = vmul.f32 %v9700_v46, %v8491_v27  ;;  %v2234_v20 = vmul.f32 %v9703_v1, %v8519_v38  ;;  %v6283_v3 = vld [vmem:[%s8302_s23 + $0x780] sm:$0xff] }
 0x19a   : > { %v2134_v5 = vadd.f32 %v2102_v37, %v2068_v55  ;;  %v1756_v23 = vadd.f32 %v1724_v0, %v1657_v9  ;;  %v2136_v18 = vadd.f32 %v2104_v52, %v2070_v44  ;;  %v2236_v43 = vmul.f32 %v9708_v32, %v8519_v38 }
 0x19b   : > { %v1758_v57 = vadd.f32 %v1726_v13, %v1659_v33  ;;  %2820 = vmatprep.mubr.bf16.mxu0 %v2621_v36  ;;  %v2300_v10 = vmul.f32 %v6217_v59, %v8522_v39  ;;  %v2302_v11 = vmul.f32 %v6219_v56, %v8522_v39  ;;  %v2366_v34 = vmul.f32 %v6250_v42, %v8547_v50 }
 0x19c   : > { %v2200_v58 = vadd.f32 %v2168_v54, %v2134_v5  ;;  %v1855_v28 = vadd.f32 %v1823_v2, %v1756_v23  ;;  %v2202_v0 = vadd.f32 %v2170_v24, %v2136_v18  ;;  %v2368_v13 = vmul.f32 %v6252_v7, %v8547_v50 }
 0x19d   : > { %v1857_v47 = vadd.f32 %v1825_v8, %v1758_v57  ;;  %v2432_v55 = vmul.f32 %v6283_v3, %v8550_v51  ;;  %v2434_v37 = vmul.f32 %v6285_v31, %v8550_v51  ;;  %v2498_v52 = vmul.f32 %v6316_v41, %v8571_v60 }
 0x19e   : > { %v2266_v45 = vadd.f32 %v2234_v20, %v2200_v58  ;;  %v1889_v9 = vadd.f32 %v8662_v21, %v1855_v28  ;;  %v2268_v44 = vadd.f32 %v2236_v43, %v2202_v0  ;;  %v2500_v54 = vmul.f32 %v6318_v25, %v8571_v60 }
 0x19f   : > { %v1891_v33 = vadd.f32 %v8662_v21, %v1857_v47  ;;  %v1062_v2 = vmul.f32 %v8585_v15, %v9664_v26  ;;  %v1064_v8 = vmul.f32 %v8585_v15, %v9667_v29  ;;  %v1129_v5 = vmul.f32 %v9670_v48, %v8588_v17 }
 0x1a0   : > { %v2332_v36 = vadd.f32 %v2300_v10, %v2266_v45  ;;  %v1921_v24 = vmax.f32 %v1889_v9, 0.0  ;;  %v2334_v23 = vadd.f32 %v2302_v11, %v2268_v44  ;;  %v1131_v57 = vmul.f32 %v9678_v22, %v8588_v17  ;;  %v9764_v9 = vld [vmem:[%s8302_s23 + $0xa8] sm:$0xff]  ;;  %v9769_v44 = vld [vmem:[%s8302_s23 + $0xb8] sm:$0xff] }
 0x1a1   : > { %v1923_v20 = vmax.f32 %v1891_v33, 0.0  ;;  %v1161_v43 = vadd.f32 %v1129_v5, %v1062_v2  ;;  %v1228_v58 = vmul.f32 %v9684_v63, %v8607_v35  ;;  %v1230_v26 = vmul.f32 %v9687_v12, %v8607_v35  ;;  %v9781_v2 = vld [vmem:[%s8302_s23 + $0x2a8] sm:$0xff]  ;;  %v9786_v5 = vld [vmem:[%s8302_s23 + $0x2b8] sm:$0xff] }
 0x1a2   : > { %v2398_v18 = vadd.f32 %v2366_v34, %v2332_v36  ;;  %v2400_v28 = vadd.f32 %v2368_v13, %v2334_v23  ;;  %v1163_v29 = vadd.f32 %v1131_v57, %v1064_v8  ;;  %v1327_v48 = vmul.f32 %v9691_v53, %v8610_v40  ;;  %v9794_v23 = vld [vmem:[%s8302_s23 + $0x3b8] sm:$0xff] }
 0x1a3   : > { %v1945_v10 = vpack.c.bf16 %v1923_v20, %v1921_v24  ;;  %v1260_v11 = vadd.f32 %v1228_v58, %v1161_v43  ;;  %v1329_v22 = vmul.f32 %v9700_v46, %v8610_v40  ;;  %v1426_v34 = vmul.f32 %v9703_v1, %v8625_v49  ;;  %v9789_v24 = vld [vmem:[%s8302_s23 + $0x3a8] sm:$0xff] }
 0x1a4   : > { %v2464_v47 = vadd.f32 %v2432_v55, %v2398_v18  ;;  %v2466_v63 = vadd.f32 %v2434_v37, %v2400_v28  ;;  %v1262_v12 = vadd.f32 %v1230_v26, %v1163_v29  ;;  %v1428_v0 = vmul.f32 %v9708_v32, %v8625_v49  ;;  %v9801_v58 = vld [vmem:[%s8302_s23 + $0x4a8] sm:$0xff]  ;;  %v9804_v26 = vld [vmem:[%s8302_s23 + $0x4b8] sm:$0xff] }
 0x1a5   : > { %3013 = vmatprep.mubr.bf16.mxu1 %v1945_v10  ;;  %v1525_v13 = vmul.f32 %v6217_v59, %v8628_v4  ;;  %v1359_v45 = vadd.f32 %v1327_v48, %v1260_v11  ;;  %v1527_v55 = vmul.f32 %v6219_v56, %v8628_v4  ;;  %v1624_v46 = vmul.f32 %v6250_v42, %v8639_v62  ;;  %v9772_v59 = vld [vmem:[%s8302_s23 + $0x1a8] sm:$0xff] }
 0x1a6   : > { %v2530_v53 = vadd.f32 %v2498_v52, %v2464_v47  ;;  %v2532_v1 = vadd.f32 %v2500_v54, %v2466_v63  ;;  %v1361_v37 = vadd.f32 %v1329_v22, %v1262_v12  ;;  %v1626_v33 = vmul.f32 %v6252_v7, %v8639_v62  ;;  %v9778_v54 = vld [vmem:[%s8302_s23 + $0x1b8] sm:$0xff]  ;;  %v9811_v48 = vld [vmem:[%s8302_s23 + $0x5a8] sm:$0xff] }
 0x1a7   : > { %v1723_v32 = vmul.f32 %v6283_v3, %v8642_v16  ;;  %v1458_v56 = vadd.f32 %v1426_v34, %v1359_v45  ;;  %v1725_v42 = vmul.f32 %v6285_v31, %v8642_v16  ;;  %v1822_v36 = vmul.f32 %v6316_v41, %v8659_v30  ;;  %v9814_v47 = vld [vmem:[%s8302_s23 + $0x5b8] sm:$0xff]  ;;  %v9817_v11 = vld [vmem:[%s8302_s23 + $0x6a8] sm:$0xff] }
 0x1a8   : > { %v2564_v52 = vadd.f32 %v8574_v61, %v2530_v53  ;;  %v2566_v7 = vadd.f32 %v8574_v61, %v2532_v1  ;;  %v1460_v3 = vadd.f32 %v1428_v0, %v1361_v37  ;;  %v1824_v8 = vmul.f32 %v6318_v25, %v8659_v30  ;;  %v9827_v53 = vld [vmem:[%s8302_s23 + $0x7a8] sm:$0xff]  ;;  %v9830_v45 = vld [vmem:[%s8302_s23 + $0x7b8] sm:$0xff] }
 0x1a9   : > { %v2007_v31 = vmul.f32 %v8432_v6, %v9764_v9  ;;  %v1557_v20 = vadd.f32 %v1525_v13, %v1458_v56  ;;  %v2009_v57 = vmul.f32 %v8432_v6, %v9769_v44  ;;  %v2041_v25 = vmul.f32 %v9772_v59, %v8455_v14  ;;  %v9824_v13 = vld [vmem:[%s8302_s23 + $0x6b8] sm:$0xff] }
 0x1aa   : > { %v2596_v41 = vmax.f32 %v2564_v52, 0.0  ;;  %v2598_v18 = vmax.f32 %v2566_v7, 0.0  ;;  %v1559_v43 = vadd.f32 %v1527_v55, %v1460_v3  ;;  %v2043_v10 = vmul.f32 %v9778_v54, %v8455_v14  ;;  %v6965_v7 = vld [vmem:[%s12219_s3 + $0x100] sm:$0xff]  }
 0x1ab   : > { %v2107_v28 = vmul.f32 %v9781_v2, %v8468_v19  ;;  %v1656_v29 = vadd.f32 %v1624_v46, %v1557_v20  ;;  %v2073_v22 = vadd.f32 %v2041_v25, %v2007_v31  ;;  %v2109_v34 = vmul.f32 %v9786_v5, %v8468_v19  ;;  %v6966_v3 = vld [vmem:[%s12219_s3 + $0x1c0] sm:$0xff]   ;;  %v6321_v31 = vld [vmem:[%s8302_s23 + $0x8a8] sm:$0xff] }
 0x1ac   : > { %v2173_v63 = vmul.f32 %v9789_v24, %v8491_v27  ;;  %v2620_v12 = vpack.c.bf16 %v2598_v18, %v2596_v41  ;;  %v1658_v0 = vadd.f32 %v1626_v33, %v1559_v43  ;;  %v2075_v55 = vadd.f32 %v2043_v10, %v2009_v57  ;;  %v6964_v33 = vld [vmem:[%s12219_s3 + $0x140] sm:$0xff]   ;;  %v9849_v41 = vld [vmem:[%s8302_s23 + $0x8b8] sm:$0xff]  ;;  %6704 = vmatprep.subr.bf16.mxu1 %v6966_v3 }
 0x1ad   : > { %v2175_v46 = vmul.f32 %v9794_v23, %v8491_v27  ;;  %v1755_v1 = vadd.f32 %v1723_v32, %v1656_v29  ;;  %v2139_v37 = vadd.f32 %v2107_v28, %v2073_v22  ;;  %v2239_v52 = vmul.f32 %v9801_v58, %v8519_v38  ;;  %v6967_v18 = vld [vmem:[%s12219_s3 + $0x180] sm:$0xff]   ;;  %6640 = vmatprep.subr.bf16.mxu0 %v6964_v33 }
 0x1ae   : > { %v2241_v56 = vmul.f32 %v9804_v26, %v8519_v38  ;;  %2821 = vmatmul.mubr.bf16.gmra.mxu0 %v2620_v12  ;;  %v1757_v32 = vadd.f32 %v1725_v42, %v1658_v0  ;;  %v2141_v20 = vadd.f32 %v2109_v34, %v2075_v55  ;;  %v2305_v57 = vmul.f32 %v9811_v48, %v8522_v39 }
 0x1af   : > { %v2307_v25 = vmul.f32 %v9814_v47, %v8522_v39  ;;  %v1854_v43 = vadd.f32 %v1822_v36, %v1755_v1  ;;  %v2205_v10 = vadd.f32 %v2173_v63, %v2139_v37  ;;  %v2371_v28 = vmul.f32 %v9817_v11, %v8547_v50  ;;  %6641 = vmatpush3.bf16.msra.mxu0 %v6965_v7 }
 0x1b0   : > { %v2373_v42 = vmul.f32 %v9824_v13, %v8547_v50  ;;  %v1856_v29 = vadd.f32 %v1824_v8, %v1757_v32  ;;  %v2207_v22 = vadd.f32 %v2175_v46, %v2141_v20  ;;  %v2437_v34 = vmul.f32 %v9827_v53, %v8550_v51  ;;  %6705 = vmatpush3.bf16.msra.mxu1 %v6967_v18 }
 0x1b1   : > { %v2439_v12 = vmul.f32 %v9830_v45, %v8550_v51  ;;  %v1888_v0 = vadd.f32 %v8662_v21, %v1854_v43  ;;  %v2271_v36 = vadd.f32 %v2239_v52, %v2205_v10  ;;  %v2503_v63 = vmul.f32 %v6321_v31, %v8571_v60 }
 0x1b2   : > { %v2505_v55 = vmul.f32 %v9849_v41, %v8571_v60  ;;  %v1890_v1 = vadd.f32 %v8662_v21, %v1856_v29  ;;  %v2273_v8 = vadd.f32 %v2241_v56, %v2207_v22  ;;  %v1067_v46 = vmul.f32 %v8585_v15, %v9764_v9 }
 0x1b3   : > { %v1069_v37 = vmul.f32 %v8585_v15, %v9769_v44  ;;  %v1920_v33 = vmax.f32 %v1888_v0, 0.0  ;;  %v2337_v7 = vadd.f32 %v2305_v57, %v2271_v36  ;;  %v1134_v52 = vmul.f32 %v9772_v59, %v8588_v17  ;;  %v9900_v36 = vld [vmem:[%s8302_s23 + $0xa0] sm:$0xff] }
 0x1b4   : > { %v1136_v32 = vmul.f32 %v9778_v54, %v8588_v17  ;;  %v1922_v20 = vmax.f32 %v1890_v1, 0.0  ;;  %v2339_v3 = vadd.f32 %v2307_v25, %v2273_v8  ;;  %v1233_v56 = vmul.f32 %v9781_v2, %v8607_v35  ;;  %v9914_v8 = vld [vmem:[%s8302_s23 + $0x1b0] sm:$0xff] }
 0x1b5   : > { %v1235_v9 = vmul.f32 %v9786_v5, %v8607_v35  ;;  %v2403_v43 = vadd.f32 %v2371_v28, %v2337_v7  ;;  %v1166_v10 = vadd.f32 %v1134_v52, %v1067_v46  ;;  %v1332_v57 = vmul.f32 %v9789_v24, %v8610_v40  ;;  %v9927_v7 = vld [vmem:[%s8302_s23 + $0x3a0] sm:$0xff] }
 0x1b6   : > { %v1168_v44 = vadd.f32 %v1136_v32, %v1069_v37  ;;  %v1944_v18 = vpack.c.bf16 %v1922_v20, %v1920_v33  ;;  %v2405_v29 = vadd.f32 %v2373_v42, %v2339_v3  ;;  %v1334_v59 = vmul.f32 %v9794_v23, %v8610_v40  ;;  %v9920_v33 = vld [vmem:[%s8302_s23 + $0x2a0] sm:$0xff] }
 0x1b7   : > { %v1431_v54 = vmul.f32 %v9801_v58, %v8625_v49  ;;  %v2469_v2 = vadd.f32 %v2437_v34, %v2403_v43  ;;  %v1265_v25 = vadd.f32 %v1233_v56, %v1166_v10  ;;  %v1433_v28 = vmul.f32 %v9804_v26, %v8625_v49  ;;  %v9936_v56 = vld [vmem:[%s8302_s23 + $0x3b0] sm:$0xff] }
 0x1b8   : > { %v1267_v5 = vadd.f32 %v1235_v9, %v1168_v44  ;;  %3014 = vmatmul.mubr.bf16.gmra.mxu1 %v1944_v18  ;;  %v2471_v24 = vadd.f32 %v2439_v12, %v2405_v29  ;;  %v1530_v42 = vmul.f32 %v9811_v48, %v8628_v4  ;;  %v1532_v23 = vmul.f32 %v9814_v47, %v8628_v4  ;;  %v9903_v12 = vld [vmem:[%s8302_s23 + $0xb0] sm:$0xff]  ;;  %v9906_v48 = vld [vmem:[%s8302_s23 + $0x1a0] sm:$0xff] }
 0x1b9   : > { %v1629_v22 = vmul.f32 %v9817_v11, %v8639_v62  ;;  %v2535_v58 = vadd.f32 %v2503_v63, %v2469_v2  ;;  %v1364_v34 = vadd.f32 %v1332_v57, %v1265_v25  ;;  %v1631_v26 = vmul.f32 %v9824_v13, %v8639_v62  ;;  %v9939_v9 = vld [vmem:[%s8302_s23 + $0x4a0] sm:$0xff]  ;;  %v9944_v44 = vld [vmem:[%s8302_s23 + $0x4b0] sm:$0xff] }
 0x1ba   : > { %v1366_v0 = vadd.f32 %v1334_v59, %v1267_v5  ;;  %v2537_v1 = vadd.f32 %v2505_v55, %v2471_v24  ;;  %v1728_v47 = vmul.f32 %v9827_v53, %v8642_v16  ;;  %v1730_v11 = vmul.f32 %v9830_v45, %v8642_v16  ;;  %v9923_v53 = vld [vmem:[%s8302_s23 + $0x2b0] sm:$0xff]  ;;  %v6221_v2 = vld [vmem:[%s8302_s23 + $0x5a0] sm:$0xff] }
 0x1bb   : > { %v1827_v63 = vmul.f32 %v6321_v31, %v8659_v30  ;;  %v2569_v13 = vadd.f32 %v8574_v61, %v2535_v58  ;;  %v1463_v46 = vadd.f32 %v1431_v54, %v1364_v34  ;;  %v1829_v55 = vmul.f32 %v9849_v41, %v8659_v30  ;;  %v6223_v25 = vld [vmem:[%s8302_s23 + $0x5b0] sm:$0xff]  ;;  %v6254_v5 = vld [vmem:[%s8302_s23 + $0x6a0] sm:$0xff] }
 0x1bc   : > { %v1465_v37 = vadd.f32 %v1433_v28, %v1366_v0  ;;  %v2571_v45 = vadd.f32 %v8574_v61, %v2537_v1  ;;  %v2006_v31 = vmul.f32 %v8432_v6, %v9900_v36  ;;  %v2008_v52 = vmul.f32 %v8432_v6, %v9903_v12 }
 0x1bd   : > { %v2040_v32 = vmul.f32 %v9906_v48, %v8455_v14  ;;  %v2601_v41 = vmax.f32 %v2569_v13, 0.0  ;;  %v1562_v20 = vadd.f32 %v1530_v42, %v1463_v46  ;;  %v2042_v43 = vmul.f32 %v9914_v8, %v8455_v14  ;;  %v6289_v13 = vld [vmem:[%s8302_s23 + $0x7b0] sm:$0xff]  ;;  %v6320_v46 = vld [vmem:[%s8302_s23 + $0x8a0] sm:$0xff] }
 0x1be   : > { %v1564_v3 = vadd.f32 %v1532_v23, %v1465_v37  ;;  %v2603_v10 = vmax.f32 %v2571_v45, 0.0  ;;  %v2106_v18 = vmul.f32 %v9920_v33, %v8468_v19  ;;  %v2108_v29 = vmul.f32 %v9923_v53, %v8468_v19  ;;  %v6256_v23 = vld [vmem:[%s8302_s23 + $0x6b0] sm:$0xff] }
 0x1bf   : > { %v2072_v57 = vadd.f32 %v2040_v32, %v2006_v31  ;;  %v1661_v59 = vadd.f32 %v1629_v22, %v1562_v20  ;;  %v2074_v28 = vadd.f32 %v2042_v43, %v2008_v52  ;;  %v2172_v24 = vmul.f32 %v9927_v7, %v8491_v27  ;;  %v6322_v31 = vld [vmem:[%s8302_s23 + $0x8b0] sm:$0xff] }
 0x1c0   : > { %v1663_v54 = vadd.f32 %v1631_v26, %v1564_v3  ;;  %v2623_v42 = vpack.c.bf16 %v2603_v10, %v2601_v41  ;;  %v2174_v34 = vmul.f32 %v9936_v56, %v8491_v27  ;;  %v2238_v0 = vmul.f32 %v9939_v9, %v8519_v38  ;;  %v6287_v26 = vld [vmem:[%s8302_s23 + $0x7a0] sm:$0xff] }
 0x1c1   : > { %v2138_v58 = vadd.f32 %v2106_v18, %v2072_v57  ;;  %v1760_v22 = vadd.f32 %v1728_v47, %v1661_v59  ;;  %v2140_v37 = vadd.f32 %v2108_v29, %v2074_v28  ;;  %v2240_v45 = vmul.f32 %v9944_v44, %v8519_v38 }
 0x1c2   : > { %v1762_v1 = vadd.f32 %v1730_v11, %v1663_v54  ;;  %2828 = vmatprep.mubr.bf16.mxu0 %v2623_v42  ;;  %v2304_v32 = vmul.f32 %v6221_v2, %v8522_v39  ;;  %v2306_v41 = vmul.f32 %v6223_v25, %v8522_v39  ;;  %v2370_v20 = vmul.f32 %v6254_v5, %v8547_v50 }
 0x1c3   : > { %v2204_v52 = vadd.f32 %v2172_v24, %v2138_v58  ;;  %v1859_v3 = vadd.f32 %v1827_v63, %v1760_v22  ;;  %v2206_v47 = vadd.f32 %v2174_v34, %v2140_v37  ;;  %v2372_v11 = vmul.f32 %v6256_v23, %v8547_v50 }
 0x1c4   : > { %v1861_v43 = vadd.f32 %v1829_v55, %v1762_v1  ;;  %v2436_v57 = vmul.f32 %v6287_v26, %v8550_v51  ;;  %v2438_v18 = vmul.f32 %v6289_v13, %v8550_v51  ;;  %v2502_v29 = vmul.f32 %v6320_v46, %v8571_v60 }
 0x1c5   : > { %v2270_v10 = vadd.f32 %v2238_v0, %v2204_v52  ;;  %v1893_v59 = vadd.f32 %v8662_v21, %v1859_v3  ;;  %v2272_v28 = vadd.f32 %v2240_v45, %v2206_v47  ;;  %v2504_v24 = vmul.f32 %v6322_v31, %v8571_v60 }
 0x1c6   : > { %v1895_v54 = vadd.f32 %v8662_v21, %v1861_v43  ;;  %v1066_v63 = vmul.f32 %v8585_v15, %v9900_v36  ;;  %v1068_v55 = vmul.f32 %v8585_v15, %v9903_v12  ;;  %v1133_v58 = vmul.f32 %v9906_v48, %v8588_v17 }
 0x1c7   : > { %v2336_v42 = vadd.f32 %v2304_v32, %v2270_v10  ;;  %v1925_v34 = vmax.f32 %v1893_v59, 0.0  ;;  %v2338_v22 = vadd.f32 %v2306_v41, %v2272_v28  ;;  %v1135_v1 = vmul.f32 %v9914_v8, %v8588_v17  ;;  %v10000_v59 = vld [vmem:[%s8302_s23 + $0xc8] sm:$0xff]  ;;  %v10005_v28 = vld [vmem:[%s8302_s23 + $0xd8] sm:$0xff] }
 0x1c8   : > { %v1927_v0 = vmax.f32 %v1895_v54, 0.0  ;;  %v1165_v45 = vadd.f32 %v1133_v58, %v1066_v63  ;;  %v1232_v52 = vmul.f32 %v9920_v33, %v8607_v35  ;;  %v1234_v36 = vmul.f32 %v9923_v53, %v8607_v35  ;;  %v10017_v63 = vld [vmem:[%s8302_s23 + $0x2c8] sm:$0xff]  ;;  %v6129_v58 = vld [vmem:[%s8302_s23 + $0x2d8] sm:$0xff] }
 0x1c9   : > { %v2402_v37 = vadd.f32 %v2370_v20, %v2336_v42  ;;  %v2404_v3 = vadd.f32 %v2372_v11, %v2338_v22  ;;  %v1167_v12 = vadd.f32 %v1135_v1, %v1068_v55  ;;  %v1331_v48 = vmul.f32 %v9927_v7, %v8610_v40  ;;  %v10028_v22 = vld [vmem:[%s8302_s23 + $0x3d8] sm:$0xff] }
 0x1ca   : > { %v1947_v32 = vpack.c.bf16 %v1927_v0, %v1925_v34  ;;  %v1264_v41 = vadd.f32 %v1232_v52, %v1165_v45  ;;  %v1333_v8 = vmul.f32 %v9936_v56, %v8610_v40  ;;  %v1430_v20 = vmul.f32 %v9939_v9, %v8625_v49  ;;  %v10023_v34 = vld [vmem:[%s8302_s23 + $0x3c8] sm:$0xff] }
 0x1cb   : > { %v2468_v43 = vadd.f32 %v2436_v57, %v2402_v37  ;;  %v2470_v33 = vadd.f32 %v2438_v18, %v2404_v3  ;;  %v1266_v53 = vadd.f32 %v1234_v36, %v1167_v12  ;;  %v1432_v47 = vmul.f32 %v9944_v44, %v8625_v49  ;;  %v6193_v52 = vld [vmem:[%s8302_s23 + $0x4c8] sm:$0xff]  ;;  %v10036_v36 = vld [vmem:[%s8302_s23 + $0x4d8] sm:$0xff] }
 0x1cc   : > { %3021 = vmatprep.mubr.bf16.mxu1 %v1947_v32  ;;  %v1529_v11 = vmul.f32 %v6221_v2, %v8628_v4  ;;  %v1363_v10 = vadd.f32 %v1331_v48, %v1264_v41  ;;  %v1531_v57 = vmul.f32 %v6223_v25, %v8628_v4  ;;  %v1628_v56 = vmul.f32 %v6254_v5, %v8639_v62  ;;  %v10008_v2 = vld [vmem:[%s8302_s23 + $0x1c8] sm:$0xff] }
 0x1cd   : > { %v2534_v7 = vadd.f32 %v2502_v29, %v2468_v43  ;;  %v2536_v9 = vadd.f32 %v2504_v24, %v2470_v33  ;;  %v1365_v18 = vadd.f32 %v1333_v8, %v1266_v53  ;;  %v1630_v54 = vmul.f32 %v6256_v23, %v8639_v62  ;;  %v10014_v24 = vld [vmem:[%s8302_s23 + $0x1d8] sm:$0xff]  ;;  %v6226_v48 = vld [vmem:[%s8302_s23 + $0x5c8] sm:$0xff] }
 0x1ce   : > { %v1727_v44 = vmul.f32 %v6287_v26, %v8642_v16  ;;  %v1462_v25 = vadd.f32 %v1430_v20, %v1363_v10  ;;  %v1729_v5 = vmul.f32 %v6289_v13, %v8642_v16  ;;  %v1826_v42 = vmul.f32 %v6320_v46, %v8659_v30  ;;  %v6228_v43 = vld [vmem:[%s8302_s23 + $0x5d8] sm:$0xff] }
 0x1cf   : > { %v2568_v29 = vadd.f32 %v8574_v61, %v2534_v7  ;;  %v2570_v23 = vadd.f32 %v8574_v61, %v2536_v9  ;;  %v1464_v26 = vadd.f32 %v1432_v47, %v1365_v18  ;;  %v1828_v55 = vmul.f32 %v6322_v31, %v8659_v30  ;;  %v6259_v47 = vld [vmem:[%s8302_s23 + $0x6c8] sm:$0xff]  ;;  %v6294_v9 = vld [vmem:[%s8302_s23 + $0x7d8] sm:$0xff] }
 0x1d0   : > { %v2011_v13 = vmul.f32 %v8432_v6, %v10000_v59  ;;  %v1561_v0 = vadd.f32 %v1529_v11, %v1462_v25  ;;  %v2013_v1 = vmul.f32 %v8432_v6, %v10005_v28  ;;  %v2045_v37 = vmul.f32 %v10008_v2, %v8455_v14  ;;  %v6261_v11 = vld [vmem:[%s8302_s23 + $0x6d8] sm:$0xff] }
 0x1d1   : > { %v2600_v46 = vmax.f32 %v2568_v29, 0.0  ;;  %v2602_v31 = vmax.f32 %v2570_v23, 0.0  ;;  %v1563_v45 = vadd.f32 %v1531_v57, %v1464_v26  ;;  %v2047_v32 = vmul.f32 %v10014_v24, %v8455_v14  ;;  %v6325_v26 = vld [vmem:[%s8302_s23 + $0x8c8] sm:$0xff] }
 0x1d2   : > { %v2111_v3 = vmul.f32 %v10017_v63, %v8468_v19  ;;  %v1660_v12 = vadd.f32 %v1628_v56, %v1561_v0  ;;  %v2077_v41 = vadd.f32 %v2045_v37, %v2011_v13  ;;  %v2113_v8 = vmul.f32 %v6129_v58, %v8468_v19  ;;  %v6292_v56 = vld [vmem:[%s8302_s23 + $0x7c8] sm:$0xff]  ;;  %v6327_v13 = vld [vmem:[%s8302_s23 + $0x8d8] sm:$0xff] }
 0x1d3   : > { %v2177_v20 = vmul.f32 %v10023_v34, %v8491_v27  ;;  %v2622_v33 = vpack.c.bf16 %v2602_v31, %v2600_v46  ;;  %v1662_v53 = vadd.f32 %v1630_v54, %v1563_v45  ;;  %v2079_v7 = vadd.f32 %v2047_v32, %v2013_v1 }
 0x1d4   : > { %v2179_v10 = vmul.f32 %v10028_v22, %v8491_v27  ;;  %v1759_v57 = vadd.f32 %v1727_v44, %v1660_v12  ;;  %v2143_v18 = vadd.f32 %v2111_v3, %v2077_v41  ;;  %v2243_v29 = vmul.f32 %v6193_v52, %v8519_v38 }
 0x1d5   : > { %v2245_v25 = vmul.f32 %v10036_v36, %v8519_v38  ;;  %2829 = vmatmul.mubr.bf16.gmra.mxu0 %v2622_v33  ;;  %v1761_v23 = vadd.f32 %v1729_v5, %v1662_v53  ;;  %v2145_v54 = vadd.f32 %v2113_v8, %v2079_v7  ;;  %v2309_v46 = vmul.f32 %v6226_v48, %v8522_v39 }
 0x1d6   : > { %v2311_v0 = vmul.f32 %v6228_v43, %v8522_v39  ;;  %v1858_v1 = vadd.f32 %v1826_v42, %v1759_v57  ;;  %v2209_v37 = vadd.f32 %v2177_v20, %v2143_v18  ;;  %v2375_v44 = vmul.f32 %v6259_v47, %v8547_v50 }
 0x1d7   : > { %v2377_v31 = vmul.f32 %v6261_v11, %v8547_v50  ;;  %v1860_v45 = vadd.f32 %v1828_v55, %v1761_v23  ;;  %v2211_v32 = vadd.f32 %v2179_v10, %v2145_v54  ;;  %v2441_v3 = vmul.f32 %v6292_v56, %v8550_v51 }
 0x1d8   : > { %v2443_v12 = vmul.f32 %v6294_v9, %v8550_v51  ;;  %v1892_v5 = vadd.f32 %v8662_v21, %v1858_v1  ;;  %v2275_v41 = vadd.f32 %v2243_v29, %v2209_v37  ;;  %v2507_v8 = vmul.f32 %v6325_v26, %v8571_v60 }
 0x1d9   : > { %v2509_v33 = vmul.f32 %v6327_v13, %v8571_v60  ;;  %v1894_v42 = vadd.f32 %v8662_v21, %v1860_v45  ;;  %v2277_v20 = vadd.f32 %v2245_v25, %v2211_v32  ;;  %v1071_v53 = vmul.f32 %v8585_v15, %v10000_v59 }
 0x1da   : > { %v1073_v55 = vmul.f32 %v8585_v15, %v10005_v28  ;;  %v1924_v7 = vmax.f32 %v1892_v5, 0.0  ;;  %v2341_v10 = vadd.f32 %v2309_v46, %v2275_v41  ;;  %v1138_v57 = vmul.f32 %v10008_v2, %v8588_v17 }
 0x1db   : > { %v1140_v18 = vmul.f32 %v10014_v24, %v8588_v17  ;;  %v1926_v29 = vmax.f32 %v1894_v42, 0.0  ;;  %v2343_v23 = vadd.f32 %v2311_v0, %v2277_v20  ;;  %v1237_v54 = vmul.f32 %v10017_v63, %v8607_v35  ;;  %v10091_v42 = vld [vmem:[%s8302_s23 + $0xc0] sm:$0xff] }
 0x1dc   : > { %v1239_v25 = vmul.f32 %v6129_v58, %v8607_v35  ;;  %v2407_v1 = vadd.f32 %v2375_v44, %v2341_v10  ;;  %v1170_v59 = vadd.f32 %v1138_v57, %v1071_v53  ;;  %v1336_v28 = vmul.f32 %v10023_v34, %v8610_v40  ;;  %v10097_v20 = vld [vmem:[%s8302_s23 + $0x1c0] sm:$0xff] }
 0x1dd   : > { %v1172_v37 = vadd.f32 %v1140_v18, %v1073_v55  ;;  %v1946_v46 = vpack.c.bf16 %v1926_v29, %v1924_v7  ;;  %v2409_v45 = vadd.f32 %v2377_v31, %v2343_v23  ;;  %v1338_v2 = vmul.f32 %v10028_v22, %v8610_v40  ;;  %v10108_v10 = vld [vmem:[%s8302_s23 + $0x2c0] sm:$0xff] }
 0x1de   : > { %v1435_v24 = vmul.f32 %v6193_v52, %v8625_v49  ;;  %v2473_v0 = vadd.f32 %v2441_v3, %v2407_v1  ;;  %v1269_v63 = vadd.f32 %v1237_v54, %v1170_v59  ;;  %v1437_v58 = vmul.f32 %v10036_v36, %v8625_v49  ;;  %v10094_v36 = vld [vmem:[%s8302_s23 + $0xd0] sm:$0xff] }
 0x1df   : > { %v1271_v32 = vadd.f32 %v1239_v25, %v1172_v37  ;;  %3022 = vmatmul.mubr.bf16.gmra.mxu1 %v1946_v46  ;;  %v2475_v44 = vadd.f32 %v2443_v12, %v2409_v45  ;;  %v1534_v34 = vmul.f32 %v6226_v48, %v8628_v4  ;;  %v1536_v31 = vmul.f32 %v6228_v43, %v8628_v4  ;;  %v10124_v54 = vld [vmem:[%s8302_s23 + $0x3d0] sm:$0xff]  ;;  %v10127_v25 = vld [vmem:[%s8302_s23 + $0x4c0] sm:$0xff] }
 0x1e0   : > { %v1633_v5 = vmul.f32 %v6259_v47, %v8639_v62  ;;  %v2539_v22 = vadd.f32 %v2507_v8, %v2473_v0  ;;  %v1368_v41 = vadd.f32 %v1336_v28, %v1269_v63  ;;  %v1635_v3 = vmul.f32 %v6261_v11, %v8639_v62  ;;  %v10103_v8 = vld [vmem:[%s8302_s23 + $0x1d0] sm:$0xff]  ;;  %v6225_v0 = vld [vmem:[%s8302_s23 + $0x5c0] sm:$0xff] }
 0x1e1   : > { %v1370_v52 = vadd.f32 %v1338_v2, %v1271_v32  ;;  %v2541_v12 = vadd.f32 %v2509_v33, %v2475_v44  ;;  %v1732_v48 = vmul.f32 %v6292_v56, %v8642_v16  ;;  %v1734_v43 = vmul.f32 %v6294_v9, %v8642_v16  ;;  %v10111_v33 = vld [vmem:[%s8302_s23 + $0x2d0] sm:$0xff]  ;;  %v10115_v9 = vld [vmem:[%s8302_s23 + $0x3c0] sm:$0xff] }
 0x1e2   : > { %v1831_v47 = vmul.f32 %v6325_v26, %v8659_v30  ;;  %v2573_v11 = vadd.f32 %v8574_v61, %v2539_v22  ;;  %v1467_v53 = vadd.f32 %v1435_v24, %v1368_v41  ;;  %v1833_v7 = vmul.f32 %v6327_v13, %v8659_v30  ;;  %v10132_v37 = vld [vmem:[%s8302_s23 + $0x4d0] sm:$0xff]  ;;  %v6258_v32 = vld [vmem:[%s8302_s23 + $0x6c0] sm:$0xff] }
 0x1e3   : > { %v1469_v55 = vadd.f32 %v1437_v58, %v1370_v52  ;;  %v2575_v56 = vadd.f32 %v8574_v61, %v2541_v12  ;;  %v2010_v26 = vmul.f32 %v8432_v6, %v10091_v42  ;;  %v2012_v57 = vmul.f32 %v8432_v6, %v10094_v36  ;;  %v6227_v63 = vld [vmem:[%s8302_s23 + $0x5d0] sm:$0xff] }
 0x1e4   : > { %v2044_v18 = vmul.f32 %v10097_v20, %v8455_v14  ;;  %v2605_v13 = vmax.f32 %v2573_v11, 0.0  ;;  %v1566_v29 = vadd.f32 %v1534_v34, %v1467_v53  ;;  %v2046_v1 = vmul.f32 %v10103_v8, %v8455_v14  ;;  %v6293_v11 = vld [vmem:[%s8302_s23 + $0x7d0] sm:$0xff]  ;;  %v6324_v53 = vld [vmem:[%s8302_s23 + $0x8c0] sm:$0xff] }
 0x1e5   : > { %v1568_v23 = vadd.f32 %v1536_v31, %v1469_v55  ;;  %v2607_v59 = vmax.f32 %v2575_v56, 0.0  ;;  %v2110_v46 = vmul.f32 %v10108_v10, %v8468_v19  ;;  %v2112_v45 = vmul.f32 %v10111_v33, %v8468_v19  ;;  %v6260_v31 = vld [vmem:[%s8302_s23 + $0x6d0] sm:$0xff] }
 0x1e6   : > { %v2076_v28 = vadd.f32 %v2044_v18, %v2010_v26  ;;  %v1665_v2 = vadd.f32 %v1633_v5, %v1566_v29  ;;  %v2078_v58 = vadd.f32 %v2046_v1, %v2012_v57  ;;  %v2176_v44 = vmul.f32 %v10115_v9, %v8491_v27  ;;  %v6326_v26 = vld [vmem:[%s8302_s23 + $0x8d0] sm:$0xff] }
 0x1e7   : > { %v1667_v24 = vadd.f32 %v1635_v3, %v1568_v23  ;;  %v2625_v34 = vpack.c.bf16 %v2607_v59, %v2605_v13  ;;  %v2178_v41 = vmul.f32 %v10124_v54, %v8491_v27  ;;  %v2242_v52 = vmul.f32 %v10127_v25, %v8519_v38  ;;  %v6291_v3 = vld [vmem:[%s8302_s23 + $0x7c0] sm:$0xff] }
 0x1e8   : > { %v2142_v22 = vadd.f32 %v2110_v46, %v2076_v28  ;;  %v1764_v5 = vadd.f32 %v1732_v48, %v1665_v2  ;;  %v2144_v55 = vadd.f32 %v2112_v45, %v2078_v58  ;;  %v2244_v56 = vmul.f32 %v10132_v37, %v8519_v38 }
 0x1e9   : > { %v1766_v12 = vadd.f32 %v1734_v43, %v1667_v24  ;;  %2836 = vmatprep.mubr.bf16.mxu0 %v2625_v34  ;;  %v2308_v18 = vmul.f32 %v6225_v0, %v8522_v39  ;;  %v2310_v13 = vmul.f32 %v6227_v63, %v8522_v39  ;;  %v2374_v29 = vmul.f32 %v6258_v32, %v8547_v50 }
 0x1ea   : > { %v2208_v57 = vadd.f32 %v2176_v44, %v2142_v22  ;;  %v1863_v23 = vadd.f32 %v1831_v47, %v1764_v5  ;;  %v2210_v48 = vadd.f32 %v2178_v41, %v2144_v55  ;;  %v2376_v43 = vmul.f32 %v6260_v31, %v8547_v50 }
 0x1eb   : > { %v1865_v1 = vadd.f32 %v1833_v7, %v1766_v12  ;;  %v2440_v28 = vmul.f32 %v6291_v3, %v8550_v51  ;;  %v2442_v46 = vmul.f32 %v6293_v11, %v8550_v51  ;;  %v2506_v45 = vmul.f32 %v6324_v53, %v8571_v60 }
 0x1ec   : > { %v2274_v59 = vadd.f32 %v2242_v52, %v2208_v57  ;;  %v1897_v2 = vadd.f32 %v8662_v21, %v1863_v23  ;;  %v2276_v58 = vadd.f32 %v2244_v56, %v2210_v48  ;;  %v2508_v44 = vmul.f32 %v6326_v26, %v8571_v60 }
 0x1ed   : > { %v1899_v24 = vadd.f32 %v8662_v21, %v1865_v1  ;;  %v1070_v47 = vmul.f32 %v8585_v15, %v10091_v42  ;;  %v1072_v7 = vmul.f32 %v8585_v15, %v10094_v36  ;;  %v1137_v22 = vmul.f32 %v10097_v20, %v8588_v17 }
 0x1ee   : > { %v2340_v34 = vadd.f32 %v2308_v18, %v2274_v59  ;;  %v1929_v41 = vmax.f32 %v1897_v2, 0.0  ;;  %v2342_v5 = vadd.f32 %v2310_v13, %v2276_v58  ;;  %v1139_v12 = vmul.f32 %v10103_v8, %v8588_v17  ;;  %v10188_v2 = vld [vmem:[%s8302_s23 + $0xe8] sm:$0xff]  ;;  %v10193_v58 = vld [vmem:[%s8302_s23 + $0xf8] sm:$0xff] }
 0x1ef   : > { %v1931_v52 = vmax.f32 %v1899_v24, 0.0  ;;  %v1169_v56 = vadd.f32 %v1137_v22, %v1070_v47  ;;  %v1236_v57 = vmul.f32 %v10108_v10, %v8607_v35  ;;  %v1238_v42 = vmul.f32 %v10111_v33, %v8607_v35  ;;  %v10205_v47 = vld [vmem:[%s8302_s23 + $0x2e8] sm:$0xff]  ;;  %v6133_v22 = vld [vmem:[%s8302_s23 + $0x2f8] sm:$0xff] }
 0x1f0   : > { %v2406_v55 = vadd.f32 %v2374_v29, %v2340_v34  ;;  %v2408_v23 = vadd.f32 %v2376_v43, %v2342_v5  ;;  %v1171_v36 = vadd.f32 %v1139_v12, %v1072_v7  ;;  %v1335_v20 = vmul.f32 %v10115_v9, %v8610_v40  ;;  %v10216_v5 = vld [vmem:[%s8302_s23 + $0x3f8] sm:$0xff] }
 0x1f1   : > { %v1949_v18 = vpack.c.bf16 %v1931_v52, %v1929_v41  ;;  %v1268_v13 = vadd.f32 %v1236_v57, %v1169_v56  ;;  %v1337_v8 = vmul.f32 %v10124_v54, %v8610_v40  ;;  %v1434_v29 = vmul.f32 %v10127_v25, %v8625_v49  ;;  %v10211_v41 = vld [vmem:[%s8302_s23 + $0x3e8] sm:$0xff] }
 0x1f2   : > { %v2472_v1 = vadd.f32 %v2440_v28, %v2406_v55  ;;  %v2474_v10 = vadd.f32 %v2442_v46, %v2408_v23  ;;  %v1270_v33 = vadd.f32 %v1238_v42, %v1171_v36  ;;  %v1436_v48 = vmul.f32 %v10132_v37, %v8625_v49  ;;  %v6197_v57 = vld [vmem:[%s8302_s23 + $0x4e8] sm:$0xff]  ;;  %v10224_v42 = vld [vmem:[%s8302_s23 + $0x4f8] sm:$0xff] }
 0x1f3   : > { %3029 = vmatprep.mubr.bf16.mxu1 %v1949_v18  ;;  %v1533_v43 = vmul.f32 %v6225_v0, %v8628_v4  ;;  %v1367_v59 = vadd.f32 %v1335_v20, %v1268_v13  ;;  %v1535_v28 = vmul.f32 %v6227_v63, %v8628_v4  ;;  %v1632_v54 = vmul.f32 %v6258_v32, %v8639_v62  ;;  %v10196_v0 = vld [vmem:[%s8302_s23 + $0x1e8] sm:$0xff] }
 0x1f4   : > { %v2538_v9 = vadd.f32 %v2506_v45, %v2472_v1  ;;  %v2540_v25 = vadd.f32 %v2508_v44, %v2474_v10  ;;  %v1369_v46 = vadd.f32 %v1337_v8, %v1270_v33  ;;  %v1634_v24 = vmul.f32 %v6260_v31, %v8639_v62  ;;  %v10202_v44 = vld [vmem:[%s8302_s23 + $0x1f8] sm:$0xff]  ;;  %v6230_v20 = vld [vmem:[%s8302_s23 + $0x5e8] sm:$0xff] }
 0x1f5   : > { %v1731_v37 = vmul.f32 %v6291_v3, %v8642_v16  ;;  %v1466_v63 = vadd.f32 %v1434_v29, %v1367_v59  ;;  %v1733_v32 = vmul.f32 %v6293_v11, %v8642_v16  ;;  %v1830_v34 = vmul.f32 %v6324_v53, %v8659_v30  ;;  %v6232_v1 = vld [vmem:[%s8302_s23 + $0x5f8] sm:$0xff] }
 0x1f6   : > { %v2572_v45 = vadd.f32 %v8574_v61, %v2538_v9  ;;  %v2574_v31 = vadd.f32 %v8574_v61, %v2540_v25  ;;  %v1468_v3 = vadd.f32 %v1436_v48, %v1369_v46  ;;  %v1832_v7 = vmul.f32 %v6326_v26, %v8659_v30  ;;  %v6263_v48 = vld [vmem:[%s8302_s23 + $0x6e8] sm:$0xff]  ;;  %v6298_v25 = vld [vmem:[%s8302_s23 + $0x7f8] sm:$0xff] }
 0x1f7   : > { %v2015_v11 = vmul.f32 %v8432_v6, %v10188_v2  ;;  %v1565_v52 = vadd.f32 %v1533_v43, %v1466_v63  ;;  %v2017_v12 = vmul.f32 %v8432_v6, %v10193_v58  ;;  %v2049_v55 = vmul.f32 %v10196_v0, %v8455_v14  ;;  %v6265_v43 = vld [vmem:[%s8302_s23 + $0x6f8] sm:$0xff] }
 0x1f8   : > { %v2604_v53 = vmax.f32 %v2572_v45, 0.0  ;;  %v2606_v26 = vmax.f32 %v2574_v31, 0.0  ;;  %v1567_v56 = vadd.f32 %v1535_v28, %v1468_v3  ;;  %v2051_v18 = vmul.f32 %v10202_v44, %v8455_v14  ;;  %v6329_v3 = vld [vmem:[%s8302_s23 + $0x8e8] sm:$0xff] }
 0x1f9   : > { %v2115_v23 = vmul.f32 %v10205_v47, %v8468_v19  ;;  %v1664_v36 = vadd.f32 %v1632_v54, %v1565_v52  ;;  %v2081_v13 = vadd.f32 %v2049_v55, %v2015_v11  ;;  %v2117_v8 = vmul.f32 %v6133_v22, %v8468_v19  ;;  %v6296_v54 = vld [vmem:[%s8302_s23 + $0x7e8] sm:$0xff]  ;;  %v6331_v11 = vld [vmem:[%s8302_s23 + $0x8f8] sm:$0xff] }
 0x1fa   : > { %v2181_v29 = vmul.f32 %v10211_v41, %v8491_v27  ;;  %v2624_v10 = vpack.c.bf16 %v2606_v26, %v2604_v53  ;;  %v1666_v33 = vadd.f32 %v1634_v24, %v1567_v56  ;;  %v2083_v9 = vadd.f32 %v2051_v18, %v2017_v12 }
 0x1fb   : > { %v2183_v59 = vmul.f32 %v10216_v5, %v8491_v27  ;;  %v1763_v28 = vadd.f32 %v1731_v37, %v1664_v36  ;;  %v2147_v46 = vadd.f32 %v2115_v23, %v2081_v13  ;;  %v2247_v45 = vmul.f32 %v6197_v57, %v8519_v38 }
 0x1fc   : > { %v2249_v63 = vmul.f32 %v10224_v42, %v8519_v38  ;;  %2837 = vmatmul.mubr.bf16.gmra.mxu0 %v2624_v10  ;;  %v1765_v31 = vadd.f32 %v1733_v32, %v1666_v33  ;;  %v2149_v24 = vadd.f32 %v2117_v8, %v2083_v9  ;;  %v2313_v53 = vmul.f32 %v6230_v20, %v8522_v39 }
 0x1fd   : > { %v2315_v52 = vmul.f32 %v6232_v1, %v8522_v39  ;;  %v1862_v12 = vadd.f32 %v1830_v34, %v1763_v28  ;;  %v2213_v55 = vadd.f32 %v2181_v29, %v2147_v46  ;;  %v2379_v37 = vmul.f32 %v6263_v48, %v8547_v50 }
 0x1fe   : > { %v2381_v26 = vmul.f32 %v6265_v43, %v8547_v50  ;;  %v1864_v56 = vadd.f32 %v1832_v7, %v1765_v31  ;;  %v2215_v18 = vadd.f32 %v2183_v59, %v2149_v24  ;;  %v2445_v23 = vmul.f32 %v6296_v54, %v8550_v51 }
 0x1ff   : > { %v2447_v36 = vmul.f32 %v6298_v25, %v8550_v51  ;;  %v1896_v32 = vadd.f32 %v8662_v21, %v1862_v12  ;;  %v2279_v13 = vadd.f32 %v2247_v45, %v2213_v55  ;;  %v2511_v8 = vmul.f32 %v6329_v3, %v8571_v60 }
 0x200   : > { %v2513_v10 = vmul.f32 %v6331_v11, %v8571_v60  ;;  %v1898_v34 = vadd.f32 %v8662_v21, %v1864_v56  ;;  %v2281_v29 = vadd.f32 %v2249_v63, %v2215_v18  ;;  %v1075_v33 = vmul.f32 %v8585_v15, %v10188_v2 }
 0x201   : > { %v1077_v7 = vmul.f32 %v8585_v15, %v10193_v58  ;;  %v1928_v9 = vmax.f32 %v1896_v32, 0.0  ;;  %v2345_v59 = vadd.f32 %v2313_v53, %v2279_v13  ;;  %v1142_v28 = vmul.f32 %v10196_v0, %v8588_v17 }
 0x202   : > { %v1144_v46 = vmul.f32 %v10202_v44, %v8588_v17  ;;  %v1930_v45 = vmax.f32 %v1898_v34, 0.0  ;;  %v2347_v31 = vadd.f32 %v2315_v52, %v2281_v29  ;;  %v1241_v24 = vmul.f32 %v10205_v47, %v8607_v35  ;;  %v10279_v34 = vld [vmem:[%s8302_s23 + $0xe0] sm:$0xff] }
 0x203   : > { %v1243_v63 = vmul.f32 %v6133_v22, %v8607_v35  ;;  %v2411_v12 = vadd.f32 %v2379_v37, %v2345_v59  ;;  %v1174_v2 = vadd.f32 %v1142_v28, %v1075_v33  ;;  %v1340_v58 = vmul.f32 %v10211_v41, %v8610_v40  ;;  %v10285_v29 = vld [vmem:[%s8302_s23 + $0x1e0] sm:$0xff] }
 0x204   : > { %v1176_v55 = vadd.f32 %v1144_v46, %v1077_v7  ;;  %v1948_v53 = vpack.c.bf16 %v1930_v45, %v1928_v9  ;;  %v2413_v56 = vadd.f32 %v2381_v26, %v2347_v31  ;;  %v1342_v0 = vmul.f32 %v10216_v5, %v8610_v40  ;;  %v10296_v59 = vld [vmem:[%s8302_s23 + $0x2e0] sm:$0xff] }
 0x205   : > { %v1439_v44 = vmul.f32 %v6197_v57, %v8625_v49  ;;  %v2477_v52 = vadd.f32 %v2445_v23, %v2411_v12  ;;  %v1273_v47 = vadd.f32 %v1241_v24, %v1174_v2  ;;  %v1441_v22 = vmul.f32 %v10224_v42, %v8625_v49  ;;  %v10282_v42 = vld [vmem:[%s8302_s23 + $0xf0] sm:$0xff] }
 0x206   : > { %v1275_v18 = vadd.f32 %v1243_v63, %v1176_v55  ;;  %3030 = vmatmul.mubr.bf16.gmra.mxu1 %v1948_v53  ;;  %v2479_v37 = vadd.f32 %v2447_v36, %v2413_v56  ;;  %v1538_v41 = vmul.f32 %v6230_v20, %v8628_v4  ;;  %v1540_v26 = vmul.f32 %v6232_v1, %v8628_v4  ;;  %v10312_v24 = vld [vmem:[%s8302_s23 + $0x3f0] sm:$0xff]  ;;  %v10315_v63 = vld [vmem:[%s8302_s23 + $0x4e0] sm:$0xff] }
 0x207   : > { %v1637_v32 = vmul.f32 %v6263_v48, %v8639_v62  ;;  %v2543_v5 = vadd.f32 %v2511_v8, %v2477_v52  ;;  %v1372_v13 = vadd.f32 %v1340_v58, %v1273_v47  ;;  %v1639_v23 = vmul.f32 %v6265_v43, %v8639_v62  ;;  %v10291_v8 = vld [vmem:[%s8302_s23 + $0x1f0] sm:$0xff]  ;;  %v10331_v47 = vld [vmem:[%s8302_s23 + $0x6e0] sm:$0xff] }
 0x208   : > { %v1374_v57 = vadd.f32 %v1342_v0, %v1275_v18  ;;  %v2545_v36 = vadd.f32 %v2513_v10, %v2479_v37  ;;  %v1736_v20 = vmul.f32 %v6296_v54, %v8642_v16  ;;  %v1738_v1 = vmul.f32 %v6298_v25, %v8642_v16  ;;  %v10299_v10 = vld [vmem:[%s8302_s23 + $0x2f0] sm:$0xff]  ;;  %v10303_v25 = vld [vmem:[%s8302_s23 + $0x3e0] sm:$0xff] }
 0x209   : > { %v1835_v48 = vmul.f32 %v6329_v3, %v8659_v30  ;;  %v2577_v43 = vadd.f32 %v8574_v61, %v2543_v5  ;;  %v1471_v33 = vadd.f32 %v1439_v44, %v1372_v13  ;;  %v1837_v9 = vmul.f32 %v6331_v11, %v8659_v30  ;;  %v10320_v55 = vld [vmem:[%s8302_s23 + $0x4f0] sm:$0xff]  ;;  %v6229_v44 = vld [vmem:[%s8302_s23 + $0x5e0] sm:$0xff] }
 0x20a   : > { %v1473_v7 = vadd.f32 %v1441_v22, %v1374_v57  ;;  %v2579_v54 = vadd.f32 %v8574_v61, %v2545_v36  ;;  %v2014_v3 = vmul.f32 %v8432_v6, %v10279_v34  ;;  %v2016_v28 = vmul.f32 %v8432_v6, %v10282_v42  ;;  %v10328_v52 = vld [vmem:[%s8302_s23 + $0x5f0] sm:$0xff]  ;;  %v6295_v13 = vld [vmem:[%s8302_s23 + $0x7e0] sm:$0xff] }
 0x20b   : > { %v2048_v46 = vmul.f32 %v10285_v29, %v8455_v14  ;;  %v2609_v11 = vmax.f32 %v2577_v43, 0.0  ;;  %v1570_v45 = vadd.f32 %v1538_v41, %v1471_v33  ;;  %v2050_v12 = vmul.f32 %v10291_v8, %v8455_v14  ;;  %v10336_v37 = vld [vmem:[%s8302_s23 + $0x6f0] sm:$0xff] }
 0x20c   : > { %v1572_v31 = vadd.f32 %v1540_v26, %v1473_v7  ;;  %v2611_v2 = vmax.f32 %v2579_v54, 0.0  ;;  %v2114_v58 = vmul.f32 %v10296_v59, %v8468_v19  ;;  %v2116_v53 = vmul.f32 %v10299_v10, %v8468_v19  ;;  %v10344_v57 = vld [vmem:[%s8302_s23 + $0x7f0] sm:$0xff] }
 0x20d   : > { %v2080_v6 = vadd.f32 %v2048_v46, %v2014_v3  ;;  %v1669_v56 = vadd.f32 %v1637_v32, %v1570_v45  ;;  %v2082_v14 = vadd.f32 %v2050_v12, %v2016_v28  ;;  %v2180_v18 = vmul.f32 %v10303_v25, %v8491_v27  ;;  %v6330_v33 = vld [vmem:[%s8302_s23 + $0x8f0] sm:$0xff] }
 0x20e   : > { %v1671_v0 = vadd.f32 %v1639_v23, %v1572_v31  ;;  %v2627_v22 = vpack.c.bf16 %v2611_v2, %v2609_v11  ;;  %v2182_v19 = vmul.f32 %v10312_v24, %v8491_v27  ;;  %v2246_v26 = vmul.f32 %v10315_v63, %v8519_v38  ;;  %v10347_v23 = vld [vmem:[%s8302_s23 + $0x8e0] sm:$0xff] }
 0x20f   : > { %v2146_v41 = vadd.f32 %v2114_v58, %v2080_v6  ;;  %v1768_v32 = vadd.f32 %v1736_v20, %v1669_v56  ;;  %v2148_v36 = vadd.f32 %v2116_v53, %v2082_v14  ;;  %v2248_v43 = vmul.f32 %v10320_v55, %v8519_v38 }
 0x210   : > { %v1770_v5 = vadd.f32 %v1738_v1, %v1671_v0  ;;  %2844 = vmatprep.mubr.bf16.mxu0 %v2627_v22  ;;  %v2312_v54 = vmul.f32 %v6229_v44, %v8522_v39  ;;  %v2314_v27 = vmul.f32 %v10328_v52, %v8522_v39  ;;  %v2378_v20 = vmul.f32 %v10331_v47, %v8547_v50 }
 0x211   : > { %v2212_v7 = vadd.f32 %v2180_v18, %v2146_v41  ;;  %v1867_v1 = vadd.f32 %v1835_v48, %v1768_v32  ;;  %v2214_v28 = vadd.f32 %v2182_v19, %v2148_v36  ;;  %v2380_v46 = vmul.f32 %v10336_v37, %v8547_v50 }
 0x212   : > { %v1869_v3 = vadd.f32 %v1837_v9, %v1770_v5  ;;  %v2444_v38 = vmul.f32 %v6295_v13, %v8550_v51  ;;  %v2446_v45 = vmul.f32 %v10344_v57, %v8550_v51  ;;  %v2510_v31 = vmul.f32 %v10347_v23, %v8571_v60 }
 0x213   : > { %v2278_v11 = vadd.f32 %v2246_v26, %v2212_v7  ;;  %v1901_v39 = vadd.f32 %v8662_v21, %v1867_v1  ;;  %v2280_v2 = vadd.f32 %v2248_v43, %v2214_v28  ;;  %v2512_v48 = vmul.f32 %v6330_v33, %v8571_v60  ;;  %v10440_v1 = vld [vmem:[%s8302_s23 + $0x108] sm:$0xff]  ;;  %v10445_v28 = vld [vmem:[%s8302_s23 + $0x118] sm:$0xff] }
 0x214   : > { %v1903_v12 = vadd.f32 %v8662_v21, %v1869_v3  ;;  %v1074_v50 = vmul.f32 %v8585_v15, %v10279_v34  ;;  %v1076_v6 = vmul.f32 %v8585_v15, %v10282_v42  ;;  %v1141_v51 = vmul.f32 %v10285_v29, %v8588_v17 }
 0x215   : > { %v2344_v9 = vadd.f32 %v2312_v54, %v2278_v11  ;;  %v1933_v58 = vmax.f32 %v1901_v39, 0.0  ;;  %v2346_v56 = vadd.f32 %v2314_v27, %v2280_v2  ;;  %v1143_v0 = vmul.f32 %v10291_v8, %v8588_v17  ;;  %v10450_v11 = vld [vmem:[%s8302_s23 + $0x208] sm:$0xff]  ;;  %v10457_v39 = vld [vmem:[%s8302_s23 + $0x218] sm:$0xff] }
 0x216   : > { %v1935_v53 = vmax.f32 %v1903_v12, 0.0  ;;  %v1173_v60 = vadd.f32 %v1141_v51, %v1074_v50  ;;  %v1240_v18 = vmul.f32 %v10296_v59, %v8607_v35  ;;  %v1242_v34 = vmul.f32 %v10299_v10, %v8607_v35 }
 0x217   : > { %v2410_v14 = vadd.f32 %v2378_v20, %v2344_v9  ;;  %v2412_v42 = vadd.f32 %v2380_v46, %v2346_v56  ;;  %v1175_v29 = vadd.f32 %v1143_v0, %v1076_v6  ;;  %v1339_v22 = vmul.f32 %v10303_v25, %v8610_v40  ;;  %v10467_v6 = vld [vmem:[%s8302_s23 + $0x308] sm:$0xff] }
 0x218   : > { %v1951_v15 = vpack.c.bf16 %v1935_v53, %v1933_v58  ;;  %v1272_v8 = vadd.f32 %v1240_v18, %v1173_v60  ;;  %v1341_v41 = vmul.f32 %v10312_v24, %v8610_v40  ;;  %v1438_v59 = vmul.f32 %v10315_v63, %v8625_v49  ;;  %v10474_v53 = vld [vmem:[%s8302_s23 + $0x318] sm:$0xff] }
 0x219   : > { %v2476_v17 = vadd.f32 %v2444_v38, %v2410_v14  ;;  %v2478_v35 = vadd.f32 %v2446_v45, %v2412_v42  ;;  %v1274_v10 = vadd.f32 %v1242_v34, %v1175_v29  ;;  %v1440_v19 = vmul.f32 %v10320_v55, %v8625_v49 }
 0x21a   : > { %3037 = vmatprep.mubr.bf16.mxu1 %v1951_v15  ;;  %v1537_v26 = vmul.f32 %v6229_v44, %v8628_v4  ;;  %v1371_v32 = vadd.f32 %v1339_v22, %v1272_v8  ;;  %v1539_v5 = vmul.f32 %v10328_v52, %v8628_v4  ;;  %v1636_v40 = vmul.f32 %v10331_v47, %v8639_v62  ;;  %v10487_v15 = vld [vmem:[%s8302_s23 + $0x408] sm:$0xff]  ;;  %v10492_v22 = vld [vmem:[%s8302_s23 + $0x418] sm:$0xff] }
 0x21b   : > { %v2542_v25 = vadd.f32 %v2510_v31, %v2476_v17  ;;  %v2544_v24 = vadd.f32 %v2512_v48, %v2478_v35  ;;  %v1373_v63 = vadd.f32 %v1341_v41, %v1274_v10  ;;  %v1638_v49 = vmul.f32 %v10336_v37, %v8639_v62  ;;  %v10497_v8 = vld [vmem:[%s8302_s23 + $0x508] sm:$0xff] }
 0x21c   : > { %v1735_v55 = vmul.f32 %v6295_v13, %v8642_v16  ;;  %v1470_v36 = vadd.f32 %v1438_v59, %v1371_v32  ;;  %v1737_v4 = vmul.f32 %v10344_v57, %v8642_v16  ;;  %v1834_v52 = vmul.f32 %v10347_v23, %v8659_v30  ;;  %v10420_v16 = vld [vmem:[%s8302_s23 + $0x8] sm:$0xff]  ;;  %v10425_v23 = vld [vmem:[%s8302_s23 + $0x18] sm:$0xff] }
 0x21d   : > { %v2576_v44 = vadd.f32 %v8574_v61, %v2542_v25  ;;  %v2578_v47 = vadd.f32 %v8574_v61, %v2544_v24  ;;  %v1472_v43 = vadd.f32 %v1440_v19, %v1373_v63  ;;  %v1836_v62 = vmul.f32 %v6330_v33, %v8659_v30  ;;  %v10502_v59 = vld [vmem:[%s8302_s23 + $0x518] sm:$0xff] }
 0x21e   : > { %v10415_v37 = vstv %s10375_s12  ;;  %v1569_v7 = vadd.f32 %v1537_v26, %v1470_v36  ;;  %v10432_v54 = vstv %s10381_s13  ;;  %v10435_v27 = vstv %s10385_s16  ;;  %s10506_s12 = sld [smem:[#allocation3 + $0x1e]]  ;;  %v7245_v24 = vld [vmem:[%s8302_s23 + $0x618] sm:$0xff] }
 0x21f   : > { %v2608_v13 = vmax.f32 %v2576_v44, 0.0  ;;  %v3049_v57 = vmul.f32 %v10420_v16, %v10415_v37  ;;  %v3051_v61 = vmul.f32 %v10425_v23, %v10415_v37  ;;  %v2610_v30 = vmax.f32 %v2578_v47, 0.0  ;;  %s10512_s13 = sld [smem:[#allocation3 + $0x1f]]  ;;  %v7247_v47 = vld [vmem:[%s8302_s23 + $0x718] sm:$0xff] }
 0x220   : > { %v1571_v33 = vadd.f32 %v1539_v5, %v1472_v43  ;;  %v1668_v20 = vadd.f32 %v1636_v40, %v1569_v7  ;;  %v3083_v3 = vmul.f32 %v10440_v1, %v10432_v54  ;;  %v3085_v46 = vmul.f32 %v10445_v28, %v10432_v54  ;;  %v7244_v5 = vld [vmem:[%s8302_s23 + $0x608] sm:$0xff]  ;;  %s10524_s16 = sld [smem:[#allocation3 + $0x20]] }
 0x221   : > { %v3149_v38 = vmul.f32 %v10450_v11, %v10435_v27  ;;  %v2626_v45 = vpack.c.bf16 %v2610_v30, %v2608_v13  ;;  %v3151_v12 = vmul.f32 %v10457_v39, %v10435_v27  ;;  %v10462_v2 = vstv %s10394_s26  ;;  %s10534_s26 = sld [smem:[#allocation3 + $0x21]] }
 0x222   : > { %v1670_v31 = vadd.f32 %v1638_v49, %v1571_v33  ;;  %v1767_v48 = vadd.f32 %v1735_v55, %v1668_v20  ;;  %v3115_v9 = vadd.f32 %v3083_v3, %v3049_v57  ;;  %v3117_v50 = vadd.f32 %v3085_v46, %v3051_v61  ;;  %v7248_v61 = vld [vmem:[%s8302_s23 + $0x808] sm:$0xff]  ;;  %v7249_v33 = vld [vmem:[%s8302_s23 + $0x818] sm:$0xff] }
 0x223   : > { %v3215_v51 = vmul.f32 %v10467_v6, %v10462_v2  ;;  %2845 = vmatmul.mubr.bf16.gmra.mxu0 %v2626_v45  ;;  %v3217_v56 = vmul.f32 %v10474_v53, %v10462_v2  ;;  %v10479_v0 = vstv %s10400_s22  ;;  %v10482_v14 = vstv %s10405_s25  ;;  %s10549_s22 = sld [smem:[#allocation3 + $0x22]] }
 0x224   : > { %v1769_v58 = vadd.f32 %v1737_v4, %v1670_v31  ;;  %v1866_v60 = vadd.f32 %v1834_v52, %v1767_v48  ;;  %v3181_v18 = vadd.f32 %v3149_v38, %v3115_v9  ;;  %v3183_v34 = vadd.f32 %v3151_v12, %v3117_v50  ;;  %v7246_v4 = vld [vmem:[%s8302_s23 + $0x708] sm:$0xff]  ;;  %s10555_s25 = sld [smem:[#allocation3 + $0x23]] }
 0x225   : > { %v3281_v42 = vmul.f32 %v10487_v15, %v10479_v0  ;;  %v3283_v17 = vmul.f32 %v10492_v22, %v10479_v0  ;;  %v3347_v41 = vmul.f32 %v10497_v8, %v10482_v14  ;;  %v3349_v35 = vmul.f32 %v10502_v59, %v10482_v14 }
 0x226   : > { %v1868_v29 = vadd.f32 %v1836_v62, %v1769_v58  ;;  %v1900_v10 = vadd.f32 %v8662_v21, %v1866_v60  ;;  %v3247_v19 = vadd.f32 %v3215_v51, %v3181_v18  ;;  %v3249_v26 = vadd.f32 %v3217_v56, %v3183_v34 }
 0x227   : > { %v10510_v25 = vstv %s10429_s15  ;;  %v10520_v49 = vstv %s10437_s27  ;;  %v10529_v62 = vstv %s10454_s28  ;;  %v10532_v13 = vstv %s10464_s17  ;;  %s7584_s27 = smov 64   ;;  %s7585_s28 = smov 32  }
 0x228   : > { %v1902_v32 = vadd.f32 %v8662_v21, %v1868_v29  ;;  %v3413_v40 = vmul.f32 %v7244_v5, %v10510_v25  ;;  %v3415_v63 = vmul.f32 %v7245_v24, %v10510_v25  ;;  %12249 = vst [vmem:[#allocation9_spill] sm:$0xff] %v10520_v49  ;;  %v1932_v55 = vmax.f32 %v1900_v10, 0.0  ;;  %12250 = vst [vmem:[#allocation10_spill] sm:$0xff] %v10529_v62 }
 0x229   : > { %v3313_v44 = vadd.f32 %v3281_v42, %v3247_v19  ;;  %v3315_v36 = vadd.f32 %v3283_v17, %v3249_v26  ;;  %v3479_v52 = vmul.f32 %v7246_v4, %v10520_v49  ;;  %v3481_v43 = vmul.f32 %v7247_v47, %v10520_v49 }
 0x22a   : > { %v1934_v21 = vmax.f32 %v1902_v32, 0.0  ;;  %v3545_v30 = vmul.f32 %v7248_v61, %v10529_v62  ;;  %v3547_v20 = vmul.f32 %v7249_v33, %v10529_v62  ;;  %v10541_v46 = vstv %s10417_s14  ;;  %s10571_s14 = sld [smem:[#allocation5 + $0x3]] }
 0x22b   : > { %v3379_v7 = vadd.f32 %v3347_v41, %v3313_v44  ;;  %v3381_v57 = vadd.f32 %v3349_v35, %v3315_v36  ;;  %v10544_v38 = vstv %s10471_s29  ;;  %v10547_v45 = vstv %s10484_s30 }
 0x22c   : > { %v1950_v3 = vpack.c.bf16 %v1934_v21, %v1932_v55  ;;  %v3934_v48 = vmul.f32 %v10420_v16, %v10541_v46  ;;  %v3936_v9 = vmul.f32 %v10425_v23, %v10541_v46  ;;  %v3968_v50 = vmul.f32 %v10440_v1, %v10544_v38 }
 0x22d   : > { %v3445_v31 = vadd.f32 %v3413_v40, %v3379_v7  ;;  %v3447_v12 = vadd.f32 %v3415_v63, %v3381_v57  ;;  %v3970_v51 = vmul.f32 %v10445_v28, %v10544_v38  ;;  %v4034_v58 = vmul.f32 %v10450_v11, %v10547_v45 }
 0x22e   : > { %3038 = vmatmul.mubr.bf16.gmra.mxu1 %v1950_v3  ;;  %v4036_v56 = vmul.f32 %v10457_v39, %v10547_v45  ;;  %v10566_v23 = vstv %s10506_s12  ;;  %v10569_v18 = vstv %s10512_s13  ;;  %v4000_v1 = vadd.f32 %v3968_v50, %v3934_v48  ;;  %v7250_v3 = vld [vmem:[%s8302_s23] sm:$0xff]  ;;  %v7253_v48 = vld [vmem:[%s8302_s23 + $0x110] sm:$0xff]  ;;  %s7586_s13 = smov 96  }
 0x22f   : > { %v3511_v16 = vadd.f32 %v3479_v52, %v3445_v31  ;;  %v3513_v60 = vadd.f32 %v3481_v43, %v3447_v12  ;;  %v4002_v34 = vadd.f32 %v3970_v51, %v3936_v9  ;;  %v4100_v28 = vmul.f32 %v10467_v6, %v10566_v23  ;;  %v7251_v12 = vld [vmem:[%s8302_s23 + $0x10] sm:$0xff]  ;;  %v7254_v9 = vld [vmem:[%s8302_s23 + $0x200] sm:$0xff] }
 0x230   : > { %v4102_v11 = vmul.f32 %v10474_v53, %v10566_v23  ;;  %v4166_v29 = vmul.f32 %v10487_v15, %v10569_v18  ;;  %v4168_v17 = vmul.f32 %v10492_v22, %v10569_v18  ;;  %v4066_v41 = vadd.f32 %v4034_v58, %v4000_v1  ;;  %v7255_v51 = vld [vmem:[%s8302_s23 + $0x210] sm:$0xff] }
 0x231   : > { %v3577_v42 = vadd.f32 %v3545_v30, %v3511_v16  ;;  %v3579_v39 = vadd.f32 %v3547_v20, %v3513_v60  ;;  %v4068_v35 = vadd.f32 %v4036_v56, %v4002_v34  ;;  %v10582_v10 = vstv %s10524_s16  ;;  %v7256_v60 = vld [vmem:[%s8302_s23 + $0x300] sm:$0xff]  ;;  %v7257_v34 = vld [vmem:[%s8302_s23 + $0x310] sm:$0xff] }
 0x232   : > { %v10585_v19 = vstv %s10534_s26  ;;  %v4232_v26 = vmul.f32 %v10497_v8, %v10582_v10  ;;  %v4234_v15 = vmul.f32 %v10502_v59, %v10582_v10  ;;  %v4132_v32 = vadd.f32 %v4100_v28, %v4066_v41 }
 0x233   : > { %v3611_v6 = vadd.f32 %v10532_v13, %v3577_v42  ;;  %v3613_v53 = vadd.f32 %v10532_v13, %v3579_v39  ;;  %v4134_v22 = vadd.f32 %v4102_v11, %v4068_v35  ;;  %v4298_v40 = vmul.f32 %v7244_v5, %v10585_v19  ;;  %v7258_v39 = vld [vmem:[%s8302_s23 + $0x400] sm:$0xff] }
 0x234   : > { %v4300_v63 = vmul.f32 %v7245_v24, %v10585_v19  ;;  %v10596_v36 = vstv %s10549_s22  ;;  %v10599_v52 = vstv %s10555_s25  ;;  %v4198_v8 = vadd.f32 %v4166_v29, %v4132_v32  ;;  %s6066_s22 = sshll.u32 %s6054_s20, 4 }
 0x235   : > { %v3643_v55 = vmax.f32 %v3611_v6, 0.0  ;;  %v3645_v44 = vmax.f32 %v3613_v53, 0.0  ;;  %v4200_v21 = vadd.f32 %v4168_v17, %v4134_v22  ;;  %v4364_v59 = vmul.f32 %v7246_v4, %v10596_v36  ;;  %v7259_v17 = vld [vmem:[%s8302_s23 + $0x410] sm:$0xff]  ;;  %v7260_v53 = vld [vmem:[%s8302_s23 + $0x500] sm:$0xff]  ;;  %p1006_p7 = scmp.lt.s32.totalorder %s6066_s22, 31 }
 0x236   : > { %v4366_v43 = vmul.f32 %v7247_v47, %v10596_v36  ;;  %v4430_v7 = vmul.f32 %v7248_v61, %v10599_v52  ;;  %v4432_v24 = vmul.f32 %v7249_v33, %v10599_v52  ;;  %v10606_v57 = vstv %s10571_s14  ;;  %v7252_v47 = vld [vmem:[%s8302_s23 + $0x100] sm:$0xff] }
 0x237   : > { %v3675_v5 = vpack.c.bf16 %v3645_v44, %v3643_v55  ;;  %12251 = vst [vmem:[#allocation11_spill] sm:$0xff] %v10606_v57  ;;  %v4264_v30 = vadd.f32 %v4232_v26, %v4198_v8  ;;  %v4266_v20 = vadd.f32 %v4234_v15, %v4200_v21  ;;  %v3048_v31 = vmul.f32 %v7250_v3, %v10415_v37  ;;  %v7261_v15 = vld [vmem:[%s8302_s23 + $0x510] sm:$0xff]  ;;  %s12388_s22 = smov (!%p1006_p7, %s6066_s22), 31 }
 0x238   : > { %v3050_v4 = vmul.f32 %v7251_v12, %v10415_v37  ;;  %v3082_v61 = vmul.f32 %v7252_v47, %v10432_v54  ;;  %v3084_v33 = vmul.f32 %v7253_v48, %v10432_v54  ;;  %v3148_v50 = vmul.f32 %v7254_v9, %v10435_v27  ;;  %v7263_v44 = vld [vmem:[%s8302_s23 + $0x610] sm:$0xff]  ;;  %s6067_s25 = sshll.u32 %s12388_s22, 3 }
 0x239   : > { %3850 = vmatprep.mubr.bf16.mxu0 %v3675_v5  ;;  %v3150_v58 = vmul.f32 %v7255_v51, %v10435_v27  ;;  %v4330_v56 = vadd.f32 %v4298_v40, %v4264_v30  ;;  %v4332_v16 = vadd.f32 %v4300_v63, %v4266_v20  ;;  %v3214_v1 = vmul.f32 %v7256_v60, %v10462_v2  ;;  %v7262_v63 = vld [vmem:[%s8302_s23 + $0x600] sm:$0xff]  ;;  %v7265_v30 = vld [vmem:[%s8302_s23 + $0x710] sm:$0xff] }
 0x23a   : > { %v3216_v28 = vmul.f32 %v7257_v34, %v10462_v2  ;;  %v3114_v11 = vadd.f32 %v3082_v61, %v3048_v31  ;;  %v3116_v42 = vadd.f32 %v3084_v33, %v3050_v4  ;;  %v3280_v29 = vmul.f32 %v7258_v39, %v10479_v0  ;;  %v7264_v5 = vld [vmem:[%s8302_s23 + $0x700] sm:$0xff] }
 0x23b   : > { %v3282_v41 = vmul.f32 %v7259_v17, %v10479_v0  ;;  %v4396_v35 = vadd.f32 %v4364_v59, %v4330_v56  ;;  %v4398_v6 = vadd.f32 %v4366_v43, %v4332_v16  ;;  %v3346_v26 = vmul.f32 %v7260_v53, %v10482_v14  ;;  %v7266_v61 = vld [vmem:[%s8302_s23 + $0x800] sm:$0xff] }
 0x23c   : > { %v3348_v32 = vmul.f32 %v7261_v15, %v10482_v14  ;;  %v3180_v22 = vadd.f32 %v3148_v50, %v3114_v11  ;;  %v3182_v40 = vadd.f32 %v3150_v58, %v3116_v42  ;;  %v3412_v55 = vmul.f32 %v7262_v63, %v10510_v25  ;;  %v7267_v50 = vld [vmem:[%s8302_s23 + $0x810] sm:$0xff] }
 0x23d   : > { %v3414_v8 = vmul.f32 %v7263_v44, %v10510_v25  ;;  %v4462_v21 = vadd.f32 %v4430_v7, %v4396_v35  ;;  %v4464_v59 = vadd.f32 %v4432_v24, %v4398_v6  ;;  %v3478_v43 = vmul.f32 %v7264_v5, %v10520_v49 }
 0x23e   : > { %v3480_v20 = vmul.f32 %v7265_v30, %v10520_v49  ;;  %v3246_v31 = vadd.f32 %v3214_v1, %v3180_v22  ;;  %v3248_v4 = vadd.f32 %v3216_v28, %v3182_v40  ;;  %v3544_v33 = vmul.f32 %v7266_v61, %v10529_v62 }
 0x23f   : > { %v3546_v58 = vmul.f32 %v7267_v50, %v10529_v62  ;;  %v4496_v56 = vadd.f32 %v10606_v57, %v4462_v21  ;;  %v4498_v16 = vadd.f32 %v10606_v57, %v4464_v59  ;;  %v3933_v7 = vmul.f32 %v7250_v3, %v10541_v46 }
 0x240   : > { %v3935_v24 = vmul.f32 %v7251_v12, %v10541_v46  ;;  %v3312_v11 = vadd.f32 %v3280_v29, %v3246_v31  ;;  %v3314_v42 = vadd.f32 %v3282_v41, %v3248_v4  ;;  %v3967_v35 = vmul.f32 %v7252_v47, %v10544_v38 }
 0x241   : > { %v3969_v1 = vmul.f32 %v7253_v48, %v10544_v38  ;;  %v4528_v28 = vmax.f32 %v4496_v56, 0.0  ;;  %v4530_v6 = vmax.f32 %v4498_v16, 0.0  ;;  %v4033_v22 = vmul.f32 %v7254_v9, %v10547_v45  ;;  %v7269_v56 = vld [vmem:[%s8302_s23 + $0x38] sm:$0xff] }
 0x242   : > { %v4035_v40 = vmul.f32 %v7255_v51, %v10547_v45  ;;  %v3378_v62 = vadd.f32 %v3346_v26, %v3312_v11  ;;  %v3380_v21 = vadd.f32 %v3348_v32, %v3314_v42  ;;  %v3999_v49 = vadd.f32 %v3967_v35, %v3933_v7  ;;  %v7271_v7 = vld [vmem:[%s8302_s23 + $0x138] sm:$0xff]  ;;  %v7272_v11 = vld [vmem:[%s8302_s23 + $0x228] sm:$0xff] }
 0x243   : > { %v4001_v59 = vadd.f32 %v3969_v1, %v3935_v24  ;;  %v4560_v57 = vpack.c.bf16 %v4530_v6, %v4528_v28  ;;  %v4099_v3 = vmul.f32 %v7256_v60, %v10566_v23  ;;  %v4101_v12 = vmul.f32 %v7257_v34, %v10566_v23  ;;  %v7273_v35 = vld [vmem:[%s8302_s23 + $0x238] sm:$0xff] }
 0x244   : > { %v4165_v29 = vmul.f32 %v7258_v39, %v10569_v18  ;;  %v3444_v47 = vadd.f32 %v3412_v55, %v3378_v62  ;;  %v3446_v41 = vadd.f32 %v3414_v8, %v3380_v21  ;;  %v4065_v48 = vadd.f32 %v4033_v22, %v3999_v49 }
 0x245   : > { %v4067_v31 = vadd.f32 %v4035_v40, %v4001_v59  ;;  %4735 = vmatprep.mubr.bf16.mxu1 %v4560_v57  ;;  %v4167_v9 = vmul.f32 %v7259_v17, %v10569_v18  ;;  %v4231_v51 = vmul.f32 %v7260_v53, %v10582_v10  ;;  %v4233_v26 = vmul.f32 %v7261_v15, %v10582_v10 }
 0x246   : > { %v4297_v32 = vmul.f32 %v7262_v63, %v10585_v19  ;;  %v3510_v60 = vadd.f32 %v3478_v43, %v3444_v47  ;;  %v3512_v4 = vadd.f32 %v3480_v20, %v3446_v41  ;;  %v4131_v34 = vadd.f32 %v4099_v3, %v4065_v48  ;;  %v7268_v43 = vld [vmem:[%s8302_s23 + $0x28] sm:$0xff] }
 0x247   : > { %v4133_v39 = vadd.f32 %v4101_v12, %v4067_v31  ;;  %v4299_v62 = vmul.f32 %v7263_v44, %v10585_v19  ;;  %v4363_v49 = vmul.f32 %v7264_v5, %v10596_v36  ;;  %v4365_v57 = vmul.f32 %v7265_v30, %v10596_v36  ;;  %v7270_v5 = vld [vmem:[%s8302_s23 + $0x128] sm:$0xff] }
 0x248   : > { %v4429_v17 = vmul.f32 %v7266_v61, %v10599_v52  ;;  %v3576_v53 = vadd.f32 %v3544_v33, %v3510_v60  ;;  %v3578_v55 = vadd.f32 %v3546_v58, %v3512_v4  ;;  %v4197_v15 = vadd.f32 %v4165_v29, %v4131_v34  ;;  %v7274_v3 = vld [vmem:[%s8302_s23 + $0x328] sm:$0xff]  ;;  %v7275_v29 = vld [vmem:[%s8302_s23 + $0x338] sm:$0xff] }
 0x249   : > { %v4199_v63 = vadd.f32 %v4167_v9, %v4133_v39  ;;  %v4431_v8 = vmul.f32 %v7267_v50, %v10599_v52  ;;  %v3053_v20 = vmul.f32 %v7268_v43, %v10415_v37  ;;  %v3055_v44 = vmul.f32 %v7269_v56, %v10415_v37  ;;  %v7276_v9 = vld [vmem:[%s8302_s23 + $0x428] sm:$0xff]  ;;  %v7277_v60 = vld [vmem:[%s8302_s23 + $0x438] sm:$0xff] }
 0x24a   : > { %v3087_v30 = vmul.f32 %v7270_v5, %v10432_v54  ;;  %v3610_v61 = vadd.f32 %v10532_v13, %v3576_v53  ;;  %v3612_v33 = vadd.f32 %v10532_v13, %v3578_v55  ;;  %v4263_v58 = vadd.f32 %v4231_v51, %v4197_v15  ;;  %v7278_v34 = vld [vmem:[%s8302_s23 + $0x528] sm:$0xff] }
 0x24b   : > { %v4265_v16 = vadd.f32 %v4233_v26, %v4199_v63  ;;  %v3089_v50 = vmul.f32 %v7271_v7, %v10432_v54  ;;  %v3153_v42 = vmul.f32 %v7272_v11, %v10435_v27  ;;  %v3155_v1 = vmul.f32 %v7273_v35, %v10435_v27  ;;  %v7280_v55 = vld [vmem:[%s8302_s23 + $0x628] sm:$0xff] }
 0x24c   : > { %v3119_v24 = vadd.f32 %v3087_v30, %v3053_v20  ;;  %v3642_v28 = vmax.f32 %v3610_v61, 0.0  ;;  %v3644_v6 = vmax.f32 %v3612_v33, 0.0  ;;  %v4329_v22 = vadd.f32 %v4297_v32, %v4263_v58  ;;  %v7282_v61 = vld [vmem:[%s8302_s23 + $0x728] sm:$0xff]  ;;  %v12252_v33 = vld [vmem:[#allocation9_spill] sm:$0xff] }
 0x24d   : > { %v4331_v40 = vadd.f32 %v4299_v62, %v4265_v16  ;;  %v3121_v21 = vadd.f32 %v3089_v50, %v3055_v44  ;;  %v3219_v12 = vmul.f32 %v7274_v3, %v10462_v2  ;;  %v3221_v47 = vmul.f32 %v7275_v29, %v10462_v2  ;;  %v7281_v44 = vld [vmem:[%s8302_s23 + $0x638] sm:$0xff]  ;;  %v12253_v16 = vld [vmem:[#allocation11_spill] sm:$0xff] }
 0x24e   : > { %v3185_v59 = vadd.f32 %v3153_v42, %v3119_v24  ;;  %v3674_v41 = vpack.c.bf16 %v3644_v6, %v3642_v28  ;;  %v4395_v48 = vadd.f32 %v4363_v49, %v4329_v22  ;;  %v3285_v51 = vmul.f32 %v7276_v9, %v10479_v0  ;;  %v7279_v49 = vld [vmem:[%s8302_s23 + $0x538] sm:$0xff]  ;;  %v7284_v42 = vld [vmem:[%s8302_s23 + $0x828] sm:$0xff] }
 0x24f   : > { %v4397_v31 = vadd.f32 %v4365_v57, %v4331_v40  ;;  %v3187_v26 = vadd.f32 %v3155_v1, %v3121_v21  ;;  %v3287_v4 = vmul.f32 %v7277_v60, %v10479_v0  ;;  %v3351_v39 = vmul.f32 %v7278_v34, %v10482_v14  ;;  %v12254_v1 = vld [vmem:[#allocation10_spill] sm:$0xff]  ;;  %v7285_v40 = vld [vmem:[%s8302_s23 + $0x838] sm:$0xff] }
 0x250   : > { %v3251_v32 = vadd.f32 %v3219_v12, %v3185_v59  ;;  %3851 = vmatmul.mubr.bf16.vlgmr.msra.gmra.mxu0 %v3674_v41  ;;  %v4461_v62 = vadd.f32 %v4429_v17, %v4395_v48  ;;  %v3353_v57 = vmul.f32 %v7279_v49, %v10482_v14  ;;  %v3417_v15 = vmul.f32 %v7280_v55, %v10510_v25 }
 0x251   : > { %v4463_v53 = vadd.f32 %v4431_v8, %v4397_v31  ;;  %v3253_v63 = vadd.f32 %v3221_v47, %v3187_v26  ;;  %v3419_v30 = vmul.f32 %v7281_v44, %v10510_v25  ;;  %v3483_v58 = vmul.f32 %v7282_v61, %v12252_v33  ;;  %v7283_v8 = vld [vmem:[%s8302_s23 + $0x738] sm:$0xff] }
 0x252   : > { %v3317_v20 = vadd.f32 %v3285_v51, %v3251_v32  ;;  %v4495_v50 = vadd.f32 %v12253_v16, %v4461_v62  ;;  %v3485_v24 = vmul.f32 %v7283_v8, %v12252_v33  ;;  %v3549_v28 = vmul.f32 %v7284_v42, %v12254_v1 }
 0x253   : > { %v4497_v17 = vadd.f32 %v12253_v16, %v4463_v53  ;;  %v3319_v6 = vadd.f32 %v3287_v4, %v3253_v63  ;;  %v3551_v21 = vmul.f32 %v7285_v40, %v12254_v1  ;;  %v3938_v59 = vmul.f32 %v7268_v43, %v10541_v46 }
 0x254   : > { %v3383_v22 = vadd.f32 %v3351_v39, %v3317_v20  ;;  %v4527_v12 = vmax.f32 %v4495_v50, 0.0  ;;  %v3940_v41 = vmul.f32 %v7269_v56, %v10541_v46  ;;  %v3972_v48 = vmul.f32 %v7270_v5, %v10544_v38 }
 0x255   : > { %v4529_v47 = vmax.f32 %v4497_v17, 0.0  ;;  %v3385_v31 = vadd.f32 %v3353_v57, %v3319_v6  ;;  %v3974_v26 = vmul.f32 %v7271_v7, %v10544_v38  ;;  %v4038_v32 = vmul.f32 %v7272_v11, %v10547_v45 }
 0x256   : > { %v3449_v51 = vadd.f32 %v3417_v15, %v3383_v22  ;;  %v4004_v4 = vadd.f32 %v3972_v48, %v3938_v59  ;;  %v4040_v39 = vmul.f32 %v7273_v35, %v10547_v45  ;;  %v4104_v53 = vmul.f32 %v7274_v3, %v10566_v23  ;;  %v7286_v22 = vld [vmem:[%s8302_s23 + $0x20] sm:$0xff]  ;;  %v7287_v59 = vld [vmem:[%s8302_s23 + $0x30] sm:$0xff] }
 0x257   : > { %v4559_v62 = vpack.c.bf16 %v4529_v47, %v4527_v12  ;;  %v3451_v63 = vadd.f32 %v3419_v30, %v3385_v31  ;;  %v4006_v20 = vadd.f32 %v3974_v26, %v3940_v41  ;;  %v4106_v50 = vmul.f32 %v7275_v29, %v10566_v23  ;;  %v7290_v48 = vld [vmem:[%s8302_s23 + $0x220] sm:$0xff] }
 0x258   : > { %v3515_v43 = vadd.f32 %v3483_v58, %v3449_v51  ;;  %v4070_v56 = vadd.f32 %v4038_v32, %v4004_v4  ;;  %v4170_v5 = vmul.f32 %v7276_v9, %v10569_v18  ;;  %v4172_v57 = vmul.f32 %v7277_v60, %v10569_v18  ;;  %v7291_v32 = vld [vmem:[%s8302_s23 + $0x230] sm:$0xff]  ;;  %v7292_v4 = vld [vmem:[%s8302_s23 + $0x320] sm:$0xff] }
 0x259   : > { %4736 = vmatmul.mubr.bf16.vlgmr.msra.gmra.mxu1 %v4559_v62  ;;  %v4236_v7 = vmul.f32 %v7278_v34, %v10582_v10  ;;  %v3517_v11 = vadd.f32 %v3485_v24, %v3451_v63  ;;  %v4072_v17 = vadd.f32 %v4040_v39, %v4006_v20  ;;  %v4238_v35 = vmul.f32 %v7279_v49, %v10582_v10  ;;  %v7293_v20 = vld [vmem:[%s8302_s23 + $0x330] sm:$0xff] }
 0x25a   : > { %v3581_v15 = vadd.f32 %v3549_v28, %v3515_v43  ;;  %v4136_v3 = vadd.f32 %v4104_v53, %v4070_v56  ;;  %v4302_v30 = vmul.f32 %v7280_v55, %v10585_v19  ;;  %v4304_v29 = vmul.f32 %v7281_v44, %v10585_v19 }
 0x25b   : > { %v4368_v58 = vmul.f32 %v7282_v61, %v10596_v36  ;;  %v3583_v9 = vadd.f32 %v3551_v21, %v3517_v11  ;;  %v4138_v34 = vadd.f32 %v4106_v50, %v4072_v17  ;;  %v4370_v24 = vmul.f32 %v7283_v8, %v10596_v36  ;;  %v7288_v8 = vld [vmem:[%s8302_s23 + $0x120] sm:$0xff]  ;;  %v7295_v11 = vld [vmem:[%s8302_s23 + $0x430] sm:$0xff] }
 0x25c   : > { %v3615_v60 = vadd.f32 %v10532_v13, %v3581_v15  ;;  %v4202_v28 = vadd.f32 %v4170_v5, %v4136_v3  ;;  %v4434_v49 = vmul.f32 %v7284_v42, %v10599_v52  ;;  %v4436_v6 = vmul.f32 %v7285_v40, %v10599_v52  ;;  %v7289_v42 = vld [vmem:[%s8302_s23 + $0x130] sm:$0xff] }
 0x25d   : > { %v3052_v55 = vmul.f32 %v7286_v22, %v10415_v37  ;;  %v3617_v44 = vadd.f32 %v10532_v13, %v3583_v9  ;;  %v4204_v21 = vadd.f32 %v4172_v57, %v4138_v34  ;;  %v3054_v12 = vmul.f32 %v7287_v59, %v10415_v37  ;;  %v7294_v57 = vld [vmem:[%s8302_s23 + $0x420] sm:$0xff]  ;;  %v7297_v34 = vld [vmem:[%s8302_s23 + $0x530] sm:$0xff] }
 0x25e   : > { %v3647_v61 = vmax.f32 %v3615_v60, 0.0  ;;  %v4268_v47 = vadd.f32 %v4236_v7, %v4202_v28  ;;  %v3086_v41 = vmul.f32 %v7288_v8, %v10432_v54  ;;  %v3088_v40 = vmul.f32 %v7289_v42, %v10432_v54  ;;  %v7298_v28 = vld [vmem:[%s8302_s23 + $0x620] sm:$0xff] }
 0x25f   : > { %v3152_v31 = vmul.f32 %v7290_v48, %v10435_v27  ;;  %v3649_v51 = vmax.f32 %v3617_v44, 0.0  ;;  %v4270_v26 = vadd.f32 %v4238_v35, %v4204_v21  ;;  %v3154_v62 = vmul.f32 %v7291_v32, %v10435_v27  ;;  %v7299_v44 = vld [vmem:[%s8302_s23 + $0x630] sm:$0xff] }
 0x260   : > { %v3218_v39 = vmul.f32 %v7292_v4, %v10462_v2  ;;  %v4334_v53 = vadd.f32 %v4302_v30, %v4268_v47  ;;  %v3118_v63 = vadd.f32 %v3086_v41, %v3052_v55  ;;  %v3120_v43 = vadd.f32 %v3088_v40, %v3054_v12  ;;  %v7296_v30 = vld [vmem:[%s8302_s23 + $0x520] sm:$0xff] }
 0x261   : > { %v3220_v50 = vmul.f32 %v7293_v20, %v10462_v2  ;;  %v3677_v56 = vpack.c.bf16 %v3649_v51, %v3647_v61  ;;  %v4336_v5 = vadd.f32 %v4304_v29, %v4270_v26  ;;  %v3284_v7 = vmul.f32 %v7294_v57, %v10479_v0  ;;  %v7300_v47 = vld [vmem:[%s8302_s23 + $0x720] sm:$0xff] }
 0x262   : > { %v3286_v15 = vmul.f32 %v7295_v11, %v10479_v0  ;;  %v4400_v17 = vadd.f32 %v4368_v58, %v4334_v53  ;;  %v3184_v35 = vadd.f32 %v3152_v31, %v3118_v63  ;;  %v3186_v3 = vadd.f32 %v3154_v62, %v3120_v43  ;;  %v7301_v31 = vld [vmem:[%s8302_s23 + $0x730] sm:$0xff]  ;;  %v7302_v51 = vld [vmem:[%s8302_s23 + $0x820] sm:$0xff] }
 0x263   : > { %v3350_v9 = vmul.f32 %v7296_v30, %v10482_v14  ;;  %3858 = vmatprep.mubr.bf16.mxu0 %v3677_v56  ;;  %v4402_v60 = vadd.f32 %v4370_v24, %v4336_v5  ;;  %v3352_v29 = vmul.f32 %v7297_v34, %v10482_v14  ;;  %v3416_v55 = vmul.f32 %v7298_v28, %v10510_v25  ;;  %v7303_v62 = vld [vmem:[%s8302_s23 + $0x830] sm:$0xff] }
 0x264   : > { %v3418_v58 = vmul.f32 %v7299_v44, %v10510_v25  ;;  %v4466_v61 = vadd.f32 %v4434_v49, %v4400_v17  ;;  %v3250_v21 = vadd.f32 %v3218_v39, %v3184_v35  ;;  %v3252_v12 = vadd.f32 %v3220_v50, %v3186_v3 }
 0x265   : > { %v3482_v41 = vmul.f32 %v7300_v47, %v12252_v33  ;;  %v4468_v40 = vadd.f32 %v4436_v6, %v4402_v60  ;;  %v3484_v24 = vmul.f32 %v7301_v31, %v12252_v33  ;;  %v3548_v26 = vmul.f32 %v7302_v51, %v12254_v1 }
 0x266   : > { %v3550_v53 = vmul.f32 %v7303_v62, %v12254_v1  ;;  %v4500_v63 = vadd.f32 %v12253_v16, %v4466_v61  ;;  %v3316_v43 = vadd.f32 %v3284_v7, %v3250_v21  ;;  %v3318_v56 = vadd.f32 %v3286_v15, %v3252_v12 }
 0x267   : > { %v3937_v49 = vmul.f32 %v7286_v22, %v10541_v46  ;;  %v4502_v39 = vadd.f32 %v12253_v16, %v4468_v40  ;;  %v3939_v50 = vmul.f32 %v7287_v59, %v10541_v46  ;;  %v3971_v6 = vmul.f32 %v7288_v8, %v10544_v38 }
 0x268   : > { %v3973_v5 = vmul.f32 %v7289_v42, %v10544_v38  ;;  %v4532_v17 = vmax.f32 %v4500_v63, 0.0  ;;  %v3382_v35 = vadd.f32 %v3350_v9, %v3316_v43  ;;  %v3384_v3 = vadd.f32 %v3352_v29, %v3318_v56  ;;  %v7305_v56 = vld [vmem:[%s8302_s23 + $0x58] sm:$0xff] }
 0x269   : > { %v4037_v60 = vmul.f32 %v7290_v48, %v10547_v45  ;;  %v4534_v1 = vmax.f32 %v4502_v39, 0.0  ;;  %v4003_v33 = vadd.f32 %v3971_v6, %v3937_v49  ;;  %v4039_v7 = vmul.f32 %v7291_v32, %v10547_v45  ;;  %v7307_v6 = vld [vmem:[%s8302_s23 + $0x158] sm:$0xff] }
 0x26a   : > { %v4005_v61 = vadd.f32 %v3973_v5, %v3939_v50  ;;  %v3448_v15 = vadd.f32 %v3416_v55, %v3382_v35  ;;  %v3450_v22 = vadd.f32 %v3418_v58, %v3384_v3  ;;  %v4103_v21 = vmul.f32 %v7292_v4, %v10566_v23 }
 0x26b   : > { %v4105_v59 = vmul.f32 %v7293_v20, %v10566_v23  ;;  %v4562_v12 = vpack.c.bf16 %v4534_v1, %v4532_v17  ;;  %v4069_v8 = vadd.f32 %v4037_v60, %v4003_v33  ;;  %v4169_v42 = vmul.f32 %v7294_v57, %v10569_v18 }
 0x26c   : > { %v4071_v40 = vadd.f32 %v4039_v7, %v4005_v61  ;;  %v3514_v9 = vadd.f32 %v3482_v41, %v3448_v15  ;;  %v3516_v29 = vadd.f32 %v3484_v24, %v3450_v22  ;;  %v4171_v48 = vmul.f32 %v7295_v11, %v10569_v18  ;;  %v7309_v61 = vld [vmem:[%s8302_s23 + $0x258] sm:$0xff] }
 0x26d   : > { %v4235_v63 = vmul.f32 %v7296_v30, %v10582_v10  ;;  %4743 = vmatprep.mubr.bf16.mxu1 %v4562_v12  ;;  %v4135_v32 = vadd.f32 %v4103_v21, %v4069_v8  ;;  %v4237_v58 = vmul.f32 %v7297_v34, %v10582_v10  ;;  %v4301_v4 = vmul.f32 %v7298_v28, %v10585_v19  ;;  %v7310_v21 = vld [vmem:[%s8302_s23 + $0x348] sm:$0xff]  ;;  %v7311_v12 = vld [vmem:[%s8302_s23 + $0x358] sm:$0xff] }
 0x26e   : > { %v4137_v55 = vadd.f32 %v4105_v59, %v4071_v40  ;;  %v3580_v1 = vadd.f32 %v3548_v26, %v3514_v9  ;;  %v3582_v33 = vadd.f32 %v3550_v53, %v3516_v29  ;;  %v4303_v20 = vmul.f32 %v7299_v44, %v10585_v19  ;;  %v7304_v53 = vld [vmem:[%s8302_s23 + $0x48] sm:$0xff] }
 0x26f   : > { %v4367_v57 = vmul.f32 %v7300_v47, %v10596_v36  ;;  %v4201_v41 = vadd.f32 %v4169_v42, %v4135_v32  ;;  %v4369_v30 = vmul.f32 %v7301_v31, %v10596_v36  ;;  %v4433_v24 = vmul.f32 %v7302_v51, %v10599_v52  ;;  %v7306_v31 = vld [vmem:[%s8302_s23 + $0x148] sm:$0xff]  ;;  %v7313_v32 = vld [vmem:[%s8302_s23 + $0x458] sm:$0xff] }
 0x270   : > { %v4203_v11 = vadd.f32 %v4171_v48, %v4137_v55  ;;  %v3614_v34 = vadd.f32 %v10532_v13, %v3580_v1  ;;  %v3616_v28 = vadd.f32 %v10532_v13, %v3582_v33  ;;  %v4435_v26 = vmul.f32 %v7303_v62, %v10599_v52  ;;  %v7308_v62 = vld [vmem:[%s8302_s23 + $0x248] sm:$0xff]  ;;  %v7315_v1 = vld [vmem:[%s8302_s23 + $0x558] sm:$0xff] }
 0x271   : > { %v3057_v43 = vmul.f32 %v7304_v53, %v10415_v37  ;;  %v4267_v44 = vadd.f32 %v4235_v63, %v4201_v41  ;;  %v3059_v49 = vmul.f32 %v7305_v56, %v10415_v37  ;;  %v3091_v51 = vmul.f32 %v7306_v31, %v10432_v54  ;;  %v7312_v29 = vld [vmem:[%s8302_s23 + $0x448] sm:$0xff] }
 0x272   : > { %v4269_v47 = vadd.f32 %v4237_v58, %v4203_v11  ;;  %v3646_v39 = vmax.f32 %v3614_v34, 0.0  ;;  %v3648_v50 = vmax.f32 %v3616_v28, 0.0  ;;  %v3093_v5 = vmul.f32 %v7307_v6, %v10432_v54  ;;  %v7314_v58 = vld [vmem:[%s8302_s23 + $0x548] sm:$0xff]  ;;  %v7317_v28 = vld [vmem:[%s8302_s23 + $0x658] sm:$0xff] }
 0x273   : > { %v3157_v17 = vmul.f32 %v7308_v62, %v10435_v27  ;;  %v4333_v35 = vadd.f32 %v4301_v4, %v4267_v44  ;;  %v3123_v60 = vadd.f32 %v3091_v51, %v3057_v43  ;;  %v3159_v7 = vmul.f32 %v7309_v61, %v10435_v27  ;;  %v7316_v11 = vld [vmem:[%s8302_s23 + $0x648] sm:$0xff]  ;;  %v7319_v51 = vld [vmem:[%s8302_s23 + $0x758] sm:$0xff] }
 0x274   : > { %v4335_v3 = vadd.f32 %v4303_v20, %v4269_v47  ;;  %v3676_v15 = vpack.c.bf16 %v3648_v50, %v3646_v39  ;;  %v3125_v22 = vadd.f32 %v3093_v5, %v3059_v49  ;;  %v3223_v59 = vmul.f32 %v7310_v21, %v10462_v2  ;;  %v7318_v44 = vld [vmem:[%s8302_s23 + $0x748] sm:$0xff]  ;;  %v12255_v47 = vld [vmem:[#allocation9_spill] sm:$0xff] }
 0x275   : > { %v3225_v8 = vmul.f32 %v7311_v12, %v10462_v2  ;;  %v4399_v40 = vadd.f32 %v4367_v57, %v4333_v35  ;;  %v3189_v9 = vadd.f32 %v3157_v17, %v3123_v60  ;;  %v3289_v48 = vmul.f32 %v7312_v29, %v10479_v0  ;;  %v7320_v5 = vld [vmem:[%s8302_s23 + $0x848] sm:$0xff]  ;;  %v7321_v60 = vld [vmem:[%s8302_s23 + $0x858] sm:$0xff] }
 0x276   : > { %v4401_v42 = vadd.f32 %v4369_v30, %v4335_v3  ;;  %3859 = vmatmul.mubr.bf16.gmra.mxu0 %v3676_v15  ;;  %v3191_v63 = vadd.f32 %v3159_v7, %v3125_v22  ;;  %v3291_v55 = vmul.f32 %v7313_v32, %v10479_v0  ;;  %v3355_v4 = vmul.f32 %v7314_v58, %v10482_v14  ;;  %v12256_v17 = vld [vmem:[#allocation10_spill] sm:$0xff] }
 0x277   : > { %v3357_v33 = vmul.f32 %v7315_v1, %v10482_v14  ;;  %v4465_v20 = vadd.f32 %v4433_v24, %v4399_v40  ;;  %v3255_v41 = vadd.f32 %v3223_v59, %v3189_v9  ;;  %v3421_v30 = vmul.f32 %v7316_v11, %v10510_v25 }
 0x278   : > { %v4467_v57 = vadd.f32 %v4435_v26, %v4401_v42  ;;  %v3257_v34 = vadd.f32 %v3225_v8, %v3191_v63  ;;  %v3423_v43 = vmul.f32 %v7317_v28, %v10510_v25  ;;  %v3487_v49 = vmul.f32 %v7318_v44, %v12255_v47 }
 0x279   : > { %v3489_v39 = vmul.f32 %v7319_v51, %v12255_v47  ;;  %v4499_v50 = vadd.f32 %v12253_v16, %v4465_v20  ;;  %v3321_v26 = vadd.f32 %v3289_v48, %v3255_v41  ;;  %v3553_v35 = vmul.f32 %v7320_v5, %v12256_v17 }
 0x27a   : > { %v4501_v24 = vadd.f32 %v12253_v16, %v4467_v57  ;;  %v3323_v3 = vadd.f32 %v3291_v55, %v3257_v34  ;;  %v3555_v7 = vmul.f32 %v7321_v60, %v12256_v17  ;;  %v3942_v15 = vmul.f32 %v7304_v53, %v10541_v46 }
 0x27b   : > { %v3944_v22 = vmul.f32 %v7305_v56, %v10541_v46  ;;  %v4531_v59 = vmax.f32 %v4499_v50, 0.0  ;;  %v3387_v40 = vadd.f32 %v3355_v4, %v3321_v26  ;;  %v3976_v42 = vmul.f32 %v7306_v31, %v10544_v38 }
 0x27c   : > { %v4533_v8 = vmax.f32 %v4501_v24, 0.0  ;;  %v3389_v9 = vadd.f32 %v3357_v33, %v3323_v3  ;;  %v3978_v63 = vmul.f32 %v7307_v6, %v10544_v38  ;;  %v4042_v48 = vmul.f32 %v7308_v62, %v10547_v45  ;;  %v7323_v3 = vld [vmem:[%s8302_s23 + $0x50] sm:$0xff] }
 0x27d   : > { %v4044_v20 = vmul.f32 %v7309_v61, %v10547_v45  ;;  %v3453_v57 = vadd.f32 %v3421_v30, %v3387_v40  ;;  %v4008_v41 = vadd.f32 %v3976_v42, %v3942_v15  ;;  %v4108_v34 = vmul.f32 %v7310_v21, %v10566_v23 }
 0x27e   : > { %v4561_v55 = vpack.c.bf16 %v4533_v8, %v4531_v59  ;;  %v3455_v53 = vadd.f32 %v3423_v43, %v3389_v9  ;;  %v4010_v16 = vadd.f32 %v3978_v63, %v3944_v22  ;;  %v4110_v56 = vmul.f32 %v7311_v12, %v10566_v23  ;;  %v7325_v59 = vld [vmem:[%s8302_s23 + $0x150] sm:$0xff]  ;;  %v7326_v8 = vld [vmem:[%s8302_s23 + $0x240] sm:$0xff] }
 0x27f   : > { %v4174_v4 = vmul.f32 %v7312_v29, %v10569_v18  ;;  %v3519_v31 = vadd.f32 %v3487_v49, %v3453_v57  ;;  %v4074_v33 = vadd.f32 %v4042_v48, %v4008_v41  ;;  %v4176_v6 = vmul.f32 %v7313_v32, %v10569_v18  ;;  %v7327_v48 = vld [vmem:[%s8302_s23 + $0x250] sm:$0xff]  ;;  %v7328_v41 = vld [vmem:[%s8302_s23 + $0x340] sm:$0xff] }
 0x280   : > { %4744 = vmatmul.mubr.bf16.gmra.mxu1 %v4561_v55  ;;  %v4240_v62 = vmul.f32 %v7314_v58, %v10582_v10  ;;  %v3521_v61 = vadd.f32 %v3489_v39, %v3455_v53  ;;  %v4076_v50 = vadd.f32 %v4044_v20, %v4010_v16  ;;  %v4242_v30 = vmul.f32 %v7315_v1, %v10582_v10  ;;  %v7322_v39 = vld [vmem:[%s8302_s23 + $0x40] sm:$0xff]  ;;  %v7329_v53 = vld [vmem:[%s8302_s23 + $0x350] sm:$0xff] }
 0x281   : > { %v4306_v21 = vmul.f32 %v7316_v11, %v10585_v19  ;;  %v3585_v43 = vadd.f32 %v3553_v35, %v3519_v31  ;;  %v4140_v24 = vadd.f32 %v4108_v34, %v4074_v33  ;;  %v4308_v12 = vmul.f32 %v7317_v28, %v10585_v19 }
 0x282   : > { %v4372_v29 = vmul.f32 %v7318_v44, %v10596_v36  ;;  %v3587_v49 = vadd.f32 %v3555_v7, %v3521_v61  ;;  %v4142_v26 = vadd.f32 %v4110_v56, %v4076_v50  ;;  %v4374_v32 = vmul.f32 %v7319_v51, %v10596_v36  ;;  %v7324_v51 = vld [vmem:[%s8302_s23 + $0x140] sm:$0xff] }
 0x283   : > { %v4438_v58 = vmul.f32 %v7320_v5, %v10599_v52  ;;  %v3619_v16 = vadd.f32 %v10532_v13, %v3585_v43  ;;  %v4206_v1 = vadd.f32 %v4174_v4, %v4140_v24  ;;  %v4440_v11 = vmul.f32 %v7321_v60, %v10599_v52  ;;  %v7332_v43 = vld [vmem:[%s8302_s23 + $0x540] sm:$0xff] }
 0x284   : > { %v3056_v35 = vmul.f32 %v7322_v39, %v10415_v37  ;;  %v3621_v28 = vadd.f32 %v10532_v13, %v3587_v49  ;;  %v4208_v44 = vadd.f32 %v4176_v6, %v4142_v26  ;;  %v3058_v7 = vmul.f32 %v7323_v3, %v10415_v37  ;;  %v7330_v6 = vld [vmem:[%s8302_s23 + $0x440] sm:$0xff] }
 0x285   : > { %v3090_v5 = vmul.f32 %v7324_v51, %v10432_v54  ;;  %v3651_v15 = vmax.f32 %v3619_v16, 0.0  ;;  %v4272_v22 = vadd.f32 %v4240_v62, %v4206_v1  ;;  %v3092_v60 = vmul.f32 %v7325_v59, %v10432_v54  ;;  %v7334_v1 = vld [vmem:[%s8302_s23 + $0x640] sm:$0xff] }
 0x286   : > { %v3156_v40 = vmul.f32 %v7326_v8, %v10435_v27  ;;  %v3653_v42 = vmax.f32 %v3621_v28, 0.0  ;;  %v4274_v9 = vadd.f32 %v4242_v30, %v4208_v44  ;;  %v3158_v20 = vmul.f32 %v7327_v48, %v10435_v27  ;;  %v7331_v30 = vld [vmem:[%s8302_s23 + $0x450] sm:$0xff] }
 0x287   : > { %v3122_v63 = vadd.f32 %v3090_v5, %v3056_v35  ;;  %v4338_v55 = vadd.f32 %v4306_v21, %v4272_v22  ;;  %v3124_v57 = vadd.f32 %v3092_v60, %v3058_v7  ;;  %v3222_v34 = vmul.f32 %v7328_v41, %v10462_v2  ;;  %v7335_v44 = vld [vmem:[%s8302_s23 + $0x650] sm:$0xff]  ;;  %v7336_v5 = vld [vmem:[%s8302_s23 + $0x740] sm:$0xff] }
 0x288   : > { %v3224_v56 = vmul.f32 %v7329_v53, %v10462_v2  ;;  %v3679_v4 = vpack.c.bf16 %v3653_v42, %v3651_v15  ;;  %v4340_v31 = vadd.f32 %v4308_v12, %v4274_v9  ;;  %v3288_v62 = vmul.f32 %v7330_v6, %v10479_v0  ;;  %v7333_v12 = vld [vmem:[%s8302_s23 + $0x550] sm:$0xff]  ;;  %v7338_v42 = vld [vmem:[%s8302_s23 + $0x840] sm:$0xff] }
 0x289   : > { %v3188_v33 = vadd.f32 %v3156_v40, %v3122_v63  ;;  %v4404_v61 = vadd.f32 %v4372_v29, %v4338_v55  ;;  %v3190_v50 = vadd.f32 %v3158_v20, %v3124_v57  ;;  %v3290_v21 = vmul.f32 %v7331_v30, %v10479_v0  ;;  %v12257_v63 = vld [vmem:[#allocation11_spill] sm:$0xff] }
 0x28a   : > { %v3354_v24 = vmul.f32 %v7332_v43, %v10482_v14  ;;  %3866 = vmatprep.mubr.bf16.mxu0 %v3679_v4  ;;  %v4406_v49 = vadd.f32 %v4374_v32, %v4340_v31  ;;  %v3356_v16 = vmul.f32 %v7333_v12, %v10482_v14  ;;  %v3420_v29 = vmul.f32 %v7334_v1, %v10510_v25  ;;  %v7337_v32 = vld [vmem:[%s8302_s23 + $0x750] sm:$0xff] }
 0x28b   : > { %v3254_v26 = vadd.f32 %v3222_v34, %v3188_v33  ;;  %v4470_v35 = vadd.f32 %v4438_v58, %v4404_v61  ;;  %v3256_v28 = vadd.f32 %v3224_v56, %v3190_v50  ;;  %v3422_v7 = vmul.f32 %v7335_v44, %v10510_v25  ;;  %v7339_v57 = vld [vmem:[%s8302_s23 + $0x850] sm:$0xff] }
 0x28c   : > { %v3486_v15 = vmul.f32 %v7336_v5, %v12255_v47  ;;  %v4472_v22 = vadd.f32 %v4440_v11, %v4406_v49  ;;  %v3488_v40 = vmul.f32 %v7337_v32, %v12255_v47  ;;  %v3552_v9 = vmul.f32 %v7338_v42, %v12256_v17 }
 0x28d   : > { %v3320_v60 = vadd.f32 %v3288_v62, %v3254_v26  ;;  %v4504_v20 = vadd.f32 %v12257_v63, %v4470_v35  ;;  %v3322_v55 = vadd.f32 %v3290_v21, %v3256_v28  ;;  %v3554_v58 = vmul.f32 %v7339_v57, %v12256_v17 }
 0x28e   : > { %v3941_v34 = vmul.f32 %v7322_v39, %v10541_v46  ;;  %v4506_v56 = vadd.f32 %v12257_v63, %v4472_v22  ;;  %v3943_v11 = vmul.f32 %v7323_v3, %v10541_v46  ;;  %v3975_v31 = vmul.f32 %v7324_v51, %v10544_v38 }
 0x28f   : > { %v3386_v4 = vadd.f32 %v3354_v24, %v3320_v60  ;;  %v4536_v33 = vmax.f32 %v4504_v20, 0.0  ;;  %v3388_v62 = vadd.f32 %v3356_v16, %v3322_v55  ;;  %v3977_v61 = vmul.f32 %v7325_v59, %v10544_v38 }
 0x290   : > { %v4041_v50 = vmul.f32 %v7326_v8, %v10547_v45  ;;  %v4538_v49 = vmax.f32 %v4506_v56, 0.0  ;;  %v4007_v26 = vadd.f32 %v3975_v31, %v3941_v34  ;;  %v4043_v35 = vmul.f32 %v7327_v48, %v10547_v45  ;;  %v7340_v56 = vld [vmem:[%s8302_s23 + $0x68] sm:$0xff] }
 0x291   : > { %v3452_v21 = vadd.f32 %v3420_v29, %v3386_v4  ;;  %v3454_v28 = vadd.f32 %v3422_v7, %v3388_v62  ;;  %v4009_v39 = vadd.f32 %v3977_v61, %v3943_v11  ;;  %v4107_v22 = vmul.f32 %v7328_v41, %v10566_v23  ;;  %v7341_v11 = vld [vmem:[%s8302_s23 + $0x78] sm:$0xff] }
 0x292   : > { %v4109_v24 = vmul.f32 %v7329_v53, %v10566_v23  ;;  %v4564_v3 = vpack.c.bf16 %v4538_v49, %v4536_v33  ;;  %v4073_v51 = vadd.f32 %v4041_v50, %v4007_v26  ;;  %v4173_v16 = vmul.f32 %v7330_v6, %v10569_v18  ;;  %v7342_v33 = vld [vmem:[%s8302_s23 + $0x168] sm:$0xff]  ;;  %v7343_v61 = vld [vmem:[%s8302_s23 + $0x178] sm:$0xff] }
 0x293   : > { %v3518_v60 = vadd.f32 %v3486_v15, %v3452_v21  ;;  %v3520_v20 = vadd.f32 %v3488_v40, %v3454_v28  ;;  %v4075_v59 = vadd.f32 %v4043_v35, %v4009_v39  ;;  %v4175_v8 = vmul.f32 %v7331_v30, %v10569_v18  ;;  %v7345_v35 = vld [vmem:[%s8302_s23 + $0x278] sm:$0xff]  ;;  %v7346_v39 = vld [vmem:[%s8302_s23 + $0x368] sm:$0xff] }
 0x294   : > { %v4239_v29 = vmul.f32 %v7332_v43, %v10582_v10  ;;  %4751 = vmatprep.mubr.bf16.mxu1 %v4564_v3  ;;  %v4139_v7 = vadd.f32 %v4107_v22, %v4073_v51  ;;  %v4241_v55 = vmul.f32 %v7333_v12, %v10582_v10  ;;  %v4305_v41 = vmul.f32 %v7334_v1, %v10585_v19  ;;  %v7347_v51 = vld [vmem:[%s8302_s23 + $0x378] sm:$0xff] }
 0x295   : > { %v3584_v48 = vadd.f32 %v3552_v9, %v3518_v60  ;;  %v3586_v53 = vadd.f32 %v3554_v58, %v3520_v20  ;;  %v4141_v15 = vadd.f32 %v4109_v24, %v4075_v59  ;;  %v4307_v6 = vmul.f32 %v7335_v44, %v10585_v19 }
 0x296   : > { %v4371_v40 = vmul.f32 %v7336_v5, %v10596_v36  ;;  %v4205_v34 = vadd.f32 %v4173_v16, %v4139_v7  ;;  %v4373_v43 = vmul.f32 %v7337_v32, %v10596_v36  ;;  %v4437_v9 = vmul.f32 %v7338_v42, %v10599_v52 }
 0x297   : > { %v3618_v30 = vadd.f32 %v10532_v13, %v3584_v48  ;;  %v3620_v12 = vadd.f32 %v10532_v13, %v3586_v53  ;;  %v4207_v1 = vadd.f32 %v4175_v8, %v4141_v15  ;;  %v4439_v58 = vmul.f32 %v7339_v57, %v10599_v52  ;;  %v7344_v57 = vld [vmem:[%s8302_s23 + $0x268] sm:$0xff]  ;;  %v7349_v48 = vld [vmem:[%s8302_s23 + $0x478] sm:$0xff] }
 0x298   : > { %v3061_v44 = vmul.f32 %v7340_v56, %v10415_v37  ;;  %v4271_v5 = vadd.f32 %v4239_v29, %v4205_v34  ;;  %v3063_v31 = vmul.f32 %v7341_v11, %v10415_v37  ;;  %v3095_v32 = vmul.f32 %v7342_v33, %v10432_v54  ;;  %v7348_v8 = vld [vmem:[%s8302_s23 + $0x468] sm:$0xff] }
 0x299   : > { %v3650_v4 = vmax.f32 %v3618_v30, 0.0  ;;  %v3652_v42 = vmax.f32 %v3620_v12, 0.0  ;;  %v4273_v62 = vadd.f32 %v4241_v55, %v4207_v1  ;;  %v3097_v50 = vmul.f32 %v7343_v61, %v10432_v54  ;;  %v7350_v53 = vld [vmem:[%s8302_s23 + $0x568] sm:$0xff] }
 0x29a   : > { %v3161_v49 = vmul.f32 %v7344_v57, %v10435_v27  ;;  %v4337_v21 = vadd.f32 %v4305_v41, %v4271_v5  ;;  %v3127_v26 = vadd.f32 %v3095_v32, %v3061_v44  ;;  %v3163_v28 = vmul.f32 %v7345_v35, %v10435_v27  ;;  %v7352_v12 = vld [vmem:[%s8302_s23 + $0x668] sm:$0xff]  ;;  %v7353_v44 = vld [vmem:[%s8302_s23 + $0x678] sm:$0xff] }
 0x29b   : > { %v3227_v22 = vmul.f32 %v7346_v39, %v10462_v2  ;;  %v3678_v24 = vpack.c.bf16 %v3652_v42, %v3650_v4  ;;  %v4339_v3 = vadd.f32 %v4307_v6, %v4273_v62  ;;  %v3129_v60 = vadd.f32 %v3097_v50, %v3063_v31  ;;  %v7351_v6 = vld [vmem:[%s8302_s23 + $0x578] sm:$0xff]  ;;  %v7354_v31 = vld [vmem:[%s8302_s23 + $0x768] sm:$0xff] }
 0x29c   : > { %v3229_v16 = vmul.f32 %v7347_v51, %v10462_v2  ;;  %v4403_v20 = vadd.f32 %v4371_v40, %v4337_v21  ;;  %v3193_v59 = vadd.f32 %v3161_v49, %v3127_v26  ;;  %v3293_v29 = vmul.f32 %v7348_v8, %v10479_v0  ;;  %v7355_v42 = vld [vmem:[%s8302_s23 + $0x778] sm:$0xff] }
 0x29d   : > { %v3295_v7 = vmul.f32 %v7349_v48, %v10479_v0  ;;  %3867 = vmatmul.mubr.bf16.gmra.mxu0 %v3678_v24  ;;  %v4405_v55 = vadd.f32 %v4373_v43, %v4339_v3  ;;  %v3195_v41 = vadd.f32 %v3163_v28, %v3129_v60  ;;  %v3359_v15 = vmul.f32 %v7350_v53, %v10482_v14  ;;  %v7357_v26 = vld [vmem:[%s8302_s23 + $0x878] sm:$0xff] }
 0x29e   : > { %v3361_v40 = vmul.f32 %v7351_v6, %v10482_v14  ;;  %v4469_v30 = vadd.f32 %v4437_v9, %v4403_v20  ;;  %v3259_v34 = vadd.f32 %v3227_v22, %v3193_v59  ;;  %v3425_v1 = vmul.f32 %v7352_v12, %v10510_v25  ;;  %v7356_v9 = vld [vmem:[%s8302_s23 + $0x868] sm:$0xff] }
 0x29f   : > { %v3427_v4 = vmul.f32 %v7353_v44, %v10510_v25  ;;  %v4471_v5 = vadd.f32 %v4439_v58, %v4405_v55  ;;  %v3261_v43 = vadd.f32 %v3229_v16, %v3195_v41  ;;  %v3491_v32 = vmul.f32 %v7354_v31, %v12255_v47 }
 0x2a0   : > { %v3493_v62 = vmul.f32 %v7355_v42, %v12255_v47  ;;  %v4503_v50 = vadd.f32 %v12257_v63, %v4469_v30  ;;  %v3325_v49 = vadd.f32 %v3293_v29, %v3259_v34  ;;  %v3557_v21 = vmul.f32 %v7356_v9, %v12256_v17 }
 0x2a1   : > { %v3559_v28 = vmul.f32 %v7357_v26, %v12256_v17  ;;  %v4505_v22 = vadd.f32 %v12257_v63, %v4471_v5  ;;  %v3327_v24 = vadd.f32 %v3295_v7, %v3261_v43  ;;  %v3946_v58 = vmul.f32 %v7340_v56, %v10541_v46 }
 0x2a2   : > { %v3948_v3 = vmul.f32 %v7341_v11, %v10541_v46  ;;  %v4535_v60 = vmax.f32 %v4503_v50, 0.0  ;;  %v3391_v16 = vadd.f32 %v3359_v15, %v3325_v49  ;;  %v3980_v20 = vmul.f32 %v7342_v33, %v10544_v38 }
 0x2a3   : > { %v3982_v59 = vmul.f32 %v7343_v61, %v10544_v38  ;;  %v4537_v29 = vmax.f32 %v4505_v22, 0.0  ;;  %v3393_v55 = vadd.f32 %v3361_v40, %v3327_v24  ;;  %v4046_v41 = vmul.f32 %v7344_v57, %v10547_v45  ;;  %v7358_v24 = vld [vmem:[%s8302_s23 + $0x60] sm:$0xff] }
 0x2a4   : > { %v4048_v30 = vmul.f32 %v7345_v35, %v10547_v45  ;;  %v3457_v34 = vadd.f32 %v3425_v1, %v3391_v16  ;;  %v4012_v17 = vadd.f32 %v3980_v20, %v3946_v58  ;;  %v4112_v7 = vmul.f32 %v7346_v39, %v10566_v23  ;;  %v7361_v16 = vld [vmem:[%s8302_s23 + $0x170] sm:$0xff] }
 0x2a5   : > { %v4014_v5 = vadd.f32 %v3982_v59, %v3948_v3  ;;  %v4563_v56 = vpack.c.bf16 %v4537_v29, %v4535_v60  ;;  %v3459_v43 = vadd.f32 %v3427_v4, %v3393_v55  ;;  %v4114_v11 = vmul.f32 %v7347_v51, %v10566_v23  ;;  %v7362_v29 = vld [vmem:[%s8302_s23 + $0x260] sm:$0xff] }
 0x2a6   : > { %v4178_v15 = vmul.f32 %v7348_v8, %v10569_v18  ;;  %v3523_v33 = vadd.f32 %v3491_v32, %v3457_v34  ;;  %v4078_v50 = vadd.f32 %v4046_v41, %v4012_v17  ;;  %v4180_v40 = vmul.f32 %v7349_v48, %v10569_v18  ;;  %v7363_v41 = vld [vmem:[%s8302_s23 + $0x270] sm:$0xff] }
 0x2a7   : > { %v4080_v61 = vadd.f32 %v4048_v30, %v4014_v5  ;;  %4752 = vmatmul.mubr.bf16.gmra.mxu1 %v4563_v56  ;;  %v3525_v57 = vadd.f32 %v3493_v62, %v3459_v43  ;;  %v4244_v35 = vmul.f32 %v7350_v53, %v10582_v10  ;;  %v4246_v1 = vmul.f32 %v7351_v6, %v10582_v10  ;;  %v7364_v56 = vld [vmem:[%s8302_s23 + $0x360] sm:$0xff] }
 0x2a8   : > { %v4310_v39 = vmul.f32 %v7352_v12, %v10585_v19  ;;  %v3589_v4 = vadd.f32 %v3557_v21, %v3523_v33  ;;  %v4144_v49 = vadd.f32 %v4112_v7, %v4078_v50  ;;  %v4312_v8 = vmul.f32 %v7353_v44, %v10585_v19  ;;  %v7365_v33 = vld [vmem:[%s8302_s23 + $0x370] sm:$0xff] }
 0x2a9   : > { %v4146_v51 = vadd.f32 %v4114_v11, %v4080_v61  ;;  %v3591_v17 = vadd.f32 %v3559_v28, %v3525_v57  ;;  %v4376_v32 = vmul.f32 %v7354_v31, %v10596_v36  ;;  %v4378_v48 = vmul.f32 %v7355_v42, %v10596_v36  ;;  %v7359_v28 = vld [vmem:[%s8302_s23 + $0x70] sm:$0xff]  ;;  %v7360_v42 = vld [vmem:[%s8302_s23 + $0x160] sm:$0xff] }
 0x2aa   : > { %v4442_v53 = vmul.f32 %v7356_v9, %v10599_v52  ;;  %v3623_v62 = vadd.f32 %v10532_v13, %v3589_v4  ;;  %v4210_v6 = vadd.f32 %v4178_v15, %v4144_v49  ;;  %v4444_v12 = vmul.f32 %v7357_v26, %v10599_v52  ;;  %v7366_v61 = vld [vmem:[%s8302_s23 + $0x460] sm:$0xff] }
 0x2ab   : > { %v4212_v22 = vadd.f32 %v4180_v40, %v4146_v51  ;;  %v3625_v21 = vadd.f32 %v10532_v13, %v3591_v17  ;;  %v3060_v44 = vmul.f32 %v7358_v24, %v10415_v37  ;;  %v3062_v31 = vmul.f32 %v7359_v28, %v10415_v37  ;;  %v7368_v51 = vld [vmem:[%s8302_s23 + $0x560] sm:$0xff]  ;;  %v7369_v17 = vld [vmem:[%s8302_s23 + $0x570] sm:$0xff] }
 0x2ac   : > { %v3094_v9 = vmul.f32 %v7360_v42, %v10432_v54  ;;  %v3655_v58 = vmax.f32 %v3623_v62, 0.0  ;;  %v4276_v3 = vadd.f32 %v4244_v35, %v4210_v6  ;;  %v3096_v26 = vmul.f32 %v7361_v16, %v10432_v54  ;;  %v7370_v6 = vld [vmem:[%s8302_s23 + $0x660] sm:$0xff] }
 0x2ad   : > { %v4278_v60 = vadd.f32 %v4246_v1, %v4212_v22  ;;  %v3657_v20 = vmax.f32 %v3625_v21, 0.0  ;;  %v3160_v55 = vmul.f32 %v7362_v29, %v10435_v27  ;;  %v3162_v30 = vmul.f32 %v7363_v41, %v10435_v27 }
 0x2ae   : > { %v3126_v59 = vadd.f32 %v3094_v9, %v3060_v44  ;;  %v4342_v34 = vadd.f32 %v4310_v39, %v4276_v3  ;;  %v3128_v7 = vadd.f32 %v3096_v26, %v3062_v31  ;;  %v3226_v43 = vmul.f32 %v7364_v56, %v10462_v2  ;;  %v7367_v39 = vld [vmem:[%s8302_s23 + $0x470] sm:$0xff] }
 0x2af   : > { %v4344_v5 = vadd.f32 %v4312_v8, %v4278_v60  ;;  %v3681_v11 = vpack.c.bf16 %v3657_v20, %v3655_v58  ;;  %v3228_v50 = vmul.f32 %v7365_v33, %v10462_v2  ;;  %v3292_v40 = vmul.f32 %v7366_v61, %v10479_v0  ;;  %v7371_v44 = vld [vmem:[%s8302_s23 + $0x670] sm:$0xff]  ;;  %v7372_v58 = vld [vmem:[%s8302_s23 + $0x760] sm:$0xff] }
 0x2b0   : > { %v3192_v15 = vadd.f32 %v3160_v55, %v3126_v59  ;;  %v4408_v57 = vadd.f32 %v4376_v32, %v4342_v34  ;;  %v3194_v1 = vadd.f32 %v3162_v30, %v3128_v7  ;;  %v3294_v4 = vmul.f32 %v7367_v39, %v10479_v0  ;;  %v7373_v60 = vld [vmem:[%s8302_s23 + $0x770] sm:$0xff]  ;;  %v7374_v20 = vld [vmem:[%s8302_s23 + $0x860] sm:$0xff]  ;;  %v12258_v59 = vld [vmem:[#allocation10_spill] sm:$0xff] }
 0x2b1   : > { %v4410_v35 = vadd.f32 %v4378_v48, %v4344_v5  ;;  %3874 = vmatprep.mubr.bf16.mxu0 %v3681_v11  ;;  %v3358_v8 = vmul.f32 %v7368_v51, %v10482_v14  ;;  %v3360_v62 = vmul.f32 %v7369_v17, %v10482_v14  ;;  %v3424_v32 = vmul.f32 %v7370_v6, %v10510_v25 }
 0x2b2   : > { %v3258_v49 = vadd.f32 %v3226_v43, %v3192_v15  ;;  %v4474_v48 = vadd.f32 %v4442_v53, %v4408_v57  ;;  %v3260_v21 = vadd.f32 %v3228_v50, %v3194_v1  ;;  %v3426_v31 = vmul.f32 %v7371_v44, %v10510_v25 }
 0x2b3   : > { %v4476_v22 = vadd.f32 %v4444_v12, %v4410_v35  ;;  %v3490_v3 = vmul.f32 %v7372_v58, %v12255_v47  ;;  %v3492_v26 = vmul.f32 %v7373_v60, %v12255_v47  ;;  %v3556_v55 = vmul.f32 %v7374_v20, %v12258_v59  ;;  %v7375_v12 = vld [vmem:[%s8302_s23 + $0x870] sm:$0xff] }
 0x2b4   : > { %v3324_v9 = vadd.f32 %v3292_v40, %v3258_v49  ;;  %v4508_v30 = vadd.f32 %v12257_v63, %v4474_v48  ;;  %v3326_v53 = vadd.f32 %v3294_v4, %v3260_v21  ;;  %v3558_v5 = vmul.f32 %v7375_v12, %v12258_v59 }
 0x2b5   : > { %v4510_v34 = vadd.f32 %v12257_v63, %v4476_v22  ;;  %v3945_v43 = vmul.f32 %v7358_v24, %v10541_v46  ;;  %v3947_v11 = vmul.f32 %v7359_v28, %v10541_v46  ;;  %v3979_v15 = vmul.f32 %v7360_v42, %v10544_v38 }
 0x2b6   : > { %v3390_v7 = vadd.f32 %v3358_v8, %v3324_v9  ;;  %v4540_v50 = vmax.f32 %v4508_v30, 0.0  ;;  %v3392_v57 = vadd.f32 %v3360_v62, %v3326_v53  ;;  %v3981_v35 = vmul.f32 %v7361_v16, %v10544_v38 }
 0x2b7   : > { %v4542_v40 = vmax.f32 %v4510_v34, 0.0  ;;  %v4011_v49 = vadd.f32 %v3979_v15, %v3945_v43  ;;  %v4045_v48 = vmul.f32 %v7362_v29, %v10547_v45  ;;  %v4047_v4 = vmul.f32 %v7363_v41, %v10547_v45 }
 0x2b8   : > { %v3456_v1 = vadd.f32 %v3424_v32, %v3390_v7  ;;  %v3458_v21 = vadd.f32 %v3426_v31, %v3392_v57  ;;  %v4013_v8 = vadd.f32 %v3981_v35, %v3947_v11  ;;  %v4111_v24 = vmul.f32 %v7364_v56, %v10566_v23  ;;  %v7376_v7 = vld [vmem:[%s8302_s23 + $0x88] sm:$0xff]  ;;  %v7377_v11 = vld [vmem:[%s8302_s23 + $0x98] sm:$0xff] }
 0x2b9   : > { %v4566_v22 = vpack.c.bf16 %v4542_v40, %v4540_v50  ;;  %v4077_v28 = vadd.f32 %v4045_v48, %v4011_v49  ;;  %v4113_v42 = vmul.f32 %v7365_v33, %v10566_v23  ;;  %v4177_v30 = vmul.f32 %v7366_v61, %v10569_v18  ;;  %v7378_v50 = vld [vmem:[%s8302_s23 + $0x188] sm:$0xff]  ;;  %v7379_v57 = vld [vmem:[%s8302_s23 + $0x198] sm:$0xff] }
 0x2ba   : > { %v3522_v9 = vadd.f32 %v3490_v3, %v3456_v1  ;;  %v3524_v62 = vadd.f32 %v3492_v26, %v3458_v21  ;;  %v4079_v16 = vadd.f32 %v4047_v4, %v4013_v8  ;;  %v4179_v32 = vmul.f32 %v7367_v39, %v10569_v18  ;;  %v7381_v4 = vld [vmem:[%s8302_s23 + $0x298] sm:$0xff]  ;;  %v7382_v21 = vld [vmem:[%s8302_s23 + $0x388] sm:$0xff] }
 0x2bb   : > { %4759 = vmatprep.mubr.bf16.mxu1 %v4566_v22  ;;  %v4243_v29 = vmul.f32 %v7368_v51, %v10582_v10  ;;  %v4143_v34 = vadd.f32 %v4111_v24, %v4077_v28  ;;  %v4245_v31 = vmul.f32 %v7369_v17, %v10582_v10  ;;  %v4309_v56 = vmul.f32 %v7370_v6, %v10585_v19 }
 0x2bc   : > { %v3588_v41 = vadd.f32 %v3556_v55, %v3522_v9  ;;  %v3590_v3 = vadd.f32 %v3558_v5, %v3524_v62  ;;  %v4145_v53 = vadd.f32 %v4113_v42, %v4079_v16  ;;  %v4311_v33 = vmul.f32 %v7371_v44, %v10585_v19  ;;  %v7383_v42 = vld [vmem:[%s8302_s23 + $0x398] sm:$0xff] }
 0x2bd   : > { %v4375_v61 = vmul.f32 %v7372_v58, %v10596_v36  ;;  %v4209_v39 = vadd.f32 %v4177_v30, %v4143_v34  ;;  %v4377_v51 = vmul.f32 %v7373_v60, %v10596_v36  ;;  %v4441_v55 = vmul.f32 %v7374_v20, %v10599_v52 }
 0x2be   : > { %v3622_v26 = vadd.f32 %v10532_v13, %v3588_v41  ;;  %v3624_v17 = vadd.f32 %v10532_v13, %v3590_v3  ;;  %v4211_v6 = vadd.f32 %v4179_v32, %v4145_v53  ;;  %v4443_v5 = vmul.f32 %v7375_v12, %v10599_v52  ;;  %v7380_v12 = vld [vmem:[%s8302_s23 + $0x288] sm:$0xff]  ;;  %v7385_v41 = vld [vmem:[%s8302_s23 + $0x498] sm:$0xff] }
 0x2bf   : > { %v3065_v44 = vmul.f32 %v7376_v7, %v10415_v37  ;;  %v4275_v58 = vadd.f32 %v4243_v29, %v4209_v39  ;;  %v3067_v15 = vmul.f32 %v7377_v11, %v10415_v37  ;;  %v3099_v60 = vmul.f32 %v7378_v50, %v10432_v54  ;;  %v7384_v32 = vld [vmem:[%s8302_s23 + $0x488] sm:$0xff] }
 0x2c0   : > { %v3654_v43 = vmax.f32 %v3622_v26, 0.0  ;;  %v3656_v20 = vmax.f32 %v3624_v17, 0.0  ;;  %v4277_v40 = vadd.f32 %v4245_v31, %v4211_v6  ;;  %v3101_v35 = vmul.f32 %v7379_v57, %v10432_v54  ;;  %v7386_v3 = vld [vmem:[%s8302_s23 + $0x588] sm:$0xff] }
 0x2c1   : > { %v3165_v1 = vmul.f32 %v7380_v12, %v10435_v27  ;;  %v4341_v49 = vadd.f32 %v4309_v56, %v4275_v58  ;;  %v3131_v48 = vadd.f32 %v3099_v60, %v3065_v44  ;;  %v3167_v22 = vmul.f32 %v7381_v4, %v10435_v27  ;;  %v7388_v17 = vld [vmem:[%s8302_s23 + $0x688] sm:$0xff]  ;;  %v7389_v44 = vld [vmem:[%s8302_s23 + $0x698] sm:$0xff] }
 0x2c2   : > { %v3231_v8 = vmul.f32 %v7382_v21, %v10462_v2  ;;  %v3680_v24 = vpack.c.bf16 %v3656_v20, %v3654_v43  ;;  %v4343_v9 = vadd.f32 %v4311_v33, %v4277_v40  ;;  %v3133_v28 = vadd.f32 %v3101_v35, %v3067_v15  ;;  %v7387_v33 = vld [vmem:[%s8302_s23 + $0x598] sm:$0xff]  ;;  %v7390_v15 = vld [vmem:[%s8302_s23 + $0x788] sm:$0xff] }
 0x2c3   : > { %v3233_v30 = vmul.f32 %v7383_v42, %v10462_v2  ;;  %v4407_v62 = vadd.f32 %v4375_v61, %v4341_v49  ;;  %v3197_v16 = vadd.f32 %v3165_v1, %v3131_v48  ;;  %v3297_v29 = vmul.f32 %v7384_v32, %v10479_v0  ;;  %v7391_v20 = vld [vmem:[%s8302_s23 + $0x798] sm:$0xff] }
 0x2c4   : > { %v3299_v34 = vmul.f32 %v7385_v41, %v10479_v0  ;;  %3875 = vmatmul.mubr.bf16.gmra.mxu0 %v3680_v24  ;;  %v4409_v31 = vadd.f32 %v4377_v51, %v4343_v9  ;;  %v3199_v56 = vadd.f32 %v3167_v22, %v3133_v28  ;;  %v3363_v53 = vmul.f32 %v7386_v3, %v10482_v14  ;;  %v7393_v48 = vld [vmem:[%s8302_s23 + $0x898] sm:$0xff] }
 0x2c5   : > { %v3365_v61 = vmul.f32 %v7387_v33, %v10482_v14  ;;  %v4473_v26 = vadd.f32 %v4441_v55, %v4407_v62  ;;  %v3263_v39 = vadd.f32 %v3231_v8, %v3197_v16  ;;  %v3429_v6 = vmul.f32 %v7388_v17, %v10510_v25  ;;  %v7392_v55 = vld [vmem:[%s8302_s23 + $0x888] sm:$0xff] }
 0x2c6   : > { %v3431_v43 = vmul.f32 %v7389_v44, %v10510_v25  ;;  %v4475_v58 = vadd.f32 %v4443_v5, %v4409_v31  ;;  %v3265_v51 = vadd.f32 %v3233_v30, %v3199_v56  ;;  %v3495_v60 = vmul.f32 %v7390_v15, %v12255_v47 }
 0x2c7   : > { %v3497_v40 = vmul.f32 %v7391_v20, %v12255_v47  ;;  %v4507_v35 = vadd.f32 %v12257_v63, %v4473_v26  ;;  %v3329_v1 = vadd.f32 %v3297_v29, %v3263_v39  ;;  %v3561_v49 = vmul.f32 %v7392_v55, %v12258_v59 }
 0x2c8   : > { %v3563_v22 = vmul.f32 %v7393_v48, %v12258_v59  ;;  %v4509_v8 = vadd.f32 %v12257_v63, %v4475_v58  ;;  %v3331_v24 = vadd.f32 %v3299_v34, %v3265_v51  ;;  %v3950_v5 = vmul.f32 %v7376_v7, %v10541_v46 }
 0x2c9   : > { %v3952_v9 = vmul.f32 %v7377_v11, %v10541_v46  ;;  %v4539_v28 = vmax.f32 %v4507_v35, 0.0  ;;  %v3395_v30 = vadd.f32 %v3363_v53, %v3329_v1  ;;  %v3984_v62 = vmul.f32 %v7378_v50, %v10544_v38 }
 0x2ca   : > { %v3986_v16 = vmul.f32 %v7379_v57, %v10544_v38  ;;  %v4541_v29 = vmax.f32 %v4509_v8, 0.0  ;;  %v3397_v31 = vadd.f32 %v3365_v61, %v3331_v24  ;;  %v4050_v56 = vmul.f32 %v7380_v12, %v10547_v45  ;;  %v7394_v24 = vld [vmem:[%s8302_s23 + $0x80] sm:$0xff] }
 0x2cb   : > { %v4052_v26 = vmul.f32 %v7381_v4, %v10547_v45  ;;  %v3461_v39 = vadd.f32 %v3429_v6, %v3395_v30  ;;  %v4016_v59 = vadd.f32 %v3984_v62, %v3950_v5  ;;  %v4116_v34 = vmul.f32 %v7382_v21, %v10566_v23  ;;  %v7397_v30 = vld [vmem:[%s8302_s23 + $0x190] sm:$0xff] }
 0x2cc   : > { %v4018_v58 = vadd.f32 %v3986_v16, %v3952_v9  ;;  %v4565_v7 = vpack.c.bf16 %v4541_v29, %v4539_v28  ;;  %v3463_v51 = vadd.f32 %v3431_v43, %v3397_v31  ;;  %v4118_v11 = vmul.f32 %v7383_v42, %v10566_v23  ;;  %v7398_v29 = vld [vmem:[%s8302_s23 + $0x280] sm:$0xff] }
 0x2cd   : > { %v4182_v53 = vmul.f32 %v7384_v32, %v10569_v18  ;;  %v3527_v50 = vadd.f32 %v3495_v60, %v3461_v39  ;;  %v4082_v35 = vadd.f32 %v4050_v56, %v4016_v59  ;;  %v4184_v61 = vmul.f32 %v7385_v41, %v10569_v18  ;;  %v7399_v56 = vld [vmem:[%s8302_s23 + $0x290] sm:$0xff] }
 0x2ce   : > { %v4084_v57 = vadd.f32 %v4052_v26, %v4018_v58  ;;  %4760 = vmatmul.mubr.bf16.gmra.mxu1 %v4565_v7  ;;  %v3529_v12 = vadd.f32 %v3497_v40, %v3463_v51  ;;  %v4248_v4 = vmul.f32 %v7386_v3, %v10582_v10  ;;  %v4250_v6 = vmul.f32 %v7387_v33, %v10582_v10  ;;  %v7400_v7 = vld [vmem:[%s8302_s23 + $0x380] sm:$0xff] }
 0x2cf   : > { %v4314_v21 = vmul.f32 %v7388_v17, %v10585_v19  ;;  %v3593_v43 = vadd.f32 %v3561_v49, %v3527_v50  ;;  %v4148_v1 = vadd.f32 %v4116_v34, %v4082_v35  ;;  %v4316_v32 = vmul.f32 %v7389_v44, %v10585_v19  ;;  %v7401_v50 = vld [vmem:[%s8302_s23 + $0x390] sm:$0xff] }
 0x2d0   : > { %v4150_v42 = vadd.f32 %v4118_v11, %v4084_v57  ;;  %v3595_v59 = vadd.f32 %v3563_v22, %v3529_v12  ;;  %v4380_v60 = vmul.f32 %v7390_v15, %v10596_v36  ;;  %v4382_v41 = vmul.f32 %v7391_v20, %v10596_v36  ;;  %v7395_v22 = vld [vmem:[%s8302_s23 + $0x90] sm:$0xff]  ;;  %v7396_v20 = vld [vmem:[%s8302_s23 + $0x180] sm:$0xff] }
 0x2d1   : > { %v4446_v3 = vmul.f32 %v7392_v55, %v10599_v52  ;;  %v3627_v40 = vadd.f32 %v10532_v13, %v3593_v43  ;;  %v4214_v33 = vadd.f32 %v4182_v53, %v4148_v1  ;;  %v4448_v17 = vmul.f32 %v7393_v48, %v10599_v52  ;;  %v7402_v57 = vld [vmem:[%s8302_s23 + $0x480] sm:$0xff] }
 0x2d2   : > { %v4216_v8 = vadd.f32 %v4184_v61, %v4150_v42  ;;  %v3629_v49 = vadd.f32 %v10532_v13, %v3595_v59  ;;  %v3064_v44 = vmul.f32 %v7394_v24, %v10415_v37  ;;  %v3066_v15 = vmul.f32 %v7395_v22, %v10415_v37  ;;  %v7404_v42 = vld [vmem:[%s8302_s23 + $0x580] sm:$0xff]  ;;  %v7405_v59 = vld [vmem:[%s8302_s23 + $0x590] sm:$0xff] }
 0x2d3   : > { %v3098_v55 = vmul.f32 %v7396_v20, %v10432_v54  ;;  %v3659_v5 = vmax.f32 %v3627_v40, 0.0  ;;  %v4280_v9 = vadd.f32 %v4248_v4, %v4214_v33  ;;  %v3100_v48 = vmul.f32 %v7397_v30, %v10432_v54  ;;  %v7406_v33 = vld [vmem:[%s8302_s23 + $0x680] sm:$0xff] }
 0x2d4   : > { %v4282_v28 = vadd.f32 %v4250_v6, %v4216_v8  ;;  %v3661_v62 = vmax.f32 %v3629_v49, 0.0  ;;  %v3164_v31 = vmul.f32 %v7398_v29, %v10435_v27  ;;  %v3166_v26 = vmul.f32 %v7399_v56, %v10435_v27 }
 0x2d5   : > { %v3130_v16 = vadd.f32 %v3098_v55, %v3064_v44  ;;  %v4346_v39 = vadd.f32 %v4314_v21, %v4280_v9  ;;  %v3132_v34 = vadd.f32 %v3100_v48, %v3066_v15  ;;  %v3230_v51 = vmul.f32 %v7400_v7, %v10462_v2  ;;  %v7403_v21 = vld [vmem:[%s8302_s23 + $0x490] sm:$0xff] }
 0x2d6   : > { %v4348_v58 = vadd.f32 %v4316_v32, %v4282_v28  ;;  %v3683_v11 = vpack.c.bf16 %v3661_v62, %v3659_v5  ;;  %v3232_v35 = vmul.f32 %v7401_v50, %v10462_v2  ;;  %v3296_v61 = vmul.f32 %v7402_v57, %v10479_v0  ;;  %v7407_v44 = vld [vmem:[%s8302_s23 + $0x690] sm:$0xff]  ;;  %v7408_v5 = vld [vmem:[%s8302_s23 + $0x780] sm:$0xff] }
 0x2d7   : > { %v3196_v53 = vadd.f32 %v3164_v31, %v3130_v16  ;;  %v4412_v12 = vadd.f32 %v4380_v60, %v4346_v39  ;;  %v3198_v6 = vadd.f32 %v3166_v26, %v3132_v34  ;;  %v3298_v43 = vmul.f32 %v7403_v21, %v10479_v0  ;;  %v7409_v28 = vld [vmem:[%s8302_s23 + $0x790] sm:$0xff]  ;;  %v7410_v62 = vld [vmem:[%s8302_s23 + $0x880] sm:$0xff]  ;;  %v12259_v16 = vld [vmem:[#allocation10_spill] sm:$0xff] }
 0x2d8   : > { %v4414_v4 = vadd.f32 %v4382_v41, %v4348_v58  ;;  %3882 = vmatprep.mubr.bf16.mxu0 %v3683_v11  ;;  %v3362_v32 = vmul.f32 %v7404_v42, %v10482_v14  ;;  %v3364_v40 = vmul.f32 %v7405_v59, %v10482_v14  ;;  %v3428_v60 = vmul.f32 %v7406_v33, %v10510_v25 }
 0x2d9   : > { %v3262_v1 = vadd.f32 %v3230_v51, %v3196_v53  ;;  %v4478_v41 = vadd.f32 %v4446_v3, %v4412_v12  ;;  %v3264_v49 = vadd.f32 %v3232_v35, %v3198_v6  ;;  %v3430_v15 = vmul.f32 %v7407_v44, %v10510_v25 }
 0x2da   : > { %v4480_v8 = vadd.f32 %v4448_v17, %v4414_v4  ;;  %v3494_v9 = vmul.f32 %v7408_v5, %v12255_v47  ;;  %v3496_v48 = vmul.f32 %v7409_v28, %v12255_v47  ;;  %v3560_v31 = vmul.f32 %v7410_v62, %v12259_v16  ;;  %v7411_v17 = vld [vmem:[%s8302_s23 + $0x890] sm:$0xff] }
 0x2db   : > { %v3328_v55 = vadd.f32 %v3296_v61, %v3262_v1  ;;  %v4512_v26 = vadd.f32 %v12257_v63, %v4478_v41  ;;  %v3330_v3 = vadd.f32 %v3298_v43, %v3264_v49  ;;  %v3562_v58 = vmul.f32 %v7411_v17, %v12259_v16 }
 0x2dc   : > { %v4514_v39 = vadd.f32 %v12257_v63, %v4480_v8  ;;  %v3949_v51 = vmul.f32 %v7394_v24, %v10541_v46  ;;  %v3951_v11 = vmul.f32 %v7395_v22, %v10541_v46  ;;  %v3983_v53 = vmul.f32 %v7396_v20, %v10544_v38 }
 0x2dd   : > { %v3394_v34 = vadd.f32 %v3362_v32, %v3328_v55  ;;  %v4544_v35 = vmax.f32 %v4512_v26, 0.0  ;;  %v3396_v12 = vadd.f32 %v3364_v40, %v3330_v3  ;;  %v3985_v4 = vmul.f32 %v7397_v30, %v10544_v38 }
 0x2de   : > { %v4546_v61 = vmax.f32 %v4514_v39, 0.0  ;;  %v4015_v1 = vadd.f32 %v3983_v53, %v3949_v51  ;;  %v4049_v41 = vmul.f32 %v7398_v29, %v10547_v45  ;;  %v4051_v43 = vmul.f32 %v7399_v56, %v10547_v45  ;;  %v7414_v53 = vld [vmem:[%s8302_s23 + $0x1a8] sm:$0xff] }
 0x2df   : > { %v3460_v6 = vadd.f32 %v3428_v60, %v3394_v34  ;;  %v3462_v49 = vadd.f32 %v3430_v15, %v3396_v12  ;;  %v4017_v32 = vadd.f32 %v3985_v4, %v3951_v11  ;;  %v4115_v24 = vmul.f32 %v7400_v7, %v10566_v23  ;;  %v11131_v34 = vld [vmem:[%s8302_s23 + $0xa8] sm:$0xff]  ;;  %v7413_v11 = vld [vmem:[%s8302_s23 + $0xb8] sm:$0xff] }
 0x2e0   : > { %v4568_v8 = vpack.c.bf16 %v4546_v61, %v4544_v35  ;;  %v4081_v22 = vadd.f32 %v4049_v41, %v4015_v1  ;;  %v4117_v20 = vmul.f32 %v7401_v50, %v10566_v23  ;;  %v4181_v26 = vmul.f32 %v7402_v57, %v10569_v18  ;;  %v7415_v12 = vld [vmem:[%s8302_s23 + $0x1b8] sm:$0xff]  ;;  %v7416_v4 = vld [vmem:[%s8302_s23 + $0x2a8] sm:$0xff] }
 0x2e1   : > { %v3526_v55 = vadd.f32 %v3494_v9, %v3460_v6  ;;  %v3528_v40 = vadd.f32 %v3496_v48, %v3462_v49  ;;  %v4083_v30 = vadd.f32 %v4051_v43, %v4017_v32  ;;  %v4183_v60 = vmul.f32 %v7403_v21, %v10569_v18  ;;  %v7417_v43 = vld [vmem:[%s8302_s23 + $0x2b8] sm:$0xff]  ;;  %v7418_v49 = vld [vmem:[%s8302_s23 + $0x3a8] sm:$0xff] }
 0x2e2   : > { %4767 = vmatprep.mubr.bf16.mxu1 %v4568_v8  ;;  %v4247_v29 = vmul.f32 %v7404_v42, %v10582_v10  ;;  %v4147_v39 = vadd.f32 %v4115_v24, %v4081_v22  ;;  %v4249_v15 = vmul.f32 %v7405_v59, %v10582_v10  ;;  %v4313_v7 = vmul.f32 %v7406_v33, %v10585_v19 }
 0x2e3   : > { %v3592_v56 = vadd.f32 %v3560_v31, %v3526_v55  ;;  %v3594_v9 = vadd.f32 %v3562_v58, %v3528_v40  ;;  %v4149_v3 = vadd.f32 %v4117_v20, %v4083_v30  ;;  %v4315_v50 = vmul.f32 %v7407_v44, %v10585_v19  ;;  %v7419_v20 = vld [vmem:[%s8302_s23 + $0x3b8] sm:$0xff] }
 0x2e4   : > { %v4379_v57 = vmul.f32 %v7408_v5, %v10596_v36  ;;  %v4213_v21 = vadd.f32 %v4181_v26, %v4147_v39  ;;  %v4381_v42 = vmul.f32 %v7409_v28, %v10596_v36  ;;  %v4445_v31 = vmul.f32 %v7410_v62, %v10599_v52 }
 0x2e5   : > { %v3626_v48 = vadd.f32 %v10532_v13, %v3592_v56  ;;  %v3628_v59 = vadd.f32 %v10532_v13, %v3594_v9  ;;  %v4215_v33 = vadd.f32 %v4183_v60, %v4149_v3  ;;  %v4447_v58 = vmul.f32 %v7411_v17, %v10599_v52  ;;  %v7420_v60 = vld [vmem:[%s8302_s23 + $0x4a8] sm:$0xff]  ;;  %v7421_v56 = vld [vmem:[%s8302_s23 + $0x4b8] sm:$0xff] }
 0x2e6   : > { %v3069_v44 = vmul.f32 %v11131_v34, %v10415_v37  ;;  %v4279_v51 = vadd.f32 %v4247_v29, %v4213_v21  ;;  %v3071_v28 = vmul.f32 %v7413_v11, %v10415_v37  ;;  %v3103_v62 = vmul.f32 %v7414_v53, %v10432_v54 }
 0x2e7   : > { %v3658_v5 = vmax.f32 %v3626_v48, 0.0  ;;  %v3660_v35 = vmax.f32 %v3628_v59, 0.0  ;;  %v4281_v61 = vadd.f32 %v4249_v15, %v4215_v33  ;;  %v3105_v17 = vmul.f32 %v7415_v12, %v10432_v54  ;;  %v11153_v15 = vpop.f32.mrf.mxu0  ;;  %v7423_v48 = vld [vmem:[%s8302_s23 + $0x5b8] sm:$0xff] }
 0x2e8   : > { %v3169_v6 = vmul.f32 %v7416_v4, %v10435_v27  ;;  %v4345_v1 = vadd.f32 %v4313_v7, %v4279_v51  ;;  %v3135_v41 = vadd.f32 %v3103_v62, %v3069_v44  ;;  %v3171_v8 = vmul.f32 %v7417_v43, %v10435_v27  ;;  %12260 = vst [vmem:[#allocation9_spill] sm:$0xff] %v11153_v15  ;;  %v11155_v7 = vpop.f32.mrf.mxu1  ;;  %v7424_v44 = vld [vmem:[%s8302_s23 + $0x6a8] sm:$0xff]  ;;  %v7425_v51 = vld [vmem:[%s8302_s23 + $0x6b8] sm:$0xff] }
 0x2e9   : > { %v3235_v32 = vmul.f32 %v7418_v49, %v10462_v2  ;;  %v3682_v24 = vpack.c.bf16 %v3660_v35, %v3658_v5  ;;  %v4347_v55 = vadd.f32 %v4315_v50, %v4281_v61  ;;  %v3137_v22 = vadd.f32 %v3105_v17, %v3071_v28  ;;  %12261 = vst [vmem:[#allocation11_spill] sm:$0xff] %v11155_v7  ;;  %v7422_v50 = vld [vmem:[%s8302_s23 + $0x5a8] sm:$0xff] }
 0x2ea   : > { %v3237_v26 = vmul.f32 %v7419_v20, %v10462_v2  ;;  %v4411_v40 = vadd.f32 %v4379_v57, %v4345_v1  ;;  %v3201_v30 = vadd.f32 %v3169_v6, %v3135_v41  ;;  %v3301_v29 = vmul.f32 %v7420_v60, %v10479_v0  ;;  %v11167_v62 = vpop.f32.mrf.mxu1  ;;  %v7426_v17 = vld [vmem:[%s8302_s23 + $0x7a8] sm:$0xff]  ;;  %v7427_v1 = vld [vmem:[%s8302_s23 + $0x7b8] sm:$0xff] }
 0x2eb   : > { %v3303_v39 = vmul.f32 %v7421_v56, %v10479_v0  ;;  %3883 = vmatmul.mubr.bf16.gmra.mxu0 %v3682_v24  ;;  %v4413_v9 = vadd.f32 %v4381_v42, %v4347_v55  ;;  %v3203_v3 = vadd.f32 %v3171_v8, %v3137_v22  ;;  %v3367_v57 = vmul.f32 %v7422_v50, %v10482_v14  ;;  %v11165_v42 = vpop.f32.mrf.mxu0  ;;  %v7429_v55 = vld [vmem:[%s8302_s23 + $0x8b8] sm:$0xff] }
 0x2ec   : > { %v3369_v21 = vmul.f32 %v7423_v48, %v10482_v14  ;;  %v4477_v59 = vadd.f32 %v4445_v31, %v4411_v40  ;;  %v3267_v33 = vadd.f32 %v3235_v32, %v3201_v30  ;;  %v3433_v5 = vmul.f32 %v7424_v44, %v10510_v25  ;;  %12262 = vst [vmem:[#allocation10_spill] sm:$0xff] %v11165_v42  ;;  %v7428_v32 = vld [vmem:[%s8302_s23 + $0x8a8] sm:$0xff]  ;;  %v11180_v30 = vpop.f32.mrf.mxu1 }
 0x2ed   : > { %v3435_v28 = vmul.f32 %v7425_v51, %v10510_v25  ;;  %12263 = vst [vmem:[#allocation12_spill] sm:$0xff] %v11167_v62  ;;  %v4479_v35 = vadd.f32 %v4447_v58, %v4413_v9  ;;  %v3269_v61 = vadd.f32 %v3237_v26, %v3203_v3  ;;  %v3499_v6 = vmul.f32 %v7426_v17, %v12255_v47  ;;  %v11178_v40 = vpop.f32.mrf.mxu0 }
 0x2ee   : > { %v3501_v31 = vmul.f32 %v7427_v1, %v12255_v47  ;;  %v4511_v41 = vadd.f32 %v12257_v63, %v4477_v59  ;;  %v3333_v8 = vadd.f32 %v3301_v29, %v3267_v33  ;;  %v3565_v24 = vmul.f32 %v7428_v32, %v12259_v16  ;;  %12264 = vst [vmem:[#allocation13_spill] sm:$0xff] %v11178_v40  ;;  %v11190_v42 = vpop.f32.mrf.mxu1 }
 0x2ef   : > { %v3567_v22 = vmul.f32 %v7429_v55, %v12259_v16  ;;  %12265 = vst [vmem:[#allocation14_spill] sm:$0xff] %v11180_v30  ;;  %v4513_v58 = vadd.f32 %v12257_v63, %v4479_v35  ;;  %v3335_v26 = vadd.f32 %v3303_v39, %v3269_v61  ;;  %v3954_v9 = vmul.f32 %v11131_v34, %v10541_v46  ;;  %v11188_v7 = vpop.f32.mrf.mxu0 }
 0x2f0   : > { %v3956_v3 = vmul.f32 %v7413_v11, %v10541_v46  ;;  %v4543_v59 = vmax.f32 %v4511_v41, 0.0  ;;  %v3399_v29 = vadd.f32 %v3367_v57, %v3333_v8  ;;  %v3988_v33 = vmul.f32 %v7414_v53, %v10544_v38  ;;  %12266 = vst [vmem:[#allocation15_spill] sm:$0xff] %v11188_v7  ;;  %12267 = vst [vmem:[#allocation16_spill] sm:$0xff] %v11190_v42  ;;  %v11197_v53 = vpop.f32.mrf.mxu1 }
 0x2f1   : > { %v3990_v62 = vmul.f32 %v7415_v12, %v10544_v38  ;;  %v4545_v40 = vmax.f32 %v4513_v58, 0.0  ;;  %v3401_v30 = vadd.f32 %v3369_v21, %v3335_v26  ;;  %v4054_v35 = vmul.f32 %v7416_v4, %v10547_v45  ;;  %v11195_v57 = vpop.f32.mrf.mxu0  ;;  %12269 = vst [vmem:[#allocation18_spill] sm:$0xff] %v11197_v53 }
 0x2f2   : > { %v4056_v39 = vmul.f32 %v7417_v43, %v10547_v45  ;;  %v3465_v61 = vadd.f32 %v3433_v5, %v3399_v29  ;;  %v4020_v34 = vadd.f32 %v3988_v33, %v3954_v9  ;;  %v4120_v11 = vmul.f32 %v7418_v49, %v10566_v23  ;;  %12268 = vst [vmem:[#allocation17_spill] sm:$0xff] %v11195_v57 }
 0x2f3   : > { %v4022_v15 = vadd.f32 %v3990_v62, %v3956_v3  ;;  %v4567_v12 = vpack.c.bf16 %v4545_v40, %v4543_v59  ;;  %v3467_v41 = vadd.f32 %v3435_v28, %v3401_v30  ;;  %v4122_v8 = vmul.f32 %v7419_v20, %v10566_v23  ;;  %v11202_v5 = vpop.f32.mrf.mxu0  ;;  %v11204_v62 = vpop.f32.mrf.mxu1 }
 0x2f4   : > { %v4186_v58 = vmul.f32 %v7420_v60, %v10569_v18  ;;  %v3531_v21 = vadd.f32 %v3499_v6, %v3465_v61  ;;  %v4086_v26 = vadd.f32 %v4054_v35, %v4020_v34  ;;  %v4188_v43 = vmul.f32 %v7421_v56, %v10569_v18  ;;  %12270 = vst [vmem:[#allocation19_spill] sm:$0xff] %v11202_v5 }
 0x2f5   : > { %v4088_v4 = vadd.f32 %v4056_v39, %v4022_v15  ;;  %12271 = vst [vmem:[#allocation20_spill] sm:$0xff] %v11204_v62  ;;  %4768 = vmatmul.mubr.bf16.gmra.mxu1 %v4567_v12  ;;  %v3533_v49 = vadd.f32 %v3501_v31, %v3467_v41  ;;  %v4252_v9 = vmul.f32 %v7422_v50, %v10582_v10  ;;  %v11210_v56 = vpop.f32.mrf.mxu0  ;;  %v11212_v6 = vpop.f32.mrf.mxu1  ;;  %v11235_v39 = vld [vmem:[%s8302_s23 + $0x1a0] sm:$0xff]  ;;  %v11240_v12 = vld [vmem:[%s8302_s23 + $0x1b0] sm:$0xff] }
 0x2f6   : > { %v4254_v40 = vmul.f32 %v7423_v48, %v10582_v10  ;;  %v4318_v28 = vmul.f32 %v7424_v44, %v10585_v19  ;;  %v3597_v20 = vadd.f32 %v3565_v24, %v3531_v21  ;;  %v4152_v30 = vadd.f32 %v4120_v11, %v4086_v26  ;;  %12272 = vst [vmem:[#allocation21_spill] sm:$0xff] %v11210_v56  ;;  %v7446_v56 = vld [vmem:[%s8302_s23 + $0x8a0] sm:$0xff] }
 0x2f7   : > { %v4154_v60 = vadd.f32 %v4122_v8, %v4088_v4  ;;  %v4320_v15 = vmul.f32 %v7425_v51, %v10585_v19  ;;  %12273 = vst [vmem:[#allocation22_spill] sm:$0xff] %v11212_v6  ;;  %v3599_v3 = vadd.f32 %v3567_v22, %v3533_v49  ;;  %v4384_v31 = vmul.f32 %v7426_v17, %v10596_v36  ;;  %v11219_v29 = vpop.f32.mrf.mxu0  ;;  %v11221_v33 = vpop.f32.mrf.mxu1  ;;  %v11225_v22 = vld [vmem:[%s8302_s23 + $0xa0] sm:$0xff]  ;;  %v11254_v49 = vld [vmem:[%s8302_s23 + $0x2b0] sm:$0xff] }
 0x2f8   : > { %v4386_v50 = vmul.f32 %v7427_v1, %v10596_v36  ;;  %v4450_v48 = vmul.f32 %v7428_v32, %v10599_v52  ;;  %v3631_v44 = vadd.f32 %v10532_v13, %v3597_v20  ;;  %v4218_v24 = vadd.f32 %v4186_v58, %v4152_v30  ;;  %12274 = vst [vmem:[#allocation23_spill] sm:$0xff] %v11219_v29  ;;  %v11230_v1 = vld [vmem:[%s8302_s23 + $0xb0] sm:$0xff]  ;;  %v11249_v4 = vld [vmem:[%s8302_s23 + $0x2a0] sm:$0xff] }
 0x2f9   : > { %v4220_v59 = vadd.f32 %v4188_v43, %v4154_v60  ;;  %v4452_v51 = vmul.f32 %v7429_v55, %v10599_v52  ;;  %12275 = vst [vmem:[#allocation24_spill] sm:$0xff] %v11221_v33  ;;  %v3633_v35 = vadd.f32 %v10532_v13, %v3599_v3  ;;  %v3068_v17 = vmul.f32 %v11225_v22, %v10415_v37  ;;  %v11244_v8 = vpop.f32.mrf.mxu0  ;;  %v11246_v58 = vpop.f32.mrf.mxu1  ;;  %v11259_v60 = vld [vmem:[%s8302_s23 + $0x3a0] sm:$0xff]  ;;  %v7445_v6 = vld [vmem:[%s8302_s23 + $0x7b0] sm:$0xff] }
 0x2fa   : > { %v3070_v32 = vmul.f32 %v11230_v1, %v10415_v37  ;;  %v3102_v55 = vmul.f32 %v11235_v39, %v10432_v54  ;;  %v3663_v61 = vmax.f32 %v3631_v44, 0.0  ;;  %v4284_v34 = vadd.f32 %v4252_v9, %v4218_v24  ;;  %12276 = vst [vmem:[#allocation25_spill] sm:$0xff] %v11244_v8  ;;  %12277 = vst [vmem:[#allocation26_spill] sm:$0xff] %v11246_v58  ;;  %v7444_v8 = vld [vmem:[%s8302_s23 + $0x7a0] sm:$0xff] }
 0x2fb   : > { %v4286_v11 = vadd.f32 %v4254_v40, %v4220_v59  ;;  %v3104_v41 = vmul.f32 %v11240_v12, %v10432_v54  ;;  %v3665_v21 = vmax.f32 %v3633_v35, 0.0  ;;  %v3168_v43 = vmul.f32 %v11249_v4, %v10435_v27  ;;  %v11263_v44 = vpop.f32.mrf.mxu0  ;;  %v11265_v24 = vpop.f32.mrf.mxu1 }
 0x2fc   : > { %v3134_v26 = vadd.f32 %v3102_v55, %v3068_v17  ;;  %v3170_v9 = vmul.f32 %v11254_v49, %v10435_v27  ;;  %v4350_v40 = vadd.f32 %v4318_v28, %v4284_v34  ;;  %v3234_v3 = vmul.f32 %v11259_v60, %v10462_v2  ;;  %12278 = vst [vmem:[#allocation27_spill] sm:$0xff] %v11263_v44  ;;  %v7437_v17 = vld [vmem:[%s8302_s23 + $0x3b0] sm:$0xff]  ;;  %v7438_v28 = vld [vmem:[%s8302_s23 + $0x4a0] sm:$0xff] }
 0x2fd   : > { %v4352_v20 = vadd.f32 %v4320_v15, %v4286_v11  ;;  %v3136_v30 = vadd.f32 %v3104_v41, %v3070_v32  ;;  %12279 = vst [vmem:[#allocation28_spill] sm:$0xff] %v11265_v24  ;;  %v3685_v59 = vpack.c.bf16 %v3665_v21, %v3663_v61  ;;  %v3236_v55 = vmul.f32 %v7437_v17, %v10462_v2  ;;  %v7439_v41 = vld [vmem:[%s8302_s23 + $0x4b0] sm:$0xff]  ;;  %v11273_v44 = vpop.f32.mrf.mxu0  ;;  %v11275_v24 = vpop.f32.mrf.mxu1  ;;  %v7440_v21 = vld [vmem:[%s8302_s23 + $0x5a0] sm:$0xff] }
 0x2fe   : > { %v3200_v35 = vadd.f32 %v3168_v43, %v3134_v26  ;;  %v3300_v15 = vmul.f32 %v7438_v28, %v10479_v0  ;;  %v4416_v32 = vadd.f32 %v4384_v31, %v4350_v40  ;;  %v3302_v58 = vmul.f32 %v7439_v41, %v10479_v0  ;;  %12280 = vst [vmem:[#allocation29_spill] sm:$0xff] %v11273_v44  ;;  %v7441_v43 = vld [vmem:[%s8302_s23 + $0x5b0] sm:$0xff] }
 0x2ff   : > { %v4418_v34 = vadd.f32 %v4386_v50, %v4352_v20  ;;  %v3202_v11 = vadd.f32 %v3170_v9, %v3136_v30  ;;  %12281 = vst [vmem:[#allocation30_spill] sm:$0xff] %v11275_v24  ;;  %3890 = vmatprep.mubr.bf16.mxu0 %v3685_v59  ;;  %v3366_v26 = vmul.f32 %v7440_v21, %v10482_v14  ;;  %v7442_v50 = vld [vmem:[%s8302_s23 + $0x6a0] sm:$0xff]  ;;  %v7443_v44 = vld [vmem:[%s8302_s23 + $0x6b0] sm:$0xff]  ;;  %v11285_v24 = vpop.f32.mrf.mxu0 }
 0x300   : > { %v3266_v61 = vadd.f32 %v3234_v3, %v3200_v35  ;;  %v3368_v31 = vmul.f32 %v7441_v43, %v10482_v14  ;;  %v3432_v9 = vmul.f32 %v7442_v50, %v10510_v25  ;;  %v4482_v40 = vadd.f32 %v4450_v48, %v4416_v32  ;;  %12282 = vst [vmem:[#allocation31_spill] sm:$0xff] %v11285_v24  ;;  %v11287_v3 = vpop.f32.mrf.mxu1 }
 0x301   : > { %v4484_v20 = vadd.f32 %v4452_v51, %v4418_v34  ;;  %v3268_v30 = vadd.f32 %v3236_v55, %v3202_v11  ;;  %v3434_v59 = vmul.f32 %v7443_v44, %v10510_v25  ;;  %12283 = vst [vmem:[#allocation32_spill] sm:$0xff] %v11287_v3  ;;  %v3498_v33 = vmul.f32 %v7444_v8, %v12255_v47  ;;  %v7447_v34 = vld [vmem:[%s8302_s23 + $0x8b0] sm:$0xff]  ;;  %v11299_v24 = vpop.f32.mrf.mxu0 }
 0x302   : > { %v3332_v35 = vadd.f32 %v3300_v15, %v3266_v61  ;;  %v3500_v29 = vmul.f32 %v7445_v6, %v12255_v47  ;;  %v3564_v48 = vmul.f32 %v7446_v56, %v12259_v16  ;;  %v4516_v51 = vadd.f32 %v12257_v63, %v4482_v40  ;;  %12284 = vst [vmem:[#allocation33_spill] sm:$0xff] %v11299_v24  ;;  %v11301_v15 = vpop.f32.mrf.mxu1 }
 0x303   : > { %v4518_v55 = vadd.f32 %v12257_v63, %v4484_v20  ;;  %v3334_v32 = vadd.f32 %v3302_v58, %v3268_v30  ;;  %v3566_v11 = vmul.f32 %v7447_v34, %v12259_v16  ;;  %12285 = vst [vmem:[#allocation34_spill] sm:$0xff] %v11301_v15  ;;  %v3953_v3 = vmul.f32 %v11225_v22, %v10541_v46  ;;  %v11311_v5 = vpop.f32.mrf.mxu0 }
 0x304   : > { %v3398_v61 = vadd.f32 %v3366_v26, %v3332_v35  ;;  %v3955_v62 = vmul.f32 %v11230_v1, %v10541_v46  ;;  %v3987_v40 = vmul.f32 %v11235_v39, %v10544_v38  ;;  %v4548_v53 = vmax.f32 %v4516_v51, 0.0  ;;  %12286 = vst [vmem:[#allocation35_spill] sm:$0xff] %v11311_v5  ;;  %v11313_v24 = vpop.f32.mrf.mxu1 }
 0x305   : > { %v4550_v20 = vmax.f32 %v4518_v55, 0.0  ;;  %v3400_v58 = vadd.f32 %v3368_v31, %v3334_v32  ;;  %v3989_v30 = vmul.f32 %v11240_v12, %v10544_v38  ;;  %12287 = vst [vmem:[#allocation36_spill] sm:$0xff] %v11313_v24  ;;  %v4053_v22 = vmul.f32 %v11249_v4, %v10547_v45  ;;  %v11321_v55 = vpop.f32.mrf.mxu0 }
 0x306   : > { %v3464_v26 = vadd.f32 %v3432_v9, %v3398_v61  ;;  %v4019_v35 = vadd.f32 %v3987_v40, %v3953_v3  ;;  %v4055_v1 = vmul.f32 %v11254_v49, %v10547_v45  ;;  %v4119_v31 = vmul.f32 %v11259_v60, %v10566_v23  ;;  %12288 = vst [vmem:[#allocation37_spill] sm:$0xff] %v11321_v55  ;;  %v11323_v12 = vpop.f32.mrf.mxu1 }
 0x307   : > { %v4570_v15 = vpack.c.bf16 %v4550_v20, %v4548_v53  ;;  %v3466_v39 = vadd.f32 %v3434_v59, %v3400_v58  ;;  %v4021_v51 = vadd.f32 %v3989_v30, %v3955_v62  ;;  %12289 = vst [vmem:[#allocation38_spill] sm:$0xff] %v11323_v12  ;;  %v4121_v9 = vmul.f32 %v7437_v17, %v10566_v23  ;;  %v11329_v49 = vpop.f32.mrf.mxu0 }
 0x308   : > { %v3530_v32 = vadd.f32 %v3498_v33, %v3464_v26  ;;  %v4085_v24 = vadd.f32 %v4053_v22, %v4019_v35  ;;  %v4185_v3 = vmul.f32 %v7438_v28, %v10569_v18  ;;  %v4187_v53 = vmul.f32 %v7439_v41, %v10569_v18  ;;  %12290 = vst [vmem:[#allocation39_spill] sm:$0xff] %v11329_v49  ;;  %v11331_v60 = vpop.f32.mrf.mxu1  ;;  %v7465_v49 = vld [vmem:[%s8302_s23 + $0x8d8] sm:$0xff] }
 0x309   : > { %4775 = vmatprep.mubr.bf16.mxu1 %v4570_v15  ;;  %v3532_v4 = vadd.f32 %v3500_v29, %v3466_v39  ;;  %v4087_v61 = vadd.f32 %v4055_v1, %v4021_v51  ;;  %v4251_v62 = vmul.f32 %v7440_v21, %v10582_v10  ;;  %12291 = vst [vmem:[#allocation40_spill] sm:$0xff] %v11331_v60  ;;  %v11337_v41 = vpop.f32.mrf.mxu0  ;;  %v7450_v39 = vld [vmem:[%s8302_s23 + $0x1c8] sm:$0xff]  ;;  %v7463_v60 = vld [vmem:[%s8302_s23 + $0x7d8] sm:$0xff] }
 0x30a   : > { %v3596_v59 = vadd.f32 %v3564_v48, %v3530_v32  ;;  %v4151_v40 = vadd.f32 %v4119_v31, %v4085_v24  ;;  %v4253_v33 = vmul.f32 %v7441_v43, %v10582_v10  ;;  %v4317_v17 = vmul.f32 %v7442_v50, %v10585_v19  ;;  %12292 = vst [vmem:[#allocation41_spill] sm:$0xff] %v11337_v41  ;;  %v11339_v21 = vpop.f32.mrf.mxu1  ;;  %v7451_v32 = vld [vmem:[%s8302_s23 + $0x1d8] sm:$0xff] }
 0x30b   : > { %v3598_v20 = vadd.f32 %v3566_v11, %v3532_v4  ;;  %v4153_v28 = vadd.f32 %v4121_v9, %v4087_v61  ;;  %v4319_v29 = vmul.f32 %v7443_v44, %v10585_v19  ;;  %v4383_v15 = vmul.f32 %v7444_v8, %v10596_v36  ;;  %12293 = vst [vmem:[#allocation42_spill] sm:$0xff] %v11339_v21  ;;  %v11347_v44 = vld [vmem:[%s8302_s23 + $0xc8] sm:$0xff]  ;;  %v11351_v26 = vpop.f32.mrf.mxu0  ;;  %v7457_v21 = vld [vmem:[%s8302_s23 + $0x4d8] sm:$0xff] }
 0x30c   : > { %v3630_v48 = vadd.f32 %v10532_v13, %v3596_v59  ;;  %v4217_v24 = vadd.f32 %v4185_v3, %v4151_v40  ;;  %v4385_v58 = vmul.f32 %v7445_v6, %v10596_v36  ;;  %v4449_v43 = vmul.f32 %v7446_v56, %v10599_v52  ;;  %12294 = vst [vmem:[#allocation43_spill] sm:$0xff] %v11351_v26  ;;  %v11353_v35 = vpop.f32.mrf.mxu1  ;;  %v7449_v56 = vld [vmem:[%s8302_s23 + $0xd8] sm:$0xff]  ;;  %v7452_v3 = vld [vmem:[%s8302_s23 + $0x2c8] sm:$0xff] }
 0x30d   : > { %v3632_v50 = vadd.f32 %v10532_v13, %v3598_v20  ;;  %v4219_v11 = vadd.f32 %v4187_v53, %v4153_v28  ;;  %v4451_v8 = vmul.f32 %v7447_v34, %v10599_v52  ;;  %v3073_v30 = vmul.f32 %v11347_v44, %v10415_v37  ;;  %12295 = vst [vmem:[#allocation44_spill] sm:$0xff] %v11353_v35  ;;  %v11363_v61 = vpop.f32.mrf.mxu0  ;;  %v7453_v59 = vld [vmem:[%s8302_s23 + $0x2d8] sm:$0xff]  ;;  %v7454_v20 = vld [vmem:[%s8302_s23 + $0x3c8] sm:$0xff] }
 0x30e   : > { %v3662_v6 = vmax.f32 %v3630_v48, 0.0  ;;  %v4283_v22 = vadd.f32 %v4251_v62, %v4217_v24  ;;  %v3075_v1 = vmul.f32 %v7449_v56, %v10415_v37  ;;  %v3107_v51 = vmul.f32 %v7450_v39, %v10432_v54  ;;  %12296 = vst [vmem:[#allocation45_spill] sm:$0xff] %v11363_v61  ;;  %v7462_v26 = vld [vmem:[%s8302_s23 + $0x7c8] sm:$0xff] }
 0x30f   : > { %v3664_v34 = vmax.f32 %v3632_v50, 0.0  ;;  %v4285_v31 = vadd.f32 %v4253_v33, %v4219_v11  ;;  %v3109_v9 = vmul.f32 %v7451_v32, %v10432_v54  ;;  %v3173_v4 = vmul.f32 %v7452_v3, %v10435_v27  ;;  %v11369_v33 = vpop.f32.mrf.mxu1  ;;  %v7455_v11 = vld [vmem:[%s8302_s23 + $0x3d8] sm:$0xff]  ;;  %v11373_v35 = vpop.f32.mrf.mxu0 }
 0x310   : > { %v4349_v53 = vadd.f32 %v4317_v17, %v4283_v22  ;;  %v3139_v62 = vadd.f32 %v3107_v51, %v3073_v30  ;;  %v3175_v40 = vmul.f32 %v7453_v59, %v10435_v27  ;;  %v3239_v28 = vmul.f32 %v7454_v20, %v10462_v2  ;;  %12297 = vst [vmem:[#allocation46_spill] sm:$0xff] %v11369_v33  ;;  %v7456_v22 = vld [vmem:[%s8302_s23 + $0x4c8] sm:$0xff] }
 0x311   : > { %v3684_v48 = vpack.c.bf16 %v3664_v34, %v3662_v6  ;;  %v4351_v24 = vadd.f32 %v4319_v29, %v4285_v31  ;;  %v3141_v50 = vadd.f32 %v3109_v9, %v3075_v1  ;;  %v3241_v61 = vmul.f32 %v7455_v11, %v10462_v2  ;;  %12298 = vst [vmem:[#allocation47_spill] sm:$0xff] %v11373_v35  ;;  %v7458_v1 = vld [vmem:[%s8302_s23 + $0x5c8] sm:$0xff]  ;;  %v7459_v31 = vld [vmem:[%s8302_s23 + $0x5d8] sm:$0xff]  ;;  %v11383_v9 = vpop.f32.mrf.mxu0 }
 0x312   : > { %v4415_v17 = vadd.f32 %v4383_v15, %v4349_v53  ;;  %v3205_v30 = vadd.f32 %v3173_v4, %v3139_v62  ;;  %v3305_v51 = vmul.f32 %v7456_v22, %v10479_v0  ;;  %v3307_v33 = vmul.f32 %v7457_v21, %v10479_v0  ;;  %12299 = vst [vmem:[#allocation48_spill] sm:$0xff] %v11383_v9  ;;  %v7460_v62 = vld [vmem:[%s8302_s23 + $0x6c8] sm:$0xff] }
 0x313   : > { %3891 = vmatmul.mubr.bf16.gmra.mxu0 %v3684_v48  ;;  %v4417_v6 = vadd.f32 %v4385_v58, %v4351_v24  ;;  %v3207_v29 = vadd.f32 %v3175_v40, %v3141_v50  ;;  %v3371_v34 = vmul.f32 %v7458_v1, %v10482_v14  ;;  %v3373_v15 = vmul.f32 %v7459_v31, %v10482_v14  ;;  %v7461_v48 = vld [vmem:[%s8302_s23 + $0x6d8] sm:$0xff]  ;;  %v11389_v40 = vpop.f32.mrf.mxu1 }
 0x314   : > { %v4481_v4 = vadd.f32 %v4449_v43, %v4415_v17  ;;  %v3271_v53 = vadd.f32 %v3239_v28, %v3205_v30  ;;  %v3437_v35 = vmul.f32 %v7460_v62, %v10510_v25  ;;  %v3439_v58 = vmul.f32 %v7461_v48, %v10510_v25  ;;  %12300 = vst [vmem:[#allocation49_spill] sm:$0xff] %v11389_v40  ;;  %v11395_v43 = vpop.f32.mrf.mxu0  ;;  %v7464_v30 = vld [vmem:[%s8302_s23 + $0x8c8] sm:$0xff] }
 0x315   : > { %v4483_v24 = vadd.f32 %v4451_v8, %v4417_v6  ;;  %v3273_v50 = vadd.f32 %v3241_v61, %v3207_v29  ;;  %v3503_v41 = vmul.f32 %v7462_v26, %v12255_v47  ;;  %v3505_v9 = vmul.f32 %v7463_v60, %v12255_v47  ;;  %12301 = vst [vmem:[#allocation50_spill] sm:$0xff] %v11395_v43 }
 0x316   : > { %v4515_v28 = vadd.f32 %v12257_v63, %v4481_v4  ;;  %v3337_v17 = vadd.f32 %v3305_v51, %v3271_v53  ;;  %v3569_v12 = vmul.f32 %v7464_v30, %v12259_v16  ;;  %v3571_v55 = vmul.f32 %v7465_v49, %v12259_v16  ;;  %v11408_v4 = vpop.f32.mrf.mxu1  ;;  %v11410_v53 = vpop.f32.mrf.mxu0 }
 0x317   : > { %v4517_v8 = vadd.f32 %v12257_v63, %v4483_v24  ;;  %v3339_v61 = vadd.f32 %v3307_v33, %v3273_v50  ;;  %v3958_v6 = vmul.f32 %v11347_v44, %v10541_v46  ;;  %v3960_v29 = vmul.f32 %v7449_v56, %v10541_v46  ;;  %12302 = vst [vmem:[#allocation51_spill] sm:$0xff] %v11408_v4 }
 0x318   : > { %v4547_v40 = vmax.f32 %v4515_v28, 0.0  ;;  %v3403_v5 = vadd.f32 %v3371_v34, %v3337_v17  ;;  %v3992_v43 = vmul.f32 %v7450_v39, %v10544_v38  ;;  %v3994_v51 = vmul.f32 %v7451_v32, %v10544_v38  ;;  %12303 = vst [vmem:[#allocation52_spill] sm:$0xff] %v11410_v53 }
 0x319   : > { %v4549_v57 = vmax.f32 %v4517_v8, 0.0  ;;  %v3405_v42 = vadd.f32 %v3373_v15, %v3339_v61  ;;  %v4058_v24 = vmul.f32 %v7452_v3, %v10547_v45  ;;  %v4060_v33 = vmul.f32 %v7453_v59, %v10547_v45  ;;  %v11418_v8 = vpop.f32.mrf.mxu1  ;;  %v11420_v3 = vpop.f32.mrf.mxu0 }
 0x31a   : > { %v3469_v50 = vadd.f32 %v3437_v35, %v3403_v5  ;;  %v4024_v44 = vadd.f32 %v3992_v43, %v3958_v6  ;;  %v4026_v7 = vadd.f32 %v3994_v51, %v3960_v29  ;;  %v4124_v56 = vmul.f32 %v7454_v20, %v10566_v23  ;;  %12304 = vst [vmem:[#allocation53_spill] sm:$0xff] %v11418_v8  ;;  %v7469_v51 = vld [vmem:[%s8302_s23 + $0x1d0] sm:$0xff] }
 0x31b   : > { %v4569_v34 = vpack.c.bf16 %v4549_v57, %v4547_v40  ;;  %v3471_v28 = vadd.f32 %v3439_v58, %v3405_v42  ;;  %v4126_v39 = vmul.f32 %v7455_v11, %v10566_v23  ;;  %v4190_v32 = vmul.f32 %v7456_v22, %v10569_v18  ;;  %12305 = vst [vmem:[#allocation54_spill] sm:$0xff] %v11420_v3  ;;  %v11431_v58 = vpop.f32.mrf.mxu1  ;;  %v11433_v40 = vpop.f32.mrf.mxu0 }
 0x31c   : > { %v3535_v17 = vadd.f32 %v3503_v41, %v3469_v50  ;;  %v4090_v4 = vadd.f32 %v4058_v24, %v4024_v44  ;;  %v4092_v53 = vadd.f32 %v4060_v33, %v4026_v7  ;;  %v4192_v15 = vmul.f32 %v7457_v21, %v10569_v18  ;;  %12306 = vst [vmem:[#allocation55_spill] sm:$0xff] %v11431_v58  ;;  %v7470_v33 = vld [vmem:[%s8302_s23 + $0x2c0] sm:$0xff]  ;;  %v7471_v44 = vld [vmem:[%s8302_s23 + $0x2d0] sm:$0xff] }
 0x31d   : > { %4776 = vmatmul.mubr.bf16.gmra.mxu1 %v4569_v34  ;;  %v3537_v5 = vadd.f32 %v3505_v9, %v3471_v28  ;;  %v4256_v35 = vmul.f32 %v7458_v1, %v10582_v10  ;;  %v4258_v57 = vmul.f32 %v7459_v31, %v10582_v10  ;;  %v4322_v42 = vmul.f32 %v7460_v62, %v10585_v19 }
 0x31e   : > { %v3601_v59 = vadd.f32 %v3569_v12, %v3535_v17  ;;  %v4156_v20 = vadd.f32 %v4124_v56, %v4090_v4  ;;  %v4158_v41 = vadd.f32 %v4126_v39, %v4092_v53  ;;  %v4324_v7 = vmul.f32 %v7461_v48, %v10585_v19  ;;  %12307 = vst [vmem:[#allocation56_spill] sm:$0xff] %v11433_v40  ;;  %v7467_v48 = vld [vmem:[%s8302_s23 + $0xd0] sm:$0xff] }
 0x31f   : > { %v3603_v21 = vadd.f32 %v3571_v55, %v3537_v5  ;;  %v4388_v11 = vmul.f32 %v7462_v26, %v10596_v36  ;;  %v4390_v22 = vmul.f32 %v7463_v60, %v10596_v36  ;;  %v4454_v9 = vmul.f32 %v7464_v30, %v10599_v52  ;;  %v11437_v26 = vld [vmem:[%s8302_s23 + $0xc0] sm:$0xff]  ;;  %v11455_v5 = vpop.f32.mrf.mxu0 }
 0x320   : > { %v3635_v1 = vadd.f32 %v10532_v13, %v3601_v59  ;;  %v4222_v31 = vadd.f32 %v4190_v32, %v4156_v20  ;;  %v4224_v62 = vadd.f32 %v4192_v15, %v4158_v41  ;;  %v4456_v12 = vmul.f32 %v7465_v49, %v10599_v52  ;;  %v7468_v30 = vld [vmem:[%s8302_s23 + $0x1c0] sm:$0xff]  ;;  %v11453_v15 = vpop.f32.mrf.mxu1  ;;  %12309 = vst [vmem:[#allocation58_spill] sm:$0xff] %v11455_v5  ;;  %v7473_v59 = vld [vmem:[%s8302_s23 + $0x3d0] sm:$0xff] }
 0x321   : > { %v3637_v55 = vadd.f32 %v10532_v13, %v3603_v21  ;;  %v3072_v60 = vmul.f32 %v11437_v26, %v10415_v37  ;;  %v3074_v43 = vmul.f32 %v7467_v48, %v10415_v37  ;;  %v3106_v49 = vmul.f32 %v7468_v30, %v10432_v54  ;;  %v7472_v32 = vld [vmem:[%s8302_s23 + $0x3c0] sm:$0xff]  ;;  %12308 = vst [vmem:[#allocation57_spill] sm:$0xff] %v11453_v15 }
 0x322   : > { %v3667_v61 = vmax.f32 %v3635_v1, 0.0  ;;  %v4288_v6 = vadd.f32 %v4256_v35, %v4222_v31  ;;  %v4290_v29 = vadd.f32 %v4258_v57, %v4224_v62  ;;  %v3108_v4 = vmul.f32 %v7469_v51, %v10432_v54  ;;  %v7474_v41 = vld [vmem:[%s8302_s23 + $0x4c0] sm:$0xff]  ;;  %v7475_v31 = vld [vmem:[%s8302_s23 + $0x4d0] sm:$0xff] }
 0x323   : > { %v3669_v53 = vmax.f32 %v3637_v55, 0.0  ;;  %v3138_v24 = vadd.f32 %v3106_v49, %v3072_v60  ;;  %v3172_v50 = vmul.f32 %v7470_v33, %v10435_v27  ;;  %v3174_v56 = vmul.f32 %v7471_v44, %v10435_v27  ;;  %v7476_v60 = vld [vmem:[%s8302_s23 + $0x5c0] sm:$0xff]  ;;  %v7477_v49 = vld [vmem:[%s8302_s23 + $0x5d0] sm:$0xff] }
 0x324   : > { %v4354_v34 = vadd.f32 %v4322_v42, %v4288_v6  ;;  %v4356_v28 = vadd.f32 %v4324_v7, %v4290_v29  ;;  %v3140_v39 = vadd.f32 %v3108_v4, %v3074_v43  ;;  %v3238_v17 = vmul.f32 %v7472_v32, %v10462_v2  ;;  %v7478_v6 = vld [vmem:[%s8302_s23 + $0x6c0] sm:$0xff] }
 0x325   : > { %v3687_v35 = vpack.c.bf16 %v3669_v53, %v3667_v61  ;;  %v3204_v57 = vadd.f32 %v3172_v50, %v3138_v24  ;;  %v3240_v20 = vmul.f32 %v7473_v59, %v10462_v2  ;;  %v3304_v42 = vmul.f32 %v7474_v41, %v10479_v0  ;;  %v7479_v53 = vld [vmem:[%s8302_s23 + $0x6d0] sm:$0xff]  ;;  %v11471_v50 = vpop.f32.mrf.mxu1 }
 0x326   : > { %v4420_v7 = vadd.f32 %v4388_v11, %v4354_v34  ;;  %v4422_v21 = vadd.f32 %v4390_v22, %v4356_v28  ;;  %v3206_v1 = vadd.f32 %v3174_v56, %v3140_v39  ;;  %v3306_v62 = vmul.f32 %v7475_v31, %v10479_v0  ;;  %12310 = vst [vmem:[#allocation59_spill] sm:$0xff] %v11471_v50  ;;  %v11473_v56 = vpop.f32.mrf.mxu0  ;;  %v7480_v28 = vld [vmem:[%s8302_s23 + $0x7c0] sm:$0xff] }
 0x327   : > { %3898 = vmatprep.mubr.bf16.mxu0 %v3687_v35  ;;  %v3270_v55 = vadd.f32 %v3238_v17, %v3204_v57  ;;  %v3370_v43 = vmul.f32 %v7476_v60, %v10482_v14  ;;  %v3372_v61 = vmul.f32 %v7477_v49, %v10482_v14  ;;  %v3436_v11 = vmul.f32 %v7478_v6, %v10510_v25  ;;  %v7481_v17 = vld [vmem:[%s8302_s23 + $0x7d0] sm:$0xff]  ;;  %v7482_v57 = vld [vmem:[%s8302_s23 + $0x8c0] sm:$0xff] }
 0x328   : > { %v4486_v29 = vadd.f32 %v4454_v9, %v4420_v7  ;;  %v4488_v22 = vadd.f32 %v4456_v12, %v4422_v21  ;;  %v3272_v4 = vadd.f32 %v3240_v20, %v3206_v1  ;;  %v3438_v24 = vmul.f32 %v7479_v53, %v10510_v25  ;;  %12311 = vst [vmem:[#allocation60_spill] sm:$0xff] %v11473_v56  ;;  %v7483_v21 = vld [vmem:[%s8302_s23 + $0x8d0] sm:$0xff] }
 0x329   : > { %v3336_v34 = vadd.f32 %v3304_v42, %v3270_v55  ;;  %v3502_v39 = vmul.f32 %v7480_v28, %v12255_v47  ;;  %v3504_v35 = vmul.f32 %v7481_v17, %v12255_v47  ;;  %v3568_v9 = vmul.f32 %v7482_v57, %v12259_v16 }
 0x32a   : > { %v4520_v12 = vadd.f32 %v12257_v63, %v4486_v29  ;;  %v4522_v20 = vadd.f32 %v12257_v63, %v4488_v22  ;;  %v3338_v7 = vadd.f32 %v3306_v62, %v3272_v4  ;;  %v3570_v1 = vmul.f32 %v7483_v21, %v12259_v16  ;;  %v11490_v29 = vpop.f32.mrf.mxu1  ;;  %v11492_v22 = vpop.f32.mrf.mxu0 }
 0x32b   : > { %v3402_v50 = vadd.f32 %v3370_v43, %v3336_v34  ;;  %v3957_v42 = vmul.f32 %v11437_v26, %v10541_v46  ;;  %v3959_v55 = vmul.f32 %v7467_v48, %v10541_v46  ;;  %v3991_v56 = vmul.f32 %v7468_v30, %v10544_v38  ;;  %12312 = vst [vmem:[#allocation61_spill] sm:$0xff] %v11490_v29 }
 0x32c   : > { %v4552_v5 = vmax.f32 %v4520_v12, 0.0  ;;  %v4554_v40 = vmax.f32 %v4522_v20, 0.0  ;;  %v3404_v15 = vadd.f32 %v3372_v61, %v3338_v7  ;;  %v3993_v58 = vmul.f32 %v7469_v51, %v10544_v38  ;;  %12313 = vst [vmem:[#allocation62_spill] sm:$0xff] %v11492_v22 }
 0x32d   : > { %v3468_v62 = vadd.f32 %v3436_v11, %v3402_v50  ;;  %v4023_v4 = vadd.f32 %v3991_v56, %v3957_v42  ;;  %v4057_v43 = vmul.f32 %v7470_v33, %v10547_v45  ;;  %v4059_v34 = vmul.f32 %v7471_v44, %v10547_v45  ;;  %v11501_v50 = vpop.f32.mrf.mxu1 }
 0x32e   : > { %v4572_v26 = vpack.c.bf16 %v4554_v40, %v4552_v5  ;;  %v3470_v3 = vadd.f32 %v3438_v24, %v3404_v15  ;;  %v4025_v48 = vadd.f32 %v3993_v58, %v3959_v55  ;;  %v4123_v30 = vmul.f32 %v7472_v32, %v10566_v23  ;;  %12314 = vst [vmem:[#allocation63_spill] sm:$0xff] %v11501_v50  ;;  %v11503_v40 = vpop.f32.mrf.mxu0  ;;  %v7486_v55 = vld [vmem:[%s8302_s23 + $0x1e8] sm:$0xff] }
 0x32f   : > { %v3534_v12 = vadd.f32 %v3502_v39, %v3468_v62  ;;  %v4089_v20 = vadd.f32 %v4057_v43, %v4023_v4  ;;  %v4125_v61 = vmul.f32 %v7473_v59, %v10566_v23  ;;  %v4189_v51 = vmul.f32 %v7474_v41, %v10569_v18  ;;  %12315 = vst [vmem:[#allocation64_spill] sm:$0xff] %v11503_v40  ;;  %v7487_v4 = vld [vmem:[%s8302_s23 + $0x1f8] sm:$0xff] }
 0x330   : > { %4783 = vmatprep.mubr.bf16.mxu1 %v4572_v26  ;;  %v3536_v7 = vadd.f32 %v3504_v35, %v3470_v3  ;;  %v4091_v22 = vadd.f32 %v4059_v34, %v4025_v48  ;;  %v4191_v11 = vmul.f32 %v7475_v31, %v10569_v18  ;;  %v4255_v33 = vmul.f32 %v7476_v60, %v10582_v10  ;;  %v11515_v35 = vld [vmem:[%s8302_s23 + $0xe8] sm:$0xff]  ;;  %v7501_v40 = vld [vmem:[%s8302_s23 + $0x8f8] sm:$0xff] }
 0x331   : > { %v3600_v58 = vadd.f32 %v3568_v9, %v3534_v12  ;;  %v4155_v44 = vadd.f32 %v4123_v30, %v4089_v20  ;;  %v4257_v32 = vmul.f32 %v7477_v49, %v10582_v10  ;;  %v4321_v15 = vmul.f32 %v7478_v6, %v10585_v19  ;;  %v11521_v9 = vpop.f32.mrf.mxu0  ;;  %v7488_v34 = vld [vmem:[%s8302_s23 + $0x2e8] sm:$0xff]  ;;  %v7489_v12 = vld [vmem:[%s8302_s23 + $0x2f8] sm:$0xff] }
 0x332   : > { %v3602_v5 = vadd.f32 %v3570_v1, %v3536_v7  ;;  %v4157_v59 = vadd.f32 %v4125_v61, %v4091_v22  ;;  %v4323_v3 = vmul.f32 %v7479_v53, %v10585_v19  ;;  %v4387_v41 = vmul.f32 %v7480_v28, %v10596_v36  ;;  %v11519_v28 = vpop.f32.mrf.mxu1  ;;  %12317 = vst [vmem:[#allocation66_spill] sm:$0xff] %v11521_v9  ;;  %v7485_v1 = vld [vmem:[%s8302_s23 + $0xf8] sm:$0xff]  ;;  %v7490_v61 = vld [vmem:[%s8302_s23 + $0x3e8] sm:$0xff] }
 0x333   : > { %v3634_v31 = vadd.f32 %v10532_v13, %v3600_v58  ;;  %v4221_v60 = vadd.f32 %v4189_v51, %v4155_v44  ;;  %v4389_v24 = vmul.f32 %v7481_v17, %v10596_v36  ;;  %v4453_v56 = vmul.f32 %v7482_v57, %v10599_v52  ;;  %12316 = vst [vmem:[#allocation65_spill] sm:$0xff] %v11519_v28  ;;  %v7491_v58 = vld [vmem:[%s8302_s23 + $0x3f8] sm:$0xff] }
 0x334   : > { %v3636_v49 = vadd.f32 %v10532_v13, %v3602_v5  ;;  %v4223_v39 = vadd.f32 %v4191_v11, %v4157_v59  ;;  %v4455_v6 = vmul.f32 %v7483_v21, %v10599_v52  ;;  %v3077_v53 = vmul.f32 %v11515_v35, %v10415_v37  ;;  %v11539_v5 = vpop.f32.mrf.mxu0 }
 0x335   : > { %v3666_v17 = vmax.f32 %v3634_v31, 0.0  ;;  %v4287_v57 = vadd.f32 %v4255_v33, %v4221_v60  ;;  %v3079_v42 = vmul.f32 %v7485_v1, %v10415_v37  ;;  %v3111_v22 = vmul.f32 %v7486_v55, %v10432_v54  ;;  %12319 = vst [vmem:[#allocation68_spill] sm:$0xff] %v11539_v5  ;;  %v7492_v31 = vld [vmem:[%s8302_s23 + $0x4e8] sm:$0xff] }
 0x336   : > { %v3668_v21 = vmax.f32 %v3636_v49, 0.0  ;;  %v4289_v62 = vadd.f32 %v4257_v32, %v4223_v39  ;;  %v3113_v43 = vmul.f32 %v7487_v4, %v10432_v54  ;;  %v3177_v26 = vmul.f32 %v7488_v34, %v10435_v27  ;;  %v11537_v32 = vpop.f32.mrf.mxu1  ;;  %v7493_v49 = vld [vmem:[%s8302_s23 + $0x4f8] sm:$0xff] }
 0x337   : > { %v4353_v48 = vadd.f32 %v4321_v15, %v4287_v57  ;;  %v3143_v30 = vadd.f32 %v3111_v22, %v3077_v53  ;;  %v3179_v20 = vmul.f32 %v7489_v12, %v10435_v27  ;;  %v3243_v51 = vmul.f32 %v7490_v61, %v10462_v2  ;;  %12318 = vst [vmem:[#allocation67_spill] sm:$0xff] %v11537_v32 }
 0x338   : > { %v3686_v7 = vpack.c.bf16 %v3668_v21, %v3666_v17  ;;  %v4355_v11 = vadd.f32 %v4323_v3, %v4289_v62  ;;  %v3145_v33 = vadd.f32 %v3113_v43, %v3079_v42  ;;  %v3245_v44 = vmul.f32 %v7491_v58, %v10462_v2  ;;  %v7494_v17 = vld [vmem:[%s8302_s23 + $0x5e8] sm:$0xff]  ;;  %v7495_v42 = vld [vmem:[%s8302_s23 + $0x5f8] sm:$0xff]  ;;  %v11557_v32 = vpop.f32.mrf.mxu1 }
 0x339   : > { %v4419_v15 = vadd.f32 %v4387_v41, %v4353_v48  ;;  %v3209_v59 = vadd.f32 %v3177_v26, %v3143_v30  ;;  %v3309_v60 = vmul.f32 %v7492_v31, %v10479_v0  ;;  %v3311_v39 = vmul.f32 %v7493_v49, %v10479_v0  ;;  %v7496_v62 = vld [vmem:[%s8302_s23 + $0x6e8] sm:$0xff]  ;;  %v7497_v26 = vld [vmem:[%s8302_s23 + $0x6f8] sm:$0xff]  ;;  %12320 = vst [vmem:[#allocation69_spill] sm:$0xff] %v11557_v32 }
 0x33a   : > { %3899 = vmatmul.mubr.bf16.gmra.mxu0 %v3686_v7  ;;  %v4421_v3 = vadd.f32 %v4389_v24, %v4355_v11  ;;  %v3211_v53 = vadd.f32 %v3179_v20, %v3145_v33  ;;  %v3375_v57 = vmul.f32 %v7494_v17, %v10482_v14  ;;  %v3377_v22 = vmul.f32 %v7495_v42, %v10482_v14  ;;  %v7498_v7 = vld [vmem:[%s8302_s23 + $0x7e8] sm:$0xff]  ;;  %v7499_v11 = vld [vmem:[%s8302_s23 + $0x7f8] sm:$0xff]  ;;  %v11574_v5 = vpop.f32.mrf.mxu1 }
 0x33b   : > { %v4485_v41 = vadd.f32 %v4453_v56, %v4419_v15  ;;  %v3275_v21 = vadd.f32 %v3243_v51, %v3209_v59  ;;  %v3441_v43 = vmul.f32 %v7496_v62, %v10510_v25  ;;  %v3443_v48 = vmul.f32 %v7497_v26, %v10510_v25  ;;  %v11559_v56 = vpop.f32.mrf.mxu0  ;;  %v7500_v59 = vld [vmem:[%s8302_s23 + $0x8e8] sm:$0xff] }
 0x33c   : > { %v4487_v30 = vadd.f32 %v4455_v6, %v4421_v3  ;;  %v3277_v24 = vadd.f32 %v3245_v44, %v3211_v53  ;;  %v3507_v20 = vmul.f32 %v7498_v7, %v12255_v47  ;;  %v3509_v33 = vmul.f32 %v7499_v11, %v12255_v47  ;;  %12321 = vst [vmem:[#allocation70_spill] sm:$0xff] %v11559_v56 }
 0x33d   : > { %v4519_v51 = vadd.f32 %v12257_v63, %v4485_v41  ;;  %v3341_v15 = vadd.f32 %v3309_v60, %v3275_v21  ;;  %v3573_v9 = vmul.f32 %v7500_v59, %v12259_v16  ;;  %v3575_v6 = vmul.f32 %v7501_v40, %v12259_v16 }
 0x33e   : > { %v4521_v44 = vadd.f32 %v12257_v63, %v4487_v30  ;;  %v3343_v3 = vadd.f32 %v3311_v39, %v3277_v24  ;;  %v3962_v53 = vmul.f32 %v11515_v35, %v10541_v46  ;;  %v3964_v28 = vmul.f32 %v7485_v1, %v10541_v46  ;;  %v11576_v39 = vpop.f32.mrf.mxu0 }
 0x33f   : > { %v4551_v32 = vmax.f32 %v4519_v51, 0.0  ;;  %v3407_v50 = vadd.f32 %v3375_v57, %v3341_v15  ;;  %v3996_v29 = vmul.f32 %v7486_v55, %v10544_v38  ;;  %v3998_v60 = vmul.f32 %v7487_v4, %v10544_v38 }
 0x340   : > { %v4553_v41 = vmax.f32 %v4521_v44, 0.0  ;;  %v3409_v21 = vadd.f32 %v3377_v22, %v3343_v3  ;;  %v4062_v8 = vmul.f32 %v7488_v34, %v10547_v45  ;;  %v4064_v56 = vmul.f32 %v7489_v12, %v10547_v45 }
 0x341   : > { %v3473_v30 = vadd.f32 %v3441_v43, %v3407_v50  ;;  %v4028_v35 = vadd.f32 %v3996_v29, %v3962_v53  ;;  %v4030_v24 = vadd.f32 %v3998_v60, %v3964_v28  ;;  %v4128_v1 = vmul.f32 %v7490_v61, %v10566_v23  ;;  %v11585_v28 = vpop.f32.mrf.mxu1  ;;  %v11587_v61 = vpop.f32.mrf.mxu0 }
 0x342   : > { %v4571_v57 = vpack.c.bf16 %v4553_v41, %v4551_v32  ;;  %v3475_v51 = vadd.f32 %v3443_v48, %v3409_v21  ;;  %v4130_v55 = vmul.f32 %v7491_v58, %v10566_v23  ;;  %v4194_v4 = vmul.f32 %v7492_v31, %v10569_v18 }
 0x343   : > { %v3539_v22 = vadd.f32 %v3507_v20, %v3473_v30  ;;  %v4094_v15 = vadd.f32 %v4062_v8, %v4028_v35  ;;  %v4096_v34 = vadd.f32 %v4064_v56, %v4030_v24  ;;  %v4196_v12 = vmul.f32 %v7493_v49, %v10569_v18  ;;  %v11597_v56 = vld [vmem:[%s8302_s23 + $0xe0] sm:$0xff]  ;;  %v11613_v53 = vpop.f32.mrf.mxu0  ;;  %v7505_v30 = vld [vmem:[%s8302_s23 + $0x1f0] sm:$0xff] }
 0x344   : > { %4784 = vmatmul.mubr.bf16.gmra.mxu1 %v4571_v57  ;;  %v3541_v44 = vadd.f32 %v3509_v33, %v3475_v51  ;;  %v4260_v3 = vmul.f32 %v7494_v17, %v10582_v10  ;;  %v4262_v29 = vmul.f32 %v7495_v42, %v10582_v10  ;;  %v4326_v50 = vmul.f32 %v7496_v62, %v10585_v19  ;;  %v7507_v51 = vld [vmem:[%s8302_s23 + $0x2f0] sm:$0xff] }
 0x345   : > { %v3605_v58 = vadd.f32 %v3573_v9, %v3539_v22  ;;  %v4160_v32 = vadd.f32 %v4128_v1, %v4094_v15  ;;  %v4162_v8 = vadd.f32 %v4130_v55, %v4096_v34  ;;  %v4328_v31 = vmul.f32 %v7497_v26, %v10585_v19  ;;  %v7506_v1 = vld [vmem:[%s8302_s23 + $0x2e0] sm:$0xff] }
 0x346   : > { %v3607_v49 = vadd.f32 %v3575_v6, %v3541_v44  ;;  %v4392_v43 = vmul.f32 %v7498_v7, %v10596_v36  ;;  %v4394_v17 = vmul.f32 %v7499_v11, %v10596_v36  ;;  %v4458_v42 = vmul.f32 %v7500_v59, %v10599_v52  ;;  %v11602_v7 = vld [vmem:[%s8302_s23 + $0xf0] sm:$0xff]  ;;  %v11607_v59 = vld [vmem:[%s8302_s23 + $0x1e0] sm:$0xff] }
 0x347   : > { %v3639_v62 = vadd.f32 %v10532_v13, %v3605_v58  ;;  %v4226_v48 = vadd.f32 %v4194_v4, %v4160_v32  ;;  %v4228_v20 = vadd.f32 %v4196_v12, %v4162_v8  ;;  %v4460_v33 = vmul.f32 %v7501_v40, %v10599_v52  ;;  %v11611_v40 = vpop.f32.mrf.mxu1  ;;  %v7508_v34 = vld [vmem:[%s8302_s23 + $0x3e0] sm:$0xff] }
 0x348   : > { %v3641_v9 = vadd.f32 %v10532_v13, %v3607_v49  ;;  %v3076_v26 = vmul.f32 %v11597_v56, %v10415_v37  ;;  %v3078_v11 = vmul.f32 %v11602_v7, %v10415_v37  ;;  %v3110_v6 = vmul.f32 %v11607_v59, %v10432_v54  ;;  %v7510_v58 = vld [vmem:[%s8302_s23 + $0x4e0] sm:$0xff] }
 0x349   : > { %v3671_v60 = vmax.f32 %v3639_v62, 0.0  ;;  %v4292_v41 = vadd.f32 %v4260_v3, %v4226_v48  ;;  %v4294_v21 = vadd.f32 %v4262_v29, %v4228_v20  ;;  %v3112_v35 = vmul.f32 %v7505_v30, %v10432_v54  ;;  %v7509_v54 = vld [vmem:[%s8302_s23 + $0x3f0] sm:$0xff]  ;;  %v11627_v8 = vpop.f32.mrf.mxu1 }
 0x34a   : > { %v3673_v24 = vmax.f32 %v3641_v9, 0.0  ;;  %v3142_v37 = vadd.f32 %v3110_v6, %v3076_v26  ;;  %v3176_v57 = vmul.f32 %v7506_v1, %v10435_v27  ;;  %v3178_v55 = vmul.f32 %v7507_v51, %v10435_v27  ;;  %v11629_v27 = vpop.f32.mrf.mxu0  ;;  %v7511_v62 = vld [vmem:[%s8302_s23 + $0x4f0] sm:$0xff]  ;;  %v7514_v6 = vld [vmem:[%s8302_s23 + $0x6e0] sm:$0xff] }
 0x34b   : > { %v4358_v4 = vadd.f32 %v4326_v50, %v4292_v41  ;;  %v4360_v22 = vadd.f32 %v4328_v31, %v4294_v21  ;;  %v3144_v15 = vadd.f32 %v3112_v35, %v3078_v11  ;;  %v3242_v12 = vmul.f32 %v7508_v34, %v10462_v2  ;;  %v7513_v26 = vld [vmem:[%s8302_s23 + $0x5f0] sm:$0xff] }
 0x34c   : > { %v3689_v44 = vpack.c.bf16 %v3673_v24, %v3671_v60  ;;  %v3208_v3 = vadd.f32 %v3176_v57, %v3142_v37  ;;  %v3244_v29 = vmul.f32 %v7509_v54, %v10462_v2  ;;  %v3308_v32 = vmul.f32 %v7510_v58, %v10479_v0  ;;  %v7512_v2 = vld [vmem:[%s8302_s23 + $0x5e0] sm:$0xff]  ;;  %v7515_v21 = vld [vmem:[%s8302_s23 + $0x6f0] sm:$0xff] }
 0x34d   : > { %v4424_v50 = vadd.f32 %v4392_v43, %v4358_v4  ;;  %v4426_v31 = vadd.f32 %v4394_v17, %v4360_v22  ;;  %v3210_v49 = vadd.f32 %v3178_v55, %v3144_v15  ;;  %v3310_v48 = vmul.f32 %v7511_v62, %v10479_v0  ;;  %v7516_v24 = vld [vmem:[%s8302_s23 + $0x7e0] sm:$0xff]  ;;  %v7517_v57 = vld [vmem:[%s8302_s23 + $0x7f0] sm:$0xff]  ;;  %v11647_v22 = vpop.f32.mrf.mxu1  ;;  %v11649_v15 = vpop.f32.mrf.mxu0 }
 0x34e   : > { %3906 = vmatprep.mubr.bf16.mxu0 %v3689_v44  ;;  %v3274_v20 = vadd.f32 %v3242_v12, %v3208_v3  ;;  %v3374_v9 = vmul.f32 %v7512_v2, %v10482_v14  ;;  %v3376_v11 = vmul.f32 %v7513_v26, %v10482_v14  ;;  %v3440_v43 = vmul.f32 %v7514_v6, %v10510_v25  ;;  %v7518_v4 = vld [vmem:[%s8302_s23 + $0x8e0] sm:$0xff] }
 0x34f   : > { %v4490_v60 = vadd.f32 %v4458_v42, %v4424_v50  ;;  %v4492_v17 = vadd.f32 %v4460_v33, %v4426_v31  ;;  %v3276_v41 = vadd.f32 %v3244_v29, %v3210_v49  ;;  %v3442_v0 = vmul.f32 %v7515_v21, %v10510_v25  ;;  %v7519_v25 = vld [vmem:[%s8302_s23 + $0x8f0] sm:$0xff] }
 0x350   : > { %v3340_v35 = vadd.f32 %v3308_v32, %v3274_v20  ;;  %v3506_v37 = vmul.f32 %v7516_v24, %v12255_v47  ;;  %v3508_v55 = vmul.f32 %v7517_v57, %v12255_v47  ;;  %v3572_v14 = vmul.f32 %v7518_v4, %v12259_v16 }
 0x351   : > { %v4524_v42 = vadd.f32 %v12257_v63, %v4490_v60  ;;  %v4526_v33 = vadd.f32 %v12257_v63, %v4492_v17  ;;  %v3342_v12 = vadd.f32 %v3310_v48, %v3276_v41  ;;  %v3574_v44 = vmul.f32 %v7519_v25, %v12259_v16 }
 0x352   : > { %v3406_v3 = vadd.f32 %v3374_v9, %v3340_v35  ;;  %v3961_v29 = vmul.f32 %v11597_v56, %v10541_v46  ;;  %v3963_v47 = vmul.f32 %v11602_v7, %v10541_v46  ;;  %v3995_v32 = vmul.f32 %v11607_v59, %v10544_v38  ;;  %v11664_v9 = vpop.f32.mrf.mxu1  ;;  %v11666_v56 = vpop.f32.mrf.mxu0 }
 0x353   : > { %v4556_v50 = vmax.f32 %v4524_v42, 0.0  ;;  %v4558_v31 = vmax.f32 %v4526_v33, 0.0  ;;  %v3408_v49 = vadd.f32 %v3376_v11, %v3342_v12  ;;  %v3997_v20 = vmul.f32 %v7505_v30, %v10544_v38 }
 0x354   : > { %v3472_v60 = vadd.f32 %v3440_v43, %v3406_v3  ;;  %v4027_v48 = vadd.f32 %v3995_v32, %v3961_v29  ;;  %v4061_v17 = vmul.f32 %v7506_v1, %v10547_v45  ;;  %v4063_v16 = vmul.f32 %v7507_v51, %v10547_v45  ;;  %v11673_v12 = vpop.f32.mrf.mxu1 }
 0x355   : > { %v4574_v41 = vpack.c.bf16 %v4558_v31, %v4556_v50  ;;  %v3474_v46 = vadd.f32 %v3442_v0, %v3408_v49  ;;  %v4029_v7 = vadd.f32 %v3997_v20, %v3963_v47  ;;  %v4127_v59 = vmul.f32 %v7508_v34, %v10566_v23  ;;  %v11675_v0 = vpop.f32.mrf.mxu0 }
 0x356   : > { %v3538_v35 = vadd.f32 %v3506_v37, %v3472_v60  ;;  %v4093_v42 = vadd.f32 %v4061_v17, %v4027_v48  ;;  %v4129_v11 = vmul.f32 %v7509_v54, %v10566_v23  ;;  %v4193_v38 = vmul.f32 %v7510_v58, %v10569_v18  ;;  %v6713_v47 = vpop.f32.mrf.mxu1 }
 0x357   : > { %4791 = vmatprep.mubr.bf16.mxu1 %v4574_v41  ;;  %v3540_v30 = vadd.f32 %v3508_v55, %v3474_v46  ;;  %v4095_v1 = vadd.f32 %v4063_v16, %v4029_v7  ;;  %v4195_v45 = vmul.f32 %v7511_v62, %v10569_v18  ;;  %v4259_v33 = vmul.f32 %v7512_v2, %v10582_v10  ;;  %v6652_v32 = vpop.f32.mrf.mxu0  ;;  %v12322_v16 = vld [vmem:[#allocation9_spill] sm:$0xff]  ;;  %v12323_v41 = vld [vmem:[#allocation10_spill] sm:$0xff] }
 0x358   : > { %v3604_v51 = vadd.f32 %v3572_v14, %v3538_v35  ;;  %v4159_v43 = vadd.f32 %v4127_v59, %v4093_v42  ;;  %v4261_v3 = vmul.f32 %v7513_v26, %v10582_v10  ;;  %v4325_v58 = vmul.f32 %v7514_v6, %v10585_v19  ;;  %v6715_v60 = vpop.f32.mrf.mxu1  ;;  %v12327_v59 = vld [vmem:[#allocation15_spill] sm:$0xff] }
 0x359   : > { %v3606_v34 = vadd.f32 %v3574_v44, %v3540_v30  ;;  %v4161_v37 = vadd.f32 %v4129_v11, %v4095_v1  ;;  %v4327_v62 = vmul.f32 %v7515_v21, %v10585_v19  ;;  %v4391_v29 = vmul.f32 %v7516_v24, %v10596_v36  ;;  %v12328_v11 = vld [vmem:[#allocation14_spill] sm:$0xff]  ;;  %v12330_v1 = vld [vmem:[#allocation17_spill] sm:$0xff] }
 0x35a   : > { %v3638_v23 = vadd.f32 %v10532_v13, %v3604_v51  ;;  %v4225_v54 = vadd.f32 %v4193_v38, %v4159_v43  ;;  %v4393_v10 = vmul.f32 %v7517_v57, %v10596_v36  ;;  %v4457_v31 = vmul.f32 %v7518_v4, %v10599_v52  ;;  %v12324_v36 = vld [vmem:[#allocation11_spill] sm:$0xff]  ;;  %v12325_v57 = vld [vmem:[#allocation12_spill] sm:$0xff]  ;;  %v12326_v4 = vld [vmem:[#allocation13_spill] sm:$0xff]  ;;  %v6716_v42 = vpop.f32.mrf.mxu1 }
 0x35b   : > { %v3640_v55 = vadd.f32 %v10532_v13, %v3606_v34  ;;  %v4227_v18 = vadd.f32 %v4195_v45, %v4161_v37  ;;  %v4459_v13 = vmul.f32 %v7519_v25, %v10599_v52  ;;  %v6516_v46 = vadd.f32 %v12323_v41, %v12322_v16  ;;  %v12329_v38 = vld [vmem:[#allocation16_spill] sm:$0xff]  ;;  %v12331_v45 = vld [vmem:[#allocation19_spill] sm:$0xff]  ;;  %v12332_v43 = vld [vmem:[#allocation18_spill] sm:$0xff] }
 0x35c   : > { %v3670_v14 = vmax.f32 %v3638_v23, 0.0  ;;  %v4291_v2 = vadd.f32 %v4259_v33, %v4225_v54  ;;  %v6580_v7 = vadd.f32 %v12325_v57, %v12324_v36  ;;  %v6519_v35 = vadd.f32 %v12327_v59, %v12326_v4  ;;  %v12333_v33 = vld [vmem:[#allocation20_spill] sm:$0xff]  ;;  %v12334_v23 = vld [vmem:[#allocation21_spill] sm:$0xff]  ;;  %v12335_v54 = vld [vmem:[#allocation23_spill] sm:$0xff] }
 0x35d   : > { %v3672_v44 = vmax.f32 %v3640_v55, 0.0  ;;  %v4293_v50 = vadd.f32 %v4261_v3, %v4227_v18  ;;  %v6654_v19 = vpop.f32.mrf.mxu0  ;;  %v6583_v30 = vadd.f32 %v12329_v38, %v12328_v11  ;;  %v6522_v51 = vadd.f32 %v12331_v45, %v12330_v1  ;;  %v12336_v55 = vld [vmem:[#allocation22_spill] sm:$0xff]  ;;  %v12337_v18 = vld [vmem:[#allocation24_spill] sm:$0xff]  ;;  %v12344_v41 = vld [vmem:[#allocation29_spill] sm:$0xff] }
 0x35e   : > { %v4357_v26 = vadd.f32 %v4325_v58, %v4291_v2  ;;  %v6586_v34 = vadd.f32 %v12333_v33, %v12332_v43  ;;  %v6525_v58 = vadd.f32 %v12335_v54, %v12334_v23  ;;  %v12345_v36 = vld [vmem:[#allocation31_spill] sm:$0xff]  ;;  %v6644_v57 = vadd.f32 %v11587_v61, %v11576_v39  ;;  %v12346_v4 = vld [vmem:[#allocation30_spill] sm:$0xff]  ;;  %v12347_v59 = vld [vmem:[#allocation32_spill] sm:$0xff] }
 0x35f   : > { %v3688_v49 = vpack.c.bf16 %v3672_v44, %v3670_v14  ;;  %v4359_v6 = vadd.f32 %v4327_v62, %v4293_v50  ;;  %v6655_v52 = vpop.f32.mrf.mxu0  ;;  %v6589_v62 = vadd.f32 %v12337_v18, %v12336_v55  ;;  %v2987_v44 = vadd.f32 %v6583_v30, %v6519_v35  ;;  %v11732_v1 = vld [vmem:[%s12220_s4] ss:$0 sm:$0xff] }
 0x360   : > { %v4423_v20 = vadd.f32 %v4391_v29, %v4357_v26  ;;  %v2984_v29 = vadd.f32 %v6580_v7, %v6516_v46  ;;  %v2992_v50 = vadd.f32 %v6586_v34, %v6522_v51  ;;  %v12339_v26 = vld [vmem:[#allocation27_spill] sm:$0xff]  ;;  %v6531_v46 = vadd.f32 %v12345_v36, %v12344_v41  ;;  %v12354_v41 = vld [vmem:[#allocation38_spill] sm:$0xff]  ;;  %v12355_v36 = vld [vmem:[#allocation40_spill] sm:$0xff] }
 0x361   : > { %3907 = vmatmul.mubr.bf16.gmra.mxu0 %v3688_v49  ;;  %v4425_v21 = vadd.f32 %v4393_v10, %v4359_v6  ;;  %v6657_v2 = vpop.f32.mrf.mxu0  ;;  %v12338_v10 = vld [vmem:[#allocation25_spill] sm:$0xff]  ;;  %v12340_v49 = vld [vmem:[#allocation26_spill] sm:$0xff]  ;;  %v12341_v6 = vld [vmem:[#allocation28_spill] sm:$0xff]  ;;  %v2995_v16 = vadd.f32 %v6589_v62, %v6525_v58  ;;  %v6647_v7 = vadd.f32 %v11629_v27, %v11613_v53  ;;  %v6595_v35 = vadd.f32 %v12347_v59, %v12346_v4 }
 0x362   : > { %v4489_v48 = vadd.f32 %v4457_v31, %v4423_v20  ;;  %v6528_v31 = vadd.f32 %v12339_v26, %v12338_v10  ;;  %v12342_v20 = vld [vmem:[#allocation68_spill] sm:$0xff]  ;;  %v3915_v38 = vadd.f32 %v6644_v57, %v2984_v29  ;;  %v6711_v39 = vadd.f32 %v11664_v9, %v11647_v22  ;;  %v12349_v10 = vld [vmem:[#allocation35_spill] sm:$0xff] }
 0x363   : > { %v4491_v24 = vadd.f32 %v4459_v13, %v4425_v21  ;;  %v6592_v13 = vadd.f32 %v12341_v6, %v12340_v49  ;;  %v12343_v21 = vld [vmem:[#allocation70_spill] sm:$0xff]  ;;  %v6658_v11 = vpop.f32.mrf.mxu0  ;;  %v3916_v30 = vadd.f32 %v6647_v7, %v2987_v44  ;;  %v6653_v61 = vadd.f32 %v6652_v32, %v11675_v0  ;;  %v12351_v49 = vld [vmem:[#allocation36_spill] sm:$0xff] }
 0x364   : > { %v4523_v17 = vadd.f32 %v12257_v63, %v4489_v48  ;;  %v6561_v48 = vadd.f32 %v12343_v21, %v12342_v20  ;;  %v6659_v43 = vadd.f32 %v6658_v11, %v6657_v2  ;;  %v3003_v33 = vadd.f32 %v6595_v35, %v6531_v46 }
 0x365   : > { %v4525_v25 = vadd.f32 %v12257_v63, %v4491_v24  ;;  %v6625_v24 = vadd.f32 %v11585_v28, %v11574_v5  ;;  %v6708_v5 = vadd.f32 %v11627_v8, %v11611_v40  ;;  %v6650_v28 = vadd.f32 %v11666_v56, %v11649_v15 }
 0x366   : > { %v4555_v37 = vmax.f32 %v4523_v17, 0.0  ;;  %v3000_v27 = vadd.f32 %v6592_v13, %v6528_v31  ;;  %v6714_v40 = vadd.f32 %v6713_v47, %v11673_v12  ;;  %v6656_v8 = vadd.f32 %v6655_v52, %v6654_v19  ;;  %v12350_v31 = vld [vmem:[#allocation34_spill] sm:$0xff] }
 0x367   : > { %v4557_v3 = vmax.f32 %v4525_v25, 0.0  ;;  %v6718_v14 = vpop.f32.mrf.mxu1  ;;  %v11720_v25 = vadd.f32 %v6625_v24, %v6561_v48  ;;  %v3917_v45 = vadd.f32 %v6650_v28, %v2992_v50  ;;  %v4800_v15 = vadd.f32 %v6708_v5, %v3915_v38  ;;  %v12348_v50 = vld [vmem:[#allocation33_spill] sm:$0xff] }
 0x368   : > { %v4801_v56 = vadd.f32 %v6711_v39, %v3916_v30  ;;  %v3918_v51 = vadd.f32 %v6653_v61, %v2995_v16  ;;  %v6717_v22 = vadd.f32 %v6716_v42, %v6715_v60  ;;  %v3919_v9 = vadd.f32 %v6656_v8, %v3000_v27  ;;  %v12352_v24 = vld [vmem:[#allocation37_spill] sm:$0xff] }
 0x369   : > { %v4573_v63 = vpack.c.bf16 %v4557_v3, %v4555_v37  ;;  %v6719_v17 = vpop.f32.mrf.mxu1  ;;  %v4802_v34 = vadd.f32 %v6714_v40, %v3917_v45  ;;  %v11736_v0 = vadd.f32 %v11732_v1, %v4800_v15  ;;  %v3920_v54 = vadd.f32 %v6659_v43, %v3003_v33  ;;  %v12357_v43 = vld [vmem:[#allocation43_spill] sm:$0xff] }
 0x36a   : > { %v11739_v32 = vadd.f32 %v11732_v1, %v4801_v56  ;;  %v4803_v3 = vadd.f32 %v6717_v22, %v3918_v51  ;;  %v6720_v23 = vadd.f32 %v6719_v17, %v6718_v14  ;;  %v6534_v26 = vadd.f32 %v12349_v10, %v12348_v50  ;;  %v12353_v17 = vld [vmem:[#allocation39_spill] sm:$0xff]  ;;  %v12356_v51 = vld [vmem:[#allocation41_spill] sm:$0xff]  ;;  %v12359_v22 = vld [vmem:[#allocation44_spill] sm:$0xff] }
 0x36b   : > { %4792 = vmatmul.mubr.bf16.gmra.mxu1 %v4573_v63  ;;  %v6721_v53 = vpop.f32.mrf.mxu1  ;;  %6976 = vtanh.f32 %v11736_v0  ;;  %v11743_v12 = vadd.f32 %v11732_v1, %v4802_v34  ;;  %v6598_v6 = vadd.f32 %v12351_v49, %v12350_v31  ;;  %v6537_v16 = vadd.f32 %v12353_v17, %v12352_v24  ;;  %v12358_v34 = vld [vmem:[#allocation42_spill] sm:$0xff] }
 0x36c   : > { %v4804_v47 = vadd.f32 %v6720_v23, %v3919_v9  ;;  %6978 = vtanh.f32 %v11739_v32  ;;  %v11747_v60 = vadd.f32 %v11732_v1, %v4803_v3  ;;  %v6601_v46 = vadd.f32 %v12355_v36, %v12354_v41  ;;  %v12364_v41 = vld [vmem:[#allocation48_spill] sm:$0xff]  ;;  %v12365_v36 = vld [vmem:[#allocation50_spill] sm:$0xff] }
 0x36d   : > { %v6722_v37 = vpop.f32.mrf.mxu1  ;;  %6980 = vtanh.f32 %v11743_v12  ;;  %v3008_v48 = vadd.f32 %v6598_v6, %v6534_v26  ;;  %v6540_v33 = vadd.f32 %v12357_v43, %v12356_v51  ;;  %v6604_v9 = vadd.f32 %v12359_v22, %v12358_v34 }
 0x36e   : > { %v6723_v19 = vadd.f32 %v6722_v37, %v6721_v53  ;;  %v11751_v52 = vadd.f32 %v11732_v1, %v4804_v47  ;;  %6982 = vtanh.f32 %v11747_v60  ;;  %v3011_v35 = vadd.f32 %v6601_v46, %v6537_v16  ;;  %v12361_v47 = vld [vmem:[#allocation47_spill] sm:$0xff] }
 0x36f   : > { %v3016_v23 = vadd.f32 %v6604_v9, %v6540_v33  ;;  %v6546_v46 = vadd.f32 %v12365_v36, %v12364_v41 }
 0x370   : > { %v4805_v42 = vadd.f32 %v6723_v19, %v3920_v54  ;;  %6984 = vtanh.f32 %v11751_v52  ;;  %v12360_v54 = vld [vmem:[#allocation45_spill] sm:$0xff] }
 0x371   : > { %v6543_v19 = vadd.f32 %v12361_v47, %v12360_v54 }
 0x372   : > { %v11755_v58 = vadd.f32 %v11732_v1, %v4805_v42  ;;  %v12362_v42 = vld [vmem:[#allocation46_spill] sm:$0xff] }
 0x374   : > { %6986 = vtanh.f32 %v11755_v58 }
 0x378   : > { %v6977_v55 = vpop.eup %6976 }
 0x379   : > { %4967 = vrot.lane.b32.xlu0 %v6977_v55, %s7584_s27  ;;  %v6979_v18 = vpop.eup %6978  ;;  %v12363_v55 = vld [vmem:[#allocation49_spill] sm:$0xff] }
 0x37a   : > { %v6981_v62 = vpop.eup %6980 }
 0x37b   : > { %4971 = vrot.lane.b32.xlu1 %v6981_v62, %s7584_s27  ;;  %v6983_v2 = vpop.eup %6982 }
 0x37d   : > { %4969 = vrot.lane.b32.xlu0 %v6979_v18, %s7584_s27  ;;  %v6985_v29 = vpop.eup %6984  ;;  %v6607_v18 = vadd.f32 %v12363_v55, %v12362_v42 }
 0x37f   : > { %4973 = vrot.lane.b32.xlu1 %v6983_v2, %s7584_s27 }
 0x381   : > { %4975 = vrot.lane.b32.xlu0 %v6985_v29, %s7584_s27  ;;  %v6987_v13 = vpop.eup %6986  ;;  %v3019_v29 = vadd.f32 %v6607_v18, %v6543_v19  ;;  %v12372_v18 = vld [vmem:[#allocation56_spill] sm:$0xff] }
 0x383   : > { %4977 = vrot.lane.b32.xlu1 %v6987_v13, %s7584_s27 }
 0x384   : > { %v6660_v14 = vpop.f32.mrf.mxu0 }
 0x386   : > { %v6661_v63 = vpop.f32.mrf.mxu0 }
 0x387   : > { %v6662_v20 = vadd.f32 %v6661_v63, %v6660_v14 }
 0x388   : > { %v6663_v44 = vpop.f32.mrf.mxu0 }
 0x389   : > { %v3921_v7 = vadd.f32 %v6662_v20, %v3008_v48 }
 0x38a   : > { %v6664_v21 = vpop.f32.mrf.mxu0 }
 0x38b   : > { %v6665_v4 = vadd.f32 %v6664_v21, %v6663_v44 }
 0x38d   : > { %v3922_v38 = vadd.f32 %v6665_v4, %v3011_v35 }
 0x38e   : > { %v6724_v57 = vpop.f32.mrf.mxu1 }
 0x390   : > { %v6725_v59 = vpop.f32.mrf.mxu1 }
 0x391   : > { %v6726_v5 = vadd.f32 %v6725_v59, %v6724_v57  ;;  %v12366_v57 = vld [vmem:[#allocation51_spill] sm:$0xff] }
 0x392   : > { %v6727_v28 = vpop.f32.mrf.mxu1 }
 0x393   : > { %v4806_v11 = vadd.f32 %v6726_v5, %v3921_v7  ;;  %v12367_v7 = vld [vmem:[#allocation53_spill] sm:$0xff] }
 0x394   : > { %v6728_v30 = vpop.f32.mrf.mxu1  ;;  %v6610_v4 = vadd.f32 %v12367_v7, %v12366_v57 }
 0x395   : > { %v11774_v39 = vadd.f32 %v11732_v1, %v4806_v11  ;;  %v6729_v61 = vadd.f32 %v6728_v30, %v6727_v28  ;;  %v12368_v28 = vld [vmem:[#allocation52_spill] sm:$0xff]  ;;  %v12369_v11 = vld [vmem:[#allocation54_spill] sm:$0xff]  ;;  %v12370_v30 = vld [vmem:[#allocation55_spill] sm:$0xff] }
 0x396   : > { %v3024_v5 = vadd.f32 %v6610_v4, %v6546_v46 }
 0x397   : > { %6988 = vtanh.f32 %v11774_v39  ;;  %v4807_v53 = vadd.f32 %v6729_v61, %v3922_v38  ;;  %v6549_v38 = vadd.f32 %v12369_v11, %v12368_v28  ;;  %v12371_v61 = vld [vmem:[#allocation57_spill] sm:$0xff]  ;;  %v6427_v28 = vmul.f32 -1.442695, %v11736_v0 }
 0x398   : > { %v6432_v0 = vmul.f32 -1.442695, %v11755_v58 }
 0x399   : > { %v11778_v27 = vadd.f32 %v11732_v1, %v4807_v53  ;;  %v6613_v53 = vadd.f32 %v12371_v61, %v12370_v30  ;;  %v6429_v61 = vmul.f32 -1.442695, %v11743_v12 }
 0x39b   : > { %6990 = vtanh.f32 %v11778_v27 }
 0x3a4   : > { %v6989_v45 = vpop.eup %6988 }
 0x3a5   : > { %4979 = vrot.lane.b32.xlu0 %v6989_v45, %s7584_s27 }
 0x3a8   : > { %v6991_v40 = vpop.eup %6990 }
 0x3a9   : > { %4981 = vrot.lane.b32.xlu1 %v6991_v40, %s7584_s27 }
 0x3ab   : > { %v6666_v8 = vpop.f32.mrf.mxu0 }
 0x3ad   : > { %v6667_v15 = vpop.f32.mrf.mxu0 }
 0x3ae   : > { %v6668_v37 = vadd.f32 %v6667_v15, %v6666_v8 }
 0x3af   : > { %v6669_v56 = vpop.f32.mrf.mxu0 }
 0x3b0   : > { %v3923_v14 = vadd.f32 %v6668_v37, %v3016_v23 }
 0x3b1   : > { %v6670_v3 = vpop.f32.mrf.mxu0 }
 0x3b2   : > { %v6671_v2 = vadd.f32 %v6670_v3, %v6669_v56  ;;  %v3027_v56 = vadd.f32 %v6613_v53, %v6549_v38  ;;  %v6428_v38 = vmul.f32 -1.442695, %v11739_v32  ;;  %v6430_v53 = vmul.f32 -1.442695, %v11747_v60 }
 0x3b3   : > { %v6433_v32 = vmul.f32 -1.442695, %v11774_v39 }
 0x3b4   : > { %v3924_v26 = vadd.f32 %v6671_v2, %v3019_v29  ;;  %v12374_v2 = vld [vmem:[#allocation59_spill] sm:$0xff] }
 0x3b5   : > { %v6730_v62 = vpop.f32.mrf.mxu1 }
 0x3b7   : > { %v6731_v63 = vpop.f32.mrf.mxu1 }
 0x3b8   : > { %v6732_v44 = vadd.f32 %v6731_v63, %v6730_v62  ;;  %v12373_v62 = vld [vmem:[#allocation58_spill] sm:$0xff]  ;;  %v12375_v63 = vld [vmem:[#allocation61_spill] sm:$0xff] }
 0x3b9   : > { %v6733_v50 = vpop.f32.mrf.mxu1  ;;  %v6616_v29 = vadd.f32 %v12375_v63, %v12374_v2 }
 0x3ba   : > { %v4808_v10 = vadd.f32 %v6732_v44, %v3923_v14  ;;  %v6552_v14 = vadd.f32 %v12373_v62, %v12372_v18 }
 0x3bb   : > { %v6734_v31 = vpop.f32.mrf.mxu1 }
 0x3bc   : > { %v11792_v49 = vadd.f32 %v11732_v1, %v4808_v10  ;;  %v6735_v6 = vadd.f32 %v6734_v31, %v6733_v50  ;;  %v3032_v10 = vadd.f32 %v6616_v29, %v6552_v14  ;;  %v12377_v31 = vld [vmem:[#allocation62_spill] sm:$0xff] }
 0x3be   : > { %6992 = vtanh.f32 %v11792_v49  ;;  %v4809_v13 = vadd.f32 %v6735_v6, %v3924_v26  ;;  %v12376_v26 = vld [vmem:[#allocation60_spill] sm:$0xff]  ;;  %v6435_v12 = vmul.f32 -1.442695, %v11792_v49 }
 0x3bf   : > { %v6555_v6 = vadd.f32 %v12377_v31, %v12376_v26 }
 0x3c0   : > { %v11796_v20 = vadd.f32 %v11732_v1, %v4809_v13  ;;  %v12378_v13 = vld [vmem:[#allocation63_spill] sm:$0xff] }
 0x3c2   : > { %6994 = vtanh.f32 %v11796_v20 }
 0x3cb   : > { %v6993_v21 = vpop.eup %6992 }
 0x3cc   : > { %4983 = vrot.lane.b32.xlu0 %v6993_v21, %s7584_s27  ;;  %v12379_v21 = vld [vmem:[#allocation65_spill] sm:$0xff] }
 0x3cf   : > { %v6995_v48 = vpop.eup %6994 }
 0x3d0   : > { %4985 = vrot.lane.b32.xlu1 %v6995_v48, %s7584_s27  ;;  %v6619_v48 = vadd.f32 %v12379_v21, %v12378_v13 }
 0x3d2   : > { %v3035_v36 = vadd.f32 %v6619_v48, %v6555_v6 }
 0x3d3   : > { %v6672_v24 = vpop.f32.mrf.mxu0 }
 0x3d5   : > { %v6673_v17 = vpop.f32.mrf.mxu0 }
 0x3d6   : > { %v6674_v59 = vadd.f32 %v6673_v17, %v6672_v24 }
 0x3d7   : > { %v6675_v16 = vpop.f32.mrf.mxu0 }
 0x3d8   : > { %v3925_v40 = vadd.f32 %v6674_v59, %v3024_v5 }
 0x3d9   : > { %v6676_v35 = vpop.f32.mrf.mxu0 }
 0x3da   : > { %v6677_v8 = vadd.f32 %v6676_v35, %v6675_v16 }
 0x3dc   : > { %v3926_v34 = vadd.f32 %v6677_v8, %v3027_v56  ;;  %v6434_v8 = vmul.f32 -1.442695, %v11778_v27 }
 0x3dd   : > { %v6736_v45 = vpop.f32.mrf.mxu1 }
 0x3df   : > { %v6737_v15 = vpop.f32.mrf.mxu1 }
 0x3e0   : > { %v6738_v51 = vadd.f32 %v6737_v15, %v6736_v45  ;;  %v6431_v45 = vmul.f32 -1.442695, %v11751_v52  ;;  %v6436_v52 = vmul.f32 -1.442695, %v11796_v20 }
 0x3e1   : > { %v6739_v43 = vpop.f32.mrf.mxu1 }
 0x3e2   : > { %v4810_v33 = vadd.f32 %v6738_v51, %v3925_v40 }
 0x3e3   : > { %v6740_v22 = vpop.f32.mrf.mxu1 }
 0x3e4   : > { %v11810_v9 = vadd.f32 %v11732_v1, %v4810_v33  ;;  %v6741_v37 = vadd.f32 %v6740_v22, %v6739_v43 }
 0x3e6   : > { %6996 = vtanh.f32 %v11810_v9  ;;  %v4811_v3 = vadd.f32 %v6741_v37, %v3926_v34  ;;  %v12380_v37 = vld [vmem:[#allocation64_spill] sm:$0xff] }
 0x3e8   : > { %v11814_v23 = vadd.f32 %v11732_v1, %v4811_v3  ;;  %v12381_v3 = vld [vmem:[#allocation66_spill] sm:$0xff] }
 0x3ea   : > { %6998 = vtanh.f32 %v11814_v23 }
 0x3eb   : > { %v4968_v13 = vpop.permute.xlu0 %4967 }
 0x3f3   : > { %v6997_v54 = vpop.eup %6996 }
 0x3f4   : > { %4987 = vrot.lane.b32.xlu0 %v6997_v54, %s7584_s27  ;;  %v6558_v54 = vadd.f32 %v12381_v3, %v12380_v37 }
 0x3f7   : > { %v6999_v47 = vpop.eup %6998 }
 0x3f8   : > { %4989 = vrot.lane.b32.xlu1 %v6999_v47, %s7584_s27  ;;  %v12382_v47 = vld [vmem:[#allocation67_spill] sm:$0xff] }
 0x3fa   : > { %v6678_v19 = vpop.f32.mrf.mxu0 }
 0x3fc   : > { %v6679_v42 = vpop.f32.mrf.mxu0 }
 0x3fd   : > { %v6680_v44 = vadd.f32 %v6679_v42, %v6678_v19  ;;  %v12383_v19 = vld [vmem:[#allocation69_spill] sm:$0xff] }
 0x3fe   : > { %v6681_v55 = vpop.f32.mrf.mxu0  ;;  %v6622_v20 = vadd.f32 %v12383_v19, %v12382_v47 }
 0x3ff   : > { %v3927_v17 = vadd.f32 %v6680_v44, %v3032_v10 }
 0x400   : > { %v6682_v50 = vpop.f32.mrf.mxu0  ;;  %v3040_v63 = vadd.f32 %v6622_v20, %v6558_v54 }
 0x401   : > { %v6683_v16 = vadd.f32 %v6682_v50, %v6681_v55 }
 0x403   : > { %v3928_v4 = vadd.f32 %v6683_v16, %v3035_v36 }
 0x404   : > { %v6742_v24 = vpop.f32.mrf.mxu1 }
 0x406   : > { %v6743_v41 = vpop.f32.mrf.mxu1 }
 0x407   : > { %v6744_v46 = vadd.f32 %v6743_v41, %v6742_v24 }
 0x408   : > { %v6745_v57 = vpop.f32.mrf.mxu1 }
 0x409   : > { %v4812_v7 = vadd.f32 %v6744_v46, %v3927_v17 }
 0x40a   : > { %v6746_v59 = vpop.f32.mrf.mxu1 }
 0x40b   : > { %v11828_v35 = vadd.f32 %v11732_v1, %v4812_v7  ;;  %v6747_v5 = vadd.f32 %v6746_v59, %v6745_v57  ;;  %v4972_v57 = vpop.permute.xlu1 %4971 }
 0x40d   : > { %7000 = vtanh.f32 %v11828_v35  ;;  %v4813_v11 = vadd.f32 %v6747_v5, %v3928_v4 }
 0x40e   : > { %7002 = vpow2.f32 %v6427_v28 }
 0x40f   : > { %v11834_v30 = vadd.f32 %v11732_v1, %v4813_v11  ;;  %v4970_v11 = vpop.permute.xlu0 %4969 }
 0x411   : > { %7004 = vtanh.f32 %v11834_v30 }
 0x412   : > { %7006 = vpow2.f32 %v6428_v38 }
 0x413   : > { %7008 = vpow2.f32 %v6429_v61 }
 0x414   : > { %7010 = vpow2.f32 %v6430_v53 }
 0x415   : > { %7012 = vpow2.f32 %v6431_v45 }
 0x416   : > { %7014 = vpow2.f32 %v6432_v0 }
 0x417   : > { %7016 = vpow2.f32 %v6433_v32 }
 0x418   : > { %7018 = vpow2.f32 %v6434_v8  ;;  %v4976_v8 = vpop.permute.xlu0 %4975 }
 0x419   : > { %7020 = vpow2.f32 %v6435_v12 }
 0x41a   : > { %v7001_v40 = vpop.eup %7000  ;;  %7022 = vpow2.f32 %v6436_v52 }
 0x41b   : > { %4991 = vrot.lane.b32.xlu0 %v7001_v40, %s7584_s27  ;;  %v7003_v15 = vpop.eup %7002  ;;  %v4974_v40 = vpop.permute.xlu1 %4973 }
 0x41c   : > { %v4887_v56 = vadd.f32 1.0, %v7003_v15 }
 0x41e   : > { %v7005_v60 = vpop.eup %7004  ;;  %7024 = vrcp.f32 %v4887_v56 }
 0x41f   : > { %4993 = vrot.lane.b32.xlu1 %v7005_v60, %s7584_s27  ;;  %v7007_v58 = vpop.eup %7006 }
 0x420   : > { %v7009_v39 = vpop.eup %7008  ;;  %v4888_v43 = vadd.f32 1.0, %v7007_v58  ;;  %v4980_v58 = vpop.permute.xlu0 %4979 }
 0x421   : > { %v6684_v51 = vpop.f32.mrf.mxu0  ;;  %v7011_v33 = vpop.eup %7010  ;;  %v4889_v49 = vadd.f32 1.0, %v7009_v39 }
 0x422   : > { %v7013_v34 = vpop.eup %7012  ;;  %7026 = vrcp.f32 %v4888_v43  ;;  %v4890_v42 = vadd.f32 1.0, %v7011_v33 }
 0x423   : > { %v6685_v27 = vpop.f32.mrf.mxu0  ;;  %v7015_v55 = vpop.eup %7014  ;;  %7028 = vrcp.f32 %v4889_v49  ;;  %v4891_v18 = vadd.f32 1.0, %v7013_v34 }
 0x424   : > { %v6686_v62 = vadd.f32 %v6685_v27, %v6684_v51  ;;  %v7017_v14 = vpop.eup %7016  ;;  %7030 = vrcp.f32 %v4890_v42  ;;  %v4892_v44 = vadd.f32 1.0, %v7015_v55  ;;  %v6438_v55 = vmul.f32 -1.442695, %v11814_v23 }
 0x425   : > { %v6687_v22 = vpop.f32.mrf.mxu0  ;;  %v7019_v29 = vpop.eup %7018  ;;  %7032 = vrcp.f32 %v4891_v18  ;;  %v4893_v26 = vadd.f32 1.0, %v7017_v14 }
 0x426   : > { %v7021_v10 = vpop.eup %7020  ;;  %v3929_v31 = vadd.f32 %v6686_v62, %v3040_v63  ;;  %v4894_v48 = vadd.f32 1.0, %v7019_v29  ;;  %7034 = vrcp.f32 %v4892_v44 }
 0x427   : > { %v6688_v2 = vpop.f32.mrf.mxu0  ;;  %v4895_v17 = vadd.f32 1.0, %v7021_v10  ;;  %v7023_v41 = vpop.eup %7022  ;;  %7036 = vrcp.f32 %v4893_v26 }
 0x428   : > { %v6689_v6 = vadd.f32 %v6688_v2, %v6687_v22  ;;  %7038 = vrcp.f32 %v4894_v48  ;;  %v4896_v38 = vadd.f32 1.0, %v7023_v41  ;;  %v6437_v22 = vmul.f32 -1.442695, %v11810_v9 }
 0x429   : > { %7040 = vrcp.f32 %v4895_v17 }
 0x42a   : > { %v3930_v46 = vadd.f32 %v6689_v6, %v11720_v25 }
 0x42b   : > { %v6748_v50 = vpop.f32.mrf.mxu1  ;;  %v11852_v7 = vpop.eup %7024 }
 0x42c   : > { %v5015_v28 = vmul.f32 %v11852_v7, %v4968_v13 }
 0x42d   : > { %v6749_v21 = vpop.f32.mrf.mxu1 }
 0x42e   : > { %v6750_v24 = vadd.f32 %v6749_v21, %v6748_v50 }
 0x42f   : > { %v6751_v16 = vpop.f32.mrf.mxu1  ;;  %v11858_v61 = vpop.eup %7026 }
 0x430   : > { %v4814_v36 = vadd.f32 %v6750_v24, %v3929_v31  ;;  %v11861_v25 = vpop.eup %7028  ;;  %v5016_v45 = vmul.f32 %v11858_v61, %v4970_v11  ;;  %v6439_v24 = vmul.f32 -1.442695, %v11828_v35 }
 0x431   : > { %v6752_v4 = vpop.f32.mrf.mxu1  ;;  %v5017_v32 = vmul.f32 %v11861_v25, %v4972_v57  ;;  %v11868_v12 = vpop.eup %7030 }
 0x432   : > { %v11855_v59 = vadd.f32 %v11732_v1, %v4814_v36  ;;  %v6753_v5 = vadd.f32 %v6752_v4, %v6751_v16  ;;  %v11871_v15 = vpop.eup %7032  ;;  %v5018_v60 = vmul.f32 %v11868_v12, %v4974_v40  ;;  %v6440_v36 = vmul.f32 -1.442695, %v11834_v30 }
 0x433   : > { %v5019_v52 = vmul.f32 %v11871_v15, %v4976_v8  ;;  %v11875_v56 = vpop.eup %7034 }
 0x434   : > { %7042 = vtanh.f32 %v11855_v59  ;;  %v4815_v53 = vadd.f32 %v6753_v5, %v3930_v46  ;;  %v11877_v39 = vpop.eup %7036  ;;  %v6441_v30 = vmul.f32 -1.442695, %v11855_v59 }
 0x435   : > { %7044 = vtanh.f32 %v5015_v28  ;;  %v5021_v43 = vmul.f32 %v11877_v39, %v4980_v58  ;;  %v11881_v33 = vpop.eup %7038 }
 0x436   : > { %v11865_v0 = vadd.f32 %v11732_v1, %v4815_v53  ;;  %7046 = vrcp.f32 %v4896_v38  ;;  %v4978_v1 = vpop.permute.xlu1 %4977  ;;  %v11883_v34 = vpop.eup %7040 }
 0x437   : > { %v5020_v51 = vmul.f32 %v11875_v56, %v4978_v1 }
 0x438   : > { %7048 = vtanh.f32 %v11865_v0  ;;  %v6442_v8 = vmul.f32 -1.442695, %v11865_v0 }
 0x439   : > { %7050 = vtanh.f32 %v5016_v45 }
 0x43a   : > { %7052 = vtanh.f32 %v5017_v32  ;;  %v4982_v27 = vpop.permute.xlu1 %4981 }
 0x43b   : > { %7054 = vtanh.f32 %v5018_v60  ;;  %v5022_v3 = vmul.f32 %v11881_v33, %v4982_v27 }
 0x43c   : > { %7056 = vtanh.f32 %v5019_v52 }
 0x43d   : > { %7058 = vtanh.f32 %v5020_v51 }
 0x43e   : > { %v4984_v49 = vpop.permute.xlu0 %4983  ;;  %7060 = vtanh.f32 %v5021_v43 }
 0x43f   : > { %v5023_v54 = vmul.f32 %v11883_v34, %v4984_v49  ;;  %7062 = vpow2.f32 %v6437_v22 }
 0x440   : > { %7064 = vtanh.f32 %v5022_v3 }
 0x441   : > { %v7043_v37 = vpop.eup %7042  ;;  %7066 = vtanh.f32 %v5023_v54 }
 0x442   : > { %4995 = vrot.lane.b32.xlu0 %v7043_v37, %s7584_s27  ;;  %v7045_v47 = vpop.eup %7044  ;;  %v4986_v19 = vpop.permute.xlu1 %4985  ;;  %7068 = vpow2.f32 %v6438_v55  ;;  %v6969_v55 = vld [vmem:[%s12221_s5] sm:$0xff]  }
 0x443   : > { %v11889_v20 = vpop.eup %7046 }
 0x444   : > { %v5024_v9 = vmul.f32 %v11889_v20, %v4986_v19 }
 0x445   : > { %v7049_v42 = vpop.eup %7048 }
 0x446   : > { %v7051_v18 = vpop.eup %7050  ;;  %4997 = vrot.lane.b32.xlu1 %v7049_v42, %s7584_s27  ;;  %5063 = vrot.lane.b32.xlu0 %v7045_v47, %s7585_s28  ;;  %7070 = vtanh.f32 %v5024_v9  ;;  %v6968_v42 = vld [vmem:[%s12221_s5 + $0x8] sm:$0xff]  }
 0x447   : > { %v7053_v62 = vpop.eup %7052  ;;  %6786 = vmatprep.subr.bf16.mxu0 %v6968_v42  ;;  %6850 = vmatprep.subr.bf16.mxu1 %v6968_v42 }
 0x448   : > { %v7055_v14 = vpop.eup %7054  ;;  %6787 = vmatpush3.bf16.msra.mxu0 %v6968_v42  ;;  %6852 = vmatpush3.bf16.msra.mxu1 %v6968_v42 }
 0x449   : > { %v7057_v2 = vpop.eup %7056  ;;  %6788 = vmatprep.subr.bf16.mxu0 %v6969_v55  ;;  %6851 = vmatprep.subr.bf16.mxu1 %v6969_v55 }
 0x44a   : > { %5065 = vrot.lane.b32.xlu1 %v7051_v18, %s7585_s28  ;;  %5067 = vrot.lane.b32.xlu0 %v7053_v62, %s7585_s28  ;;  %v7059_v23 = vpop.eup %7058 }
 0x44b   : > { %v7061_v63 = vpop.eup %7060 }
 0x44c   : > { %v7063_v29 = vpop.eup %7062  ;;  %6789 = vmatpush3.bf16.msra.mxu0 %v6969_v55  ;;  %6853 = vmatpush3.bf16.msra.mxu1 %v6969_v55 }
 0x44d   : > { %v7065_v44 = vpop.eup %7064  ;;  %v4897_v10 = vadd.f32 1.0, %v7063_v29 }
 0x44e   : > { %5069 = vrot.lane.b32.xlu1 %v7055_v14, %s7585_s28  ;;  %5071 = vrot.lane.b32.xlu0 %v7057_v2, %s7585_s28  ;;  %v7067_v50 = vpop.eup %7066 }
 0x44f   : > { %v7069_v26 = vpop.eup %7068  ;;  %7072 = vrcp.f32 %v4897_v10 }
 0x450   : > { %v4898_v6 = vadd.f32 1.0, %v7069_v26 }
 0x452   : > { %5073 = vrot.lane.b32.xlu1 %v7059_v23, %s7585_s28  ;;  %5075 = vrot.lane.b32.xlu0 %v7061_v63, %s7585_s28  ;;  %7074 = vrcp.f32 %v4898_v6 }
 0x453   : > { %v7071_v31 = vpop.eup %7070 }
 0x456   : > { %5077 = vrot.lane.b32.xlu1 %v7065_v44, %s7585_s28  ;;  %5079 = vrot.lane.b32.xlu0 %v7067_v50, %s7585_s28 }
 0x45a   : > { %5081 = vrot.lane.b32.xlu1 %v7071_v31, %s7585_s28 }
 0x45c   : > { %v11904_v13 = vpop.eup %7072 }
 0x45f   : > { %v11908_v17 = vpop.eup %7074 }
 0x466   : > { %v4988_v21 = vpop.permute.xlu0 %4987 }
 0x467   : > { %v5025_v48 = vmul.f32 %v11904_v13, %v4988_v21 }
 0x469   : > { %7076 = vtanh.f32 %v5025_v48 }
 0x46a   : > { %v4990_v16 = vpop.permute.xlu1 %4989  ;;  %7078 = vpow2.f32 %v6439_v24 }
 0x46b   : > { %v5026_v41 = vmul.f32 %v11908_v17, %v4990_v16 }
 0x46d   : > { %7080 = vtanh.f32 %v5026_v41 }
 0x46e   : > { %7082 = vpow2.f32 %v6440_v36 }
 0x476   : > { %v7077_v46 = vpop.eup %7076 }
 0x477   : > { %5083 = vrot.lane.b32.xlu0 %v7077_v46, %s7585_s28  ;;  %v7079_v57 = vpop.eup %7078 }
 0x478   : > { %v4899_v5 = vadd.f32 1.0, %v7079_v57 }
 0x47a   : > { %v7081_v4 = vpop.eup %7080  ;;  %7084 = vrcp.f32 %v4899_v5 }
 0x47b   : > { %5085 = vrot.lane.b32.xlu1 %v7081_v4, %s7585_s28  ;;  %v7083_v35 = vpop.eup %7082 }
 0x47c   : > { %v4900_v28 = vadd.f32 1.0, %v7083_v35 }
 0x47e   : > { %7086 = vrcp.f32 %v4900_v28 }
 0x487   : > { %v11914_v11 = vpop.eup %7084 }
 0x48b   : > { %v11918_v45 = vpop.eup %7086 }
 0x48d   : > { %v4992_v38 = vpop.permute.xlu0 %4991 }
 0x48e   : > { %v5027_v53 = vmul.f32 %v11914_v11, %v4992_v38 }
 0x490   : > { %7088 = vtanh.f32 %v5027_v53 }
 0x491   : > { %v4994_v32 = vpop.permute.xlu1 %4993  ;;  %7090 = vpow2.f32 %v6441_v30 }
 0x492   : > { %v5028_v40 = vmul.f32 %v11918_v45, %v4994_v32 }
 0x494   : > { %7092 = vtanh.f32 %v5028_v40 }
 0x495   : > { %7094 = vpow2.f32 %v6442_v8 }
 0x49d   : > { %v7089_v60 = vpop.eup %7088 }
 0x49e   : > { %5087 = vrot.lane.b32.xlu0 %v7089_v60, %s7585_s28  ;;  %v7091_v52 = vpop.eup %7090 }
 0x49f   : > { %v4901_v58 = vadd.f32 1.0, %v7091_v52  ;;  %v11973_v52 = vld [vmem:[%s12222_s6] ss:$0 sm:$0xff] }
 0x4a1   : > { %v7093_v1 = vpop.eup %7092  ;;  %7096 = vrcp.f32 %v4901_v58 }
 0x4a2   : > { %5089 = vrot.lane.b32.xlu1 %v7093_v1, %s7585_s28  ;;  %v7095_v59 = vpop.eup %7094 }
 0x4a3   : > { %v4902_v51 = vadd.f32 1.0, %v7095_v59 }
 0x4a5   : > { %7098 = vrcp.f32 %v4902_v51 }
 0x4ae   : > { %v11924_v43 = vpop.eup %7096 }
 0x4b2   : > { %v11927_v0 = vpop.eup %7098 }
 0x4b4   : > { %v4996_v27 = vpop.permute.xlu0 %4995 }
 0x4b5   : > { %v5029_v49 = vmul.f32 %v11924_v43, %v4996_v27 }
 0x4b7   : > { %7100 = vtanh.f32 %v5029_v49 }
 0x4b8   : > { %v4998_v22 = vpop.permute.xlu1 %4997  ;;  %v5064_v3 = vpop.permute.xlu0 %5063 }
 0x4b9   : > { %v5030_v37 = vmul.f32 %v11927_v0, %v4998_v22  ;;  %v5111_v62 = vmul.f32 %v11852_v7, %v5064_v3 }
 0x4bb   : > { %7102 = vtanh.f32 %v5030_v37 }
 0x4bc   : > { %v5066_v54 = vpop.permute.xlu1 %5065  ;;  %v5068_v47 = vpop.permute.xlu0 %5067 }
 0x4bd   : > { %v5112_v18 = vmul.f32 %v11858_v61, %v5066_v54  ;;  %v5113_v61 = vmul.f32 %v11861_v25, %v5068_v47 }
 0x4bf   : > { %v5127_v23 = vpack.c.bf16 %v5112_v18, %v5111_v62 }
 0x4c0   : > { %v5070_v19 = vpop.permute.xlu1 %5069  ;;  %v5072_v9 = vpop.permute.xlu0 %5071 }
 0x4c1   : > { %v5114_v63 = vmul.f32 %v11868_v12, %v5070_v19  ;;  %v5115_v50 = vmul.f32 %v11871_v15, %v5072_v9 }
 0x4c3   : > { %v5128_v26 = vpack.c.bf16 %v5114_v63, %v5113_v61 }
 0x4c4   : > { %v7101_v14 = vpop.eup %7100  ;;  %v5074_v2 = vpop.permute.xlu1 %5073 }
 0x4c5   : > { %5091 = vrot.lane.b32.xlu0 %v7101_v14, %s7585_s28  ;;  %v5116_v29 = vmul.f32 %v11875_v56, %v5074_v2  ;;  %v5076_v44 = vpop.permute.xlu0 %5075 }
 0x4c6   : > { %v5117_v56 = vmul.f32 %v11877_v39, %v5076_v44 }
 0x4c7   : > { %v5129_v31 = vpack.c.bf16 %v5116_v29, %v5115_v50 }
 0x4c8   : > { %v7103_v7 = vpop.eup %7102  ;;  %v5078_v10 = vpop.permute.xlu1 %5077 }
 0x4c9   : > { %5093 = vrot.lane.b32.xlu1 %v7103_v7, %s7585_s28  ;;  %5154 = vrot.lane.b32.xlu0 %v5127_v23, %s7586_s13  ;;  %v5118_v12 = vmul.f32 %v11881_v33, %v5078_v10  ;;  %v5080_v6 = vpop.permute.xlu0 %5079 }
 0x4ca   : > { %v5119_v15 = vmul.f32 %v11883_v34, %v5080_v6 }
 0x4cb   : > { %v5130_v25 = vpack.c.bf16 %v5118_v12, %v5117_v56 }
 0x4cc   : > { %v5082_v21 = vpop.permute.xlu1 %5081 }
 0x4cd   : > { %5156 = vrot.lane.b32.xlu1 %v5128_v26, %s7586_s13  ;;  %5158 = vrot.lane.b32.xlu0 %v5129_v31, %s7586_s13  ;;  %v5120_v48 = vmul.f32 %v11889_v20, %v5082_v21 }
 0x4cf   : > { %v5131_v24 = vpack.c.bf16 %v5120_v48, %v5119_v15 }
 0x4d1   : > { %5160 = vrot.lane.b32.xlu1 %v5130_v25, %s7586_s13  ;;  %5162 = vrot.lane.b32.xlu0 %v5131_v24, %s7586_s13 }
 0x4e9   : > { %v5084_v16 = vpop.permute.xlu0 %5083 }
 0x4ea   : > { %v5121_v41 = vmul.f32 %v11904_v13, %v5084_v16 }
 0x4ed   : > { %v5086_v33 = vpop.permute.xlu1 %5085 }
 0x4ee   : > { %v5122_v39 = vmul.f32 %v11908_v17, %v5086_v33 }
 0x4f0   : > { %v5132_v36 = vpack.c.bf16 %v5122_v39, %v5121_v41 }
 0x4f2   : > { %5164 = vrot.lane.b32.xlu1 %v5132_v36, %s7586_s13 }
 0x510   : > { %v5088_v46 = vpop.permute.xlu0 %5087 }
 0x511   : > { %v5123_v34 = vmul.f32 %v11914_v11, %v5088_v46 }
 0x514   : > { %v5090_v57 = vpop.permute.xlu1 %5089 }
 0x515   : > { %v5124_v20 = vmul.f32 %v11918_v45, %v5090_v57 }
 0x517   : > { %v5133_v4 = vpack.c.bf16 %v5124_v20, %v5123_v34 }
 0x519   : > { %5166 = vrot.lane.b32.xlu0 %v5133_v4, %s7586_s13 }
 0x537   : > { %v5092_v5 = vpop.permute.xlu0 %5091 }
 0x538   : > { %v5125_v13 = vmul.f32 %v11924_v43, %v5092_v5 }
 0x53b   : > { %v5094_v35 = vpop.permute.xlu1 %5093  ;;  %v5155_v28 = vpop.permute.xlu0 %5154 }
 0x53c   : > { %v5126_v17 = vmul.f32 %v11927_v0, %v5094_v35  ;;  %6790 = vmatprep.mubr.msk.bf16.mxu0 %vm5182_vm0, %v5155_v28 }
 0x53e   : > { %v5134_v38 = vpack.c.bf16 %v5126_v17, %v5125_v13 }
 0x53f   : > { %v5157_v53 = vpop.permute.xlu1 %5156  ;;  %v5159_v30 = vpop.permute.xlu0 %5158 }
 0x540   : > { %5168 = vrot.lane.b32.xlu1 %v5134_v38, %s7586_s13  ;;  %6791 = vmatmul.mubr.msk.bf16.vlgmr.msra.gmra.mxu0 %vm5182_vm0, %v5157_v53 }
 0x541   : > { %6794 = vmatprep.mubr.msk.bf16.mxu0 %vm5182_vm0, %v5159_v30 }
 0x543   : > { %v5163_v11 = vpop.permute.xlu0 %5162  ;;  %v5161_v45 = vpop.permute.xlu1 %5160 }
 0x544   : > { %6798 = vmatprep.mubr.msk.bf16.mxu1 %vm5182_vm0, %v5163_v11 }
 0x548   : > { %6795 = vmatmul.mubr.msk.bf16.gmra.mxu0 %vm5182_vm0, %v5161_v45 }
 0x564   : > { %v5165_v32 = vpop.permute.xlu1 %5164 }
 0x565   : > { %6799 = vmatmul.mubr.msk.bf16.vlgmr.msra.gmra.mxu1 %vm5182_vm0, %v5165_v32 }
 0x58b   : > { %v5167_v40 = vpop.permute.xlu0 %5166 }
 0x58c   : > { %6802 = vmatprep.mubr.msk.bf16.mxu1 %vm5182_vm0, %v5167_v40 }
 0x5b2   : > { %v5169_v8 = vpop.permute.xlu1 %5168 }
 0x5b3   : > { %6803 = vmatmul.mubr.msk.bf16.gmra.mxu1 %vm5182_vm0, %v5169_v8 }
 0x600   : > { %v6792_v60 = vpop.f32.mrf.mxu0 }
 0x601   : > { %v5250_v51 = vadd.f32 %v6792_v60, %v11973_v52 }
 0x602   : > { %v5241_v1 = vpop.f32.mrf.mxu0 }
 0x603   : > { %v5242_v58 = vadd.f32 %v11973_v52, %v5241_v1  ;;  %v6456_v15 = vmul.f32 -1.442695, %v5250_v51 }
 0x604   : > { %v6793_v59 = vpop.f32.mrf.mxu0 }
 0x605   : > { %7104 = vtanh.f32 %v5242_v58  ;;  %v5253_v0 = vadd.f32 %v6793_v59, %v11973_v52  ;;  %v6454_v25 = vmul.f32 -1.442695, %v5242_v58 }
 0x606   : > { %v5244_v43 = vpop.f32.mrf.mxu0  ;;  %7106 = vtanh.f32 %v5250_v51 }
 0x607   : > { %v5245_v27 = vadd.f32 %v11973_v52, %v5244_v43  ;;  %v6457_v24 = vmul.f32 -1.442695, %v5253_v0 }
 0x608   : > { %v6796_v49 = vpop.f32.mrf.mxu0 }
 0x609   : > { %7108 = vtanh.f32 %v5245_v27  ;;  %v5266_v54 = vadd.f32 %v6796_v49, %v11973_v52  ;;  %v6455_v48 = vmul.f32 -1.442695, %v5245_v27 }
 0x60a   : > { %v5257_v22 = vpop.f32.mrf.mxu0  ;;  %7110 = vtanh.f32 %v5253_v0 }
 0x60b   : > { %v5258_v37 = vadd.f32 %v11973_v52, %v5257_v22  ;;  %v6460_v33 = vmul.f32 -1.442695, %v5266_v54 }
 0x60c   : > { %v6797_v3 = vpop.f32.mrf.mxu0 }
 0x60d   : > { %7112 = vtanh.f32 %v5258_v37  ;;  %v5269_v42 = vadd.f32 %v6797_v3, %v11973_v52  ;;  %v6458_v16 = vmul.f32 -1.442695, %v5258_v37 }
 0x60e   : > { %v5260_v47 = vpop.f32.mrf.mxu0  ;;  %7114 = vtanh.f32 %v5266_v54 }
 0x60f   : > { %v5261_v19 = vadd.f32 %v11973_v52, %v5260_v47  ;;  %v6461_v39 = vmul.f32 -1.442695, %v5269_v42 }
 0x611   : > { %7116 = vtanh.f32 %v5261_v19  ;;  %v6459_v41 = vmul.f32 -1.442695, %v5261_v19 }
 0x612   : > { %v7105_v55 = vpop.eup %7104  ;;  %7118 = vtanh.f32 %v5269_v42 }
 0x613   : > { %5432 = vrot.lane.b32.xlu0 %v7105_v55, %s7584_s27  ;;  %v7107_v18 = vpop.eup %7106 }
 0x616   : > { %v7109_v9 = vpop.eup %7108 }
 0x617   : > { %5434 = vrot.lane.b32.xlu1 %v7109_v9, %s7584_s27  ;;  %5436 = vrot.lane.b32.xlu0 %v7107_v18, %s7584_s27  ;;  %v7111_v62 = vpop.eup %7110 }
 0x61a   : > { %v7113_v14 = vpop.eup %7112 }
 0x61b   : > { %5438 = vrot.lane.b32.xlu1 %v7111_v62, %s7584_s27  ;;  %5440 = vrot.lane.b32.xlu0 %v7113_v14, %s7584_s27  ;;  %v7115_v2 = vpop.eup %7114 }
 0x61e   : > { %v7117_v23 = vpop.eup %7116 }
 0x61f   : > { %5442 = vrot.lane.b32.xlu1 %v7117_v23, %s7584_s27  ;;  %5444 = vrot.lane.b32.xlu0 %v7115_v2, %s7584_s27  ;;  %v7119_v63 = vpop.eup %7118 }
 0x623   : > { %5446 = vrot.lane.b32.xlu1 %v7119_v63, %s7584_s27 }
 0x625   : > { %v6800_v29 = vpop.f32.mrf.mxu1 }
 0x626   : > { %v11995_v7 = vadd.f32 %v6800_v29, %v11973_v52 }
 0x627   : > { %v5273_v44 = vpop.f32.mrf.mxu1 }
 0x628   : > { %v11992_v61 = vadd.f32 %v11973_v52, %v5273_v44  ;;  %v6464_v3 = vmul.f32 -1.442695, %v11995_v7 }
 0x629   : > { %v6801_v50 = vpop.f32.mrf.mxu1 }
 0x62a   : > { %7120 = vtanh.f32 %v11992_v61  ;;  %v12003_v31 = vadd.f32 %v6801_v50, %v11973_v52  ;;  %v6462_v49 = vmul.f32 -1.442695, %v11992_v61 }
 0x62b   : > { %v5276_v10 = vpop.f32.mrf.mxu1  ;;  %7122 = vtanh.f32 %v11995_v7 }
 0x62c   : > { %v11999_v26 = vadd.f32 %v11973_v52, %v5276_v10  ;;  %v6465_v14 = vmul.f32 -1.442695, %v12003_v31 }
 0x62e   : > { %7124 = vtanh.f32 %v11999_v26  ;;  %v6463_v19 = vmul.f32 -1.442695, %v11999_v26 }
 0x62f   : > { %7126 = vtanh.f32 %v12003_v31 }
 0x630   : > { %7128 = vpow2.f32 %v6454_v25 }
 0x631   : > { %7130 = vpow2.f32 %v6456_v15 }
 0x632   : > { %7132 = vpow2.f32 %v6455_v48 }
 0x633   : > { %7134 = vpow2.f32 %v6457_v24 }
 0x634   : > { %7136 = vpow2.f32 %v6458_v16 }
 0x635   : > { %7138 = vpow2.f32 %v6460_v33 }
 0x636   : > { %7140 = vpow2.f32 %v6459_v41 }
 0x637   : > { %v7121_v12 = vpop.eup %7120  ;;  %7142 = vpow2.f32 %v6461_v39 }
 0x638   : > { %5448 = vrot.lane.b32.xlu0 %v7121_v12, %s7584_s27  ;;  %v7123_v6 = vpop.eup %7122 }
 0x63b   : > { %v7125_v56 = vpop.eup %7124 }
 0x63c   : > { %5450 = vrot.lane.b32.xlu1 %v7125_v56, %s7584_s27  ;;  %5452 = vrot.lane.b32.xlu0 %v7123_v6, %s7584_s27  ;;  %v7127_v21 = vpop.eup %7126 }
 0x63d   : > { %v7129_v36 = vpop.eup %7128 }
 0x63e   : > { %v7131_v46 = vpop.eup %7130  ;;  %v5352_v20 = vadd.f32 1.0, %v7129_v36 }
 0x63f   : > { %v7133_v34 = vpop.eup %7132  ;;  %v5354_v5 = vadd.f32 1.0, %v7131_v46 }
 0x640   : > { %5454 = vrot.lane.b32.xlu1 %v7127_v21, %s7584_s27  ;;  %v5353_v28 = vadd.f32 1.0, %v7133_v34  ;;  %v7135_v17 = vpop.eup %7134  ;;  %7144 = vrcp.f32 %v5352_v20 }
 0x641   : > { %v7137_v53 = vpop.eup %7136  ;;  %v5355_v45 = vadd.f32 1.0, %v7135_v17 }
 0x642   : > { %v5356_v32 = vadd.f32 1.0, %v7137_v53  ;;  %v7139_v40 = vpop.eup %7138 }
 0x643   : > { %v7141_v60 = vpop.eup %7140  ;;  %v5358_v1 = vadd.f32 1.0, %v7139_v40 }
 0x644   : > { %v7143_v58 = vpop.eup %7142  ;;  %v5357_v59 = vadd.f32 1.0, %v7141_v60 }
 0x645   : > { %v5359_v51 = vadd.f32 1.0, %v7143_v58 }
 0x64d   : > { %v12027_v43 = vpop.eup %7144 }
 0x673   : > { %v6804_v57 = vpop.f32.mrf.mxu1 }
 0x674   : > { %v12015_v38 = vadd.f32 %v6804_v57, %v11973_v52 }
 0x675   : > { %v5289_v4 = vpop.f32.mrf.mxu1 }
 0x676   : > { %v12012_v35 = vadd.f32 %v11973_v52, %v5289_v4 }
 0x677   : > { %v6805_v13 = vpop.f32.mrf.mxu1 }
 0x678   : > { %7146 = vtanh.f32 %v12012_v35  ;;  %v12023_v8 = vadd.f32 %v6805_v13, %v11973_v52 }
 0x679   : > { %v5292_v30 = vpop.f32.mrf.mxu1  ;;  %7148 = vrcp.f32 %v5354_v5 }
 0x67a   : > { %v12019_v11 = vadd.f32 %v11973_v52, %v5292_v30  ;;  %7150 = vrcp.f32 %v5353_v28 }
 0x67b   : > { %7152 = vtanh.f32 %v12015_v38 }
 0x67c   : > { %7154 = vtanh.f32 %v12019_v11 }
 0x67d   : > { %7156 = vrcp.f32 %v5355_v45 }
 0x67e   : > { %7158 = vrcp.f32 %v5356_v32 }
 0x67f   : > { %7160 = vtanh.f32 %v12023_v8 }
 0x680   : > { %7162 = vrcp.f32 %v5358_v1 }
 0x681   : > { %7164 = vrcp.f32 %v5357_v59 }
 0x682   : > { %7166 = vrcp.f32 %v5359_v51 }
 0x685   : > { %v7147_v27 = vpop.eup %7146  ;;  %v5433_v52 = vpop.permute.xlu0 %5432 }
 0x686   : > { %v12030_v0 = vpop.eup %7148  ;;  %5456 = vrot.lane.b32.xlu0 %v7147_v27, %s7584_s27  ;;  %v5480_v22 = vmul.f32 %v12027_v43, %v5433_v52 }
 0x687   : > { %v12034_v37 = vpop.eup %7150 }
 0x688   : > { %v7153_v54 = vpop.eup %7152  ;;  %7168 = vtanh.f32 %v5480_v22 }
 0x689   : > { %v7155_v47 = vpop.eup %7154  ;;  %7170 = vpow2.f32 %v6462_v49  ;;  %v5435_v42 = vpop.permute.xlu1 %5434 }
 0x68a   : > { %v5437_v55 = vpop.permute.xlu0 %5436  ;;  %5458 = vrot.lane.b32.xlu1 %v7155_v47, %s7584_s27  ;;  %5460 = vrot.lane.b32.xlu0 %v7153_v54, %s7584_s27  ;;  %v5481_v18 = vmul.f32 %v12034_v37, %v5435_v42  ;;  %v12042_v62 = vpop.eup %7156  ;;  %7172 = vpow2.f32 %v6464_v3  ;;  %v6466_v3 = vmul.f32 -1.442695, %v12012_v35  ;;  %v6468_v54 = vmul.f32 -1.442695, %v12015_v38 }
 0x68b   : > { %v5482_v9 = vmul.f32 %v12030_v0, %v5437_v55  ;;  %v12045_v2 = vpop.eup %7158  ;;  %v6467_v47 = vmul.f32 -1.442695, %v12019_v11 }
 0x68c   : > { %7174 = vtanh.f32 %v5481_v18  ;;  %v7161_v23 = vpop.eup %7160 }
 0x68d   : > { %7176 = vpow2.f32 %v6463_v19  ;;  %v5439_v63 = vpop.permute.xlu1 %5438  ;;  %v12050_v50 = vpop.eup %7162  ;;  %v6469_v19 = vmul.f32 -1.442695, %v12023_v8 }
 0x68e   : > { %v5441_v29 = vpop.permute.xlu0 %5440  ;;  %5462 = vrot.lane.b32.xlu1 %v7161_v23, %s7584_s27  ;;  %7178 = vtanh.f32 %v5482_v9  ;;  %v5483_v44 = vmul.f32 %v12042_v62, %v5439_v63  ;;  %v12052_v7 = vpop.eup %7164 }
 0x68f   : > { %v5484_v61 = vmul.f32 %v12045_v2, %v5441_v29  ;;  %7180 = vpow2.f32 %v6465_v14  ;;  %v12056_v6 = vpop.eup %7166 }
 0x690   : > { %7182 = vtanh.f32 %v5483_v44 }
 0x691   : > { %7184 = vtanh.f32 %v5484_v61  ;;  %v5443_v10 = vpop.permute.xlu1 %5442 }
 0x692   : > { %v5445_v26 = vpop.permute.xlu0 %5444  ;;  %v5485_v31 = vmul.f32 %v12052_v7, %v5443_v10 }
 0x693   : > { %v5486_v12 = vmul.f32 %v12050_v50, %v5445_v26 }
 0x694   : > { %7186 = vtanh.f32 %v5485_v31 }
 0x695   : > { %v7169_v56 = vpop.eup %7168  ;;  %7188 = vtanh.f32 %v5486_v12  ;;  %v5447_v21 = vpop.permute.xlu1 %5446 }
 0x696   : > { %v7171_v25 = vpop.eup %7170  ;;  %5528 = vrot.lane.b32.xlu0 %v7169_v56, %s7585_s28  ;;  %v5487_v15 = vmul.f32 %v12056_v6, %v5447_v21 }
 0x697   : > { %v7173_v48 = vpop.eup %7172  ;;  %v5360_v16 = vadd.f32 1.0, %v7171_v25 }
 0x698   : > { %7190 = vtanh.f32 %v5487_v15  ;;  %v5362_v36 = vadd.f32 1.0, %v7173_v48  ;;  %v6970_v48 = vld [vmem:[%s12223_s7 + $0x8] sm:$0xff]  }
 0x699   : > { %v7175_v24 = vpop.eup %7174  ;;  %7192 = vrcp.f32 %v5360_v16  ;;  %6806 = vmatprep.subr.bf16.mxu1 %v6970_v48 }
 0x69a   : > { %v7177_v33 = vpop.eup %7176  ;;  %5530 = vrot.lane.b32.xlu1 %v7175_v24, %s7585_s28  ;;  %7194 = vrcp.f32 %v5362_v36  ;;  %v6971_v24 = vld [vmem:[%s12223_s7] sm:$0xff]   ;;  %6807 = vmatpush3.bf16.msra.mxu1 %v6970_v48 }
 0x69b   : > { %v7179_v41 = vpop.eup %7178  ;;  %v5361_v57 = vadd.f32 1.0, %v7177_v33  ;;  %6808 = vmatprep.subr.bf16.mxu1 %v6971_v24 }
 0x69c   : > { %v7181_v39 = vpop.eup %7180  ;;  %5532 = vrot.lane.b32.xlu0 %v7179_v41, %s7585_s28 }
 0x69d   : > { %v7183_v46 = vpop.eup %7182  ;;  %v5363_v4 = vadd.f32 1.0, %v7181_v39  ;;  %7196 = vrcp.f32 %v5361_v57 }
 0x69e   : > { %v7185_v34 = vpop.eup %7184  ;;  %5534 = vrot.lane.b32.xlu1 %v7183_v46, %s7585_s28  ;;  %6809 = vmatpush3.bf16.msra.mxu1 %v6971_v24 }
 0x69f   : > { %7198 = vrcp.f32 %v5363_v4 }
 0x6a0   : > { %5536 = vrot.lane.b32.xlu0 %v7185_v34, %s7585_s28 }
 0x6a1   : > { %v7187_v20 = vpop.eup %7186 }
 0x6a2   : > { %v7189_v5 = vpop.eup %7188  ;;  %5538 = vrot.lane.b32.xlu1 %v7187_v20, %s7585_s28 }
 0x6a4   : > { %5540 = vrot.lane.b32.xlu0 %v7189_v5, %s7585_s28 }
 0x6a5   : > { %v7191_v28 = vpop.eup %7190 }
 0x6a6   : > { %5542 = vrot.lane.b32.xlu1 %v7191_v28, %s7585_s28  ;;  %v12067_v13 = vpop.eup %7192 }
 0x6a7   : > { %v12070_v30 = vpop.eup %7194 }
 0x6aa   : > { %v5449_v17 = vpop.permute.xlu0 %5448  ;;  %v12072_v45 = vpop.eup %7196 }
 0x6ab   : > { %v5488_v53 = vmul.f32 %v12067_v13, %v5449_v17 }
 0x6ac   : > { %v12076_v58 = vpop.eup %7198 }
 0x6ad   : > { %7200 = vtanh.f32 %v5488_v53 }
 0x6ae   : > { %v5451_v32 = vpop.permute.xlu1 %5450  ;;  %v5453_v40 = vpop.permute.xlu0 %5452 }
 0x6af   : > { %v5489_v60 = vmul.f32 %v12072_v45, %v5451_v32  ;;  %v5490_v1 = vmul.f32 %v12070_v30, %v5453_v40 }
 0x6b1   : > { %7202 = vtanh.f32 %v5489_v60 }
 0x6b2   : > { %7204 = vtanh.f32 %v5490_v1  ;;  %v5455_v59 = vpop.permute.xlu1 %5454 }
 0x6b3   : > { %v5491_v51 = vmul.f32 %v12076_v58, %v5455_v59 }
 0x6b5   : > { %7206 = vtanh.f32 %v5491_v51 }
 0x6b6   : > { %7208 = vpow2.f32 %v6466_v3 }
 0x6b7   : > { %7210 = vpow2.f32 %v6468_v54  ;;  %v6972_v54 = vld [vmem:[%s12225_s9 + $0x18] sm:$0xff]  }
 0x6b8   : > { %7212 = vpow2.f32 %v6467_v47  ;;  %6826 = vmatprep.subr.bf16.mxu0 %v6972_v54 }
 0x6b9   : > { %7214 = vpow2.f32 %v6469_v19  ;;  %6827 = vmatpush3.bf16.msra.mxu0 %v6972_v54 }
 0x6ba   : > { %v7201_v27 = vpop.eup %7200 }
 0x6bb   : > { %5544 = vrot.lane.b32.xlu0 %v7201_v27, %s7585_s28 }
 0x6be   : > { %v7203_v49 = vpop.eup %7202 }
 0x6bf   : > { %v7205_v52 = vpop.eup %7204  ;;  %5546 = vrot.lane.b32.xlu1 %v7203_v49, %s7585_s28 }
 0x6c0   : > { %5548 = vrot.lane.b32.xlu0 %v7205_v52, %s7585_s28 }
 0x6c2   : > { %v7207_v22 = vpop.eup %7206 }
 0x6c3   : > { %5550 = vrot.lane.b32.xlu1 %v7207_v22, %s7585_s28  ;;  %v7209_v42 = vpop.eup %7208 }
 0x6c4   : > { %v7211_v55 = vpop.eup %7210  ;;  %v5364_v18 = vadd.f32 1.0, %v7209_v42 }
 0x6c5   : > { %v7213_v9 = vpop.eup %7212  ;;  %v5366_v14 = vadd.f32 1.0, %v7211_v55 }
 0x6c6   : > { %7216 = vrcp.f32 %v5364_v18  ;;  %v5365_v23 = vadd.f32 1.0, %v7213_v9  ;;  %v7215_v63 = vpop.eup %7214 }
 0x6c7   : > { %7218 = vrcp.f32 %v5366_v14  ;;  %v5367_v35 = vadd.f32 1.0, %v7215_v63 }
 0x6c8   : > { %7220 = vrcp.f32 %v5365_v23 }
 0x6c9   : > { %7222 = vrcp.f32 %v5367_v35 }
 0x6d3   : > { %v12087_v38 = vpop.eup %7216 }
 0x6d4   : > { %v12090_v8 = vpop.eup %7218 }
 0x6d5   : > { %v12092_v44 = vpop.eup %7220 }
 0x6d6   : > { %v12096_v12 = vpop.eup %7222 }
 0x6f8   : > { %v5457_v11 = vpop.permute.xlu0 %5456 }
 0x6f9   : > { %v5492_v29 = vmul.f32 %v12087_v38, %v5457_v11  ;;  %v6973_v11 = vld [vmem:[%s12225_s9 + $0x10] sm:$0xff]  }
 0x6fa   : > { %6828 = vmatprep.subr.bf16.mxu0 %v6973_v11 }
 0x6fb   : > { %7224 = vtanh.f32 %v5492_v29  ;;  %6829 = vmatpush3.bf16.msra.mxu0 %v6973_v11  ;;  %v6974_v29 = vld [vmem:[%s12225_s9 + $0x8] sm:$0xff]  }
 0x6fc   : > { %v5459_v61 = vpop.permute.xlu1 %5458  ;;  %v5461_v10 = vpop.permute.xlu0 %5460  ;;  %6830 = vmatprep.subr.bf16.mxu0 %v6974_v29 }
 0x6fd   : > { %v5493_v26 = vmul.f32 %v12092_v44, %v5459_v61  ;;  %v5494_v31 = vmul.f32 %v12090_v8, %v5461_v10 }
 0x6ff   : > { %7226 = vtanh.f32 %v5493_v26  ;;  %6831 = vmatpush3.bf16.msra.mxu0 %v6974_v29 }
 0x700   : > { %7228 = vtanh.f32 %v5494_v31  ;;  %v5463_v56 = vpop.permute.xlu1 %5462  ;;  %v6470_v31 = vld [vmem:[%s12224_s8] ss:$0 sm:$0xff] }
 0x701   : > { %v5495_v21 = vmul.f32 %v12096_v12, %v5463_v56 }
 0x703   : > { %7230 = vtanh.f32 %v5495_v21 }
 0x708   : > { %v7225_v25 = vpop.eup %7224  ;;  %v5529_v15 = vpop.permute.xlu0 %5528 }
 0x709   : > { %5552 = vrot.lane.b32.xlu0 %v7225_v25, %s7585_s28  ;;  %v5576_v39 = vmul.f32 %v12027_v43, %v5529_v15 }
 0x70c   : > { %v7227_v16 = vpop.eup %7226  ;;  %v5531_v33 = vpop.permute.xlu1 %5530 }
 0x70d   : > { %v7229_v41 = vpop.eup %7228  ;;  %5554 = vrot.lane.b32.xlu1 %v7227_v16, %s7585_s28  ;;  %v5577_v36 = vmul.f32 %v12034_v37, %v5531_v33 }
 0x70e   : > { %5556 = vrot.lane.b32.xlu0 %v7229_v41, %s7585_s28  ;;  %v5533_v46 = vpop.permute.xlu0 %5532 }
 0x70f   : > { %v5592_v57 = vpack.c.bf16 %v5577_v36, %v5576_v39  ;;  %v5578_v4 = vmul.f32 %v12030_v0, %v5533_v46 }
 0x710   : > { %v7231_v34 = vpop.eup %7230  ;;  %v5535_v20 = vpop.permute.xlu1 %5534 }
 0x711   : > { %5558 = vrot.lane.b32.xlu1 %v7231_v34, %s7585_s28  ;;  %v5579_v5 = vmul.f32 %v12042_v62, %v5535_v20  ;;  %s12172_s28 = scalar_lea.vmem %s12227_s11, %s6067_s25 }
 0x712   : > { %5619 = vrot.lane.b32.xlu0 %v5592_v57, %s7586_s13  ;;  %v5537_v28 = vpop.permute.xlu0 %5536 }
 0x713   : > { %v5593_v17 = vpack.c.bf16 %v5579_v5, %v5578_v4  ;;  %v5580_v37 = vmul.f32 %v12045_v2, %v5537_v28 }
 0x714   : > { %v5539_v43 = vpop.permute.xlu1 %5538 }
 0x715   : > { %5621 = vrot.lane.b32.xlu1 %v5593_v17, %s7586_s13  ;;  %v5581_v53 = vmul.f32 %v12052_v7, %v5539_v43 }
 0x716   : > { %v5541_v32 = vpop.permute.xlu0 %5540 }
 0x717   : > { %v5594_v40 = vpack.c.bf16 %v5581_v53, %v5580_v37  ;;  %v5582_v1 = vmul.f32 %v12050_v50, %v5541_v32 }
 0x718   : > { %v5543_v60 = vpop.permute.xlu1 %5542 }
 0x719   : > { %v5583_v0 = vmul.f32 %v12056_v6, %v5543_v60  ;;  %5623 = vrot.lane.b32.xlu0 %v5594_v40, %s7586_s13 }
 0x71b   : > { %v5595_v62 = vpack.c.bf16 %v5583_v0, %v5582_v1 }
 0x71d   : > { %5625 = vrot.lane.b32.xlu1 %v5595_v62, %s7586_s13 }
 0x72d   : > { %v5545_v59 = vpop.permute.xlu0 %5544 }
 0x72e   : > { %v5584_v27 = vmul.f32 %v12067_v13, %v5545_v59 }
 0x731   : > { %v5547_v51 = vpop.permute.xlu1 %5546 }
 0x732   : > { %v5585_v2 = vmul.f32 %v12072_v45, %v5547_v51  ;;  %v5549_v49 = vpop.permute.xlu0 %5548 }
 0x733   : > { %v5586_v22 = vmul.f32 %v12070_v30, %v5549_v49 }
 0x734   : > { %v5596_v7 = vpack.c.bf16 %v5585_v2, %v5584_v27 }
 0x735   : > { %v5551_v52 = vpop.permute.xlu1 %5550 }
 0x736   : > { %v5587_v50 = vmul.f32 %v12076_v58, %v5551_v52  ;;  %5627 = vrot.lane.b32.xlu0 %v5596_v7, %s7586_s13 }
 0x738   : > { %v5597_v6 = vpack.c.bf16 %v5587_v50, %v5586_v22 }
 0x73a   : > { %5629 = vrot.lane.b32.xlu1 %v5597_v6, %s7586_s13 }
 0x77b   : > { %v5553_v3 = vpop.permute.xlu0 %5552 }
 0x77c   : > { %v5588_v45 = vmul.f32 %v12087_v38, %v5553_v3 }
 0x77f   : > { %v5555_v13 = vpop.permute.xlu1 %5554 }
 0x780   : > { %v5589_v47 = vmul.f32 %v12092_v44, %v5555_v13  ;;  %v5557_v30 = vpop.permute.xlu0 %5556 }
 0x781   : > { %v5590_v42 = vmul.f32 %v12090_v8, %v5557_v30  ;;  %v6975_v8 = vld [vmem:[%s12225_s9] sm:$0xff]  }
 0x782   : > { %v5598_v19 = vpack.c.bf16 %v5589_v47, %v5588_v45  ;;  %6832 = vmatprep.subr.bf16.mxu0 %v6975_v8 }
 0x783   : > { %v5559_v58 = vpop.permute.xlu1 %5558  ;;  %6833 = vmatpush3.bf16.msra.mxu0 %v6975_v8 }
 0x784   : > { %v5591_v55 = vmul.f32 %v12096_v12, %v5559_v58  ;;  %5631 = vrot.lane.b32.xlu0 %v5598_v19, %s7586_s13  ;;  %v5620_v18 = vpop.permute.xlu0 %5619 }
 0x785   : > { %6810 = vmatprep.mubr.msk.bf16.mxu1 %vm5182_vm0, %v5620_v18 }
 0x786   : > { %v5599_v9 = vpack.c.bf16 %v5591_v55, %v5590_v42 }
 0x787   : > { %v5622_v14 = vpop.permute.xlu1 %5621 }
 0x788   : > { %5633 = vrot.lane.b32.xlu1 %v5599_v9, %s7586_s13  ;;  %6811 = vmatmul.mubr.msk.bf16.vlgmr.msra.gmra.mxu1 %vm5182_vm0, %v5622_v14 }
 0x78b   : > { %v5624_v23 = vpop.permute.xlu0 %5623 }
 0x78c   : > { %6814 = vmatprep.mubr.msk.bf16.mxu1 %vm5182_vm0, %v5624_v23 }
 0x78f   : > { %v5626_v63 = vpop.permute.xlu1 %5625 }
 0x790   : > { %6815 = vmatmul.mubr.msk.bf16.gmra.mxu1 %vm5182_vm0, %v5626_v63 }
 0x7a8   : > { %v5628_v35 = vpop.permute.xlu0 %5627 }
 0x7a9   : > { %6818 = vmatprep.mubr.msk.bf16.mxu1 %vm5182_vm0, %v5628_v35  ;;  %v6481_v35 = vld [vmem:[%s12226_s10] ss:$0 sm:$0xff] }
 0x7ac   : > { %v5630_v38 = vpop.permute.xlu1 %5629 }
 0x7ad   : > { %6819 = vmatmul.mubr.msk.bf16.gmra.mxu1 %vm5182_vm0, %v5630_v38 }
 0x7f6   : > { %v5632_v44 = vpop.permute.xlu0 %5631 }
 0x7f7   : > { %6822 = vmatprep.mubr.msk.bf16.mxu1 %vm5182_vm0, %v5632_v44 }
 0x7fa   : > { %v5634_v61 = vpop.permute.xlu1 %5633 }
 0x7fb   : > { %6823 = vmatmul.mubr.msk.bf16.gmra.mxu1 %vm5182_vm0, %v5634_v61 }
 0x848   : > { %v6812_v10 = vpop.f32.mrf.mxu1 }
 0x849   : > { %v5714_v25 = vadd.f32 %v6812_v10, %v6470_v31 }
 0x84a   : > { %v5705_v26 = vpop.f32.mrf.mxu1 }
 0x84b   : > { %v5706_v56 = vadd.f32 %v6470_v31, %v5705_v26  ;;  %v5770_v39 = vmax.f32 %v5714_v25, 0.0 }
 0x84c   : > { %v6813_v12 = vpop.f32.mrf.mxu1 }
 0x84d   : > { %v5717_v21 = vadd.f32 %v6813_v12, %v6470_v31  ;;  %v5768_v33 = vmax.f32 %v5706_v56, 0.0 }
 0x84e   : > { %v5708_v15 = vpop.f32.mrf.mxu1 }
 0x84f   : > { %v5709_v48 = vadd.f32 %v6470_v31, %v5708_v15  ;;  %v5771_v24 = vmax.f32 %v5717_v21, 0.0 }
 0x850   : > { %v6816_v16 = vpop.f32.mrf.mxu1 }
 0x851   : > { %v5769_v41 = vmax.f32 %v5709_v48, 0.0  ;;  %v5785_v57 = vpack.c.bf16 %v5771_v24, %v5770_v39  ;;  %v5730_v5 = vadd.f32 %v6816_v16, %v6470_v31 }
 0x852   : > { %v5721_v36 = vpop.f32.mrf.mxu1 }
 0x853   : > { %v5784_v46 = vpack.c.bf16 %v5769_v41, %v5768_v33  ;;  %v5722_v20 = vadd.f32 %v6470_v31, %v5721_v36  ;;  %v5774_v32 = vmax.f32 %v5730_v5, 0.0 }
 0x854   : > { %v6817_v34 = vpop.f32.mrf.mxu1 }
 0x855   : > { %6834 = vmatprep.mubr.msk.bf16.mxu0 %vm5831_vm1, %v5784_v46  ;;  %v5733_v4 = vadd.f32 %v6817_v34, %v6470_v31  ;;  %v5772_v37 = vmax.f32 %v5722_v20, 0.0 }
 0x856   : > { %6835 = vmatmul.mubr.msk.bf16.vlgmr.msra.gmra.mxu0 %vm5831_vm1, %v5785_v57  ;;  %v5724_v28 = vpop.f32.mrf.mxu1 }
 0x857   : > { %v5725_v17 = vadd.f32 %v6470_v31, %v5724_v28  ;;  %v5775_v43 = vmax.f32 %v5733_v4, 0.0 }
 0x859   : > { %v5773_v53 = vmax.f32 %v5725_v17, 0.0  ;;  %v5787_v60 = vpack.c.bf16 %v5775_v43, %v5774_v32 }
 0x85b   : > { %v5786_v40 = vpack.c.bf16 %v5773_v53, %v5772_v37 }
 0x85d   : > { %6838 = vmatprep.mubr.msk.bf16.mxu0 %vm5831_vm1, %v5786_v40 }
 0x85e   : > { %6839 = vmatmul.mubr.msk.bf16.gmra.mxu0 %vm5831_vm1, %v5787_v60 }
 0x86d   : > { %v6820_v1 = vpop.f32.mrf.mxu1 }
 0x86e   : > { %v5746_v27 = vadd.f32 %v6820_v1, %v6470_v31 }
 0x86f   : > { %v5737_v0 = vpop.f32.mrf.mxu1 }
 0x870   : > { %v5738_v59 = vadd.f32 %v6470_v31, %v5737_v0  ;;  %v5778_v50 = vmax.f32 %v5746_v27, 0.0 }
 0x871   : > { %v6821_v62 = vpop.f32.mrf.mxu1 }
 0x872   : > { %v5749_v51 = vadd.f32 %v6821_v62, %v6470_v31  ;;  %v5776_v52 = vmax.f32 %v5738_v59, 0.0 }
 0x873   : > { %v5740_v2 = vpop.f32.mrf.mxu1 }
 0x874   : > { %v5741_v49 = vadd.f32 %v6470_v31, %v5740_v2  ;;  %v5779_v7 = vmax.f32 %v5749_v51, 0.0 }
 0x876   : > { %v5777_v22 = vmax.f32 %v5741_v49, 0.0  ;;  %v5789_v3 = vpack.c.bf16 %v5779_v7, %v5778_v50 }
 0x878   : > { %v5788_v6 = vpack.c.bf16 %v5777_v22, %v5776_v52 }
 0x87a   : > { %6842 = vmatprep.mubr.msk.bf16.mxu0 %vm5831_vm1, %v5788_v6 }
 0x87b   : > { %6843 = vmatmul.mubr.msk.bf16.gmra.mxu0 %vm5831_vm1, %v5789_v3 }
 0x8bb   : > { %v6824_v54 = vpop.f32.mrf.mxu1 }
 0x8bc   : > { %v5762_v19 = vadd.f32 %v6824_v54, %v6470_v31 }
 0x8bd   : > { %v5753_v13 = vpop.f32.mrf.mxu1 }
 0x8be   : > { %v5754_v47 = vadd.f32 %v6470_v31, %v5753_v13  ;;  %v5782_v14 = vmax.f32 %v5762_v19, 0.0 }
 0x8bf   : > { %v6825_v45 = vpop.f32.mrf.mxu1 }
 0x8c0   : > { %v5765_v30 = vadd.f32 %v6825_v45, %v6470_v31  ;;  %v5780_v18 = vmax.f32 %v5754_v47, 0.0 }
 0x8c1   : > { %v5756_v58 = vpop.f32.mrf.mxu1 }
 0x8c2   : > { %v5757_v42 = vadd.f32 %v6470_v31, %v5756_v58  ;;  %v5783_v55 = vmax.f32 %v5765_v30, 0.0 }
 0x8c4   : > { %v5781_v9 = vmax.f32 %v5757_v42, 0.0  ;;  %v5791_v63 = vpack.c.bf16 %v5783_v55, %v5782_v14 }
 0x8c6   : > { %v5790_v23 = vpack.c.bf16 %v5781_v9, %v5780_v18 }
 0x8c8   : > { %6846 = vmatprep.mubr.msk.bf16.mxu0 %vm5831_vm1, %v5790_v23 }
 0x8c9   : > { %6847 = vmatmul.mubr.msk.bf16.gmra.mxu0 %vm5831_vm1, %v5791_v63 }
 0x916   : > { %v6836_v38 = vpop.f32.mrf.mxu0 }
 0x917   : > { %v5899_v11 = vadd.f32 %v6836_v38, %v6481_v35 }
 0x918   : > { %v5890_v29 = vpop.f32.mrf.mxu0 }
 0x919   : > { %5956 = vst.msk [vmem:[%s12172_s28 + $0x10] sm:$0xff] %vm5953_vm2, %v5899_v11  ;;  %v5891_v8 = vadd.f32 %v6481_v35, %v5890_v29 }
 0x91a   : > { %v6837_v44 = vpop.f32.mrf.mxu0 }
 0x91b   : > { %5954 = vst.msk [vmem:[%s12172_s28] sm:$0xff] %vm5953_vm2, %v5891_v8  ;;  %v5902_v61 = vadd.f32 %v6837_v44, %v6481_v35 }
 0x91c   : > { %v5893_v10 = vpop.f32.mrf.mxu0 }
 0x91d   : > { %5957 = vst.msk [vmem:[%s12172_s28 + $0x18] sm:$0xff] %vm5953_vm2, %v5902_v61  ;;  %v5894_v26 = vadd.f32 %v6481_v35, %v5893_v10 }
 0x91e   : > { %v6840_v31 = vpop.f32.mrf.mxu0 }
 0x91f   : > { %5955 = vst.msk [vmem:[%s12172_s28 + $0x8] sm:$0xff] %vm5953_vm2, %v5894_v26  ;;  %v5915_v12 = vadd.f32 %v6840_v31, %v6481_v35 }
 0x920   : > { %v5906_v56 = vpop.f32.mrf.mxu0 }
 0x921   : > { %5960 = vst.msk [vmem:[%s12172_s28 + $0x30] sm:$0xff] %vm5953_vm2, %v5915_v12  ;;  %v5907_v21 = vadd.f32 %v6481_v35, %v5906_v56 }
 0x922   : > { %v6841_v25 = vpop.f32.mrf.mxu0 }
 0x923   : > { %5958 = vst.msk [vmem:[%s12172_s28 + $0x20] sm:$0xff] %vm5953_vm2, %v5907_v21  ;;  %v5918_v15 = vadd.f32 %v6841_v25, %v6481_v35 }
 0x924   : > { %v5909_v48 = vpop.f32.mrf.mxu0 }
 0x925   : > { %5961 = vst.msk [vmem:[%s12172_s28 + $0x38] sm:$0xff] %vm5953_vm2, %v5918_v15  ;;  %v5910_v24 = vadd.f32 %v6481_v35, %v5909_v48 }
 0x927   : > { %5959 = vst.msk [vmem:[%s12172_s28 + $0x28] sm:$0xff] %vm5953_vm2, %v5910_v24 }
 0x93b   : > { %v6844_v16 = vpop.f32.mrf.mxu0 }
 0x93c   : > { %v5931_v33 = vadd.f32 %v6844_v16, %v6481_v35 }
 0x93d   : > { %v5922_v41 = vpop.f32.mrf.mxu0 }
 0x93e   : > { %5964 = vst.msk [vmem:[%s12172_s28 + $0x50] sm:$0xff] %vm5953_vm2, %v5931_v33  ;;  %v5923_v39 = vadd.f32 %v6481_v35, %v5922_v41 }
 0x93f   : > { %v6845_v36 = vpop.f32.mrf.mxu0 }
 0x940   : > { %5962 = vst.msk [vmem:[%s12172_s28 + $0x40] sm:$0xff] %vm5953_vm2, %v5923_v39  ;;  %v5934_v46 = vadd.f32 %v6845_v36, %v6481_v35 }
 0x941   : > { %v5925_v57 = vpop.f32.mrf.mxu0 }
 0x942   : > { %5965 = vst.msk [vmem:[%s12172_s28 + $0x58] sm:$0xff] %vm5953_vm2, %v5934_v46  ;;  %v5926_v34 = vadd.f32 %v6481_v35, %v5925_v57 }
 0x944   : > { %5963 = vst.msk [vmem:[%s12172_s28 + $0x48] sm:$0xff] %vm5953_vm2, %v5926_v34 }
 0x989   : > { %v6848_v20 = vpop.f32.mrf.mxu0 }
 0x98a   : > { %v5947_v4 = vadd.f32 %v6848_v20, %v6481_v35 }
 0x98b   : > { %v5938_v5 = vpop.f32.mrf.mxu0 }
 0x98c   : > { %5968 = vst.msk [vmem:[%s12172_s28 + $0x70] sm:$0xff] %vm5953_vm2, %v5947_v4  ;;  %v5939_v28 = vadd.f32 %v6481_v35, %v5938_v5 }
 0x98d   : > { %v6849_v17 = vpop.f32.mrf.mxu0 }
 0x98e   : > { %5966 = vst.msk [vmem:[%s12172_s28 + $0x60] sm:$0xff] %vm5953_vm2, %v5939_v28  ;;  %v5950_v43 = vadd.f32 %v6849_v17, %v6481_v35 }
 0x98f   : > { %v5941_v37 = vpop.f32.mrf.mxu0 }
 0x990   : > { %5969 = vst.msk [vmem:[%s12172_s28 + $0x78] sm:$0xff] %vm5953_vm2, %v5950_v43  ;;  %v5942_v53 = vadd.f32 %v6481_v35, %v5941_v37 }
 0x992   : > { %5967 = vst.msk [vmem:[%s12172_s28 + $0x68] sm:$0xff] %vm5953_vm2, %v5942_v53 }
 0x993 PF: > { %p20_p9 = scmp.ge.s32.totalorder %s7664_s21, 4   ;;  %s12384_s17 = smov %s7576_s18 }
 0x994   : > { %s12385_s18 = smov %s7674_s24  ;;  %s12386_s19 = smov %s7664_s21 }
 0x995   :  { %22 = sbr.rel (!%p20_p9) target bundleno = 3 (0x3), region = 139 }
 0x99a   :  { %5992 = vsyncpa [#allocation4], 1 }
 0x99b   :  { %5994 = vsyncpa [#allocation4 + $0x1], 1 }
 0x99c   :  { %5995 = vsyncpa [#allocation6], 1 }

</bundles_post_ra>
